<compile_context>
chip_gen: v6e
topology: v6e:2x2x1
jax: 0.10.0
libtpu: 0.0.40
codegen_flags: <defaults>
</compile_context>

<pallas_src>
import functools

import jax
import jax.numpy as jnp
from jax import lax
from jax.experimental import pallas as pl
from jax.experimental.pallas import tpu as pltpu

# Deterministic in-script "dataset / constraints" configuration (mirrors what
# DeepLineupLoss.__init__ derives from dataset.target_cols / constraints).
TARGET_COLS = [
    "player_id", "team_id", "opp_id",
    "pos:G", "pos:F",
    "cost", "fpts-historic", "in-lineup",
]
HIST_SCORE_COL_IDX = TARGET_COLS.index("fpts-historic")
LINEUP_SLOT_COUNT = 6  # sum(constraints.lineup_constraints.values())

_LANE = 128      # lane width; also the j-chunk size for the rank loop
_SUBLANE = 8     # batch tile (sublane width)
_EPS = 1e-7      # guard for log(preds)


def _score_kernel(preds_ref, hist_ref, neg_log_ref, score_ref, *, k, jc):
    """Per batch-block: top-k lineup score (lane-broadcast) and -log(preds)."""
    preds = preds_ref[...].astype(jnp.float32)        # (TB, P)
    hist = hist_ref[...].astype(jnp.float32)          # (TB, P)
    TB, P = preds.shape

    # ---- top-k selection by predicted probability (chunked pairwise rank) ----
    # TODO(synk): the reference module builds KnapsackItems and runs a MIP
    # solver with cost / position-slot / viability constraints (dask-batched);
    # a branch-and-bound solver has no Pallas equivalent, so the lineup here is
    # the top-`k` players by predicted probability (ties broken by lower index).
    p_i = preds[:, :, None]                                          # (TB, P, 1)
    i_idx = lax.broadcasted_iota(jnp.int32, (TB, P, 1), 1)
    n_chunks = P // jc

    def body(c, rank):
        j0 = pl.multiple_of(c * jc, jc)
        pj = preds_ref[:, pl.ds(j0, jc)].astype(jnp.float32)         # (TB, jc)
        pj_b = pj[:, None, :]                                        # (TB, 1, jc)
        j_idx = lax.broadcasted_iota(jnp.int32, (TB, P, jc), 2) + j0
        beats = (pj_b > p_i) | ((pj_b == p_i) & (j_idx < i_idx))
        return rank + jnp.sum(beats.astype(jnp.int32), axis=2)       # (TB, P)

    rank = lax.fori_loop(0, n_chunks, body, jnp.zeros((TB, P), jnp.int32))
    sel = (rank < k).astype(jnp.float32)                             # 0/1 mask

    # Per-slate selected-lineup historic score, broadcast across lanes so the
    # store is a dense (8, 128) block.  Padded players contribute 0 (hist=0);
    # padded slates contribute 0 as well.
    per_slate = jnp.sum(sel * hist, axis=1, keepdims=True)           # (TB, 1)
    score_ref[...] = jnp.broadcast_to(per_slate, score_ref.shape)

    # -log(preds), eps-clamped; the global reward scale is applied later.
    neg_log_ref[...] = -jnp.log(jnp.maximum(preds, _EPS))


def _scale_kernel(reward_ref, neg_log_ref, grads_ref):
    """gradients = -log(preds) * reward (reward is an SMEM scalar)."""
    grads_ref[...] = neg_log_ref[...] * reward_ref[0, 0]


@functools.partial(jax.jit, static_argnames=("k", "hist_idx"))
def deep_lineup_loss(preds, targets,
                     k=LINEUP_SLOT_COUNT, hist_idx=HIST_SCORE_COL_IDX):
    """Returns (gradients, reward) like DeepLineupLoss.forward.

    NOTE: reward is returned as a device scalar (the reference returns
    float(reward); forcing a host sync here would block the pipeline).
    """
    B, P = preds.shape
    assert targets.shape[0] == B and targets.shape[1] == P

    # Slice the single needed feature column in the wrapper (hist_idx is a
    # Python int) so the kernel never sees the (B, P, F) targets tensor.
    hist = targets[..., hist_idx]

    # Pad batch to a sublane multiple and players to a lane multiple so every
    # vreg / store is dense.  Padded players get pred=-1 (ranked below every
    # real probability in (0, 1) -> never selected) and hist=0.
    TB = _SUBLANE
    B_pad = ((B + TB - 1) // TB) * TB
    P_pad = ((P + _LANE - 1) // _LANE) * _LANE
    preds_p = jnp.pad(preds, ((0, B_pad - B), (0, P_pad - P)),
                      constant_values=-1.0)
    hist_p = jnp.pad(hist, ((0, B_pad - B), (0, P_pad - P)),
                     constant_values=0.0)

    nb = B_pad // TB
    score_kernel = functools.partial(_score_kernel, k=int(k), jc=_LANE)

    neg_log, scores = pl.pallas_call(
        score_kernel,
        grid=(nb,),
        in_specs=[
            pl.BlockSpec((TB, P_pad), lambda i: (i, 0)),
            pl.BlockSpec((TB, P_pad), lambda i: (i, 0)),
        ],
        out_specs=(
            pl.BlockSpec((TB, P_pad), lambda i: (i, 0)),
            pl.BlockSpec((TB, _LANE), lambda i: (i, 0)),
        ),
        out_shape=(
            jax.ShapeDtypeStruct((B_pad, P_pad), jnp.float32),
            jax.ShapeDtypeStruct((B_pad, _LANE), jnp.float32),
        ),
        compiler_params=pltpu.CompilerParams(
            dimension_semantics=("parallel",)),
    )(preds_p, hist_p)

    # Batch mean over the *real* batch (padded slates scored 0).
    reward = jnp.sum(scores[:, 0]) / float(B)

    grads_p = pl.pallas_call(
        _scale_kernel,
        grid=(nb,),
        in_specs=[
            pl.BlockSpec(memory_space=pltpu.MemorySpace.SMEM),
            pl.BlockSpec((TB, P_pad), lambda i: (i, 0)),
        ],
        out_specs=pl.BlockSpec((TB, P_pad), lambda i: (i, 0)),
        out_shape=jax.ShapeDtypeStruct((B_pad, P_pad), jnp.float32),
        compiler_params=pltpu.CompilerParams(
            dimension_semantics=("parallel",)),
    )(reward.astype(jnp.float32).reshape(1, 1), neg_log)

    grads = grads_p[:B, :P].astype(preds.dtype)
    return grads, reward


def _reference(preds, targets, k=LINEUP_SLOT_COUNT, hist_idx=HIST_SCORE_COL_IDX):
    """Pure-JAX reference (same top-k stand-in for the MIP solver)."""
    B, P = preds.shape
    hist = targets[..., hist_idx]
    order = jnp.argsort(-preds, axis=1)                 # stable: lower idx wins ties
    sel = jnp.zeros((B, P), jnp.float32)
    sel = sel.at[jnp.arange(B)[:, None], order[:, :k]].set(1.0)
    reward = jnp.mean(jnp.sum(sel * hist, axis=1))
    return -jnp.log(preds) * reward, reward


if __name__ == "__main__":
    key = jax.random.PRNGKey(0)
    B, P, F = 2, 16, len(TARGET_COLS)
    k1, k2 = jax.random.split(key)
    # probabilities in (0, 1) so log() is finite, as in the module's contract
    preds = jax.random.uniform(k1, (B, P), jnp.float32, minval=0.05, maxval=0.95)
    targets = jax.random.uniform(k2, (B, P, F), jnp.float32) * 10.0

    grads, reward = deep_lineup_loss(preds, targets)
    jax.block_until_ready((grads, reward))

    ref_grads, ref_reward = _reference(preds, targets)
    assert grads.shape == (B, P)
    assert bool(jnp.all(jnp.isfinite(grads)))
    assert bool(jnp.isfinite(reward))
    assert bool(jnp.allclose(reward, ref_reward, rtol=1e-5, atol=1e-5))
    assert bool(jnp.allclose(grads, ref_grads, rtol=1e-5, atol=1e-5))
    print("KERNEL_OK")
</pallas_src>

<mosaic_0001>
module attributes {stable_mosaic.version = 11 : i64} {
  func.func @_score_kernel(%arg0: i32, %arg1: memref<8x128xf32, #tpu.memory_space<vmem>>, %arg2: memref<8x128xf32, #tpu.memory_space<vmem>>, %arg3: memref<8x128xf32, #tpu.memory_space<vmem>>, %arg4: memref<8x128xf32, #tpu.memory_space<vmem>>) attributes {dimension_semantics = [#tpu.dimension_semantics<parallel>], iteration_bounds = array<i64: 1>, scalar_prefetch = 0 : i64, scratch_operands = 0 : i64, tpu.core_type = #tpu.core_type<tc>, window_params = [{transform_indices = @transform_0, window_bounds = array<i64: 8, 128>}, {transform_indices = @transform_1, window_bounds = array<i64: 8, 128>}, {transform_indices = @transform_2, window_bounds = array<i64: 8, 128>}, {transform_indices = @transform_3, window_bounds = array<i64: 8, 128>}]} {
    %c0 = arith.constant 0 : index
    %c0_0 = arith.constant 0 : index
    %0 = vector.load %arg1[%c0, %c0_0] : memref<8x128xf32, #tpu.memory_space<vmem>>, vector<8x128xf32>
    %c0_1 = arith.constant 0 : index
    %c0_2 = arith.constant 0 : index
    %1 = vector.load %arg2[%c0_1, %c0_2] : memref<8x128xf32, #tpu.memory_space<vmem>>, vector<8x128xf32>
    %2 = vector.shape_cast %0 : vector<8x128xf32> to vector<8x128x1xf32>
    %3 = tpu.iota {dimensions = array<i32: 1>} : vector<8x128x1xi32>
    %c0_i32 = arith.constant 0 : i32
    %4 = vector.broadcast %c0_i32 : i32 to vector<8x128xi32>
    %c0_i32_3 = arith.constant 0 : i32
    %c128_i32 = arith.constant 128 : i32
    %5 = arith.muli %c0_i32_3, %c128_i32 : i32
    %6 = tpu.assume_multiple %5, 128 : i32
    %c0_4 = arith.constant 0 : index
    %7 = arith.index_cast %6 : i32 to index
    %8 = vector.load %arg1[%c0_4, %7] : memref<8x128xf32, #tpu.memory_space<vmem>>, vector<8x128xf32>
    %9 = vector.shape_cast %8 : vector<8x128xf32> to vector<8x1x128xf32>
    %10 = tpu.iota {dimensions = array<i32: 2>} : vector<8x128x128xi32>
    %11 = vector.broadcast %6 : i32 to vector<8x128x128xi32>
    %12 = arith.addi %10, %11 : vector<8x128x128xi32>
    %13 = vector.broadcast %9 : vector<8x1x128xf32> to vector<8x128x128xf32>
    %14 = vector.broadcast %2 : vector<8x128x1xf32> to vector<8x128x128xf32>
    %15 = arith.cmpf ogt, %13, %14 : vector<8x128x128xf32>
    %16 = vector.broadcast %9 : vector<8x1x128xf32> to vector<8x128x128xf32>
    %17 = vector.broadcast %2 : vector<8x128x1xf32> to vector<8x128x128xf32>
    %18 = arith.cmpf oeq, %16, %17 : vector<8x128x128xf32>
    %19 = vector.broadcast %3 : vector<8x128x1xi32> to vector<8x128x128xi32>
    %20 = arith.cmpi slt, %12, %19 : vector<8x128x128xi32>
    %21 = arith.andi %18, %20 : vector<8x128x128xi1>
    %22 = arith.ori %15, %21 : vector<8x128x128xi1>
    %23 = arith.extui %22 : vector<8x128x128xi1> to vector<8x128x128xi32>
    %cst = arith.constant dense<0> : vector<8x128xi32>
    %24 = vector.multi_reduction <add>, %23, %cst [2] : vector<8x128x128xi32> to vector<8x128xi32>
    %25 = arith.addi %4, %24 : vector<8x128xi32>
    %c1_i32 = arith.constant 1 : i32
    %c6_i32 = arith.constant 6 : i32
    %26 = vector.broadcast %c6_i32 : i32 to vector<8x128xi32>
    %27 = arith.cmpi slt, %25, %26 : vector<8x128xi32>
    %28 = arith.extui %27 : vector<8x128xi1> to vector<8x128xi32>
    %29 = arith.sitofp %28 : vector<8x128xi32> to vector<8x128xf32>
    %30 = arith.mulf %29, %1 : vector<8x128xf32>
    %cst_5 = arith.constant dense<0.000000e+00> : vector<8xf32>
    %31 = vector.multi_reduction <add>, %30, %cst_5 [1] : vector<8x128xf32> to vector<8xf32>
    %32 = vector.shape_cast %31 : vector<8xf32> to vector<8x1xf32>
    %33 = vector.shape_cast %32 : vector<8x1xf32> to vector<8x1xf32>
    %34 = vector.broadcast %33 : vector<8x1xf32> to vector<8x128xf32>
    %c0_6 = arith.constant 0 : index
    %c0_7 = arith.constant 0 : index
    %35 = vector.load %arg4[%c0_6, %c0_7] : memref<8x128xf32, #tpu.memory_space<vmem>>, vector<8x128xf32>
    tpu.vector_store %arg4[%c0_6, %c0_7], %34 {strides = array<i32>} : memref<8x128xf32, #tpu.memory_space<vmem>>, vector<8x128xf32>,
    %cst_8 = arith.constant 1.000000e-07 : f32
    %36 = vector.broadcast %cst_8 : f32 to vector<8x128xf32>
    %37 = arith.maximumf %0, %36 : vector<8x128xf32>
    %38 = math.log %37 : vector<8x128xf32>
    %cst_9 = arith.constant 0.000000e+00 : f32
    %39 = vector.broadcast %cst_9 : f32 to vector<8x128xf32>
    %40 = arith.subf %39, %38 : vector<8x128xf32>
    %c0_10 = arith.constant 0 : index
    %c0_11 = arith.constant 0 : index
    %41 = vector.load %arg3[%c0_10, %c0_11] : memref<8x128xf32, #tpu.memory_space<vmem>>, vector<8x128xf32>
    tpu.vector_store %arg3[%c0_10, %c0_11], %40 {strides = array<i32>} : memref<8x128xf32, #tpu.memory_space<vmem>>, vector<8x128xf32>,
    return
  }
  func.func @transform_0(%arg0: i32) -> (i32, i32) {
    %c0_i32 = arith.constant 0 : i32
    %c0_i32_0 = arith.constant 0 : i32
    return %arg0, %c0_i32 : i32, i32
  }
  func.func @transform_1(%arg0: i32) -> (i32, i32) {
    %c0_i32 = arith.constant 0 : i32
    %c0_i32_0 = arith.constant 0 : i32
    return %arg0, %c0_i32 : i32, i32
  }
  func.func @transform_2(%arg0: i32) -> (i32, i32) {
    %c0_i32 = arith.constant 0 : i32
    %c0_i32_0 = arith.constant 0 : i32
    return %arg0, %c0_i32 : i32, i32
  }
  func.func @transform_3(%arg0: i32) -> (i32, i32) {
    %c0_i32 = arith.constant 0 : i32
    %c0_i32_0 = arith.constant 0 : i32
    return %arg0, %c0_i32 : i32, i32
  }
}

module attributes {stable_mosaic.version = 11 : i64} {
  func.func @_scale_kernel(%arg0: i32, %arg1: memref<1x1xf32, #tpu.memory_space<smem>>, %arg2: memref<8x128xf32, #tpu.memory_space<vmem>>, %arg3: memref<8x128xf32, #tpu.memory_space<vmem>>) attributes {dimension_semantics = [#tpu.dimension_semantics<parallel>], iteration_bounds = array<i64: 1>, scalar_prefetch = 0 : i64, scratch_operands = 0 : i64, tpu.core_type = #tpu.core_type<tc>, window_params = [{transform_indices = @transform_0, window_bounds = array<i64: 1, 1>}, {transform_indices = @transform_1, window_bounds = array<i64: 8, 128>}, {transform_indices = @transform_2, window_bounds = array<i64: 8, 128>}]} {
    %c0 = arith.constant 0 : index
    %c0_0 = arith.constant 0 : index
    %0 = vector.load %arg2[%c0, %c0_0] : memref<8x128xf32, #tpu.memory_space<vmem>>, vector<8x128xf32>
    %c0_1 = arith.constant 0 : index
    %c0_2 = arith.constant 0 : index
    %1 = memref.load %arg1[%c0_1, %c0_2] : memref<1x1xf32, #tpu.memory_space<smem>>
    %2 = vector.broadcast %1 : f32 to vector<8x128xf32>
    %3 = arith.mulf %0, %2 : vector<8x128xf32>
    %c0_3 = arith.constant 0 : index
    %c0_4 = arith.constant 0 : index
    %4 = vector.load %arg3[%c0_3, %c0_4] : memref<8x128xf32, #tpu.memory_space<vmem>>, vector<8x128xf32>
    tpu.vector_store %arg3[%c0_3, %c0_4], %3 {strides = array<i32>} : memref<8x128xf32, #tpu.memory_space<vmem>>, vector<8x128xf32>,
    return
  }
  func.func @transform_0(%arg0: i32) -> (i32, i32) {
    %c0_i32 = arith.constant 0 : i32
    %c0_i32_0 = arith.constant 0 : i32
    %c0_i32_1 = arith.constant 0 : i32
    return %c0_i32, %c0_i32_0 : i32, i32
  }
  func.func @transform_1(%arg0: i32) -> (i32, i32) {
    %c0_i32 = arith.constant 0 : i32
    %c0_i32_0 = arith.constant 0 : i32
    return %arg0, %c0_i32 : i32, i32
  }
  func.func @transform_2(%arg0: i32) -> (i32, i32) {
    %c0_i32 = arith.constant 0 : i32
    %c0_i32_0 = arith.constant 0 : i32
    return %arg0, %c0_i32 : i32, i32
  }
}

</mosaic_0001>

<bundles_post_ra>
// kernel: deep_lineup_loss.3
= control target key start
LH: loop header
LB: loop body
LE: loop exit
PB: predicated region body
PF: predicated region fallthrough
CT: control target
= control target key end

     0   :  { %s45_s0 = inlined_call_operand.<no memory space> [shape: f32[1,1], index: 0, kind: input, shape index: {}]   ;;  %s46_s1 = inlined_call_operand.vmem [shape: f32[8,128], index: 1, kind: input, shape index: {}]   ;;  %s47_s2 = inlined_call_operand.vmem [shape: f32[8,128], index: 2, kind: output, shape index: {}]  }
   0x1   :  { %v12_v0 = vld [vmem:[%s46_s1] sm:$0xff]  ;;  %v14_v1 = vstv %s45_s0 }
   0x2   :  { %v15_v2 = vmul.f32 %v14_v1, %v12_v0 }
   0x4   :  { %16 = vst [vmem:[%s47_s2] sm:$0xff] %v15_v2 }

// kernel: deep_lineup_loss.2
= control target key start
LH: loop header
LB: loop body
LE: loop exit
PB: predicated region body
PF: predicated region fallthrough
CT: control target
= control target key end

     0   :  { %v8942_v0 = vlaneseq  ;;  %v5374_v2 = vmov 1966171168   ;;  %v8940_v4 = vmov 0   ;;  %s8930_s0 = inlined_call_operand.vmem [shape: f32[8,128], index: 0, kind: input, shape index: {}]   ;;  %s8931_s2 = inlined_call_operand.vmem [shape: f32[8,128], index: 2, kind: output, shape index: {0}]   ;;  %s8932_s1 = inlined_call_operand.vmem [shape: f32[8,128], index: 1, kind: input, shape index: {}]   ;;  %s8933_s3 = inlined_call_operand.vmem [shape: f32[8,128], index: 3, kind: output, shape index: {1}]  }
   0x1   :  { %v5400_v1 = vld [vmem:[%s8930_s0] sm:$0xff]  ;;  %v572_v3 = vunpack.c.l.s4 %v5374_v2  ;;  %5369 = vset.pattern.permute.xlu1 %v8940_v4  ;;  %5368 = vset.pattern.permute.xlu0 %v8940_v4 }
   0x2   :  { %v5405_v5 = vshrl.u32 %v8942_v0, 7  ;;  %v5224_v6 = vmax.f32 %v5400_v1, 1e-07 }
   0x3   :  { %v573_v7 = vunpack.c.0.s8 %v572_v3 }
   0x4   :  { %9081 = vst [vmem:[#allocation2_spill] sm:$0xff] %v5405_v5  ;;  %v5409_v8 = vsub.s32 0, %v5405_v5  ;;  %5371 = vlog2.f32 %v5224_v6  ;;  %v8939_v17 = vsub.s32 1, %v5405_v5  ;;  %v8938_v19 = vsub.s32 2, %v5405_v5 }
   0x5   :  { %v5412_v9 = vsub.s32 %v573_v7, %v5405_v5  ;;  %v8937_v21 = vsub.s32 3, %v5405_v5  ;;  %v8936_v27 = vsub.s32 4, %v5405_v5  ;;  %v8935_v45 = vsub.s32 5, %v5405_v5 }
   0x6   :  { %v18_v10 = vrot.slane %v5400_v1, %v5409_v8  ;;  %v85_v18 = vrot.slane %v5400_v1, %v8939_v17  ;;  %v152_v20 = vrot.slane %v5400_v1, %v8938_v19  ;;  %v8934_v63 = vsub.s32 6, %v5405_v5 }
   0x7   :  { %9082 = vst [vmem:[#allocation3_spill] sm:$0xff] %v5412_v9  ;;  %v5418_v11 = vrot.slane %v5400_v1, %v5412_v9  ;;  %v219_v22 = vrot.slane %v5400_v1, %v8937_v21  ;;  %v286_v30 = vrot.slane %v5400_v1, %v8936_v27  ;;  %v353_v48 = vrot.slane %v5400_v1, %v8935_v45 }
   0x8   :  { %28 = vbcast.lane.b32.xlu1 %v18_v10, 272  ;;  %20 = vbcast.lane.b32.xlu0 %v18_v10, 256  ;;  %v420_v6 = vrot.slane %v5400_v1, %v8934_v63  ;;  %v8948_v21 = vsub.s32 7, %v5405_v5 }
   0x9   :  { %v585_v12 = vcombine.high %v5418_v11, %v5418_v11 }
   0xa   :  { %v487_v4 = vrot.slane %v5400_v1, %v8948_v21 }
   0xb   :  { %v5423_v13 = vrot.slane %v585_v12, %v5412_v9 }
   0xc   :  { %32 = vbcast.lane.b32.xlu1 %v18_v10, 280  ;;  %24 = vbcast.lane.b32.xlu0 %v18_v10, 264 }
  0x10   :  { %40 = vbcast.lane.b32.xlu1 %v18_v10, 296  ;;  %36 = vbcast.lane.b32.xlu0 %v18_v10, 288 }
  0x11   :  { %v5372_v14 = vpop.eup %5371 }
  0x12   :  { %v5226_v15 = vmul.f32 0.6931472, %v5372_v14 }
  0x14   :  { %v5227_v16 = vsub.f32 0.0, %v5226_v15  ;;  %48 = vbcast.lane.b32.xlu1 %v18_v10, 312  ;;  %44 = vbcast.lane.b32.xlu0 %v18_v10, 304 }
  0x16   :  { %5228 = vst [vmem:[%s8931_s2] sm:$0xff] %v5227_v16 }
  0x18   :  { %56 = vbcast.lane.b32.xlu1 %v18_v10, 328  ;;  %52 = vbcast.lane.b32.xlu0 %v18_v10, 320 }
  0x1c   :  { %64 = vbcast.lane.b32.xlu1 %v18_v10, 344  ;;  %60 = vbcast.lane.b32.xlu0 %v18_v10, 336 }
  0x20   :  { %72 = vbcast.lane.b32.xlu1 %v18_v10, 360  ;;  %68 = vbcast.lane.b32.xlu0 %v18_v10, 352 }
  0x24   :  { %80 = vbcast.lane.b32.xlu1 %v18_v10, 376  ;;  %76 = vbcast.lane.b32.xlu0 %v18_v10, 368 }
  0x28   :  { %91 = vbcast.lane.b32.xlu1 %v85_v18, 264  ;;  %87 = vbcast.lane.b32.xlu0 %v85_v18, 256 }
  0x2c   :  { %99 = vbcast.lane.b32.xlu1 %v85_v18, 280  ;;  %95 = vbcast.lane.b32.xlu0 %v85_v18, 272 }
  0x30   :  { %107 = vbcast.lane.b32.xlu1 %v85_v18, 296  ;;  %103 = vbcast.lane.b32.xlu0 %v85_v18, 288 }
  0x34   :  { %115 = vbcast.lane.b32.xlu1 %v85_v18, 312  ;;  %111 = vbcast.lane.b32.xlu0 %v85_v18, 304 }
  0x38   :  { %123 = vbcast.lane.b32.xlu1 %v85_v18, 328  ;;  %119 = vbcast.lane.b32.xlu0 %v85_v18, 320 }
  0x3c   :  { %131 = vbcast.lane.b32.xlu1 %v85_v18, 344  ;;  %127 = vbcast.lane.b32.xlu0 %v85_v18, 336 }
  0x40   :  { %139 = vbcast.lane.b32.xlu1 %v85_v18, 360  ;;  %135 = vbcast.lane.b32.xlu0 %v85_v18, 352 }
  0x44   :  { %147 = vbcast.lane.b32.xlu1 %v85_v18, 376  ;;  %143 = vbcast.lane.b32.xlu0 %v85_v18, 368 }
  0x48   :  { %158 = vbcast.lane.b32.xlu1 %v152_v20, 264  ;;  %154 = vbcast.lane.b32.xlu0 %v152_v20, 256 }
  0x4c   :  { %166 = vbcast.lane.b32.xlu1 %v152_v20, 280  ;;  %162 = vbcast.lane.b32.xlu0 %v152_v20, 272 }
  0x50   :  { %174 = vbcast.lane.b32.xlu1 %v152_v20, 296  ;;  %170 = vbcast.lane.b32.xlu0 %v152_v20, 288 }
  0x54   :  { %182 = vbcast.lane.b32.xlu1 %v152_v20, 312  ;;  %178 = vbcast.lane.b32.xlu0 %v152_v20, 304 }
  0x58   :  { %190 = vbcast.lane.b32.xlu1 %v152_v20, 328  ;;  %186 = vbcast.lane.b32.xlu0 %v152_v20, 320 }
  0x5c   :  { %198 = vbcast.lane.b32.xlu1 %v152_v20, 344  ;;  %194 = vbcast.lane.b32.xlu0 %v152_v20, 336 }
  0x60   :  { %206 = vbcast.lane.b32.xlu1 %v152_v20, 360  ;;  %202 = vbcast.lane.b32.xlu0 %v152_v20, 352 }
  0x64   :  { %214 = vbcast.lane.b32.xlu1 %v152_v20, 376  ;;  %210 = vbcast.lane.b32.xlu0 %v152_v20, 368 }
  0x68   :  { %225 = vbcast.lane.b32.xlu1 %v219_v22, 264  ;;  %221 = vbcast.lane.b32.xlu0 %v219_v22, 256 }
  0x6c   :  { %233 = vbcast.lane.b32.xlu1 %v219_v22, 280  ;;  %229 = vbcast.lane.b32.xlu0 %v219_v22, 272 }
  0x70   :  { %241 = vbcast.lane.b32.xlu1 %v219_v22, 296  ;;  %237 = vbcast.lane.b32.xlu0 %v219_v22, 288 }
  0x74   :  { %249 = vbcast.lane.b32.xlu1 %v219_v22, 312  ;;  %245 = vbcast.lane.b32.xlu0 %v219_v22, 304 }
  0x78   :  { %257 = vbcast.lane.b32.xlu1 %v219_v22, 328  ;;  %253 = vbcast.lane.b32.xlu0 %v219_v22, 320 }
  0x7a   :  { %v5440_v23 = vpop.permute.xlu1 %28  ;;  %v5442_v24 = vpop.permute.xlu0 %20 }
  0x7c   :  { %265 = vbcast.lane.b32.xlu1 %v219_v22, 344  ;;  %261 = vbcast.lane.b32.xlu0 %v219_v22, 336 }
  0x7e   :  { %v5444_v25 = vpop.permute.xlu1 %32  ;;  %v5446_v26 = vpop.permute.xlu0 %24 }
  0x80   :  { %273 = vbcast.lane.b32.xlu1 %v219_v22, 360  ;;  %269 = vbcast.lane.b32.xlu0 %v219_v22, 352 }
  0x82   :  { %v5449_v28 = vpop.permute.xlu1 %40  ;;  %v5451_v29 = vpop.permute.xlu0 %36 }
  0x84   :  { %281 = vbcast.lane.b32.xlu1 %v219_v22, 376  ;;  %277 = vbcast.lane.b32.xlu0 %v219_v22, 368 }
  0x86   :  { %v5456_v31 = vpop.permute.xlu1 %48  ;;  %v5458_v32 = vpop.permute.xlu0 %44 }
  0x88   :  { %292 = vbcast.lane.b32.xlu1 %v286_v30, 264  ;;  %288 = vbcast.lane.b32.xlu0 %v286_v30, 256 }
  0x8a   :  { %v5460_v33 = vpop.permute.xlu1 %56  ;;  %v5462_v34 = vpop.permute.xlu0 %52 }
  0x8c   :  { %300 = vbcast.lane.b32.xlu1 %v286_v30, 280  ;;  %296 = vbcast.lane.b32.xlu0 %v286_v30, 272 }
  0x8e   :  { %v5464_v35 = vpop.permute.xlu1 %64  ;;  %v5466_v36 = vpop.permute.xlu0 %60 }
  0x90   :  { %308 = vbcast.lane.b32.xlu1 %v286_v30, 296  ;;  %304 = vbcast.lane.b32.xlu0 %v286_v30, 288 }
  0x92   :  { %v5468_v37 = vpop.permute.xlu1 %72  ;;  %v5470_v38 = vpop.permute.xlu0 %68 }
  0x94   :  { %316 = vbcast.lane.b32.xlu1 %v286_v30, 312  ;;  %312 = vbcast.lane.b32.xlu0 %v286_v30, 304 }
  0x96   :  { %v5472_v39 = vpop.permute.xlu1 %80  ;;  %v5474_v40 = vpop.permute.xlu0 %76 }
  0x98   :  { %324 = vbcast.lane.b32.xlu1 %v286_v30, 328  ;;  %320 = vbcast.lane.b32.xlu0 %v286_v30, 320 }
  0x9a   :  { %v5476_v41 = vpop.permute.xlu1 %91  ;;  %v5478_v42 = vpop.permute.xlu0 %87 }
  0x9c   :  { %332 = vbcast.lane.b32.xlu1 %v286_v30, 344  ;;  %328 = vbcast.lane.b32.xlu0 %v286_v30, 336 }
  0x9e   :  { %v5480_v43 = vpop.permute.xlu1 %99  ;;  %v5482_v44 = vpop.permute.xlu0 %95 }
  0xa0   :  { %340 = vbcast.lane.b32.xlu1 %v286_v30, 360  ;;  %336 = vbcast.lane.b32.xlu0 %v286_v30, 352 }
  0xa2   :  { %v5485_v46 = vpop.permute.xlu1 %107  ;;  %v5487_v47 = vpop.permute.xlu0 %103 }
  0xa4   :  { %348 = vbcast.lane.b32.xlu1 %v286_v30, 376  ;;  %344 = vbcast.lane.b32.xlu0 %v286_v30, 368 }
  0xa6   :  { %v5492_v49 = vpop.permute.xlu1 %115  ;;  %v5494_v50 = vpop.permute.xlu0 %111 }
  0xa8   :  { %359 = vbcast.lane.b32.xlu1 %v353_v48, 264  ;;  %355 = vbcast.lane.b32.xlu0 %v353_v48, 256 }
  0xaa   :  { %v5496_v51 = vpop.permute.xlu1 %123  ;;  %v5498_v52 = vpop.permute.xlu0 %119 }
  0xac   :  { %367 = vbcast.lane.b32.xlu1 %v353_v48, 280  ;;  %363 = vbcast.lane.b32.xlu0 %v353_v48, 272 }
  0xae   :  { %v5500_v53 = vpop.permute.xlu1 %131  ;;  %v5502_v54 = vpop.permute.xlu0 %127 }
  0xb0   :  { %375 = vbcast.lane.b32.xlu1 %v353_v48, 296  ;;  %371 = vbcast.lane.b32.xlu0 %v353_v48, 288 }
  0xb2   :  { %v5504_v55 = vpop.permute.xlu1 %139  ;;  %v5506_v56 = vpop.permute.xlu0 %135 }
  0xb4   :  { %383 = vbcast.lane.b32.xlu1 %v353_v48, 312  ;;  %379 = vbcast.lane.b32.xlu0 %v353_v48, 304 }
  0xb6   :  { %v5508_v57 = vpop.permute.xlu1 %147  ;;  %v5510_v58 = vpop.permute.xlu0 %143 }
  0xb8   :  { %391 = vbcast.lane.b32.xlu1 %v353_v48, 328  ;;  %387 = vbcast.lane.b32.xlu0 %v353_v48, 320 }
  0xba   :  { %v5512_v59 = vpop.permute.xlu1 %158  ;;  %v5514_v60 = vpop.permute.xlu0 %154 }
  0xbc   :  { %399 = vbcast.lane.b32.xlu1 %v353_v48, 344  ;;  %395 = vbcast.lane.b32.xlu0 %v353_v48, 336 }
  0xbe   :  { %v5516_v61 = vpop.permute.xlu1 %166  ;;  %v5518_v62 = vpop.permute.xlu0 %162 }
  0xc0   :  { %407 = vbcast.lane.b32.xlu1 %v353_v48, 360  ;;  %403 = vbcast.lane.b32.xlu0 %v353_v48, 352 }
  0xc2   :  { %v5521_v2 = vpop.permute.xlu1 %174  ;;  %v5523_v3 = vpop.permute.xlu0 %170 }
  0xc4   :  { %415 = vbcast.lane.b32.xlu1 %v353_v48, 376  ;;  %411 = vbcast.lane.b32.xlu0 %v353_v48, 368 }
  0xc6   :  { %v5528_v7 = vpop.permute.xlu1 %182  ;;  %v5530_v10 = vpop.permute.xlu0 %178 }
  0xc8   :  { %426 = vbcast.lane.b32.xlu1 %v420_v6, 264  ;;  %422 = vbcast.lane.b32.xlu0 %v420_v6, 256 }
  0xca   :  { %v5532_v12 = vpop.permute.xlu1 %190  ;;  %v5534_v14 = vpop.permute.xlu0 %186 }
  0xcc   :  { %434 = vbcast.lane.b32.xlu1 %v420_v6, 280  ;;  %430 = vbcast.lane.b32.xlu0 %v420_v6, 272 }
  0xce   :  { %v5536_v15 = vpop.permute.xlu1 %198  ;;  %v5538_v16 = vpop.permute.xlu0 %194 }
  0xcf   :  { %9083 = vst [vmem:[#allocation4_spill] sm:$0xff] %v5536_v15 }
  0xd0   :  { %442 = vbcast.lane.b32.xlu1 %v420_v6, 296  ;;  %438 = vbcast.lane.b32.xlu0 %v420_v6, 288 }
  0xd2   :  { %v5540_v18 = vpop.permute.xlu1 %206  ;;  %v5542_v20 = vpop.permute.xlu0 %202 }
  0xd3   :  { %9084 = vst [vmem:[#allocation5_spill] sm:$0xff] %v5540_v18  ;;  %9085 = vst [vmem:[#allocation6_spill] sm:$0xff] %v5542_v20 }
  0xd4   :  { %450 = vbcast.lane.b32.xlu1 %v420_v6, 312  ;;  %446 = vbcast.lane.b32.xlu0 %v420_v6, 304 }
  0xd6   :  { %v5544_v22 = vpop.permute.xlu1 %214  ;;  %v5546_v30 = vpop.permute.xlu0 %210 }
  0xd7   :  { %9086 = vst [vmem:[#allocation7_spill] sm:$0xff] %v5544_v22  ;;  %9087 = vst [vmem:[#allocation8_spill] sm:$0xff] %v5546_v30  ;;  %v9132_v22 = vmov 0 }
  0xd8   :  { %458 = vbcast.lane.b32.xlu1 %v420_v6, 328  ;;  %454 = vbcast.lane.b32.xlu0 %v420_v6, 320 }
  0xda   :  { %v5548_v48 = vpop.permute.xlu1 %225  ;;  %v5550_v63 = vpop.permute.xlu0 %221 }
  0xdb   :  { %9088 = vst [vmem:[#allocation9_spill] sm:$0xff] %v5548_v48  ;;  %9089 = vst [vmem:[#allocation10_spill] sm:$0xff] %v5550_v63 }
  0xdc   :  { %466 = vbcast.lane.b32.xlu1 %v420_v6, 344  ;;  %462 = vbcast.lane.b32.xlu0 %v420_v6, 336 }
  0xde   :  { %v5552_v45 = vpop.permute.xlu1 %233  ;;  %v5554_v27 = vpop.permute.xlu0 %229 }
  0xdf   :  { %9090 = vst [vmem:[#allocation11_spill] sm:$0xff] %v5552_v45  ;;  %9091 = vst [vmem:[#allocation12_spill] sm:$0xff] %v5554_v27 }
  0xe0   :  { %474 = vbcast.lane.b32.xlu1 %v420_v6, 360  ;;  %470 = vbcast.lane.b32.xlu0 %v420_v6, 352 }
  0xe2   :  { %v5557_v19 = vpop.permute.xlu1 %241  ;;  %v5559_v17 = vpop.permute.xlu0 %237 }
  0xe3   :  { %9092 = vst [vmem:[#allocation13_spill] sm:$0xff] %v5557_v19  ;;  %9093 = vst [vmem:[#allocation14_spill] sm:$0xff] %v5559_v17 }
  0xe4   :  { %482 = vbcast.lane.b32.xlu1 %v420_v6, 376  ;;  %478 = vbcast.lane.b32.xlu0 %v420_v6, 368 }
  0xe6   :  { %v5564_v0 = vpop.permute.xlu1 %249  ;;  %v5566_v48 = vpop.permute.xlu0 %245 }
  0xe7   :  { %9094 = vst [vmem:[#allocation15_spill] sm:$0xff] %v5564_v0  ;;  %9095 = vst [vmem:[#allocation16_spill] sm:$0xff] %v5566_v48 }
  0xe8   :  { %493 = vbcast.lane.b32.xlu1 %v487_v4, 264  ;;  %489 = vbcast.lane.b32.xlu0 %v487_v4, 256 }
  0xea   :  { %v5568_v45 = vpop.permute.xlu1 %257  ;;  %v5570_v27 = vpop.permute.xlu0 %253 }
  0xeb   :  { %9096 = vst [vmem:[#allocation17_spill] sm:$0xff] %v5568_v45  ;;  %9097 = vst [vmem:[#allocation18_spill] sm:$0xff] %v5570_v27 }
  0xec   :  { %501 = vbcast.lane.b32.xlu1 %v487_v4, 280  ;;  %497 = vbcast.lane.b32.xlu0 %v487_v4, 272 }
  0xee   :  { %v5572_v19 = vpop.permute.xlu1 %265  ;;  %v5574_v17 = vpop.permute.xlu0 %261 }
  0xef   :  { %9098 = vst [vmem:[#allocation19_spill] sm:$0xff] %v5572_v19  ;;  %9099 = vst [vmem:[#allocation20_spill] sm:$0xff] %v5574_v17 }
  0xf0   :  { %509 = vbcast.lane.b32.xlu1 %v487_v4, 296  ;;  %505 = vbcast.lane.b32.xlu0 %v487_v4, 288 }
  0xf2   :  { %v5576_v6 = vpop.permute.xlu1 %273  ;;  %v5578_v1 = vpop.permute.xlu0 %269 }
  0xf3   :  { %9100 = vst [vmem:[#allocation21_spill] sm:$0xff] %v5576_v6  ;;  %9101 = vst [vmem:[#allocation22_spill] sm:$0xff] %v5578_v1 }
  0xf4   :  { %517 = vbcast.lane.b32.xlu1 %v487_v4, 312  ;;  %513 = vbcast.lane.b32.xlu0 %v487_v4, 304 }
  0xf6   :  { %v5580_v21 = vpop.permute.xlu1 %281  ;;  %v5582_v0 = vpop.permute.xlu0 %277 }
  0xf7   :  { %9102 = vst [vmem:[#allocation23_spill] sm:$0xff] %v5580_v21  ;;  %9103 = vst [vmem:[#allocation24_spill] sm:$0xff] %v5582_v0 }
  0xf8   :  { %525 = vbcast.lane.b32.xlu1 %v487_v4, 328  ;;  %521 = vbcast.lane.b32.xlu0 %v487_v4, 320 }
  0xfa   :  { %v5584_v45 = vpop.permute.xlu1 %292  ;;  %v5586_v27 = vpop.permute.xlu0 %288 }
  0xfb   :  { %9104 = vst [vmem:[#allocation25_spill] sm:$0xff] %v5584_v45  ;;  %9105 = vst [vmem:[#allocation26_spill] sm:$0xff] %v5586_v27  ;;  %v5602_v45 = vrot.slane %v5418_v11, %v5412_v9  ;;  %v553_v11 = vadd.s32 8, %v5405_v5  ;;  %v556_v9 = vadd.s32 32, %v5405_v5 }
  0xfc   :  { %533 = vbcast.lane.b32.xlu1 %v487_v4, 344  ;;  %529 = vbcast.lane.b32.xlu0 %v487_v4, 336 }
  0xfe   :  { %v5588_v19 = vpop.permute.xlu1 %300  ;;  %v5590_v17 = vpop.permute.xlu0 %296 }
  0xff   :  { %9106 = vst [vmem:[#allocation27_spill] sm:$0xff] %v5588_v19  ;;  %9107 = vst [vmem:[#allocation28_spill] sm:$0xff] %v5590_v17  ;;  %v5610_v17 = vrot.slane %v5602_v45, %v5409_v8 }
 0x100   :  { %541 = vbcast.lane.b32.xlu1 %v487_v4, 360  ;;  %537 = vbcast.lane.b32.xlu0 %v487_v4, 352 }
 0x101   :  { %vm791_vm1 = vcmp.eq.f32.partialorder %v5610_v17, %v5442_v24  ;;  %vm663_vm2 = vcmp.gt.f32.partialorder %v5610_v17, %v5442_v24  ;;  %vm792_vm5 = vcmp.eq.f32.partialorder %v5610_v17, %v5446_v26  ;;  %vm664_vm7 = vcmp.gt.f32.partialorder %v5610_v17, %v5446_v26 }
 0x102   :  { %v5592_v6 = vpop.permute.xlu1 %308  ;;  %v5594_v1 = vpop.permute.xlu0 %304  ;;  %vm793_vm10 = vcmp.eq.f32.partialorder %v5610_v17, %v5440_v23  ;;  %vm665_vm12 = vcmp.gt.f32.partialorder %v5610_v17, %v5440_v23  ;;  %vm794_vm15 = vcmp.eq.f32.partialorder %v5610_v17, %v5444_v25 }
 0x103   :  { %9108 = vst [vmem:[#allocation29_spill] sm:$0xff] %v5592_v6  ;;  %9109 = vst [vmem:[#allocation30_spill] sm:$0xff] %v5594_v1  ;;  %v9114_v6 = vlaneseq }
 0x104   :  { %549 = vbcast.lane.b32.xlu1 %v487_v4, 376  ;;  %545 = vbcast.lane.b32.xlu0 %v487_v4, 368 }
 0x105   :  { %v5613_v1 = vand.u32 127, %v9114_v6  ;;  %v9121_v6 = vmov 0 }
 0x106   :  { %v5596_v21 = vpop.permute.xlu1 %316  ;;  %v5598_v0 = vpop.permute.xlu0 %312 }
 0x107   :  { %9110 = vst [vmem:[#allocation31_spill] sm:$0xff] %v5596_v21  ;;  %9111 = vst [vmem:[#allocation32_spill] sm:$0xff] %v5598_v0  ;;  %vm5619_vm0 = vcmp.lt.s32.totalorder %v5613_v1, %v5405_v5  ;;  %v9117_v21 = vmov 0  ;;  %vm5635_vm4 = vcmp.lt.s32.totalorder %v5613_v1, %v553_v11  ;;  %v9125_v11 = vmov 0 }
 0x108   :  { %9115 = vst [vmem:[#allocation35_spill] sm:$0xff] %v5613_v1  ;;  %v9118_v21 = vsel %vm5619_vm0, 4294967295, %v9117_v21  ;;  %vm935_vm3 = vmand %vm791_vm1, %vm5619_vm0  ;;  %v9122_v6 = vsel %vm5635_vm4, 4294967295, %v9121_v6  ;;  %v9127_v0 = vmov 0  }
 0x109   :  { %vm1063_vm6 = vmor %vm663_vm2, %vm935_vm3  ;;  %vm666_vm2 = vcmp.gt.f32.partialorder %v5610_v17, %v5444_v25 }
 0x10a   :  { %v5604_v27 = vpop.permute.xlu0 %320  ;;  %v5606_v19 = vpop.permute.xlu1 %324  ;;  %vm936_vm8 = vmand %vm792_vm5, %vm5635_vm4  ;;  %vm5682_vm5 = vcmp.lt.s32.totalorder %v5613_v1, %v556_v9 }
 0x10b   :  { %9112 = vst [vmem:[#allocation33_spill] sm:$0xff] %v5604_v27  ;;  %9113 = vst [vmem:[#allocation34_spill] sm:$0xff] %v5606_v19  ;;  %v9133_v22 = vsel %vm5682_vm5, 4294967295, %v9132_v22 }
 0x10c   :  { %vm1064_vm11 = vmor %vm664_vm7, %vm936_vm8 }
 0x10d   :  { %v1192_v23 = vsel %vm1064_vm11, 1, %v9127_v0 }
 0x10e   :  { %v5615_v4 = vpop.permute.xlu0 %328  ;;  %v5626_v19 = vpop.permute.xlu1 %332  ;;  %v1331_v63 = vand.u32 65535, %v1192_v23 }
 0x10f   :  { %9116 = vst [vmem:[#allocation36_spill] sm:$0xff] %v5615_v4  ;;  %9119 = vst [vmem:[#allocation37_spill] sm:$0xff] %v5626_v19  ;;  %v554_v4 = vadd.s32 16, %v5405_v5 }
 0x110   :  { %v1333_v9 = vcvt.s32.f32 %v1331_v63 }
 0x111   :  { %vm5651_vm9 = vcmp.lt.s32.totalorder %v5613_v1, %v554_v4 }
 0x112   :  { %v5628_v27 = vpop.permute.xlu0 %336  ;;  %v5642_v19 = vpop.permute.xlu1 %340  ;;  %v9126_v11 = vsel %vm5651_vm9, 4294967295, %v9125_v11  ;;  %vm937_vm13 = vmand %vm793_vm10, %vm5651_vm9  ;;  %vm667_vm10 = vcmp.gt.f32.partialorder %v5610_v17, %v5451_v29 }
 0x113   :  { %9120 = vst [vmem:[#allocation38_spill] sm:$0xff] %v5628_v27  ;;  %9123 = vst [vmem:[#allocation39_spill] sm:$0xff] %v5642_v19  ;;  %v555_v27 = vadd.s32 24, %v5405_v5  ;;  %v1191_v19 = vsel %vm1063_vm6, 1, %v9127_v0  ;;  %vm795_vm6 = vcmp.eq.f32.partialorder %v5610_v17, %v5451_v29  ;;  %v559_v29 = vadd.s32 56, %v5405_v5 }
 0x114   :  { %v1319_v4 = vand.u32 65535, %v1191_v19  ;;  %vm1065_vm1 = vmor %vm665_vm12, %vm937_vm13  ;;  %vm796_vm12 = vcmp.eq.f32.partialorder %v5610_v17, %v5449_v28 }
 0x115   :  { %vm5666_vm14 = vcmp.lt.s32.totalorder %v5613_v1, %v555_v27  ;;  %v557_v27 = vadd.s32 40, %v5405_v5  ;;  %v1193_v25 = vsel %vm1065_vm1, 1, %v9127_v0  ;;  %vm939_vm11 = vmand %vm795_vm6, %vm5682_vm5 }
 0x116   :  { %v5648_v24 = vpop.permute.xlu0 %344  ;;  %v5663_v26 = vpop.permute.xlu1 %348  ;;  %vm938_vm3 = vmand %vm794_vm15, %vm5666_vm14  ;;  %vm668_vm15 = vcmp.gt.f32.partialorder %v5610_v17, %v5449_v28  ;;  %v1344_v20 = vshrl.u32 %v1193_v25, 16 }
 0x117   :  { %9124 = vst [vmem:[#allocation40_spill] sm:$0xff] %v5648_v24  ;;  %9128 = vst [vmem:[#allocation41_spill] sm:$0xff] %v5663_v26  ;;  %v9129_v24 = vmov 0  ;;  %v1321_v26 = vcvt.s32.f32 %v1319_v4  ;;  %vm5694_vm8 = vcmp.lt.s32.totalorder %v5613_v1, %v557_v27  ;;  %v9136_v4 = vmov 0 }
 0x118   :  { %v9130_v24 = vsel %vm5666_vm14, 4294967295, %v9129_v24  ;;  %vm1066_vm7 = vmor %vm666_vm2, %vm938_vm3  ;;  %v9137_v4 = vsel %vm5694_vm8, 4294967295, %v9136_v4  ;;  %vm797_vm3 = vcmp.eq.f32.partialorder %v5610_v17, %v5458_v32 }
 0x119   :  { %v1194_v27 = vsel %vm1066_vm7, 1, %v9127_v0  ;;  %vm1067_vm13 = vmor %vm667_vm10, %vm939_vm11  ;;  %vm5724_vm7 = vcmp.lt.s32.totalorder %v5613_v1, %v559_v29  ;;  %vm669_vm10 = vcmp.gt.f32.partialorder %v5610_v17, %v5458_v32  ;;  %v561_v32 = vadd.s32 72, %v5405_v5 }
 0x11a   :  { %v5673_v48 = vpop.permute.xlu0 %355  ;;  %v5688_v30 = vpop.permute.xlu1 %359  ;;  %vm940_vm1 = vmand %vm796_vm12, %vm5694_vm8  ;;  %v1195_v15 = vsel %vm1067_vm13, 1, %v9127_v0  ;;  %vm798_vm12 = vcmp.eq.f32.partialorder %v5610_v17, %v5456_v31 }
 0x11b   :  { %9131 = vst [vmem:[#allocation42_spill] sm:$0xff] %v5673_v48  ;;  %v1320_v48 = vshrl.u32 %v1191_v19, 16  ;;  %9134 = vst [vmem:[#allocation43_spill] sm:$0xff] %v5688_v30  ;;  %v1332_v19 = vshrl.u32 %v1192_v23, 16 }
 0x11c   :  { %vm1068_vm6 = vmor %vm668_vm15, %vm940_vm1  ;;  %vm670_vm15 = vcmp.gt.f32.partialorder %v5610_v17, %v5456_v31 }
 0x11d   :  { %v1322_v30 = vcvt.s32.f32 %v1320_v48  ;;  %v1334_v23 = vcvt.s32.f32 %v1332_v19  ;;  %v9139_v48 = vmov 0  ;;  %v1346_v19 = vcvt.s32.f32 %v1344_v20  ;;  %vm942_vm1 = vmand %vm798_vm12, %vm5724_vm7 }
 0x11e   :  { %v5691_v18 = vpop.permute.xlu0 %363  ;;  %v5711_v63 = vpop.permute.xlu1 %367  ;;  %v1196_v29 = vsel %vm1068_vm6, 1, %v9127_v0  ;;  %vm799_vm6 = vcmp.eq.f32.partialorder %v5610_v17, %v5462_v34 }
 0x11f   :  { %9135 = vst [vmem:[#allocation44_spill] sm:$0xff] %v5691_v18  ;;  %v1343_v18 = vand.u32 65535, %v1193_v25  ;;  %9138 = vst [vmem:[#allocation45_spill] sm:$0xff] %v5711_v63  ;;  %v9142_v25 = vmov 0 }
 0x120   :  { %v9143_v25 = vsel %vm5724_vm7, 4294967295, %v9142_v25  ;;  %vm5761_vm7 = vcmp.lt.s32.totalorder %v5613_v1, %v561_v32 }
 0x121   :  { %v1345_v28 = vcvt.s32.f32 %v1343_v18  ;;  %v560_v18 = vadd.s32 64, %v5405_v5 }
 0x123   :  { %1323 = vadd.xlane.f32.xlu0 %v1321_v26  ;;  %v558_v26 = vadd.s32 48, %v5405_v5 }
 0x125   :  { %vm5714_vm2 = vcmp.lt.s32.totalorder %v5613_v1, %v558_v26  ;;  %v1356_v26 = vshrl.u32 %v1194_v27, 16 }
 0x126   :  { %v9140_v48 = vsel %vm5714_vm2, 4294967295, %v9139_v48  ;;  %vm941_vm11 = vmand %vm797_vm3, %vm5714_vm2  ;;  %vm5746_vm3 = vcmp.lt.s32.totalorder %v5613_v1, %v560_v18  ;;  %vm804_vm2 = vcmp.eq.f32.partialorder %v5610_v17, %v5468_v37 }
 0x127   :  { %1335 = vadd.xlane.f32.xlu0 %v1333_v9  ;;  %v1355_v9 = vand.u32 65535, %v1194_v27  ;;  %vm1069_vm13 = vmor %vm669_vm10, %vm941_vm11  ;;  %v1358_v20 = vcvt.s32.f32 %v1356_v26  ;;  %v1368_v27 = vshrl.u32 %v1195_v15, 16  ;;  %vm671_vm11 = vcmp.gt.f32.partialorder %v5610_v17, %v5462_v34 }
 0x128   :  { %1325 = vadd.xlane.f32.xlu1 %v1322_v30  ;;  %v5720_v30 = vpop.permute.xlu0 %371  ;;  %v1197_v31 = vsel %vm1069_vm13, 1, %v9127_v0  ;;  %vm1070_vm10 = vmor %vm670_vm15, %vm942_vm1  ;;  %vm800_vm13 = vcmp.eq.f32.partialorder %v5610_v17, %v5460_v33  ;;  %vm672_vm1 = vcmp.gt.f32.partialorder %v5610_v17, %v5460_v33 }
 0x129   :  { %9141 = vst [vmem:[#allocation46_spill] sm:$0xff] %v5720_v30  ;;  %v5735_v30 = vpop.permute.xlu1 %375  ;;  %vm943_vm12 = vmand %vm799_vm6, %vm5746_vm3  ;;  %v1370_v18 = vcvt.s32.f32 %v1368_v27  ;;  %v1392_v27 = vshrl.u32 %v1197_v31, 16 }
 0x12a   :  { %9144 = vst [vmem:[#allocation47_spill] sm:$0xff] %v5735_v30  ;;  %v1198_v30 = vsel %vm1070_vm10, 1, %v9127_v0  ;;  %vm1071_vm15 = vmor %vm671_vm11, %vm943_vm12  ;;  %vm801_vm10 = vcmp.eq.f32.partialorder %v5610_v17, %v5466_v36 }
 0x12b   :  { %1337 = vadd.xlane.f32.xlu0 %v1334_v23  ;;  %v1357_v23 = vcvt.s32.f32 %v1355_v9  ;;  %v9146_v9 = vmov 0  ;;  %vm944_vm6 = vmand %vm800_vm13, %vm5761_vm7  ;;  %v1199_v33 = vsel %vm1071_vm15, 1, %v9127_v0  ;;  %vm673_vm13 = vcmp.gt.f32.partialorder %v5610_v17, %v5466_v36 }
 0x12c   :  { %1347 = vadd.xlane.f32.xlu1 %v1345_v28  ;;  %v1367_v28 = vand.u32 65535, %v1195_v15  ;;  %v5738_v63 = vpop.permute.xlu0 %379  ;;  %v9147_v9 = vsel %vm5746_vm3, 4294967295, %v9146_v9  ;;  %v562_v15 = vadd.s32 80, %v5405_v5  ;;  %vm1072_vm11 = vmor %vm672_vm1, %vm944_vm6  ;;  %vm802_vm15 = vcmp.eq.f32.partialorder %v5610_v17, %v5464_v35 }
 0x12d   :  { %9145 = vst [vmem:[#allocation48_spill] sm:$0xff] %v5738_v63  ;;  %v5758_v26 = vpop.permute.xlu1 %383  ;;  %v1380_v63 = vshrl.u32 %v1196_v29, 16  ;;  %vm674_vm6 = vcmp.gt.f32.partialorder %v5610_v17, %v5464_v35  ;;  %v565_v36 = vadd.s32 104, %v5405_v5 }
 0x12e   :  { %9148 = vst [vmem:[#allocation49_spill] sm:$0xff] %v5758_v26  ;;  %vm5776_vm3 = vcmp.lt.s32.totalorder %v5613_v1, %v562_v15  ;;  %v1404_v15 = vshrl.u32 %v1198_v30, 16 }
 0x12f   :  { %1349 = vadd.xlane.f32.xlu0 %v1346_v19  ;;  %v1369_v19 = vcvt.s32.f32 %v1367_v28  ;;  %v9149_v28 = vmov 0  ;;  %v1382_v32 = vcvt.s32.f32 %v1380_v63  ;;  %v9156_v63 = vmov 0 }
 0x130   :  { %1359 = vadd.xlane.f32.xlu1 %v1357_v23  ;;  %v1379_v23 = vand.u32 65535, %v1196_v29  ;;  %v9150_v28 = vsel %vm5761_vm7, 4294967295, %v9149_v28  ;;  %v563_v29 = vadd.s32 88, %v5405_v5  ;;  %vm945_vm7 = vmand %vm801_vm10, %vm5776_vm3 }
 0x131   :  { %vm1073_vm1 = vmor %vm673_vm13, %vm945_vm7  ;;  %vm803_vm7 = vcmp.eq.f32.partialorder %v5610_v17, %v5470_v38  ;;  %vm5818_vm13 = vcmp.lt.s32.totalorder %v5613_v1, %v565_v36 }
 0x132   :  { %v1381_v34 = vcvt.s32.f32 %v1379_v23  ;;  %vm5788_vm12 = vcmp.lt.s32.totalorder %v5613_v1, %v563_v29  ;;  %v1200_v29 = vsel %vm1072_vm11, 1, %v9127_v0 }
 0x133   :  { %1361 = vadd.xlane.f32.xlu0 %v1358_v20  ;;  %v5767_v20 = vpop.permute.xlu0 %387  ;;  %v9157_v63 = vsel %vm5788_vm12, 4294967295, %v9156_v63  ;;  %vm946_vm10 = vmand %vm802_vm15, %vm5788_vm12  ;;  %vm675_vm15 = vcmp.gt.f32.partialorder %v5610_v17, %v5470_v38  ;;  %v567_v38 = vadd.s32 120, %v5405_v5 }
 0x134   :  { %1371 = vadd.xlane.f32.xlu1 %v1369_v19  ;;  %9151 = vst [vmem:[#allocation50_spill] sm:$0xff] %v5767_v20  ;;  %v1391_v19 = vand.u32 65535, %v1197_v31  ;;  %v9152_v20 = vmov 0  ;;  %v1394_v31 = vcvt.s32.f32 %v1392_v27  ;;  %v1406_v27 = vcvt.s32.f32 %v1404_v15  ;;  %vm1074_vm11 = vmor %vm674_vm6, %vm946_vm10 }
 0x135   :  { %v9153_v20 = vsel %vm5776_vm3, 4294967295, %v9152_v20  ;;  %v1202_v36 = vsel %vm1074_vm11, 1, %v9127_v0  ;;  %vm676_vm6 = vcmp.gt.f32.partialorder %v5610_v17, %v5468_v37  ;;  %vm948_vm10 = vmand %vm804_vm2, %vm5818_vm13  ;;  %vm677_vm2 = vcmp.gt.f32.partialorder %v5610_v17, %v5474_v40 }
 0x136   :  { %v1393_v23 = vcvt.s32.f32 %v1391_v19  ;;  %v564_v19 = vadd.s32 96, %v5405_v5  ;;  %vm1076_vm11 = vmor %vm676_vm6, %vm948_vm10  ;;  %vm678_vm10 = vcmp.gt.f32.partialorder %v5610_v17, %v5472_v39 }
 0x137   :  { %1373 = vadd.xlane.f32.xlu0 %v1370_v18  ;;  %v1403_v18 = vand.u32 65535, %v1198_v30  ;;  %v5785_v26 = vpop.permute.xlu0 %395 }
 0x138   :  { %1383 = vadd.xlane.f32.xlu1 %v1381_v34  ;;  %v5782_v34 = vpop.permute.xlu1 %391  ;;  %9155 = vst [vmem:[#allocation52_spill] sm:$0xff] %v5785_v26  ;;  %v1416_v26 = vshrl.u32 %v1199_v33, 16  ;;  %vm5808_vm3 = vcmp.lt.s32.totalorder %v5613_v1, %v564_v19  ;;  %v1428_v19 = vshrl.u32 %v1200_v29, 16 }
 0x139   :  { %9154 = vst [vmem:[#allocation51_spill] sm:$0xff] %v5782_v34  ;;  %v1201_v34 = vsel %vm1073_vm1, 1, %v9127_v0  ;;  %vm947_vm12 = vmand %vm803_vm7, %vm5808_vm3 }
 0x13a   :  { %v1418_v15 = vcvt.s32.f32 %v1416_v26  ;;  %vm1075_vm1 = vmor %vm675_vm15, %vm947_vm12  ;;  %v1430_v26 = vcvt.s32.f32 %v1428_v19  ;;  %vm805_vm12 = vcmp.eq.f32.partialorder %v5610_v17, %v5474_v40  ;;  %v1204_v40 = vsel %vm1076_vm11, 1, %v9127_v0 }
 0x13b   :  { %1385 = vadd.xlane.f32.xlu0 %v1382_v32  ;;  %v1405_v32 = vcvt.s32.f32 %v1403_v18  ;;  %v1203_v37 = vsel %vm1075_vm1, 1, %v9127_v0  ;;  %vm806_vm1 = vcmp.eq.f32.partialorder %v5610_v17, %v5472_v39  ;;  %v1476_v39 = vshrl.u32 %v1204_v40, 16 }
 0x13c   :  { %1395 = vadd.xlane.f32.xlu1 %v1393_v23  ;;  %v1415_v23 = vand.u32 65535, %v1199_v33  ;;  %v5805_v30 = vpop.permute.xlu1 %399  ;;  %v9162_v33 = vmov 0 }
 0x13d   :  { %9158 = vst [vmem:[#allocation53_spill] sm:$0xff] %v5805_v30  ;;  %v9163_v33 = vsel %vm5818_vm13, 4294967295, %v9162_v33  ;;  %vm5858_vm13 = vcmp.lt.s32.totalorder %v5613_v1, %v567_v38  ;;  %v1464_v38 = vshrl.u32 %v1203_v37, 16 }
 0x13e   :  { %v1417_v35 = vcvt.s32.f32 %v1415_v23  ;;  %v566_v23 = vadd.s32 112, %v5405_v5  ;;  %v5849_v5 = vrot.slane %v5423_v13, %v5409_v8 }
 0x13f   :  { %1397 = vadd.xlane.f32.xlu0 %v1394_v31  ;;  %v5814_v31 = vpop.permute.xlu0 %403  ;;  %v1466_v17 = vcvt.s32.f32 %v1464_v38 }
 0x140   :  { %1407 = vadd.xlane.f32.xlu1 %v1405_v32  ;;  %9161 = vst [vmem:[#allocation54_spill] sm:$0xff] %v5814_v31  ;;  %v1427_v32 = vand.u32 65535, %v1200_v29  ;;  %v5829_v31 = vpop.permute.xlu1 %407  ;;  %v1440_v29 = vshrl.u32 %v1201_v34, 16  ;;  %vm5840_vm7 = vcmp.lt.s32.totalorder %v5613_v1, %v566_v23  ;;  %v1452_v23 = vshrl.u32 %v1202_v36, 16 }
 0x141   :  { %vm949_vm15 = vmand %vm805_vm12, %vm5840_vm7  ;;  %v1475_v1 = vand.u32 65535, %v1204_v40 }
 0x142   :  { %v1442_v19 = vcvt.s32.f32 %v1440_v29  ;;  %vm1077_vm6 = vmor %vm677_vm2, %vm949_vm15  ;;  %vm679_vm2 = vcmp.gt.f32.partialorder %v5849_v5, %v5478_v42 }
 0x143   :  { %1409 = vadd.xlane.f32.xlu0 %v1406_v27  ;;  %v1429_v27 = vcvt.s32.f32 %v1427_v32  ;;  %v5832_v30 = vpop.permute.xlu0 %411  ;;  %v9165_v32 = vmov 0  ;;  %vm950_vm12 = vmand %vm806_vm1, %vm5858_vm13  ;;  %vm808_vm1 = vcmp.eq.f32.partialorder %v5849_v5, %v5476_v41 }
 0x144   :  { %1419 = vadd.xlane.f32.xlu1 %v1417_v35  ;;  %v1439_v35 = vand.u32 65535, %v1201_v34  ;;  %9164 = vst [vmem:[#allocation55_spill] sm:$0xff] %v5832_v30  ;;  %v9166_v32 = vsel %vm5840_vm7, 4294967295, %v9165_v32  ;;  %v5855_v34 = vpop.permute.xlu1 %415  ;;  %v1463_v30 = vand.u32 65535, %v1203_v37  ;;  %vm807_vm7 = vcmp.eq.f32.partialorder %v5849_v5, %v5478_v42  ;;  %vm1078_vm11 = vmor %vm678_vm10, %vm950_vm12 }
 0x145   :  { %vm951_vm15 = vmand %vm807_vm7, %vm5619_vm0  ;;  %vm680_vm10 = vcmp.gt.f32.partialorder %v5849_v5, %v5476_v41  ;;  %vm809_vm7 = vcmp.eq.f32.partialorder %v5849_v5, %v5482_v44 }
 0x146   :  { %v1465_v29 = vcvt.s32.f32 %v1463_v30  ;;  %v1477_v30 = vcvt.s32.f32 %v1475_v1  ;;  %vm952_vm12 = vmand %vm808_vm1, %vm5635_vm4  ;;  %vm810_vm1 = vcmp.eq.f32.partialorder %v5849_v5, %v5480_v43 }
 0x147   :  { %1421 = vadd.xlane.f32.xlu0 %v1418_v15  ;;  %v1441_v15 = vcvt.s32.f32 %v1439_v35  ;;  %v9167_v35 = vmov 0 }
 0x148   :  { %1431 = vadd.xlane.f32.xlu1 %v1429_v27  ;;  %v1451_v27 = vand.u32 65535, %v1202_v36  ;;  %v9168_v35 = vsel %vm5858_vm13, 4294967295, %v9167_v35  ;;  %v1454_v36 = vcvt.s32.f32 %v1452_v23  ;;  %v1206_v23 = vsel %vm1078_vm11, 1, %v9127_v0  ;;  %vm1080_vm11 = vmor %vm680_vm10, %vm952_vm12 }
 0x149   :  { %vm682_vm10 = vcmp.gt.f32.partialorder %v5849_v5, %v5480_v43  ;;  %vm954_vm12 = vmand %vm810_vm1, %vm5666_vm14  ;;  %vm812_vm1 = vcmp.eq.f32.partialorder %v5849_v5, %v5485_v46 }
 0x14b   :  { %1433 = vadd.xlane.f32.xlu0 %v1430_v26  ;;  %v5864_v26 = vpop.permute.xlu0 %422 }
 0x14c   :  { %1443 = vadd.xlane.f32.xlu1 %v1441_v15  ;;  %v1453_v15 = vcvt.s32.f32 %v1451_v27  ;;  %v5873_v27 = vpop.permute.xlu1 %426 }
 0x14f   :  { %1445 = vadd.xlane.f32.xlu0 %v1442_v19  ;;  %v1205_v19 = vsel %vm1077_vm6, 1, %v9127_v0  ;;  %vm1079_vm6 = vmor %vm679_vm2, %vm951_vm15  ;;  %vm681_vm2 = vcmp.gt.f32.partialorder %v5849_v5, %v5482_v44 }
 0x150   :  { %1455 = vadd.xlane.f32.xlu1 %v1453_v15  ;;  %v5876_v15 = vpop.permute.xlu0 %430  ;;  %v1487_v37 = vand.u32 65535, %v1205_v19  ;;  %v5889_v42 = vpop.permute.xlu1 %434  ;;  %v1488_v40 = vshrl.u32 %v1205_v19, 16  ;;  %vm953_vm15 = vmand %vm809_vm7, %vm5651_vm9  ;;  %v1500_v19 = vshrl.u32 %v1206_v23, 16  ;;  %vm811_vm7 = vcmp.eq.f32.partialorder %v5849_v5, %v5487_v47 }
 0x152   :  { %v1489_v38 = vcvt.s32.f32 %v1487_v37  ;;  %v1490_v41 = vcvt.s32.f32 %v1488_v40  ;;  %v1502_v44 = vcvt.s32.f32 %v1500_v19 }
 0x153   :  { %1457 = vadd.xlane.f32.xlu0 %v1454_v36  ;;  %v1478_v36 = vcvt.s32.f32 %v1476_v39 }
 0x154   :  { %1467 = vadd.xlane.f32.xlu1 %v1465_v29  ;;  %v5893_v1 = vpop.permute.xlu0 %438  ;;  %v1499_v29 = vand.u32 65535, %v1206_v23  ;;  %v5902_v37 = vpop.permute.xlu1 %442 }
 0x156   :  { %v1501_v39 = vcvt.s32.f32 %v1499_v29 }
 0x157   :  { %1469 = vadd.xlane.f32.xlu0 %v1466_v17  ;;  %v1207_v17 = vsel %vm1079_vm6, 1, %v9127_v0  ;;  %vm1081_vm6 = vmor %vm681_vm2, %vm953_vm15  ;;  %vm683_vm2 = vcmp.gt.f32.partialorder %v5849_v5, %v5487_v47 }
 0x158   :  { %1479 = vadd.xlane.f32.xlu1 %v1477_v30  ;;  %v1511_v30 = vand.u32 65535, %v1207_v17  ;;  %v1512_v23 = vshrl.u32 %v1207_v17, 16  ;;  %vm955_vm15 = vmand %vm811_vm7, %vm5682_vm5  ;;  %v5918_v43 = vpop.permute.xlu1 %450  ;;  %vm813_vm7 = vcmp.eq.f32.partialorder %v5849_v5, %v5494_v50 }
 0x15a   :  { %v1513_v40 = vcvt.s32.f32 %v1511_v30  ;;  %v1514_v19 = vcvt.s32.f32 %v1512_v23 }
 0x15b   :  { %1481 = vadd.xlane.f32.xlu0 %v1478_v36  ;;  %v1208_v36 = vsel %vm1080_vm11, 1, %v9127_v0  ;;  %vm1082_vm11 = vmor %vm682_vm10, %vm954_vm12  ;;  %vm684_vm10 = vcmp.gt.f32.partialorder %v5849_v5, %v5485_v46 }
 0x15c   :  { %1491 = vadd.xlane.f32.xlu1 %v1489_v38  ;;  %v5905_v38 = vpop.permute.xlu0 %446  ;;  %v1523_v29 = vand.u32 65535, %v1208_v36  ;;  %v1524_v17 = vshrl.u32 %v1208_v36, 16  ;;  %vm956_vm12 = vmand %vm812_vm1, %vm5694_vm8  ;;  %vm814_vm8 = vcmp.eq.f32.partialorder %v5849_v5, %v5492_v49 }
 0x15e   :  { %v1525_v30 = vcvt.s32.f32 %v1523_v29  ;;  %v1526_v47 = vcvt.s32.f32 %v1524_v17  ;;  %v5931_v29 = vpop.permute.xlu1 %458 }
 0x15f   :  { %1493 = vadd.xlane.f32.xlu0 %v1490_v41  ;;  %v1209_v41 = vsel %vm1081_vm6, 1, %v9127_v0  ;;  %vm1083_vm6 = vmor %vm683_vm2, %vm955_vm15  ;;  %vm685_vm2 = vcmp.gt.f32.partialorder %v5849_v5, %v5494_v50  ;;  %vm9170_vm15 = vnez %v9140_v48 }
 0x160   :  { %1503 = vadd.xlane.f32.xlu1 %v1501_v39  ;;  %v5922_v39 = vpop.permute.xlu0 %454  ;;  %v1536_v36 = vshrl.u32 %v1209_v41, 16  ;;  %vm957_vm1 = vmand %vm813_vm7, %vm9170_vm15  ;;  %vm815_vm7 = vcmp.eq.f32.partialorder %v5849_v5, %v5498_v52 }
 0x161   :  { %9169 = vst [vmem:[#allocation56_spill] sm:$0xff] %v5922_v39 }
 0x162   :  { %v1538_v46 = vcvt.s32.f32 %v1536_v36  ;;  %v5947_v50 = vpop.permute.xlu1 %466 }
 0x163   :  { %1505 = vadd.xlane.f32.xlu0 %v1502_v44  ;;  %v1535_v44 = vand.u32 65535, %v1209_v41 }
 0x164   :  { %1515 = vadd.xlane.f32.xlu1 %v1513_v40  ;;  %v1210_v40 = vsel %vm1082_vm11, 1, %v9127_v0  ;;  %vm1084_vm11 = vmor %vm684_vm10, %vm956_vm12  ;;  %vm686_vm10 = vcmp.gt.f32.partialorder %v5849_v5, %v5492_v49  ;;  %vm9171_vm12 = vnez %v9143_v25 }
 0x165   :  { %v1537_v23 = vcvt.s32.f32 %v1535_v44  ;;  %v1547_v39 = vand.u32 65535, %v1210_v40  ;;  %v1548_v41 = vshrl.u32 %v1210_v40, 16  ;;  %vm958_vm5 = vmand %vm814_vm8, %vm9171_vm12  ;;  %vm9173_vm8 = vnez %v9147_v9 }
 0x166   :  { %vm816_vm12 = vcmp.eq.f32.partialorder %v5849_v5, %v5496_v51 }
 0x167   :  { %1517 = vadd.xlane.f32.xlu0 %v1514_v19  ;;  %v1211_v19 = vsel %vm1083_vm6, 1, %v9127_v0  ;;  %v1549_v17 = vcvt.s32.f32 %v1547_v39  ;;  %vm1085_vm6 = vmor %vm685_vm2, %vm957_vm1  ;;  %v1550_v36 = vcvt.s32.f32 %v1548_v41  ;;  %vm687_vm2 = vcmp.gt.f32.partialorder %v5849_v5, %v5498_v52 }
 0x168   :  { %1527 = vadd.xlane.f32.xlu1 %v1525_v30  ;;  %v5934_v30 = vpop.permute.xlu0 %462  ;;  %v1559_v44 = vand.u32 65535, %v1211_v19  ;;  %v1560_v40 = vshrl.u32 %v1211_v19, 16  ;;  %vm959_vm1 = vmand %vm815_vm7, %vm9173_vm8  ;;  %vm817_vm8 = vcmp.eq.f32.partialorder %v5849_v5, %v5502_v54 }
 0x16a   :  { %v1562_v49 = vcvt.s32.f32 %v1560_v40 }
 0x16b   :  { %1529 = vadd.xlane.f32.xlu0 %v1526_v47  ;;  %v1212_v47 = vsel %vm1084_vm11, 1, %v9127_v0  ;;  %vm1086_vm11 = vmor %vm686_vm10, %vm958_vm5  ;;  %vm9174_vm10 = vnez %v9150_v28 }
 0x16c   :  { %1539 = vadd.xlane.f32.xlu1 %v1537_v23  ;;  %v5951_v39 = vpop.permute.xlu0 %470  ;;  %v1561_v23 = vcvt.s32.f32 %v1559_v44  ;;  %v1572_v19 = vshrl.u32 %v1212_v47, 16  ;;  %v5960_v44 = vpop.permute.xlu1 %474  ;;  %vm1087_vm5 = vmor %vm687_vm2, %vm959_vm1  ;;  %vm689_vm2 = vcmp.gt.f32.partialorder %v5849_v5, %v5502_v54  ;;  %vm9175_vm1 = vnez %v9153_v20 }
 0x16d   :  { %9172 = vst [vmem:[#allocation57_spill] sm:$0xff] %v5951_v39  ;;  %vm960_vm7 = vmand %vm816_vm12, %vm9174_vm10  ;;  %vm818_vm12 = vcmp.eq.f32.partialorder %v5849_v5, %v5500_v53 }
 0x16e   :  { %v1574_v52 = vcvt.s32.f32 %v1572_v19  ;;  %vm961_vm15 = vmand %vm817_vm8, %vm9175_vm1  ;;  %vm9177_vm8 = vnez %v9157_v63  ;;  %vm819_vm1 = vcmp.eq.f32.partialorder %v5849_v5, %v5506_v56 }
 0x16f   :  { %1541 = vadd.xlane.f32.xlu0 %v1538_v46  ;;  %v1571_v46 = vand.u32 65535, %v1212_v47 }
 0x170   :  { %1551 = vadd.xlane.f32.xlu1 %v1549_v17  ;;  %v1213_v17 = vsel %vm1085_vm6, 1, %v9127_v0  ;;  %vm688_vm6 = vcmp.gt.f32.partialorder %v5849_v5, %v5496_v51  ;;  %v5976_v51 = vpop.permute.xlu1 %482 }
 0x171   :  { %v1573_v41 = vcvt.s32.f32 %v1571_v46  ;;  %v1583_v39 = vand.u32 65535, %v1213_v17  ;;  %v1584_v47 = vshrl.u32 %v1213_v17, 16 }
 0x173   :  { %1553 = vadd.xlane.f32.xlu0 %v1550_v36  ;;  %v1214_v36 = vsel %vm1086_vm11, 1, %v9127_v0  ;;  %v1585_v40 = vcvt.s32.f32 %v1583_v39  ;;  %vm1088_vm11 = vmor %vm688_vm6, %vm960_vm7  ;;  %v1586_v19 = vcvt.s32.f32 %v1584_v47  ;;  %vm690_vm6 = vcmp.gt.f32.partialorder %v5849_v5, %v5500_v53 }
 0x174   :  { %1563 = vadd.xlane.f32.xlu1 %v1561_v23  ;;  %v5963_v23 = vpop.permute.xlu0 %478  ;;  %v1595_v46 = vand.u32 65535, %v1214_v36  ;;  %v1596_v17 = vshrl.u32 %v1214_v36, 16  ;;  %vm962_vm7 = vmand %vm818_vm12, %vm9177_vm8  ;;  %vm820_vm12 = vcmp.eq.f32.partialorder %v5849_v5, %v5504_v55 }
 0x176   :  { %v1598_v54 = vcvt.s32.f32 %v1596_v17 }
 0x177   :  { %1565 = vadd.xlane.f32.xlu0 %v1562_v49  ;;  %v1215_v49 = vsel %vm1087_vm5, 1, %v9127_v0  ;;  %vm1089_vm5 = vmor %vm689_vm2, %vm961_vm15 }
 0x178   :  { %1575 = vadd.xlane.f32.xlu1 %v1573_v41  ;;  %v5980_v39 = vpop.permute.xlu0 %489  ;;  %v1597_v41 = vcvt.s32.f32 %v1595_v46  ;;  %v1608_v36 = vshrl.u32 %v1215_v49, 16  ;;  %v5989_v46 = vpop.permute.xlu1 %493  ;;  %vm1090_vm15 = vmor %vm690_vm6, %vm962_vm7  ;;  %vm692_vm6 = vcmp.gt.f32.partialorder %v5849_v5, %v5504_v55  ;;  %vm9178_vm7 = vnez %v9163_v33 }
 0x179   :  { %9176 = vst [vmem:[#allocation58_spill] sm:$0xff] %v5980_v39  ;;  %vm963_vm2 = vmand %vm819_vm1, %vm5808_vm3  ;;  %vm821_vm1 = vcmp.eq.f32.partialorder %v5849_v5, %v5510_v58 }
 0x17a   :  { %v1610_v53 = vcvt.s32.f32 %v1608_v36  ;;  %vm964_vm8 = vmand %vm820_vm12, %vm9178_vm7  ;;  %vm822_vm7 = vcmp.eq.f32.partialorder %v5849_v5, %v5508_v57 }
 0x17b   :  { %1577 = vadd.xlane.f32.xlu0 %v1574_v52  ;;  %v1607_v52 = vand.u32 65535, %v1215_v49 }
 0x17c   :  { %1587 = vadd.xlane.f32.xlu1 %v1585_v40  ;;  %v1216_v40 = vsel %vm1088_vm11, 1, %v9127_v0  ;;  %vm691_vm11 = vcmp.gt.f32.partialorder %v5849_v5, %v5506_v56  ;;  %v6005_v56 = vpop.permute.xlu1 %501 }
 0x17d   :  { %v1609_v47 = vcvt.s32.f32 %v1607_v52  ;;  %v1619_v39 = vand.u32 65535, %v1216_v40  ;;  %v1620_v49 = vshrl.u32 %v1216_v40, 16 }
 0x17f   :  { %1589 = vadd.xlane.f32.xlu0 %v1586_v19  ;;  %v1217_v19 = vsel %vm1089_vm5, 1, %v9127_v0  ;;  %v1621_v17 = vcvt.s32.f32 %v1619_v39  ;;  %vm1091_vm5 = vmor %vm691_vm11, %vm963_vm2  ;;  %v1622_v36 = vcvt.s32.f32 %v1620_v49  ;;  %vm693_vm11 = vcmp.gt.f32.partialorder %v5849_v5, %v5510_v58 }
 0x180   :  { %1599 = vadd.xlane.f32.xlu1 %v1597_v41  ;;  %v5992_v41 = vpop.permute.xlu0 %497  ;;  %v1631_v52 = vand.u32 65535, %v1217_v19  ;;  %v1632_v40 = vshrl.u32 %v1217_v19, 16  ;;  %v1219_v55 = vsel %vm1091_vm5, 1, %v9127_v0  ;;  %vm9180_vm2 = vnez %v9166_v32 }
 0x181   :  { %vm965_vm12 = vmand %vm821_vm1, %vm9180_vm2  ;;  %vm694_vm5 = vcmp.gt.f32.partialorder %v5849_v5, %v5508_v57 }
 0x182   :  { %v1634_v19 = vcvt.s32.f32 %v1632_v40  ;;  %v1656_v40 = vshrl.u32 %v1219_v55, 16 }
 0x183   :  { %1601 = vadd.xlane.f32.xlu0 %v1598_v54  ;;  %v1218_v54 = vsel %vm1090_vm15, 1, %v9127_v0  ;;  %vm1092_vm15 = vmor %vm692_vm6, %vm964_vm8 }
 0x184   :  { %1611 = vadd.xlane.f32.xlu1 %v1609_v47  ;;  %v615_v47 = vcombine.high %v5602_v45, %v5602_v45  ;;  %v6011_v39 = vpop.permute.xlu0 %505  ;;  %v1644_v45 = vshrl.u32 %v1218_v54, 16  ;;  %vm1093_vm8 = vmor %vm693_vm11, %vm965_vm12  ;;  %v1658_v57 = vcvt.s32.f32 %v1656_v40 }
 0x185   :  { %9179 = vst [vmem:[#allocation59_spill] sm:$0xff] %v6011_v39  ;;  %v6023_v39 = vpop.permute.xlu1 %509  ;;  %vm966_vm6 = vmand %vm822_vm7, %vm5858_vm13 }
 0x186   :  { %v6019_v49 = vrot.slane %v615_v47, %v5409_v8 }
 0x187   :  { %1613 = vadd.xlane.f32.xlu0 %v1610_v53  ;;  %v1633_v53 = vcvt.s32.f32 %v1631_v52 }
 0x188   :  { %1623 = vadd.xlane.f32.xlu1 %v1621_v17  ;;  %v1643_v17 = vand.u32 65535, %v1218_v54  ;;  %v6026_v58 = vpop.permute.xlu0 %513  ;;  %v1646_v54 = vcvt.s32.f32 %v1644_v45  ;;  %vm823_vm1 = vcmp.eq.f32.partialorder %v6019_v49, %v5514_v60  ;;  %vm695_vm11 = vcmp.gt.f32.partialorder %v6019_v49, %v5514_v60 }
 0x189   :  { %9181 = vst [vmem:[#allocation60_spill] sm:$0xff] %v6026_v58  ;;  %vm967_vm12 = vmand %vm823_vm1, %vm5619_vm0  ;;  %v6039_v5 = vpop.permute.xlu1 %517  ;;  %vm824_vm7 = vcmp.eq.f32.partialorder %v6019_v49, %v5512_v59  ;;  %vm825_vm1 = vcmp.eq.f32.partialorder %v6019_v49, %v5518_v62 }
 0x18a   :  { %v1645_v52 = vcvt.s32.f32 %v1643_v17  ;;  %9182 = vst [vmem:[#allocation61_spill] sm:$0xff] %v6039_v5 }
 0x18b   :  { %1625 = vadd.xlane.f32.xlu0 %v1622_v36  ;;  %v1655_v36 = vand.u32 65535, %v1219_v55 }
 0x18c   :  { %1635 = vadd.xlane.f32.xlu1 %v1633_v53  ;;  %v1220_v53 = vsel %vm1092_vm15, 1, %v9127_v0  ;;  %vm1094_vm15 = vmor %vm694_vm5, %vm966_vm6  ;;  %v6043_v45 = vpop.permute.xlu0 %521  ;;  %vm696_vm5 = vcmp.gt.f32.partialorder %v6019_v49, %v5512_v59 }
 0x18d   :  { %v1657_v47 = vcvt.s32.f32 %v1655_v36  ;;  %v1667_v17 = vand.u32 65535, %v1220_v53  ;;  %v1668_v55 = vshrl.u32 %v1220_v53, 16  ;;  %9183 = vst [vmem:[#allocation62_spill] sm:$0xff] %v6043_v45  ;;  %vm968_vm6 = vmand %vm824_vm7, %vm5635_vm4  ;;  %vm826_vm7 = vcmp.eq.f32.partialorder %v6019_v49, %v5516_v61 }
 0x18f   :  { %1637 = vadd.xlane.f32.xlu0 %v1634_v19  ;;  %v1221_v19 = vsel %vm1093_vm8, 1, %v9127_v0  ;;  %vm1095_vm8 = vmor %vm695_vm11, %vm967_vm12  ;;  %v1670_v60 = vcvt.s32.f32 %v1668_v55  ;;  %vm697_vm11 = vcmp.gt.f32.partialorder %v6019_v49, %v5518_v62 }
 0x190   :  { %1647 = vadd.xlane.f32.xlu1 %v1645_v52  ;;  %v1669_v52 = vcvt.s32.f32 %v1667_v17  ;;  %v1679_v36 = vand.u32 65535, %v1221_v19  ;;  %v1680_v53 = vshrl.u32 %v1221_v19, 16  ;;  %v6052_v17 = vpop.permute.xlu1 %525  ;;  %vm969_vm12 = vmand %vm825_vm1, %vm5651_vm9  ;;  %vm827_vm1 = vcmp.eq.f32.partialorder %v6019_v49, %v5523_v3 }
 0x191   :  { %9184 = vst [vmem:[#allocation63_spill] sm:$0xff] %v6052_v17 }
 0x192   :  { %v1681_v40 = vcvt.s32.f32 %v1679_v36  ;;  %v1682_v59 = vcvt.s32.f32 %v1680_v53 }
 0x193   :  { %1649 = vadd.xlane.f32.xlu0 %v1646_v54  ;;  %v1222_v54 = vsel %vm1094_vm15, 1, %v9127_v0  ;;  %vm1096_vm15 = vmor %vm696_vm5, %vm968_vm6  ;;  %vm698_vm5 = vcmp.gt.f32.partialorder %v6019_v49, %v5516_v61 }
 0x194   :  { %1659 = vadd.xlane.f32.xlu1 %v1657_v47  ;;  %v1691_v47 = vand.u32 65535, %v1222_v54  ;;  %v1692_v19 = vshrl.u32 %v1222_v54, 16  ;;  %vm970_vm6 = vmand %vm826_vm7, %vm5666_vm14  ;;  %v6068_v62 = vpop.permute.xlu1 %533  ;;  %vm828_vm14 = vcmp.eq.f32.partialorder %v6019_v49, %v5521_v2 }
 0x195   :  { %9186 = vst [vmem:[#allocation65_spill] sm:$0xff] %v6068_v62 }
 0x196   :  { %v1693_v55 = vcvt.s32.f32 %v1691_v47  ;;  %v1694_v53 = vcvt.s32.f32 %v1692_v19 }
 0x197   :  { %1661 = vadd.xlane.f32.xlu0 %v1658_v57  ;;  %v1223_v57 = vsel %vm1095_vm8, 1, %v9127_v0  ;;  %vm1097_vm8 = vmor %vm697_vm11, %vm969_vm12  ;;  %vm699_vm11 = vcmp.gt.f32.partialorder %v6019_v49, %v5523_v3  ;;  %vm9188_vm12 = vnez %v9133_v22 }
 0x198   :  { %1671 = vadd.xlane.f32.xlu1 %v1669_v52  ;;  %v6055_v52 = vpop.permute.xlu0 %529  ;;  %v1703_v36 = vand.u32 65535, %v1223_v57  ;;  %v1704_v54 = vshrl.u32 %v1223_v57, 16  ;;  %vm971_vm7 = vmand %vm827_vm1, %vm9188_vm12  ;;  %vm829_vm12 = vcmp.eq.f32.partialorder %v6019_v49, %v5530_v10 }
 0x199   :  { %9185 = vst [vmem:[#allocation64_spill] sm:$0xff] %v6055_v52 }
 0x19a   :  { %v1705_v47 = vcvt.s32.f32 %v1703_v36  ;;  %v1706_v61 = vcvt.s32.f32 %v1704_v54  ;;  %v6081_v36 = vpop.permute.xlu1 %541 }
 0x19b   :  { %1673 = vadd.xlane.f32.xlu0 %v1670_v60  ;;  %v1224_v60 = vsel %vm1096_vm15, 1, %v9127_v0  ;;  %vm1098_vm15 = vmor %vm698_vm5, %vm970_vm6  ;;  %9189 = vst [vmem:[#allocation67_spill] sm:$0xff] %v6081_v36  ;;  %vm700_vm5 = vcmp.gt.f32.partialorder %v6019_v49, %v5521_v2  ;;  %vm9191_vm6 = vnez %v9137_v4 }
 0x19c   :  { %1683 = vadd.xlane.f32.xlu1 %v1681_v40  ;;  %v6072_v40 = vpop.permute.xlu0 %537  ;;  %v1716_v57 = vshrl.u32 %v1224_v60, 16  ;;  %vm972_vm1 = vmand %vm828_vm14, %vm9191_vm6  ;;  %vm830_vm14 = vcmp.eq.f32.partialorder %v6019_v49, %v5528_v7 }
 0x19d   :  { %9187 = vst [vmem:[#allocation66_spill] sm:$0xff] %v6072_v40 }
 0x19e   :  { %v1718_v3 = vcvt.s32.f32 %v1716_v57  ;;  %v6097_v2 = vpop.permute.xlu1 %549 }
 0x19f   :  { %1685 = vadd.xlane.f32.xlu0 %v1682_v59  ;;  %v1715_v59 = vand.u32 65535, %v1224_v60  ;;  %9193 = vst [vmem:[#allocation69_spill] sm:$0xff] %v6097_v2 }
 0x1a0   :  { %1695 = vadd.xlane.f32.xlu1 %v1693_v55  ;;  %v1225_v55 = vsel %vm1097_vm8, 1, %v9127_v0  ;;  %vm1099_vm8 = vmor %vm699_vm11, %vm971_vm7  ;;  %vm701_vm11 = vcmp.gt.f32.partialorder %v6019_v49, %v5530_v10  ;;  %vm9192_vm7 = vnez %v9140_v48 }
 0x1a1   :  { %v1717_v19 = vcvt.s32.f32 %v1715_v59  ;;  %v1727_v40 = vand.u32 65535, %v1225_v55  ;;  %v1728_v60 = vshrl.u32 %v1225_v55, 16  ;;  %vm973_vm9 = vmand %vm829_vm12, %vm9192_vm7  ;;  %vm9194_vm12 = vnez %v9143_v25 }
 0x1a2   :  { %vm831_vm7 = vcmp.eq.f32.partialorder %v6019_v49, %v5534_v14 }
 0x1a3   :  { %1697 = vadd.xlane.f32.xlu0 %v1694_v53  ;;  %v1226_v53 = vsel %vm1098_vm15, 1, %v9127_v0  ;;  %v1729_v54 = vcvt.s32.f32 %v1727_v40  ;;  %vm1100_vm15 = vmor %vm700_vm5, %vm972_vm1  ;;  %v1730_v55 = vcvt.s32.f32 %v1728_v60  ;;  %vm702_vm5 = vcmp.gt.f32.partialorder %v6019_v49, %v5528_v7 }
 0x1a4   :  { %1707 = vadd.xlane.f32.xlu1 %v1705_v47  ;;  %v6084_v47 = vpop.permute.xlu0 %545  ;;  %v1739_v59 = vand.u32 65535, %v1226_v53  ;;  %v1740_v57 = vshrl.u32 %v1226_v53, 16  ;;  %vm974_vm1 = vmand %vm830_vm14, %vm9194_vm12 }
 0x1a5   :  { %9190 = vst [vmem:[#allocation68_spill] sm:$0xff] %v6084_v47 }
 0x1a6   :  { %v1741_v40 = vcvt.s32.f32 %v1739_v59  ;;  %v1742_v60 = vcvt.s32.f32 %v1740_v57 }
 0x1a7   :  { %1709 = vadd.xlane.f32.xlu0 %v1706_v61  ;;  %v1227_v61 = vsel %vm1099_vm8, 1, %v9127_v0  ;;  %vm1101_vm8 = vmor %vm701_vm11, %vm973_vm9  ;;  %vm9197_vm11 = vnez %v9147_v9 }
 0x1a8   :  { %1719 = vadd.xlane.f32.xlu1 %v1717_v19  ;;  %v1751_v19 = vand.u32 65535, %v1227_v61  ;;  %v1752_v53 = vshrl.u32 %v1227_v61, 16  ;;  %v1229_v36 = vsel %vm1101_vm8, 1, %v9127_v0  ;;  %vm6109_vm9 = vmor %vm702_vm5, %vm974_vm1  ;;  %vm832_vm8 = vcmp.eq.f32.partialorder %v6019_v49, %v5532_v12 }
 0x1a9   :  { %vm975_vm14 = vmand %vm831_vm7, %vm9197_vm11  ;;  %v1775_v17 = vand.u32 65535, %v1229_v36  ;;  %vm704_vm7 = vcmp.gt.f32.partialorder %v6019_v49, %v5532_v12 }
 0x1aa   :  { %v1753_v2 = vcvt.s32.f32 %v1751_v19  ;;  %v1754_v19 = vcvt.s32.f32 %v1752_v53  ;;  %vm976_vm1 = vmand %vm832_vm8, %vm9174_vm10  ;;  %v1776_v53 = vshrl.u32 %v1229_v36, 16  ;;  %vm9202_vm8 = vnez %v9153_v20 }
 0x1ab   :  { %1721 = vadd.xlane.f32.xlu0 %v1718_v3  ;;  %v1228_v3 = vsel %vm1100_vm15, 1, %v9127_v0  ;;  %vm703_vm15 = vcmp.gt.f32.partialorder %v6019_v49, %v5534_v14 }
 0x1ac   :  { %1731 = vadd.xlane.f32.xlu1 %v1729_v54  ;;  %v1324_v47 = vpop.xlane.xlu0 %1323  ;;  %vm1103_vm5 = vmor %vm703_vm15, %vm975_vm14  ;;  %vm705_vm14 = vcmp.gt.f32.partialorder %v6019_v49, %v5538_v16 }
 0x1ad   :  { %v1327_v7 = vcvt.f32.s32 %v1324_v47  ;;  %v1231_v14 = vsel %vm1103_vm5, 1, %v9127_v0  ;;  %vm6139_vm15 = vmor %vm704_vm7, %vm976_vm1 }
 0x1af   :  { %1733 = vadd.xlane.f32.xlu0 %v1730_v55  ;;  %v1763_v55 = vand.u32 65535, %v1228_v3 }
 0x1b0   :  { %1743 = vadd.xlane.f32.xlu1 %v1741_v40  ;;  %v1336_v54 = vpop.xlane.xlu0 %1335  ;;  %v1777_v40 = vcvt.s32.f32 %v1775_v17 }
 0x1b1   :  { %v1326_v10 = vpop.xlane.xlu1 %1325  ;;  %v1339_v47 = vcvt.f32.s32 %v1336_v54 }
 0x1b2   :  { %v1328_v59 = vcvt.f32.s32 %v1326_v10  ;;  %v1764_v10 = vshrl.u32 %v1228_v3, 16 }
 0x1b3   :  { %1745 = vadd.xlane.f32.xlu0 %v1742_v60  ;;  %v1765_v60 = vcvt.s32.f32 %v1763_v55 }
 0x1b4   :  { %v1329_v62 = vshll.u32 %v1328_v59, 16  ;;  %1755 = vadd.xlane.f32.xlu1 %v1753_v2  ;;  %v1338_v52 = vpop.xlane.xlu0 %1337  ;;  %v1230_v59 = vsel %vm6109_vm9, 1, %v9127_v0  ;;  %v1766_v54 = vcvt.s32.f32 %v1764_v10  ;;  %vm833_vm9 = vcmp.eq.f32.partialorder %v6019_v49, %v5538_v16 }
 0x1b5   :  { %v1340_v61 = vcvt.f32.s32 %v1338_v52  ;;  %v1348_v57 = vpop.xlane.xlu1 %1347  ;;  %v1788_v10 = vshrl.u32 %v1230_v59, 16  ;;  %vm977_vm10 = vmand %vm833_vm9, %vm9202_vm8  ;;  %v1232_v16 = vsel %vm6139_vm15, 1, %v9127_v0  ;;  %vm9205_vm9 = vnez %v9157_v63 }
 0x1b6   :  { %v6119_v45 = vadd.s32 %v1329_v62, %v1327_v7  ;;  %v1787_v7 = vand.u32 65535, %v1230_v59  ;;  %vm1105_vm1 = vmor %vm705_vm14, %vm977_vm10 }
 0x1b7   :  { %v1341_v2 = vshll.u32 %v1340_v61, 16  ;;  %1757 = vadd.xlane.f32.xlu0 %v1754_v19  ;;  %v1351_v61 = vcvt.f32.s32 %v1348_v57 }
 0x1b8   :  { %9198 = vst [vmem:[#allocation70_spill] sm:$0xff] %v6119_v45  ;;  %1767 = vadd.xlane.f32.xlu1 %v1765_v60  ;;  %v1350_v52 = vpop.xlane.xlu0 %1349  ;;  %v1789_v12 = vcvt.s32.f32 %v1787_v7  ;;  %v1790_v7 = vcvt.s32.f32 %v1788_v10  ;;  %v1812_v10 = vshrl.u32 %v1232_v16, 16 }
 0x1b9   :  { %v1352_v62 = vcvt.f32.s32 %v1350_v52  ;;  %v1360_v3 = vpop.xlane.xlu1 %1359  ;;  %v6131_v55 = vadd.s32 %v1341_v2, %v1339_v47  ;;  %v1778_v47 = vcvt.s32.f32 %v1776_v53  ;;  %v9204_v52 = vld [vmem:[#allocation4_spill] sm:$0xff] }
 0x1ba   :  { %vm834_vm7 = vcmp.eq.f32.partialorder %v6019_v49, %v9204_v52  ;;  %vm706_vm5 = vcmp.gt.f32.partialorder %v6019_v49, %v9204_v52 }
 0x1bb   :  { %9199 = vst [vmem:[#allocation71_spill] sm:$0xff] %v6131_v55  ;;  %v1353_v19 = vshll.u32 %v1352_v62, 16  ;;  %1769 = vadd.xlane.f32.xlu0 %v1766_v54  ;;  %v1799_v62 = vand.u32 65535, %v1231_v14  ;;  %v1363_v54 = vcvt.f32.s32 %v1360_v3  ;;  %vm978_vm8 = vmand %vm834_vm7, %vm9205_vm9 }
 0x1bc   :  { %1779 = vadd.xlane.f32.xlu1 %v1777_v40  ;;  %v1362_v36 = vpop.xlane.xlu0 %1361  ;;  %vm6166_vm10 = vmor %vm706_vm5, %vm978_vm8  ;;  %vm9214_vm5 = vnez %v9163_v33 }
 0x1bd   :  { %v1364_v17 = vcvt.f32.s32 %v1362_v36  ;;  %v1372_v57 = vpop.xlane.xlu1 %1371  ;;  %v6147_v2 = vadd.s32 %v1353_v19, %v1351_v61  ;;  %v1800_v19 = vshrl.u32 %v1231_v14, 16  ;;  %v9207_v36 = vld [vmem:[#allocation6_spill] sm:$0xff]  ;;  %v1801_v60 = vcvt.s32.f32 %v1799_v62 }
 0x1be   :  { %vm835_vm11 = vcmp.eq.f32.partialorder %v6019_v49, %v9207_v36  ;;  %vm707_vm15 = vcmp.gt.f32.partialorder %v6019_v49, %v9207_v36  ;;  %v9220_v36 = vld [vmem:[#allocation7_spill] sm:$0xff] }
 0x1bf   :  { %9203 = vst [vmem:[#allocation72_spill] sm:$0xff] %v6147_v2  ;;  %v1365_v40 = vshll.u32 %v1364_v17, 16  ;;  %1781 = vadd.xlane.f32.xlu0 %v1778_v47  ;;  %v1811_v17 = vand.u32 65535, %v1232_v16  ;;  %v1375_v47 = vcvt.f32.s32 %v1372_v57  ;;  %vm979_vm14 = vmand %vm835_vm11, %vm5808_vm3  ;;  %v1234_v16 = vsel %vm6166_vm10, 1, %v9127_v0 }
 0x1c0   :  { %1791 = vadd.xlane.f32.xlu1 %v1789_v12  ;;  %v1374_v59 = vpop.xlane.xlu0 %1373  ;;  %v1233_v12 = vsel %vm1105_vm1, 1, %v9127_v0  ;;  %vm6183_vm7 = vmor %vm707_vm15, %vm979_vm14 }
 0x1c1   :  { %v1376_v53 = vcvt.f32.s32 %v1374_v59  ;;  %v1384_v61 = vpop.xlane.xlu1 %1383  ;;  %v6158_v3 = vadd.s32 %v1365_v40, %v1363_v54  ;;  %v1802_v54 = vcvt.s32.f32 %v1800_v19  ;;  %v1813_v52 = vcvt.s32.f32 %v1811_v17 }
 0x1c2   :  { %v1814_v17 = vcvt.s32.f32 %v1812_v10  ;;  %v617_v59 = vcombine.high %v5423_v13, %v5423_v13 }
 0x1c3   :  { %9206 = vst [vmem:[#allocation4_spill] sm:$0xff] %v6158_v3  ;;  %v1377_v2 = vshll.u32 %v1376_v53, 16  ;;  %1793 = vadd.xlane.f32.xlu0 %v1790_v7  ;;  %v9211_v53 = vld [vmem:[#allocation5_spill] sm:$0xff]  ;;  %v1823_v7 = vand.u32 65535, %v1233_v12  ;;  %v1387_v3 = vcvt.f32.s32 %v1384_v61 }
 0x1c4   :  { %1803 = vadd.xlane.f32.xlu1 %v1801_v60  ;;  %v1386_v14 = vpop.xlane.xlu0 %1385  ;;  %vm836_vm8 = vcmp.eq.f32.partialorder %v6019_v49, %v9211_v53  ;;  %vm708_vm11 = vcmp.gt.f32.partialorder %v6019_v49, %v9211_v53  ;;  %v6212_v53 = vrot.slane %v617_v59, %v5409_v8 }
 0x1c5   :  { %v1388_v57 = vcvt.f32.s32 %v1386_v14  ;;  %v1396_v62 = vpop.xlane.xlu1 %1395  ;;  %v6174_v40 = vadd.s32 %v1377_v2, %v1375_v47  ;;  %vm980_vm1 = vmand %vm836_vm8, %vm9214_vm5  ;;  %v1824_v47 = vshrl.u32 %v1233_v12, 16  ;;  %v1836_v12 = vshrl.u32 %v1234_v16, 16 }
 0x1c6   :  { %v1399_v55 = vcvt.f32.s32 %v1396_v62  ;;  %vm6201_vm15 = vmor %vm708_vm11, %vm980_vm1  ;;  %vm838_vm11 = vcmp.eq.f32.partialorder %v6019_v49, %v9220_v36 }
 0x1c7   :  { %9210 = vst [vmem:[#allocation6_spill] sm:$0xff] %v6174_v40  ;;  %v1389_v60 = vshll.u32 %v1388_v57, 16  ;;  %1805 = vadd.xlane.f32.xlu0 %v1802_v54  ;;  %v9216_v57 = vld [vmem:[#allocation8_spill] sm:$0xff]  ;;  %v1825_v54 = vcvt.s32.f32 %v1823_v7  ;;  %v1835_v40 = vand.u32 65535, %v1234_v16  ;;  %v1826_v7 = vcvt.s32.f32 %v1824_v47 }
 0x1c8   :  { %1815 = vadd.xlane.f32.xlu1 %v1813_v52  ;;  %v1398_v2 = vpop.xlane.xlu0 %1397  ;;  %vm837_vm10 = vcmp.eq.f32.partialorder %v6019_v49, %v9216_v57  ;;  %vm709_vm14 = vcmp.gt.f32.partialorder %v6019_v49, %v9216_v57  ;;  %v1838_v47 = vcvt.s32.f32 %v1836_v12 }
 0x1c9   :  { %v1400_v19 = vcvt.f32.s32 %v1398_v2  ;;  %v1408_v61 = vpop.xlane.xlu1 %1407  ;;  %v6189_v14 = vadd.s32 %v1389_v60, %v1387_v3  ;;  %v1235_v2 = vsel %vm6183_vm7, 1, %v9127_v0  ;;  %vm981_vm8 = vmand %vm837_vm10, %vm9180_vm2  ;;  %vm710_vm7 = vcmp.gt.f32.partialorder %v6019_v49, %v9220_v36  ;;  %v9222_v3 = vld [vmem:[#allocation10_spill] sm:$0xff] }
 0x1ca   :  { %v1411_v16 = vcvt.f32.s32 %v1408_v61  ;;  %vm1109_vm1 = vmor %vm709_vm14, %vm981_vm8  ;;  %v1848_v59 = vshrl.u32 %v1235_v2, 16  ;;  %vm711_vm8 = vcmp.gt.f32.partialorder %v6212_v53, %v9222_v3 }
 0x1cb   :  { %9215 = vst [vmem:[#allocation5_spill] sm:$0xff] %v6189_v14  ;;  %v1401_v52 = vshll.u32 %v1400_v19, 16  ;;  %1817 = vadd.xlane.f32.xlu0 %v1814_v17  ;;  %v1837_v19 = vcvt.s32.f32 %v1835_v40  ;;  %v1847_v17 = vand.u32 65535, %v1235_v2  ;;  %v1236_v14 = vsel %vm6201_vm15, 1, %v9127_v0  ;;  %vm982_vm10 = vmand %vm838_vm11, %vm5858_vm13 }
 0x1cc   :  { %1827 = vadd.xlane.f32.xlu1 %v1825_v54  ;;  %v1410_v13 = vpop.xlane.xlu0 %1409  ;;  %vm839_vm15 = vcmp.eq.f32.partialorder %v6212_v53, %v9222_v3  ;;  %v1237_v57 = vsel %vm1109_vm1, 1, %v9127_v0  ;;  %vm6234_vm14 = vmor %vm710_vm7, %vm982_vm10  ;;  %v1860_v12 = vshrl.u32 %v1236_v14, 16 }
 0x1cd   :  { %v1412_v10 = vcvt.f32.s32 %v1410_v13  ;;  %v1420_v62 = vpop.xlane.xlu1 %1419  ;;  %v6209_v60 = vadd.s32 %v1401_v52, %v1399_v55  ;;  %v1849_v13 = vcvt.s32.f32 %v1847_v17  ;;  %vm983_vm11 = vmand %vm839_vm15, %vm5619_vm0  ;;  %v1871_v36 = vand.u32 65535, %v1237_v57 }
 0x1ce   :  { %vm1111_vm10 = vmor %vm711_vm8, %vm983_vm11  ;;  %vm9231_vm11 = vnez %v9126_v11 }
 0x1cf   :  { %9219 = vst [vmem:[#allocation8_spill] sm:$0xff] %v6209_v60  ;;  %v1413_v54 = vshll.u32 %v1412_v10, 16  ;;  %1829 = vadd.xlane.f32.xlu0 %v1826_v7  ;;  %v1859_v10 = vand.u32 65535, %v1236_v14  ;;  %v1423_v7 = vcvt.f32.s32 %v1420_v62  ;;  %v1238_v14 = vsel %vm6234_vm14, 1, %v9127_v0 }
 0x1d0   :  { %1839 = vadd.xlane.f32.xlu1 %v1837_v19  ;;  %v1422_v55 = vpop.xlane.xlu0 %1421  ;;  %v1873_v19 = vcvt.s32.f32 %v1871_v36 }
 0x1d1   :  { %v1424_v40 = vcvt.f32.s32 %v1422_v55  ;;  %v1432_v61 = vpop.xlane.xlu1 %1431  ;;  %v6226_v52 = vadd.s32 %v1413_v54, %v1411_v16  ;;  %v1850_v16 = vcvt.s32.f32 %v1848_v59  ;;  %v9226_v55 = vld [vmem:[#allocation9_spill] sm:$0xff]  ;;  %v1861_v49 = vcvt.s32.f32 %v1859_v10 }
 0x1d2   :  { %vm840_vm7 = vcmp.eq.f32.partialorder %v6212_v53, %v9226_v55  ;;  %vm712_vm1 = vcmp.gt.f32.partialorder %v6212_v53, %v9226_v55  ;;  %v1872_v10 = vshrl.u32 %v1237_v57, 16 }
 0x1d3   :  { %9221 = vst [vmem:[#allocation7_spill] sm:$0xff] %v6226_v52  ;;  %v1425_v60 = vshll.u32 %v1424_v40, 16  ;;  %1841 = vadd.xlane.f32.xlu0 %v1838_v47  ;;  %v1435_v40 = vcvt.f32.s32 %v1432_v61  ;;  %vm984_vm15 = vmand %vm840_vm7, %vm5635_vm4 }
 0x1d4   :  { %1851 = vadd.xlane.f32.xlu1 %v1849_v13  ;;  %v1434_v2 = vpop.xlane.xlu0 %1433  ;;  %v1862_v13 = vcvt.s32.f32 %v1860_v12  ;;  %vm6261_vm14 = vmor %vm712_vm1, %vm984_vm15  ;;  %v1884_v12 = vshrl.u32 %v1238_v14, 16  ;;  %vm9234_vm15 = vnez %v9130_v24 }
 0x1d5   :  { %v1436_v62 = vcvt.f32.s32 %v1434_v2  ;;  %v1444_v17 = vpop.xlane.xlu1 %1443  ;;  %v6242_v54 = vadd.s32 %v1425_v60, %v1423_v7  ;;  %v9228_v7 = vld [vmem:[#allocation12_spill] sm:$0xff]  ;;  %v1883_v2 = vand.u32 65535, %v1238_v14  ;;  %v1240_v14 = vsel %vm6261_vm14, 1, %v9127_v0 }
 0x1d6   :  { %vm841_vm0 = vcmp.eq.f32.partialorder %v6212_v53, %v9228_v7  ;;  %vm713_vm8 = vcmp.gt.f32.partialorder %v6212_v53, %v9228_v7 }
 0x1d7   :  { %9225 = vst [vmem:[#allocation10_spill] sm:$0xff] %v6242_v54  ;;  %v1437_v47 = vshll.u32 %v1436_v62, 16  ;;  %1853 = vadd.xlane.f32.xlu0 %v1850_v16  ;;  %v1447_v62 = vcvt.f32.s32 %v1444_v17  ;;  %vm985_vm7 = vmand %vm841_vm0, %vm9231_vm11  ;;  %v1885_v55 = vcvt.s32.f32 %v1883_v2  ;;  %v1886_v2 = vcvt.s32.f32 %v1884_v12 }
 0x1d8   :  { %1863 = vadd.xlane.f32.xlu1 %v1861_v49  ;;  %v1446_v59 = vpop.xlane.xlu0 %1445  ;;  %v1239_v49 = vsel %vm1111_vm10, 1, %v9127_v0  ;;  %vm1113_vm10 = vmor %vm713_vm8, %vm985_vm7  ;;  %vm9239_vm7 = vnez %v9133_v22 }
 0x1d9   :  { %v1448_v60 = vcvt.f32.s32 %v1446_v59  ;;  %v1456_v3 = vpop.xlane.xlu1 %1455  ;;  %v6253_v61 = vadd.s32 %v1437_v47, %v1435_v40  ;;  %v1874_v40 = vcvt.s32.f32 %v1872_v10 }
 0x1db   :  { %9227 = vst [vmem:[#allocation9_spill] sm:$0xff] %v6253_v61  ;;  %v1449_v16 = vshll.u32 %v1448_v60, 16  ;;  %1865 = vadd.xlane.f32.xlu0 %v1862_v13  ;;  %v9233_v60 = vld [vmem:[#allocation11_spill] sm:$0xff]  ;;  %v1895_v13 = vand.u32 65535, %v1239_v49  ;;  %v1459_v61 = vcvt.f32.s32 %v1456_v3 }
 0x1dc   :  { %1875 = vadd.xlane.f32.xlu1 %v1873_v19  ;;  %v1458_v57 = vpop.xlane.xlu0 %1457  ;;  %vm842_vm1 = vcmp.eq.f32.partialorder %v6212_v53, %v9233_v60  ;;  %vm714_vm0 = vcmp.gt.f32.partialorder %v6212_v53, %v9233_v60 }
 0x1dd   :  { %v1460_v17 = vcvt.f32.s32 %v1458_v57  ;;  %v1468_v36 = vpop.xlane.xlu1 %1467  ;;  %v6269_v47 = vadd.s32 %v1449_v16, %v1447_v62  ;;  %vm986_vm11 = vmand %vm842_vm1, %vm9234_vm15  ;;  %v1896_v16 = vshrl.u32 %v1239_v49, 16  ;;  %v9236_v57 = vld [vmem:[#allocation14_spill] sm:$0xff]  ;;  %v1897_v59 = vcvt.s32.f32 %v1895_v13 }
 0x1de   :  { %vm843_vm4 = vcmp.eq.f32.partialorder %v6212_v53, %v9236_v57  ;;  %vm6288_vm14 = vmor %vm714_vm0, %vm986_vm11  ;;  %v1908_v49 = vshrl.u32 %v1240_v14, 16  ;;  %vm715_vm8 = vcmp.gt.f32.partialorder %v6212_v53, %v9236_v57 }
 0x1df   :  { %9232 = vst [vmem:[#allocation12_spill] sm:$0xff] %v6269_v47  ;;  %v1461_v19 = vshll.u32 %v1460_v17, 16  ;;  %1877 = vadd.xlane.f32.xlu0 %v1874_v40  ;;  %v1907_v17 = vand.u32 65535, %v1240_v14  ;;  %v1471_v40 = vcvt.f32.s32 %v1468_v36  ;;  %vm987_vm1 = vmand %vm843_vm4, %vm9239_vm7  ;;  %v1898_v13 = vcvt.s32.f32 %v1896_v16 }
 0x1e0   :  { %1887 = vadd.xlane.f32.xlu1 %v1885_v55  ;;  %v1470_v10 = vpop.xlane.xlu0 %1469  ;;  %v1241_v55 = vsel %vm1113_vm10, 1, %v9127_v0  ;;  %v1242_v14 = vsel %vm6288_vm14, 1, %v9127_v0  ;;  %vm1115_vm0 = vmor %vm715_vm8, %vm987_vm1  ;;  %vm9246_vm1 = vnez %v9140_v48 }
 0x1e1   :  { %v1472_v7 = vcvt.f32.s32 %v1470_v10  ;;  %v1480_v62 = vpop.xlane.xlu1 %1479  ;;  %v6280_v3 = vadd.s32 %v1461_v19, %v1459_v61  ;;  %v1909_v60 = vcvt.s32.f32 %v1907_v17  ;;  %v1910_v17 = vcvt.s32.f32 %v1908_v49 }
 0x1e3   :  { %9235 = vst [vmem:[#allocation11_spill] sm:$0xff] %v6280_v3  ;;  %v1473_v47 = vshll.u32 %v1472_v7, 16  ;;  %1889 = vadd.xlane.f32.xlu0 %v1886_v2  ;;  %v9241_v7 = vld [vmem:[#allocation13_spill] sm:$0xff]  ;;  %v1919_v2 = vand.u32 65535, %v1241_v55  ;;  %v1483_v3 = vcvt.f32.s32 %v1480_v62 }
 0x1e4   :  { %1899 = vadd.xlane.f32.xlu1 %v1897_v59  ;;  %v1482_v61 = vpop.xlane.xlu0 %1481  ;;  %vm844_vm11 = vcmp.eq.f32.partialorder %v6212_v53, %v9241_v7  ;;  %vm716_vm4 = vcmp.gt.f32.partialorder %v6212_v53, %v9241_v7 }
 0x1e5   :  { %v1484_v12 = vcvt.f32.s32 %v1482_v61  ;;  %v1492_v36 = vpop.xlane.xlu1 %1491  ;;  %v6296_v19 = vadd.s32 %v1473_v47, %v1471_v40  ;;  %vm988_vm10 = vmand %vm844_vm11, %vm9191_vm6  ;;  %v1920_v40 = vshrl.u32 %v1241_v55, 16  ;;  %v9243_v61 = vld [vmem:[#allocation16_spill] sm:$0xff]  ;;  %v1921_v10 = vcvt.s32.f32 %v1919_v2 }
 0x1e6   :  { %vm845_vm7 = vcmp.eq.f32.partialorder %v6212_v53, %v9243_v61  ;;  %vm6315_vm14 = vmor %vm716_vm4, %vm988_vm10  ;;  %v1932_v55 = vshrl.u32 %v1242_v14, 16  ;;  %vm717_vm8 = vcmp.gt.f32.partialorder %v6212_v53, %v9243_v61 }
 0x1e7   :  { %9240 = vst [vmem:[#allocation14_spill] sm:$0xff] %v6296_v19  ;;  %v1485_v59 = vshll.u32 %v1484_v12, 16  ;;  %1901 = vadd.xlane.f32.xlu0 %v1898_v13  ;;  %v1931_v12 = vand.u32 65535, %v1242_v14  ;;  %v1495_v13 = vcvt.f32.s32 %v1492_v36  ;;  %vm989_vm11 = vmand %vm845_vm7, %vm9246_vm1  ;;  %v1922_v2 = vcvt.s32.f32 %v1920_v40 }
 0x1e8   :  { %1911 = vadd.xlane.f32.xlu1 %v1909_v60  ;;  %v1494_v16 = vpop.xlane.xlu0 %1493  ;;  %v1243_v60 = vsel %vm1115_vm0, 1, %v9127_v0  ;;  %v1244_v14 = vsel %vm6315_vm14, 1, %v9127_v0  ;;  %vm1117_vm0 = vmor %vm717_vm8, %vm989_vm11  ;;  %vm9253_vm11 = vnez %v9147_v9 }
 0x1e9   :  { %v1496_v47 = vcvt.f32.s32 %v1494_v16  ;;  %v1504_v57 = vpop.xlane.xlu1 %1503  ;;  %v6307_v62 = vadd.s32 %v1485_v59, %v1483_v3  ;;  %v1933_v7 = vcvt.s32.f32 %v1931_v12  ;;  %v1934_v12 = vcvt.s32.f32 %v1932_v55 }
 0x1eb   :  { %9242 = vst [vmem:[#allocation13_spill] sm:$0xff] %v6307_v62  ;;  %v1497_v19 = vshll.u32 %v1496_v47, 16  ;;  %1913 = vadd.xlane.f32.xlu0 %v1910_v17  ;;  %v9248_v47 = vld [vmem:[#allocation15_spill] sm:$0xff]  ;;  %v1943_v17 = vand.u32 65535, %v1243_v60  ;;  %v1507_v62 = vcvt.f32.s32 %v1504_v57 }
 0x1ec   :  { %1923 = vadd.xlane.f32.xlu1 %v1921_v10  ;;  %v1506_v3 = vpop.xlane.xlu0 %1505  ;;  %vm846_vm4 = vcmp.eq.f32.partialorder %v6212_v53, %v9248_v47  ;;  %vm718_vm7 = vcmp.gt.f32.partialorder %v6212_v53, %v9248_v47 }
 0x1ed   :  { %v1508_v49 = vcvt.f32.s32 %v1506_v3  ;;  %v1516_v36 = vpop.xlane.xlu1 %1515  ;;  %v6323_v59 = vadd.s32 %v1497_v19, %v1495_v13  ;;  %vm990_vm10 = vmand %vm846_vm4, %vm9194_vm12  ;;  %v1944_v13 = vshrl.u32 %v1243_v60, 16  ;;  %v9250_v3 = vld [vmem:[#allocation18_spill] sm:$0xff]  ;;  %v1945_v16 = vcvt.s32.f32 %v1943_v17 }
 0x1ee   :  { %vm847_vm1 = vcmp.eq.f32.partialorder %v6212_v53, %v9250_v3  ;;  %vm6342_vm14 = vmor %vm718_vm7, %vm990_vm10  ;;  %v1956_v60 = vshrl.u32 %v1244_v14, 16  ;;  %vm719_vm8 = vcmp.gt.f32.partialorder %v6212_v53, %v9250_v3  ;;  %vm9256_vm10 = vnez %v9150_v28 }
 0x1ef   :  { %9247 = vst [vmem:[#allocation16_spill] sm:$0xff] %v6323_v59  ;;  %v1509_v10 = vshll.u32 %v1508_v49, 16  ;;  %1925 = vadd.xlane.f32.xlu0 %v1922_v2  ;;  %v1955_v49 = vand.u32 65535, %v1244_v14  ;;  %v1519_v2 = vcvt.f32.s32 %v1516_v36  ;;  %vm991_vm4 = vmand %vm847_vm1, %vm9253_vm11  ;;  %v1946_v17 = vcvt.s32.f32 %v1944_v13 }
 0x1f0   :  { %1935 = vadd.xlane.f32.xlu1 %v1933_v7  ;;  %v1518_v40 = vpop.xlane.xlu0 %1517  ;;  %v1245_v7 = vsel %vm1117_vm0, 1, %v9127_v0  ;;  %v1246_v14 = vsel %vm6342_vm14, 1, %v9127_v0  ;;  %vm1119_vm0 = vmor %vm719_vm8, %vm991_vm4  ;;  %vm9261_vm4 = vnez %v9153_v20 }
 0x1f1   :  { %v1520_v19 = vcvt.f32.s32 %v1518_v40  ;;  %v1528_v61 = vpop.xlane.xlu1 %1527  ;;  %v6334_v57 = vadd.s32 %v1509_v10, %v1507_v62  ;;  %v1957_v47 = vcvt.s32.f32 %v1955_v49  ;;  %v1958_v49 = vcvt.s32.f32 %v1956_v60 }
 0x1f3   :  { %9249 = vst [vmem:[#allocation15_spill] sm:$0xff] %v6334_v57  ;;  %v1521_v59 = vshll.u32 %v1520_v19, 16  ;;  %1937 = vadd.xlane.f32.xlu0 %v1934_v12  ;;  %v9255_v19 = vld [vmem:[#allocation17_spill] sm:$0xff]  ;;  %v1967_v12 = vand.u32 65535, %v1245_v7  ;;  %v1531_v57 = vcvt.f32.s32 %v1528_v61 }
 0x1f4   :  { %1947 = vadd.xlane.f32.xlu1 %v1945_v16  ;;  %v1530_v62 = vpop.xlane.xlu0 %1529  ;;  %vm848_vm7 = vcmp.eq.f32.partialorder %v6212_v53, %v9255_v19  ;;  %vm720_vm1 = vcmp.gt.f32.partialorder %v6212_v53, %v9255_v19 }
 0x1f5   :  { %v1532_v55 = vcvt.f32.s32 %v1530_v62  ;;  %v1540_v36 = vpop.xlane.xlu1 %1539  ;;  %v6350_v10 = vadd.s32 %v1521_v59, %v1519_v2  ;;  %vm992_vm11 = vmand %vm848_vm7, %vm9256_vm10  ;;  %v1968_v2 = vshrl.u32 %v1245_v7, 16  ;;  %v9258_v62 = vld [vmem:[#allocation20_spill] sm:$0xff]  ;;  %v1969_v40 = vcvt.s32.f32 %v1967_v12 }
 0x1f6   :  { %vm849_vm12 = vcmp.eq.f32.partialorder %v6212_v53, %v9258_v62  ;;  %vm6369_vm14 = vmor %vm720_vm1, %vm992_vm11  ;;  %v1980_v7 = vshrl.u32 %v1246_v14, 16  ;;  %vm721_vm8 = vcmp.gt.f32.partialorder %v6212_v53, %v9258_v62 }
 0x1f7   :  { %9254 = vst [vmem:[#allocation18_spill] sm:$0xff] %v6350_v10  ;;  %v1533_v16 = vshll.u32 %v1532_v55, 16  ;;  %1949 = vadd.xlane.f32.xlu0 %v1946_v17  ;;  %v1979_v55 = vand.u32 65535, %v1246_v14  ;;  %v1543_v17 = vcvt.f32.s32 %v1540_v36  ;;  %vm993_vm7 = vmand %vm849_vm12, %vm9261_vm4  ;;  %v1970_v12 = vcvt.s32.f32 %v1968_v2  ;;  %v9273_v2 = vld [vmem:[#allocation3_spill] sm:$0xff] }
 0x1f8   :  { %1959 = vadd.xlane.f32.xlu1 %v1957_v47  ;;  %v1542_v13 = vpop.xlane.xlu0 %1541  ;;  %v1247_v47 = vsel %vm1119_vm0, 1, %v9127_v0  ;;  %v1248_v14 = vsel %vm6369_vm14, 1, %v9127_v0  ;;  %vm6386_vm1 = vmor %vm721_vm8, %vm993_vm7 }
 0x1f9   :  { %v1544_v59 = vcvt.f32.s32 %v1542_v13  ;;  %v1552_v3 = vpop.xlane.xlu1 %1551  ;;  %v6361_v61 = vadd.s32 %v1533_v16, %v1531_v57  ;;  %v1981_v19 = vcvt.s32.f32 %v1979_v55  ;;  %v1992_v13 = vshrl.u32 %v1247_v47, 16 }
 0x1fa   :  { %v2003_v54 = vand.u32 65535, %v1248_v14 }
 0x1fb   :  { %9257 = vst [vmem:[#allocation17_spill] sm:$0xff] %v6361_v61  ;;  %v1545_v10 = vshll.u32 %v1544_v59, 16  ;;  %1961 = vadd.xlane.f32.xlu0 %v1958_v49  ;;  %v9263_v59 = vld [vmem:[#allocation19_spill] sm:$0xff]  ;;  %v1991_v49 = vand.u32 65535, %v1247_v47  ;;  %v1555_v61 = vcvt.f32.s32 %v1552_v3  ;;  %v1994_v62 = vcvt.s32.f32 %v1992_v13 }
 0x1fc   :  { %1971 = vadd.xlane.f32.xlu1 %v1969_v40  ;;  %v1554_v57 = vpop.xlane.xlu0 %1553  ;;  %vm850_vm11 = vcmp.eq.f32.partialorder %v6212_v53, %v9263_v59  ;;  %vm722_vm12 = vcmp.gt.f32.partialorder %v6212_v53, %v9263_v59 }
 0x1fd   :  { %v1556_v60 = vcvt.f32.s32 %v1554_v57  ;;  %v1564_v36 = vpop.xlane.xlu1 %1563  ;;  %v6377_v16 = vadd.s32 %v1545_v10, %v1543_v17  ;;  %vm6392_vm0 = vmand %vm850_vm11, %vm9205_vm9  ;;  %v1982_v17 = vcvt.s32.f32 %v1980_v7  ;;  %v1249_v7 = vsel %vm6386_vm1, 1, %v9127_v0 }
 0x1fe   :  { %v1567_v52 = vcvt.f32.s32 %v1564_v36  ;;  %vm6411_vm8 = vmor %vm722_vm12, %vm6392_vm0 }
 0x1ff   :  { %9262 = vst [vmem:[#allocation20_spill] sm:$0xff] %v6377_v16  ;;  %v1557_v40 = vshll.u32 %v1556_v60, 16  ;;  %1973 = vadd.xlane.f32.xlu0 %v1970_v12  ;;  %v5373_v60 = vld [vmem:[%s8930_s0] sm:$0xff] }
 0x200   :  { %1983 = vadd.xlane.f32.xlu1 %v1981_v19  ;;  %v1566_v10 = vpop.xlane.xlu0 %1565  ;;  %v570_v12 = vcombine.high %v5373_v60, %v5373_v60  ;;  %v9269_v16 = vld [vmem:[#allocation22_spill] sm:$0xff]  ;;  %v1993_v19 = vcvt.s32.f32 %v1991_v49  ;;  %v2004_v49 = vshrl.u32 %v1248_v14, 16  ;;  %v2015_v60 = vand.u32 65535, %v1249_v7 }
 0x201   :  { %v1568_v3 = vcvt.f32.s32 %v1566_v10  ;;  %v1576_v55 = vpop.xlane.xlu1 %1575  ;;  %v6396_v57 = vadd.s32 %v1557_v40, %v1555_v61  ;;  %vm851_vm14 = vcmp.eq.f32.partialorder %v6212_v53, %v9269_v16  ;;  %vm723_vm7 = vcmp.gt.f32.partialorder %v6212_v53, %v9269_v16  ;;  %v9278_v16 = vld [vmem:[#allocation24_spill] sm:$0xff] }
 0x202   :  { %vm995_vm11 = vmand %vm851_vm14, %vm5808_vm3  ;;  %v6422_v59 = vrot.slane %v570_v12, %v9273_v2  ;;  %v1579_v14 = vcvt.f32.s32 %v1576_v55  ;;  %v2006_v13 = vcvt.s32.f32 %v2004_v49  ;;  %v2016_v12 = vshrl.u32 %v1249_v7, 16  ;;  %v9283_v7 = vld [vmem:[#allocation26_spill] sm:$0xff] }
 0x203   :  { %9268 = vst [vmem:[#allocation19_spill] sm:$0xff] %v6396_v57  ;;  %v1569_v45 = vshll.u32 %v1568_v3, 16  ;;  %1985 = vadd.xlane.f32.xlu0 %v1982_v17  ;;  %v9274_v3 = vld [vmem:[#allocation21_spill] sm:$0xff]  ;;  %v2005_v17 = vcvt.s32.f32 %v2003_v54  ;;  %v1250_v57 = vsel %vm6411_vm8, 1, %v9127_v0  ;;  %vm6434_vm0 = vmor %vm723_vm7, %vm995_vm11  ;;  %vm853_vm8 = vcmp.eq.f32.partialorder %v6212_v53, %v9278_v16 }
 0x204   :  { %1995 = vadd.xlane.f32.xlu1 %v1993_v19  ;;  %v1578_v47 = vpop.xlane.xlu0 %1577  ;;  %vm852_vm12 = vcmp.eq.f32.partialorder %v6212_v53, %v9274_v3  ;;  %vm724_vm1 = vcmp.gt.f32.partialorder %v6212_v53, %v9274_v3  ;;  %vm725_vm11 = vcmp.gt.f32.partialorder %v6212_v53, %v9278_v16 }
 0x205   :  { %v1580_v36 = vcvt.f32.s32 %v1578_v47  ;;  %v1588_v40 = vpop.xlane.xlu1 %1587  ;;  %v6419_v10 = vadd.s32 %v1569_v45, %v1567_v52  ;;  %vm996_vm14 = vmand %vm852_vm12, %vm9214_vm5  ;;  %v6444_v47 = vrot.slane %v6422_v59, %v9273_v2 }
 0x206   :  { %vm6454_vm7 = vmor %vm724_vm1, %vm996_vm14 }
 0x207   :  { %9272 = vst [vmem:[#allocation22_spill] sm:$0xff] %v6419_v10  ;;  %v1581_v19 = vshll.u32 %v1580_v36, 16  ;;  %1997 = vadd.xlane.f32.xlu0 %v1994_v62  ;;  %v2017_v36 = vcvt.s32.f32 %v2015_v60  ;;  %v2027_v62 = vand.u32 65535, %v1250_v57  ;;  %vm997_vm12 = vmand %vm853_vm8, %vm9180_vm2  ;;  %v6466_v3 = vrot.slane %v6444_v47, %v5409_v8 }
 0x208   :  { %2007 = vadd.xlane.f32.xlu1 %v2005_v17  ;;  %v1590_v52 = vpop.xlane.xlu0 %1589  ;;  %v1591_v17 = vcvt.f32.s32 %v1588_v40  ;;  %vm1125_vm14 = vmor %vm725_vm11, %vm997_vm12 }
 0x209   :  { %v1592_v54 = vcvt.f32.s32 %v1590_v52  ;;  %v1600_v55 = vpop.xlane.xlu1 %1599  ;;  %v6440_v61 = vadd.s32 %v1581_v19, %v1579_v14  ;;  %v1251_v52 = vsel %vm6434_vm0, 1, %v9127_v0  ;;  %v2028_v14 = vshrl.u32 %v1250_v57, 16 }
 0x20a   :  { %v2018_v19 = vcvt.s32.f32 %v2016_v12  ;;  %v2039_v57 = vand.u32 65535, %v1251_v52  ;;  %v1253_v16 = vsel %vm1125_vm14, 1, %v9127_v0  ;;  %vm727_vm12 = vcmp.gt.f32.partialorder %v6466_v3, %v9283_v7 }
 0x20b   :  { %9277 = vst [vmem:[#allocation3_spill] sm:$0xff] %v6440_v61  ;;  %v1593_v10 = vshll.u32 %v1592_v54, 16  ;;  %2009 = vadd.xlane.f32.xlu0 %v2006_v13  ;;  %v9282_v54 = vld [vmem:[#allocation23_spill] sm:$0xff]  ;;  %v2029_v13 = vcvt.s32.f32 %v2027_v62  ;;  %v2030_v62 = vcvt.s32.f32 %v2028_v14 }
 0x20c   :  { %2019 = vadd.xlane.f32.xlu1 %v2017_v36  ;;  %v1602_v49 = vpop.xlane.xlu0 %1601  ;;  %vm854_vm1 = vcmp.eq.f32.partialorder %v6212_v53, %v9282_v54  ;;  %v1603_v36 = vcvt.f32.s32 %v1600_v55  ;;  %vm726_vm0 = vcmp.gt.f32.partialorder %v6212_v53, %v9282_v54  ;;  %v2063_v54 = vand.u32 65535, %v1253_v16 }
 0x20d   :  { %v1604_v40 = vcvt.f32.s32 %v1602_v49  ;;  %v1612_v60 = vpop.xlane.xlu1 %1611  ;;  %v6462_v45 = vadd.s32 %v1593_v10, %v1591_v17  ;;  %v1252_v49 = vsel %vm6454_vm7, 1, %v9127_v0  ;;  %vm998_vm8 = vmand %vm854_vm1, %vm5858_vm13  ;;  %v2040_v17 = vshrl.u32 %v1251_v52, 16 }
 0x20e   :  { %vm855_vm7 = vcmp.eq.f32.partialorder %v6466_v3, %v9283_v7  ;;  %v1615_v5 = vcvt.f32.s32 %v1612_v60  ;;  %vm6488_vm11 = vmor %vm726_vm0, %vm998_vm8  ;;  %v2052_v52 = vshrl.u32 %v1252_v49, 16  ;;  %vm9286_vm1 = vnez %v9118_v21 }
 0x20f   :  { %9281 = vst [vmem:[#allocation21_spill] sm:$0xff] %v6462_v45  ;;  %v1605_v61 = vshll.u32 %v1604_v40, 16  ;;  %2021 = vadd.xlane.f32.xlu0 %v2018_v19  ;;  %v2041_v19 = vcvt.s32.f32 %v2039_v57  ;;  %v2051_v45 = vand.u32 65535, %v1252_v49  ;;  %vm999_vm13 = vmand %vm855_vm7, %vm9286_vm1  ;;  %v2042_v57 = vcvt.s32.f32 %v2040_v17 }
 0x210   :  { %2031 = vadd.xlane.f32.xlu1 %v2029_v13  ;;  %v1614_v10 = vpop.xlane.xlu0 %1613  ;;  %v1254_v49 = vsel %vm6488_vm11, 1, %v9127_v0  ;;  %vm1127_vm8 = vmor %vm727_vm12, %vm999_vm13  ;;  %vm9289_vm7 = vnez %v9122_v6  ;;  %v2064_v7 = vshrl.u32 %v1253_v16, 16  ;;  %v2065_v13 = vcvt.s32.f32 %v2063_v54 }
 0x211   :  { %v1616_v12 = vcvt.f32.s32 %v1614_v10  ;;  %v1624_v55 = vpop.xlane.xlu1 %1623  ;;  %v6480_v40 = vadd.s32 %v1605_v61, %v1603_v36  ;;  %v9288_v10 = vld [vmem:[#allocation25_spill] sm:$0xff]  ;;  %v2053_v53 = vcvt.s32.f32 %v2051_v45  ;;  %v2054_v45 = vcvt.s32.f32 %v2052_v52 }
 0x212   :  { %vm856_vm0 = vcmp.eq.f32.partialorder %v6466_v3, %v9288_v10  ;;  %vm728_vm14 = vcmp.gt.f32.partialorder %v6466_v3, %v9288_v10  ;;  %v2076_v52 = vshrl.u32 %v1254_v49, 16  ;;  %vm9294_vm12 = vnez %v9126_v11 }
 0x213   :  { %v1617_v58 = vshll.u32 %v1616_v12, 16  ;;  %2033 = vadd.xlane.f32.xlu0 %v2030_v62  ;;  %v1627_v12 = vcvt.f32.s32 %v1624_v55  ;;  %vm1000_vm1 = vmand %vm856_vm0, %vm9289_vm7 }
 0x214   :  { %2043 = vadd.xlane.f32.xlu1 %v2041_v19  ;;  %v1626_v61 = vpop.xlane.xlu0 %1625  ;;  %v9291_v19 = vld [vmem:[#allocation28_spill] sm:$0xff]  ;;  %vm6515_vm13 = vmor %vm728_vm14, %vm1000_vm1 }
 0x215   :  { %v1628_v14 = vcvt.f32.s32 %v1626_v61  ;;  %v1636_v60 = vpop.xlane.xlu1 %1635  ;;  %v6496_v36 = vadd.s32 %v1617_v58, %v1615_v5  ;;  %vm857_vm2 = vcmp.eq.f32.partialorder %v6466_v3, %v9291_v19  ;;  %v2075_v61 = vand.u32 65535, %v1254_v49 }
 0x216   :  { %vm729_vm11 = vcmp.gt.f32.partialorder %v6466_v3, %v9291_v19  ;;  %vm1001_vm0 = vmand %vm857_vm2, %vm9294_vm12  ;;  %v1256_v49 = vsel %vm6515_vm13, 1, %v9127_v0 }
 0x217   :  { %9287 = vst [vmem:[#allocation24_spill] sm:$0xff] %v6496_v36  ;;  %v1629_v62 = vshll.u32 %v1628_v14, 16  ;;  %2045 = vadd.xlane.f32.xlu0 %v2042_v57  ;;  %v1639_v14 = vcvt.f32.s32 %v1636_v60  ;;  %v2077_v10 = vcvt.s32.f32 %v2075_v61  ;;  %vm1129_vm14 = vmor %vm729_vm11, %vm1001_vm0  ;;  %v2078_v61 = vcvt.s32.f32 %v2076_v52 }
 0x218   :  { %2055 = vadd.xlane.f32.xlu1 %v2053_v53  ;;  %v1638_v17 = vpop.xlane.xlu0 %1637  ;;  %v1255_v53 = vsel %vm1127_vm8, 1, %v9127_v0  ;;  %vm9301_vm0 = vnez %v9133_v22 }
 0x219   :  { %v1640_v58 = vcvt.f32.s32 %v1638_v17  ;;  %v1648_v5 = vpop.xlane.xlu1 %1647  ;;  %v6507_v55 = vadd.s32 %v1629_v62, %v1627_v12  ;;  %v2066_v12 = vcvt.s32.f32 %v2064_v7 }
 0x21b   :  { %9290 = vst [vmem:[#allocation23_spill] sm:$0xff] %v6507_v55  ;;  %v1641_v57 = vshll.u32 %v1640_v58, 16  ;;  %2057 = vadd.xlane.f32.xlu0 %v2054_v45  ;;  %v9296_v58 = vld [vmem:[#allocation27_spill] sm:$0xff]  ;;  %v2087_v45 = vand.u32 65535, %v1255_v53  ;;  %v1651_v55 = vcvt.f32.s32 %v1648_v5 }
 0x21c   :  { %2067 = vadd.xlane.f32.xlu1 %v2065_v13  ;;  %v1650_v16 = vpop.xlane.xlu0 %1649  ;;  %vm858_vm1 = vcmp.eq.f32.partialorder %v6466_v3, %v9296_v58  ;;  %vm730_vm2 = vcmp.gt.f32.partialorder %v6466_v3, %v9296_v58 }
 0x21d   :  { %v1652_v60 = vcvt.f32.s32 %v1650_v16  ;;  %v1660_v54 = vpop.xlane.xlu1 %1659  ;;  %v6523_v62 = vadd.s32 %v1641_v57, %v1639_v14  ;;  %vm1002_vm8 = vmand %vm858_vm1, %vm9234_vm15  ;;  %v2088_v57 = vshrl.u32 %v1255_v53, 16  ;;  %v9298_v16 = vld [vmem:[#allocation30_spill] sm:$0xff]  ;;  %v2089_v17 = vcvt.s32.f32 %v2087_v45 }
 0x21e   :  { %vm859_vm12 = vcmp.eq.f32.partialorder %v6466_v3, %v9298_v16  ;;  %vm6542_vm13 = vmor %vm730_vm2, %vm1002_vm8  ;;  %v2100_v53 = vshrl.u32 %v1256_v49, 16  ;;  %vm731_vm11 = vcmp.gt.f32.partialorder %v6466_v3, %v9298_v16 }
 0x21f   :  { %9295 = vst [vmem:[#allocation26_spill] sm:$0xff] %v6523_v62  ;;  %v1653_v13 = vshll.u32 %v1652_v60, 16  ;;  %2069 = vadd.xlane.f32.xlu0 %v2066_v12  ;;  %v2099_v60 = vand.u32 65535, %v1256_v49  ;;  %v1663_v12 = vcvt.f32.s32 %v1660_v54  ;;  %vm1003_vm1 = vmand %vm859_vm12, %vm9301_vm0  ;;  %v2090_v45 = vcvt.s32.f32 %v2088_v57 }
 0x220   :  { %2079 = vadd.xlane.f32.xlu1 %v2077_v10  ;;  %v1662_v7 = vpop.xlane.xlu0 %1661  ;;  %v1257_v10 = vsel %vm1129_vm14, 1, %v9127_v0  ;;  %v1258_v49 = vsel %vm6542_vm13, 1, %v9127_v0  ;;  %vm1131_vm14 = vmor %vm731_vm11, %vm1003_vm1  ;;  %vm9308_vm1 = vnez %v9140_v48 }
 0x221   :  { %v1664_v19 = vcvt.f32.s32 %v1662_v7  ;;  %v1672_v14 = vpop.xlane.xlu1 %1671  ;;  %v6534_v5 = vadd.s32 %v1653_v13, %v1651_v55  ;;  %v2101_v58 = vcvt.s32.f32 %v2099_v60  ;;  %v2102_v60 = vcvt.s32.f32 %v2100_v53 }
 0x223   :  { %9297 = vst [vmem:[#allocation25_spill] sm:$0xff] %v6534_v5  ;;  %v1665_v62 = vshll.u32 %v1664_v19, 16  ;;  %2081 = vadd.xlane.f32.xlu0 %v2078_v61  ;;  %v9303_v19 = vld [vmem:[#allocation29_spill] sm:$0xff]  ;;  %v2111_v61 = vand.u32 65535, %v1257_v10  ;;  %v1675_v5 = vcvt.f32.s32 %v1672_v14 }
 0x224   :  { %2091 = vadd.xlane.f32.xlu1 %v2089_v17  ;;  %v1674_v55 = vpop.xlane.xlu0 %1673  ;;  %vm860_vm2 = vcmp.eq.f32.partialorder %v6466_v3, %v9303_v19  ;;  %vm732_vm12 = vcmp.gt.f32.partialorder %v6466_v3, %v9303_v19 }
 0x225   :  { %v1676_v52 = vcvt.f32.s32 %v1674_v55  ;;  %v1684_v54 = vpop.xlane.xlu1 %1683  ;;  %v6550_v13 = vadd.s32 %v1665_v62, %v1663_v12  ;;  %vm1004_vm8 = vmand %vm860_vm2, %vm9191_vm6  ;;  %v2112_v12 = vshrl.u32 %v1257_v10, 16  ;;  %v9305_v55 = vld [vmem:[#allocation32_spill] sm:$0xff]  ;;  %v2113_v7 = vcvt.s32.f32 %v2111_v61 }
 0x226   :  { %vm861_vm0 = vcmp.eq.f32.partialorder %v6466_v3, %v9305_v55  ;;  %vm6569_vm13 = vmor %vm732_vm12, %vm1004_vm8  ;;  %v2124_v10 = vshrl.u32 %v1258_v49, 16  ;;  %vm733_vm11 = vcmp.gt.f32.partialorder %v6466_v3, %v9305_v55  ;;  %vm9311_vm8 = vnez %v9143_v25 }
 0x227   :  { %9302 = vst [vmem:[#allocation28_spill] sm:$0xff] %v6550_v13  ;;  %v1677_v17 = vshll.u32 %v1676_v52, 16  ;;  %2093 = vadd.xlane.f32.xlu0 %v2090_v45  ;;  %v2123_v52 = vand.u32 65535, %v1258_v49  ;;  %v1687_v45 = vcvt.f32.s32 %v1684_v54  ;;  %vm1005_vm2 = vmand %vm861_vm0, %vm9308_vm1  ;;  %v2114_v61 = vcvt.s32.f32 %v2112_v12 }
 0x228   :  { %2103 = vadd.xlane.f32.xlu1 %v2101_v58  ;;  %v1686_v57 = vpop.xlane.xlu0 %1685  ;;  %v1259_v58 = vsel %vm1131_vm14, 1, %v9127_v0  ;;  %v1260_v49 = vsel %vm6569_vm13, 1, %v9127_v0  ;;  %vm1133_vm14 = vmor %vm733_vm11, %vm1005_vm2  ;;  %vm9316_vm2 = vnez %v9147_v9 }
 0x229   :  { %v1688_v62 = vcvt.f32.s32 %v1686_v57  ;;  %v1696_v16 = vpop.xlane.xlu1 %1695  ;;  %v6561_v14 = vadd.s32 %v1677_v17, %v1675_v5  ;;  %v2125_v19 = vcvt.s32.f32 %v2123_v52  ;;  %v2126_v52 = vcvt.s32.f32 %v2124_v10 }
 0x22b   :  { %9304 = vst [vmem:[#allocation27_spill] sm:$0xff] %v6561_v14  ;;  %v1689_v13 = vshll.u32 %v1688_v62, 16  ;;  %2105 = vadd.xlane.f32.xlu0 %v2102_v60  ;;  %v9310_v62 = vld [vmem:[#allocation31_spill] sm:$0xff]  ;;  %v2135_v60 = vand.u32 65535, %v1259_v58  ;;  %v1699_v14 = vcvt.f32.s32 %v1696_v16 }
 0x22c   :  { %2115 = vadd.xlane.f32.xlu1 %v2113_v7  ;;  %v1698_v5 = vpop.xlane.xlu0 %1697  ;;  %vm862_vm12 = vcmp.eq.f32.partialorder %v6466_v3, %v9310_v62  ;;  %vm734_vm0 = vcmp.gt.f32.partialorder %v6466_v3, %v9310_v62 }
 0x22d   :  { %v1700_v53 = vcvt.f32.s32 %v1698_v5  ;;  %v1708_v54 = vpop.xlane.xlu1 %1707  ;;  %v6577_v17 = vadd.s32 %v1689_v13, %v1687_v45  ;;  %vm1006_vm1 = vmand %vm862_vm12, %vm9311_vm8  ;;  %v2136_v45 = vshrl.u32 %v1259_v58, 16  ;;  %v9313_v5 = vld [vmem:[#allocation33_spill] sm:$0xff]  ;;  %v2137_v57 = vcvt.s32.f32 %v2135_v60 }
 0x22e   :  { %vm863_vm6 = vcmp.eq.f32.partialorder %v6466_v3, %v9313_v5  ;;  %vm6596_vm13 = vmor %vm734_vm0, %vm1006_vm1  ;;  %v2148_v58 = vshrl.u32 %v1260_v49, 16  ;;  %vm735_vm11 = vcmp.gt.f32.partialorder %v6466_v3, %v9313_v5 }
 0x22f   :  { %9309 = vst [vmem:[#allocation30_spill] sm:$0xff] %v6577_v17  ;;  %v1701_v7 = vshll.u32 %v1700_v53, 16  ;;  %2117 = vadd.xlane.f32.xlu0 %v2114_v61  ;;  %v2147_v53 = vand.u32 65535, %v1260_v49  ;;  %v1711_v61 = vcvt.f32.s32 %v1708_v54  ;;  %vm1007_vm12 = vmand %vm863_vm6, %vm9316_vm2  ;;  %v2138_v60 = vcvt.s32.f32 %v2136_v45 }
 0x230   :  { %2127 = vadd.xlane.f32.xlu1 %v2125_v19  ;;  %v1710_v12 = vpop.xlane.xlu0 %1709  ;;  %v1261_v19 = vsel %vm1133_vm14, 1, %v9127_v0  ;;  %v1262_v49 = vsel %vm6596_vm13, 1, %v9127_v0  ;;  %vm1135_vm0 = vmor %vm735_vm11, %vm1007_vm12 }
 0x231   :  { %v1712_v13 = vcvt.f32.s32 %v1710_v12  ;;  %v1720_v55 = vpop.xlane.xlu1 %1719  ;;  %v6588_v16 = vadd.s32 %v1701_v7, %v1699_v14  ;;  %v2149_v62 = vcvt.s32.f32 %v2147_v53  ;;  %v2150_v53 = vcvt.s32.f32 %v2148_v58 }
 0x233   :  { %9312 = vst [vmem:[#allocation29_spill] sm:$0xff] %v6588_v16  ;;  %v1713_v17 = vshll.u32 %v1712_v13, 16  ;;  %2129 = vadd.xlane.f32.xlu0 %v2126_v52  ;;  %v9318_v13 = vld [vmem:[#allocation34_spill] sm:$0xff]  ;;  %v2159_v52 = vand.u32 65535, %v1261_v19  ;;  %v1723_v16 = vcvt.f32.s32 %v1720_v55 }
 0x234   :  { %2139 = vadd.xlane.f32.xlu1 %v2137_v57  ;;  %v1722_v14 = vpop.xlane.xlu0 %1721  ;;  %vm864_vm1 = vcmp.eq.f32.partialorder %v6466_v3, %v9318_v13  ;;  %vm736_vm6 = vcmp.gt.f32.partialorder %v6466_v3, %v9318_v13 }
 0x235   :  { %v1724_v10 = vcvt.f32.s32 %v1722_v14  ;;  %v1732_v54 = vpop.xlane.xlu1 %1731  ;;  %v6604_v7 = vadd.s32 %v1713_v17, %v1711_v61  ;;  %vm1008_vm14 = vmand %vm864_vm1, %vm9256_vm10  ;;  %v2160_v61 = vshrl.u32 %v1261_v19, 16  ;;  %v9320_v14 = vld [vmem:[#allocation36_spill] sm:$0xff]  ;;  %v2161_v12 = vcvt.s32.f32 %v2159_v52 }
 0x236   :  { %vm865_vm2 = vcmp.eq.f32.partialorder %v6466_v3, %v9320_v14  ;;  %vm6623_vm13 = vmor %vm736_vm6, %vm1008_vm14  ;;  %v2172_v19 = vshrl.u32 %v1262_v49, 16  ;;  %vm737_vm11 = vcmp.gt.f32.partialorder %v6466_v3, %v9320_v14 }
 0x237   :  { %9317 = vst [vmem:[#allocation32_spill] sm:$0xff] %v6604_v7  ;;  %v1725_v57 = vshll.u32 %v1724_v10, 16  ;;  %2141 = vadd.xlane.f32.xlu0 %v2138_v60  ;;  %v2171_v10 = vand.u32 65535, %v1262_v49  ;;  %v1735_v60 = vcvt.f32.s32 %v1732_v54  ;;  %vm1009_vm12 = vmand %vm865_vm2, %vm9261_vm4  ;;  %v2162_v52 = vcvt.s32.f32 %v2160_v61 }
 0x238   :  { %2151 = vadd.xlane.f32.xlu1 %v2149_v62  ;;  %v1734_v45 = vpop.xlane.xlu0 %1733  ;;  %v1263_v62 = vsel %vm1135_vm0, 1, %v9127_v0  ;;  %v1264_v49 = vsel %vm6623_vm13, 1, %v9127_v0  ;;  %vm1137_vm6 = vmor %vm737_vm11, %vm1009_vm12 }
 0x239   :  { %v1736_v17 = vcvt.f32.s32 %v1734_v45  ;;  %v1744_v5 = vpop.xlane.xlu1 %1743  ;;  %v6615_v55 = vadd.s32 %v1725_v57, %v1723_v16  ;;  %v2173_v13 = vcvt.s32.f32 %v2171_v10  ;;  %v2174_v10 = vcvt.s32.f32 %v2172_v19 }
 0x23b   :  { %9319 = vst [vmem:[#allocation31_spill] sm:$0xff] %v6615_v55  ;;  %v1737_v7 = vshll.u32 %v1736_v17, 16  ;;  %2153 = vadd.xlane.f32.xlu0 %v2150_v53  ;;  %v9324_v17 = vld [vmem:[#allocation37_spill] sm:$0xff]  ;;  %v2183_v53 = vand.u32 65535, %v1263_v62  ;;  %v1747_v55 = vcvt.f32.s32 %v1744_v5 }
 0x23c   :  { %2163 = vadd.xlane.f32.xlu1 %v2161_v12  ;;  %v1746_v16 = vpop.xlane.xlu0 %1745  ;;  %vm866_vm1 = vcmp.eq.f32.partialorder %v6466_v3, %v9324_v17  ;;  %vm738_vm2 = vcmp.gt.f32.partialorder %v6466_v3, %v9324_v17  ;;  %v586_v17 = vcombine.high %v6422_v59, %v6422_v59 }
 0x23d   :  { %v1748_v58 = vcvt.f32.s32 %v1746_v16  ;;  %v1756_v54 = vpop.xlane.xlu1 %1755  ;;  %v6631_v57 = vadd.s32 %v1737_v7, %v1735_v60  ;;  %vm1010_vm0 = vmand %vm866_vm1, %vm9205_vm9  ;;  %v2184_v60 = vshrl.u32 %v1263_v62, 16  ;;  %v9326_v16 = vld [vmem:[#allocation38_spill] sm:$0xff]  ;;  %v2185_v45 = vcvt.s32.f32 %v2183_v53 }
 0x23e   :  { %vm867_vm14 = vcmp.eq.f32.partialorder %v6466_v3, %v9326_v16  ;;  %vm6650_vm13 = vmor %vm738_vm2, %vm1010_vm0  ;;  %v2196_v62 = vshrl.u32 %v1264_v49, 16  ;;  %vm739_vm11 = vcmp.gt.f32.partialorder %v6466_v3, %v9326_v16 }
 0x23f   :  { %9323 = vst [vmem:[#allocation33_spill] sm:$0xff] %v6631_v57  ;;  %v1749_v12 = vshll.u32 %v1748_v58, 16  ;;  %2165 = vadd.xlane.f32.xlu0 %v2162_v52  ;;  %v2195_v58 = vand.u32 65535, %v1264_v49  ;;  %v1759_v52 = vcvt.f32.s32 %v1756_v54  ;;  %vm1011_vm12 = vmand %vm867_vm14, %vm5808_vm3  ;;  %v2186_v53 = vcvt.s32.f32 %v2184_v60 }
 0x240   :  { %2175 = vadd.xlane.f32.xlu1 %v2173_v13  ;;  %v1758_v61 = vpop.xlane.xlu0 %1757  ;;  %v1265_v13 = vsel %vm1137_vm6, 1, %v9127_v0  ;;  %v1266_v36 = vsel %vm6650_vm13, 1, %v9127_v0  ;;  %vm6672_vm6 = vmor %vm739_vm11, %vm1011_vm12  ;;  %vm9337_vm12 = vnez %v9166_v32 }
 0x241   :  { %v1760_v7 = vcvt.f32.s32 %v1758_v61  ;;  %v1768_v14 = vpop.xlane.xlu1 %1767  ;;  %v6642_v5 = vadd.s32 %v1749_v12, %v1747_v55 }
 0x242   :  { %v1771_v49 = vcvt.f32.s32 %v1768_v14 }
 0x243   :  { %9325 = vst [vmem:[#allocation34_spill] sm:$0xff] %v6642_v5  ;;  %v1761_v57 = vshll.u32 %v1760_v7, 16  ;;  %2177 = vadd.xlane.f32.xlu0 %v2174_v10  ;;  %v9330_v7 = vld [vmem:[#allocation39_spill] sm:$0xff]  ;;  %v2197_v10 = vcvt.s32.f32 %v2195_v58  ;;  %v2198_v58 = vcvt.s32.f32 %v2196_v62 }
 0x244   :  { %2187 = vadd.xlane.f32.xlu1 %v2185_v45  ;;  %v1770_v55 = vpop.xlane.xlu0 %1769  ;;  %vm868_vm1 = vcmp.eq.f32.partialorder %v6466_v3, %v9330_v7  ;;  %v2207_v45 = vand.u32 65535, %v1265_v13  ;;  %vm740_vm2 = vcmp.gt.f32.partialorder %v6466_v3, %v9330_v7 }
 0x245   :  { %v1772_v19 = vcvt.f32.s32 %v1770_v55  ;;  %v1780_v54 = vpop.xlane.xlu1 %1779  ;;  %v6658_v12 = vadd.s32 %v1761_v57, %v1759_v52  ;;  %vm1012_vm0 = vmand %vm868_vm1, %vm9214_vm5  ;;  %v2208_v52 = vshrl.u32 %v1265_v13, 16  ;;  %v6681_v55 = vrot.slane %v586_v17, %v9273_v2 }
 0x246   :  { %v2209_v16 = vcvt.s32.f32 %v2207_v45  ;;  %vm6691_vm13 = vmor %vm740_vm2, %vm1012_vm0  ;;  %v2220_v13 = vshrl.u32 %v1266_v36, 16 }
 0x247   :  { %9329 = vst [vmem:[#allocation36_spill] sm:$0xff] %v6658_v12  ;;  %v1773_v5 = vshll.u32 %v1772_v19, 16  ;;  %2189 = vadd.xlane.f32.xlu0 %v2186_v53  ;;  %v9334_v19 = vld [vmem:[#allocation40_spill] sm:$0xff]  ;;  %v2219_v53 = vand.u32 65535, %v1266_v36  ;;  %v1783_v12 = vcvt.f32.s32 %v1780_v54  ;;  %v2210_v17 = vcvt.s32.f32 %v2208_v52 }
 0x248   :  { %2199 = vadd.xlane.f32.xlu1 %v2197_v10  ;;  %v1782_v57 = vpop.xlane.xlu0 %1781  ;;  %vm869_vm14 = vcmp.eq.f32.partialorder %v6466_v3, %v9334_v19  ;;  %vm741_vm11 = vcmp.gt.f32.partialorder %v6466_v3, %v9334_v19  ;;  %v6703_v7 = vrot.slane %v6681_v55, %v5409_v8 }
 0x249   :  { %v1784_v14 = vcvt.f32.s32 %v1782_v57  ;;  %v1792_v60 = vpop.xlane.xlu1 %1791  ;;  %v6678_v61 = vadd.s32 %v1773_v5, %v1771_v49  ;;  %v1267_v57 = vsel %vm6672_vm6, 1, %v9127_v0  ;;  %vm1013_vm1 = vmand %vm869_vm14, %vm9337_vm12  ;;  %v9339_v49 = vld [vmem:[#allocation41_spill] sm:$0xff]  ;;  %v2221_v59 = vcvt.s32.f32 %v2219_v53  ;;  %v9341_v5 = vld [vmem:[#allocation42_spill] sm:$0xff] }
 0x24a   :  { %vm870_vm2 = vcmp.eq.f32.partialorder %v6466_v3, %v9339_v49  ;;  %v2231_v36 = vand.u32 65535, %v1267_v57  ;;  %vm742_vm6 = vcmp.gt.f32.partialorder %v6466_v3, %v9339_v49  ;;  %vm1141_vm0 = vmor %vm741_vm11, %vm1013_vm1  ;;  %vm9340_vm14 = vnez %v9168_v35 }
 0x24b   :  { %9333 = vst [vmem:[#allocation37_spill] sm:$0xff] %v6678_v61  ;;  %v1785_v10 = vshll.u32 %v1784_v14, 16  ;;  %2201 = vadd.xlane.f32.xlu0 %v2198_v58  ;;  %v1795_v14 = vcvt.f32.s32 %v1792_v60  ;;  %vm1014_vm12 = vmand %vm870_vm2, %vm9340_vm14  ;;  %v2222_v53 = vcvt.s32.f32 %v2220_v13  ;;  %v1269_v19 = vsel %vm1141_vm0, 1, %v9127_v0 }
 0x24c   :  { %2211 = vadd.xlane.f32.xlu1 %v2209_v16  ;;  %v1794_v2 = vpop.xlane.xlu0 %1793  ;;  %v1268_v16 = vsel %vm6691_vm13, 1, %v9127_v0  ;;  %vm871_vm13 = vcmp.eq.f32.partialorder %v6703_v7, %v9341_v5  ;;  %vm6725_vm11 = vmor %vm742_vm6, %vm1014_vm12  ;;  %vm743_vm1 = vcmp.gt.f32.partialorder %v6703_v7, %v9341_v5  ;;  %vm9344_vm2 = vnez %v9118_v21 }
 0x24d   :  { %v1796_v62 = vcvt.f32.s32 %v1794_v2  ;;  %v1804_v54 = vpop.xlane.xlu1 %1803  ;;  %v6699_v45 = vadd.s32 %v1785_v10, %v1783_v12  ;;  %v2232_v10 = vshrl.u32 %v1267_v57, 16  ;;  %v2244_v13 = vshrl.u32 %v1268_v16, 16  ;;  %vm1015_vm14 = vmand %vm871_vm13, %vm9344_vm2 }
 0x24e   :  { %v2255_v49 = vand.u32 65535, %v1269_v19  ;;  %vm1143_vm0 = vmor %vm743_vm1, %vm1015_vm14  ;;  %vm9350_vm1 = vnez %v9126_v11 }
 0x24f   :  { %9338 = vst [vmem:[#allocation38_spill] sm:$0xff] %v6699_v45  ;;  %v1797_v58 = vshll.u32 %v1796_v62, 16  ;;  %2213 = vadd.xlane.f32.xlu0 %v2210_v17  ;;  %v2233_v62 = vcvt.s32.f32 %v2231_v36  ;;  %v2243_v17 = vand.u32 65535, %v1268_v16  ;;  %v1807_v45 = vcvt.f32.s32 %v1804_v54 }
 0x250   :  { %2223 = vadd.xlane.f32.xlu1 %v2221_v59  ;;  %v1806_v12 = vpop.xlane.xlu0 %1805  ;;  %v1270_v16 = vsel %vm6725_vm11, 1, %v9127_v0  ;;  %v2246_v5 = vcvt.s32.f32 %v2244_v13  ;;  %v2257_v59 = vcvt.s32.f32 %v2255_v49 }
 0x251   :  { %v1808_v52 = vcvt.f32.s32 %v1806_v12  ;;  %v1816_v60 = vpop.xlane.xlu1 %1815  ;;  %v6717_v2 = vadd.s32 %v1797_v58, %v1795_v14  ;;  %v2234_v14 = vcvt.s32.f32 %v2232_v10  ;;  %v9345_v12 = vld [vmem:[#allocation43_spill] sm:$0xff]  ;;  %v2245_v3 = vcvt.s32.f32 %v2243_v17  ;;  %v9347_v17 = vld [vmem:[#allocation44_spill] sm:$0xff] }
 0x252   :  { %vm872_vm12 = vcmp.eq.f32.partialorder %v6703_v7, %v9345_v12  ;;  %vm744_vm6 = vcmp.gt.f32.partialorder %v6703_v7, %v9345_v12  ;;  %vm873_vm2 = vcmp.eq.f32.partialorder %v6703_v7, %v9347_v17  ;;  %v2268_v13 = vshrl.u32 %v1270_v16, 16 }
 0x253   :  { %v1809_v61 = vshll.u32 %v1808_v52, 16  ;;  %2225 = vadd.xlane.f32.xlu0 %v2222_v53  ;;  %v1819_v52 = vcvt.f32.s32 %v1816_v60  ;;  %vm1016_vm13 = vmand %vm872_vm12, %vm9289_vm7  ;;  %vm745_vm11 = vcmp.gt.f32.partialorder %v6703_v7, %v9347_v17 }
 0x254   :  { %2235 = vadd.xlane.f32.xlu1 %v2233_v62  ;;  %v1818_v57 = vpop.xlane.xlu0 %1817  ;;  %v2256_v62 = vshrl.u32 %v1269_v19, 16  ;;  %vm6752_vm14 = vmor %vm744_vm6, %vm1016_vm13 }
 0x255   :  { %v1820_v54 = vcvt.f32.s32 %v1818_v57  ;;  %v1828_v36 = vpop.xlane.xlu1 %1827  ;;  %v6733_v58 = vadd.s32 %v1809_v61, %v1807_v45  ;;  %v2267_v57 = vand.u32 65535, %v1270_v16  ;;  %vm1017_vm12 = vmand %vm873_vm2, %vm9350_vm1  ;;  %v1272_v16 = vsel %vm6752_vm14, 1, %v9127_v0 }
 0x257   :  { %v1821_v53 = vshll.u32 %v1820_v54, 16  ;;  %2237 = vadd.xlane.f32.xlu0 %v2234_v14  ;;  %v1831_v54 = vcvt.f32.s32 %v1828_v36  ;;  %v2269_v12 = vcvt.s32.f32 %v2267_v57  ;;  %v2270_v57 = vcvt.s32.f32 %v2268_v13 }
 0x258   :  { %2247 = vadd.xlane.f32.xlu1 %v2245_v3  ;;  %v1830_v10 = vpop.xlane.xlu0 %1829  ;;  %v1271_v3 = vsel %vm1143_vm0, 1, %v9127_v0  ;;  %vm1145_vm0 = vmor %vm745_vm11, %vm1017_vm12  ;;  %vm9357_vm12 = vnez %v9133_v22 }
 0x259   :  { %v1832_v61 = vcvt.f32.s32 %v1830_v10  ;;  %v1840_v45 = vpop.xlane.xlu1 %1839  ;;  %v6744_v60 = vadd.s32 %v1821_v53, %v1819_v52  ;;  %v2258_v52 = vcvt.s32.f32 %v2256_v62 }
 0x25b   :  { %9346 = vst [vmem:[#allocation39_spill] sm:$0xff] %v6744_v60  ;;  %v1833_v14 = vshll.u32 %v1832_v61, 16  ;;  %2249 = vadd.xlane.f32.xlu0 %v2246_v5  ;;  %v9352_v61 = vld [vmem:[#allocation45_spill] sm:$0xff]  ;;  %v2279_v5 = vand.u32 65535, %v1271_v3  ;;  %v1843_v60 = vcvt.f32.s32 %v1840_v45 }
 0x25c   :  { %2259 = vadd.xlane.f32.xlu1 %v2257_v59  ;;  %v1842_v19 = vpop.xlane.xlu0 %1841  ;;  %vm874_vm6 = vcmp.eq.f32.partialorder %v6703_v7, %v9352_v61  ;;  %vm746_vm2 = vcmp.gt.f32.partialorder %v6703_v7, %v9352_v61 }
 0x25d   :  { %v1844_v36 = vcvt.f32.s32 %v1842_v19  ;;  %v1852_v49 = vpop.xlane.xlu1 %1851  ;;  %v6760_v53 = vadd.s32 %v1833_v14, %v1831_v54  ;;  %vm1018_vm13 = vmand %vm874_vm6, %vm9234_vm15  ;;  %v2280_v14 = vshrl.u32 %v1271_v3, 16  ;;  %v9354_v19 = vld [vmem:[#allocation46_spill] sm:$0xff]  ;;  %v2281_v10 = vcvt.s32.f32 %v2279_v5 }
 0x25e   :  { %vm875_vm1 = vcmp.eq.f32.partialorder %v6703_v7, %v9354_v19  ;;  %vm6779_vm14 = vmor %vm746_vm2, %vm1018_vm13  ;;  %v2292_v3 = vshrl.u32 %v1272_v16, 16  ;;  %vm747_vm11 = vcmp.gt.f32.partialorder %v6703_v7, %v9354_v19  ;;  %vm9360_vm13 = vnez %v9137_v4 }
 0x25f   :  { %9351 = vst [vmem:[#allocation40_spill] sm:$0xff] %v6760_v53  ;;  %v1845_v59 = vshll.u32 %v1844_v36, 16  ;;  %2261 = vadd.xlane.f32.xlu0 %v2258_v52  ;;  %v2291_v36 = vand.u32 65535, %v1272_v16  ;;  %v1855_v52 = vcvt.f32.s32 %v1852_v49  ;;  %vm1019_vm6 = vmand %vm875_vm1, %vm9357_vm12  ;;  %v2282_v5 = vcvt.s32.f32 %v2280_v14 }
 0x260   :  { %2271 = vadd.xlane.f32.xlu1 %v2269_v12  ;;  %v1854_v62 = vpop.xlane.xlu0 %1853  ;;  %v1273_v12 = vsel %vm1145_vm0, 1, %v9127_v0  ;;  %v1274_v16 = vsel %vm6779_vm14, 1, %v9127_v0  ;;  %vm1147_vm0 = vmor %vm747_vm11, %vm1019_vm6  ;;  %vm9365_vm6 = vnez %v9140_v48 }
 0x261   :  { %v1856_v17 = vcvt.f32.s32 %v1854_v62  ;;  %v1864_v54 = vpop.xlane.xlu1 %1863  ;;  %v6771_v45 = vadd.s32 %v1845_v59, %v1843_v60  ;;  %v2293_v61 = vcvt.s32.f32 %v2291_v36  ;;  %v2294_v36 = vcvt.s32.f32 %v2292_v3 }
 0x263   :  { %9353 = vst [vmem:[#allocation41_spill] sm:$0xff] %v6771_v45  ;;  %v1857_v53 = vshll.u32 %v1856_v17, 16  ;;  %2273 = vadd.xlane.f32.xlu0 %v2270_v57  ;;  %v9359_v17 = vld [vmem:[#allocation47_spill] sm:$0xff]  ;;  %v2303_v57 = vand.u32 65535, %v1273_v12  ;;  %v1867_v45 = vcvt.f32.s32 %v1864_v54 }
 0x264   :  { %2283 = vadd.xlane.f32.xlu1 %v2281_v10  ;;  %v1866_v60 = vpop.xlane.xlu0 %1865  ;;  %vm876_vm2 = vcmp.eq.f32.partialorder %v6703_v7, %v9359_v17  ;;  %vm748_vm1 = vcmp.gt.f32.partialorder %v6703_v7, %v9359_v17 }
 0x265   :  { %v1868_v13 = vcvt.f32.s32 %v1866_v60  ;;  %v1876_v49 = vpop.xlane.xlu1 %1875  ;;  %v6787_v59 = vadd.s32 %v1857_v53, %v1855_v52  ;;  %vm1020_vm12 = vmand %vm876_vm2, %vm9360_vm13  ;;  %v2304_v52 = vshrl.u32 %v1273_v12, 16  ;;  %v9362_v60 = vld [vmem:[#allocation48_spill] sm:$0xff]  ;;  %v2305_v62 = vcvt.s32.f32 %v2303_v57 }
 0x266   :  { %vm877_vm15 = vcmp.eq.f32.partialorder %v6703_v7, %v9362_v60  ;;  %vm6806_vm14 = vmor %vm748_vm1, %vm1020_vm12  ;;  %v2316_v12 = vshrl.u32 %v1274_v16, 16  ;;  %vm749_vm11 = vcmp.gt.f32.partialorder %v6703_v7, %v9362_v60 }
 0x267   :  { %9358 = vst [vmem:[#allocation42_spill] sm:$0xff] %v6787_v59  ;;  %v1869_v10 = vshll.u32 %v1868_v13, 16  ;;  %2285 = vadd.xlane.f32.xlu0 %v2282_v5  ;;  %v2315_v13 = vand.u32 65535, %v1274_v16  ;;  %v1879_v5 = vcvt.f32.s32 %v1876_v49  ;;  %vm1021_vm2 = vmand %vm877_vm15, %vm9365_vm6  ;;  %v2306_v57 = vcvt.s32.f32 %v2304_v52 }
 0x268   :  { %2295 = vadd.xlane.f32.xlu1 %v2293_v61  ;;  %v1878_v14 = vpop.xlane.xlu0 %1877  ;;  %v1275_v61 = vsel %vm1147_vm0, 1, %v9127_v0  ;;  %v1276_v16 = vsel %vm6806_vm14, 1, %v9127_v0  ;;  %vm1149_vm1 = vmor %vm749_vm11, %vm1021_vm2  ;;  %vm9372_vm2 = vnez %v9147_v9 }
 0x269   :  { %v1880_v53 = vcvt.f32.s32 %v1878_v14  ;;  %v1888_v19 = vpop.xlane.xlu1 %1887  ;;  %v6798_v54 = vadd.s32 %v1869_v10, %v1867_v45  ;;  %v2317_v17 = vcvt.s32.f32 %v2315_v13  ;;  %v2318_v13 = vcvt.s32.f32 %v2316_v12 }
 0x26b   :  { %9361 = vst [vmem:[#allocation43_spill] sm:$0xff] %v6798_v54  ;;  %v1881_v59 = vshll.u32 %v1880_v53, 16  ;;  %2297 = vadd.xlane.f32.xlu0 %v2294_v36  ;;  %v9367_v53 = vld [vmem:[#allocation49_spill] sm:$0xff]  ;;  %v2327_v36 = vand.u32 65535, %v1275_v61  ;;  %v1891_v54 = vcvt.f32.s32 %v1888_v19 }
 0x26c   :  { %2307 = vadd.xlane.f32.xlu1 %v2305_v62  ;;  %v1890_v45 = vpop.xlane.xlu0 %1889  ;;  %vm878_vm12 = vcmp.eq.f32.partialorder %v6703_v7, %v9367_v53  ;;  %vm750_vm15 = vcmp.gt.f32.partialorder %v6703_v7, %v9367_v53 }
 0x26d   :  { %v1892_v3 = vcvt.f32.s32 %v1890_v45  ;;  %v1900_v49 = vpop.xlane.xlu1 %1899  ;;  %v6814_v10 = vadd.s32 %v1881_v59, %v1879_v5  ;;  %vm1022_vm0 = vmand %vm878_vm12, %vm9311_vm8  ;;  %v2328_v5 = vshrl.u32 %v1275_v61, 16  ;;  %v9369_v45 = vld [vmem:[#allocation50_spill] sm:$0xff]  ;;  %v2329_v14 = vcvt.s32.f32 %v2327_v36 }
 0x26e   :  { %vm879_vm6 = vcmp.eq.f32.partialorder %v6703_v7, %v9369_v45  ;;  %vm6833_vm14 = vmor %vm750_vm15, %vm1022_vm0  ;;  %v2340_v61 = vshrl.u32 %v1276_v16, 16  ;;  %vm751_vm11 = vcmp.gt.f32.partialorder %v6703_v7, %v9369_v45 }
 0x26f   :  { %9366 = vst [vmem:[#allocation44_spill] sm:$0xff] %v6814_v10  ;;  %v1893_v62 = vshll.u32 %v1892_v3, 16  ;;  %2309 = vadd.xlane.f32.xlu0 %v2306_v57  ;;  %v2339_v3 = vand.u32 65535, %v1276_v16  ;;  %v1903_v57 = vcvt.f32.s32 %v1900_v49  ;;  %vm1023_vm12 = vmand %vm879_vm6, %vm9372_vm2  ;;  %v2330_v36 = vcvt.s32.f32 %v2328_v5 }
 0x270   :  { %2319 = vadd.xlane.f32.xlu1 %v2317_v17  ;;  %v1902_v52 = vpop.xlane.xlu0 %1901  ;;  %v1277_v17 = vsel %vm1149_vm1, 1, %v9127_v0  ;;  %v1278_v16 = vsel %vm6833_vm14, 1, %v9127_v0  ;;  %vm1151_vm1 = vmor %vm751_vm11, %vm1023_vm12 }
 0x271   :  { %v1904_v59 = vcvt.f32.s32 %v1902_v52  ;;  %v1912_v60 = vpop.xlane.xlu1 %1911  ;;  %v6825_v19 = vadd.s32 %v1893_v62, %v1891_v54  ;;  %v2341_v53 = vcvt.s32.f32 %v2339_v3  ;;  %v2342_v3 = vcvt.s32.f32 %v2340_v61 }
 0x273   :  { %9368 = vst [vmem:[#allocation45_spill] sm:$0xff] %v6825_v19  ;;  %v1905_v10 = vshll.u32 %v1904_v59, 16  ;;  %2321 = vadd.xlane.f32.xlu0 %v2318_v13  ;;  %v9374_v59 = vld [vmem:[#allocation51_spill] sm:$0xff]  ;;  %v2351_v13 = vand.u32 65535, %v1277_v17  ;;  %v1915_v19 = vcvt.f32.s32 %v1912_v60 }
 0x274   :  { %2331 = vadd.xlane.f32.xlu1 %v2329_v14  ;;  %v1914_v54 = vpop.xlane.xlu0 %1913  ;;  %vm880_vm15 = vcmp.eq.f32.partialorder %v6703_v7, %v9374_v59  ;;  %vm752_vm6 = vcmp.gt.f32.partialorder %v6703_v7, %v9374_v59 }
 0x275   :  { %v1916_v12 = vcvt.f32.s32 %v1914_v54  ;;  %v1924_v49 = vpop.xlane.xlu1 %1923  ;;  %v6841_v62 = vadd.s32 %v1905_v10, %v1903_v57  ;;  %vm1024_vm0 = vmand %vm880_vm15, %vm9256_vm10  ;;  %v2352_v57 = vshrl.u32 %v1277_v17, 16  ;;  %v9376_v54 = vld [vmem:[#allocation52_spill] sm:$0xff]  ;;  %v2353_v52 = vcvt.s32.f32 %v2351_v13 }
 0x276   :  { %vm881_vm2 = vcmp.eq.f32.partialorder %v6703_v7, %v9376_v54  ;;  %vm6860_vm14 = vmor %vm752_vm6, %vm1024_vm0  ;;  %v2364_v17 = vshrl.u32 %v1278_v16, 16  ;;  %vm753_vm11 = vcmp.gt.f32.partialorder %v6703_v7, %v9376_v54 }
 0x277   :  { %9373 = vst [vmem:[#allocation46_spill] sm:$0xff] %v6841_v62  ;;  %v1917_v14 = vshll.u32 %v1916_v12, 16  ;;  %2333 = vadd.xlane.f32.xlu0 %v2330_v36  ;;  %v2363_v12 = vand.u32 65535, %v1278_v16  ;;  %v1927_v36 = vcvt.f32.s32 %v1924_v49  ;;  %vm1025_vm12 = vmand %vm881_vm2, %vm9261_vm4  ;;  %v2354_v13 = vcvt.s32.f32 %v2352_v57 }
 0x278   :  { %2343 = vadd.xlane.f32.xlu1 %v2341_v53  ;;  %v1926_v5 = vpop.xlane.xlu0 %1925  ;;  %v1279_v53 = vsel %vm1151_vm1, 1, %v9127_v0  ;;  %v1280_v16 = vsel %vm6860_vm14, 1, %v9127_v0  ;;  %vm1153_vm6 = vmor %vm753_vm11, %vm1025_vm12 }
 0x279   :  { %v1928_v10 = vcvt.f32.s32 %v1926_v5  ;;  %v1936_v45 = vpop.xlane.xlu1 %1935  ;;  %v6852_v60 = vadd.s32 %v1917_v14, %v1915_v19  ;;  %v2365_v59 = vcvt.s32.f32 %v2363_v12  ;;  %v2366_v12 = vcvt.s32.f32 %v2364_v17 }
 0x27b   :  { %9375 = vst [vmem:[#allocation47_spill] sm:$0xff] %v6852_v60  ;;  %v1929_v62 = vshll.u32 %v1928_v10, 16  ;;  %2345 = vadd.xlane.f32.xlu0 %v2342_v3  ;;  %v9380_v10 = vld [vmem:[#allocation53_spill] sm:$0xff]  ;;  %v2375_v3 = vand.u32 65535, %v1279_v53  ;;  %v1939_v60 = vcvt.f32.s32 %v1936_v45 }
 0x27c   :  { %2355 = vadd.xlane.f32.xlu1 %v2353_v52  ;;  %v1938_v19 = vpop.xlane.xlu0 %1937  ;;  %vm882_vm15 = vcmp.eq.f32.partialorder %v6703_v7, %v9380_v10  ;;  %vm754_vm2 = vcmp.gt.f32.partialorder %v6703_v7, %v9380_v10 }
 0x27d   :  { %v1940_v61 = vcvt.f32.s32 %v1938_v19  ;;  %v1948_v49 = vpop.xlane.xlu1 %1947  ;;  %v6868_v14 = vadd.s32 %v1929_v62, %v1927_v36  ;;  %vm1026_vm1 = vmand %vm882_vm15, %vm9205_vm9  ;;  %v2376_v36 = vshrl.u32 %v1279_v53, 16  ;;  %v9382_v19 = vld [vmem:[#allocation54_spill] sm:$0xff]  ;;  %v2377_v5 = vcvt.s32.f32 %v2375_v3 }
 0x27e   :  { %vm883_vm0 = vcmp.eq.f32.partialorder %v6703_v7, %v9382_v19  ;;  %vm6887_vm14 = vmor %vm754_vm2, %vm1026_vm1  ;;  %v2388_v53 = vshrl.u32 %v1280_v16, 16  ;;  %vm755_vm11 = vcmp.gt.f32.partialorder %v6703_v7, %v9382_v19  ;;  %vm884_vm15 = vcmp.eq.f32.partialorder %v6703_v7, %v5829_v31 }
 0x27f   :  { %9379 = vst [vmem:[#allocation48_spill] sm:$0xff] %v6868_v14  ;;  %v1941_v52 = vshll.u32 %v1940_v61, 16  ;;  %2357 = vadd.xlane.f32.xlu0 %v2354_v13  ;;  %v2387_v61 = vand.u32 65535, %v1280_v16  ;;  %v1951_v13 = vcvt.f32.s32 %v1948_v49  ;;  %vm1027_vm12 = vmand %vm883_vm0, %vm5808_vm3  ;;  %v2378_v3 = vcvt.s32.f32 %v2376_v36 }
 0x280   :  { %2367 = vadd.xlane.f32.xlu1 %v2365_v59  ;;  %v1950_v57 = vpop.xlane.xlu0 %1949  ;;  %v1281_v59 = vsel %vm1153_vm6, 1, %v9127_v0  ;;  %v1282_v16 = vsel %vm6887_vm14, 1, %v9127_v0  ;;  %vm756_vm2 = vcmp.gt.f32.partialorder %v6703_v7, %v5829_v31  ;;  %vm6904_vm6 = vmor %vm755_vm11, %vm1027_vm12  ;;  %vm9392_vm12 = vnez %v9166_v32 }
 0x281   :  { %v1952_v62 = vcvt.f32.s32 %v1950_v57  ;;  %v1960_v54 = vpop.xlane.xlu1 %1959  ;;  %v6879_v45 = vadd.s32 %v1941_v52, %v1939_v60  ;;  %v2389_v10 = vcvt.s32.f32 %v2387_v61  ;;  %vm1028_vm1 = vmand %vm884_vm15, %vm9214_vm5  ;;  %v2390_v61 = vcvt.s32.f32 %v2388_v53 }
 0x282   :  { %v616_v57 = vcombine.high %v6444_v47, %v6444_v47  ;;  %vm6922_vm14 = vmor %vm756_vm2, %vm1028_vm1  ;;  %v2412_v53 = vshrl.u32 %v1282_v16, 16  ;;  %vm886_vm2 = vcmp.eq.f32.partialorder %v6703_v7, %v5855_v34 }
 0x283   :  { %9381 = vst [vmem:[#allocation49_spill] sm:$0xff] %v6879_v45  ;;  %v1953_v14 = vshll.u32 %v1952_v62, 16  ;;  %2369 = vadd.xlane.f32.xlu0 %v2366_v12  ;;  %v2399_v62 = vand.u32 65535, %v1281_v59  ;;  %v1963_v12 = vcvt.f32.s32 %v1960_v54 }
 0x284   :  { %2379 = vadd.xlane.f32.xlu1 %v2377_v5  ;;  %v1962_v60 = vpop.xlane.xlu0 %1961  ;;  %v6933_v31 = vrot.slane %v616_v57, %v5409_v8 }
 0x285   :  { %v1964_v17 = vcvt.f32.s32 %v1962_v60  ;;  %v1972_v49 = vpop.xlane.xlu1 %1971  ;;  %v6895_v52 = vadd.s32 %v1953_v14, %v1951_v13  ;;  %v2400_v13 = vshrl.u32 %v1281_v59, 16 }
 0x286   :  { %v1975_v45 = vcvt.f32.s32 %v1972_v49 }
 0x287   :  { %9385 = vst [vmem:[#allocation50_spill] sm:$0xff] %v6895_v52  ;;  %v1965_v5 = vshll.u32 %v1964_v17, 16  ;;  %2381 = vadd.xlane.f32.xlu0 %v2378_v3  ;;  %v9389_v17 = vld [vmem:[#allocation55_spill] sm:$0xff]  ;;  %v2401_v3 = vcvt.s32.f32 %v2399_v62  ;;  %v2411_v52 = vand.u32 65535, %v1282_v16 }
 0x288   :  { %2391 = vadd.xlane.f32.xlu1 %v2389_v10  ;;  %v1974_v14 = vpop.xlane.xlu0 %1973  ;;  %vm885_vm0 = vcmp.eq.f32.partialorder %v6703_v7, %v9389_v17  ;;  %vm757_vm11 = vcmp.gt.f32.partialorder %v6703_v7, %v9389_v17 }
 0x289   :  { %v1976_v36 = vcvt.f32.s32 %v1974_v14  ;;  %v1984_v54 = vpop.xlane.xlu1 %1983  ;;  %v6910_v60 = vadd.s32 %v1965_v5, %v1963_v12  ;;  %v1283_v14 = vsel %vm6904_vm6, 1, %v9127_v0  ;;  %vm1029_vm15 = vmand %vm885_vm0, %vm9392_vm12  ;;  %v2402_v12 = vcvt.s32.f32 %v2400_v13 }
 0x28a   :  { %v2413_v19 = vcvt.s32.f32 %v2411_v52  ;;  %v1987_v16 = vcvt.f32.s32 %v1984_v54  ;;  %vm758_vm6 = vcmp.gt.f32.partialorder %v6703_v7, %v5855_v34  ;;  %vm1157_vm1 = vmor %vm757_vm11, %vm1029_vm15  ;;  %vm9394_vm0 = vnez %v9168_v35 }
 0x28b   :  { %9388 = vst [vmem:[#allocation51_spill] sm:$0xff] %v6910_v60  ;;  %v1977_v10 = vshll.u32 %v1976_v36, 16  ;;  %2393 = vadd.xlane.f32.xlu0 %v2390_v61  ;;  %v2423_v36 = vand.u32 65535, %v1283_v14  ;;  %vm1030_vm12 = vmand %vm886_vm2, %vm9394_vm0  ;;  %v2414_v13 = vcvt.s32.f32 %v2412_v53  ;;  %v2424_v57 = vshrl.u32 %v1283_v14, 16 }
 0x28c   :  { %2403 = vadd.xlane.f32.xlu1 %v2401_v3  ;;  %v1986_v47 = vpop.xlane.xlu0 %1985  ;;  %v1284_v3 = vsel %vm6922_vm14, 1, %v9127_v0  ;;  %vm887_vm14 = vcmp.eq.f32.partialorder %v6933_v31, %v5864_v26  ;;  %v1285_v17 = vsel %vm1157_vm1, 1, %v9127_v0  ;;  %vm6955_vm11 = vmor %vm758_vm6, %vm1030_vm12  ;;  %vm759_vm15 = vcmp.gt.f32.partialorder %v6933_v31, %v5864_v26 }
 0x28d   :  { %v1988_v49 = vcvt.f32.s32 %v1986_v47  ;;  %v1996_v62 = vpop.xlane.xlu1 %1995  ;;  %v6930_v5 = vadd.s32 %v1977_v10, %v1975_v45  ;;  %v2425_v59 = vcvt.s32.f32 %v2423_v36  ;;  %v2435_v47 = vand.u32 65535, %v1284_v3 }
 0x28e   :  { %v2436_v53 = vshrl.u32 %v1284_v3, 16  ;;  %vm9398_vm2 = vnez %v9118_v21  ;;  %vm888_vm12 = vcmp.eq.f32.partialorder %v6933_v31, %v5873_v27  ;;  %v2447_v7 = vand.u32 65535, %v1285_v17 }
 0x28f   :  { %9393 = vst [vmem:[#allocation52_spill] sm:$0xff] %v6930_v5  ;;  %v1989_v61 = vshll.u32 %v1988_v49, 16  ;;  %2405 = vadd.xlane.f32.xlu0 %v2402_v12  ;;  %v1999_v49 = vcvt.f32.s32 %v1996_v62  ;;  %vm1031_vm0 = vmand %vm887_vm14, %vm9398_vm2  ;;  %v2437_v34 = vcvt.s32.f32 %v2435_v47  ;;  %v1286_v26 = vsel %vm6955_vm11, 1, %v9127_v0 }
 0x290   :  { %2415 = vadd.xlane.f32.xlu1 %v2413_v19  ;;  %v1998_v45 = vpop.xlane.xlu0 %1997  ;;  %vm760_vm6 = vcmp.gt.f32.partialorder %v6933_v31, %v5873_v27  ;;  %vm1159_vm1 = vmor %vm759_vm15, %vm1031_vm0  ;;  %v2448_v47 = vshrl.u32 %v1285_v17, 16  ;;  %vm889_vm2 = vcmp.eq.f32.partialorder %v6933_v31, %v5876_v15  ;;  %vm761_vm11 = vcmp.gt.f32.partialorder %v6933_v31, %v5876_v15 }
 0x291   :  { %v2000_v52 = vcvt.f32.s32 %v1998_v45  ;;  %v2008_v54 = vpop.xlane.xlu1 %2007  ;;  %v6947_v10 = vadd.s32 %v1989_v61, %v1987_v16  ;;  %v2426_v16 = vcvt.s32.f32 %v2424_v57  ;;  %vm1032_vm14 = vmand %vm888_vm12, %vm9289_vm7  ;;  %vm9403_vm15 = vnez %v9126_v11 }
 0x292   :  { %v2011_v45 = vcvt.f32.s32 %v2008_v54  ;;  %vm6982_vm0 = vmor %vm760_vm6, %vm1032_vm14  ;;  %vm890_vm6 = vcmp.eq.f32.partialorder %v6933_v31, %v5889_v42  ;;  %vm9405_vm14 = vnez %v9130_v24  ;;  %vm891_vm7 = vcmp.eq.f32.partialorder %v6933_v31, %v5893_v1 }
 0x293   :  { %9395 = vst [vmem:[#allocation53_spill] sm:$0xff] %v6947_v10  ;;  %v2001_v12 = vshll.u32 %v2000_v52, 16  ;;  %2417 = vadd.xlane.f32.xlu0 %v2414_v13  ;;  %vm1033_vm12 = vmand %vm889_vm2, %vm9403_vm15  ;;  %v1288_v15 = vsel %vm6982_vm0, 1, %v9127_v0  ;;  %vm762_vm2 = vcmp.gt.f32.partialorder %v6933_v31, %v5889_v42 }
 0x294   :  { %2427 = vadd.xlane.f32.xlu1 %v2425_v59  ;;  %v2010_v14 = vpop.xlane.xlu0 %2009  ;;  %v2438_v59 = vcvt.s32.f32 %v2436_v53  ;;  %v2460_v53 = vshrl.u32 %v1286_v26, 16  ;;  %vm1034_vm15 = vmand %vm890_vm6, %vm9405_vm14 }
 0x295   :  { %v2012_v62 = vcvt.f32.s32 %v2010_v14  ;;  %v2020_v36 = vpop.xlane.xlu1 %2019  ;;  %v6963_v61 = vadd.s32 %v2001_v12, %v1999_v49  ;;  %v2449_v49 = vcvt.s32.f32 %v2447_v7  ;;  %v2459_v12 = vand.u32 65535, %v1286_v26  ;;  %vm7009_vm0 = vmor %vm762_vm2, %vm1034_vm15 }
 0x296   :  { %v2023_v19 = vcvt.f32.s32 %v2020_v36  ;;  %v2450_v7 = vcvt.s32.f32 %v2448_v47  ;;  %vm892_vm15 = vcmp.eq.f32.partialorder %v6933_v31, %v5902_v37 }
 0x297   :  { %9399 = vst [vmem:[#allocation54_spill] sm:$0xff] %v6963_v61  ;;  %v2013_v52 = vshll.u32 %v2012_v62, 16  ;;  %2429 = vadd.xlane.f32.xlu0 %v2426_v16  ;;  %v1287_v62 = vsel %vm1159_vm1, 1, %v9127_v0  ;;  %v2461_v27 = vcvt.s32.f32 %v2459_v12  ;;  %vm1161_vm1 = vmor %vm761_vm11, %vm1033_vm12  ;;  %vm763_vm11 = vcmp.gt.f32.partialorder %v6933_v31, %v5893_v1 }
 0x298   :  { %2439 = vadd.xlane.f32.xlu1 %v2437_v34  ;;  %v2022_v3 = vpop.xlane.xlu0 %2021  ;;  %v2472_v12 = vshrl.u32 %v1287_v62, 16  ;;  %vm9409_vm12 = vnez %v9133_v22  ;;  %v1290_v1 = vsel %vm7009_vm0, 1, %v9127_v0 }
 0x299   :  { %v2024_v13 = vcvt.f32.s32 %v2022_v3  ;;  %v2032_v57 = vpop.xlane.xlu1 %2031  ;;  %v6974_v54 = vadd.s32 %v2013_v52, %v2011_v45  ;;  %v2471_v52 = vand.u32 65535, %v1287_v62  ;;  %vm1035_vm6 = vmand %vm891_vm7, %vm9409_vm12  ;;  %vm764_vm7 = vcmp.gt.f32.partialorder %v6933_v31, %v5902_v37 }
 0x29a   :  { %v2035_v3 = vcvt.f32.s32 %v2032_v57  ;;  %vm1163_vm2 = vmor %vm763_vm11, %vm1035_vm6  ;;  %vm893_vm12 = vcmp.eq.f32.partialorder %v6933_v31, %v5905_v38  ;;  %vm765_vm11 = vcmp.gt.f32.partialorder %v6933_v31, %v5905_v38  ;;  %vm9414_vm6 = vnez %v9140_v48 }
 0x29b   :  { %9400 = vst [vmem:[#allocation55_spill] sm:$0xff] %v6974_v54  ;;  %v2025_v14 = vshll.u32 %v2024_v13, 16  ;;  %2441 = vadd.xlane.f32.xlu0 %v2438_v59 }
 0x29c   :  { %2451 = vadd.xlane.f32.xlu1 %v2449_v49  ;;  %v2034_v17 = vpop.xlane.xlu0 %2033  ;;  %v2462_v49 = vcvt.s32.f32 %v2460_v53  ;;  %v2484_v53 = vshrl.u32 %v1288_v15, 16 }
 0x29d   :  { %v2036_v36 = vcvt.f32.s32 %v2034_v17  ;;  %v2044_v34 = vpop.xlane.xlu1 %2043  ;;  %v6990_v45 = vadd.s32 %v2025_v14, %v2023_v19  ;;  %v2473_v19 = vcvt.s32.f32 %v2471_v52  ;;  %v2483_v14 = vand.u32 65535, %v1288_v15 }
 0x29e   :  { %v2047_v16 = vcvt.f32.s32 %v2044_v34  ;;  %v2474_v52 = vcvt.s32.f32 %v2472_v12 }
 0x29f   :  { %9404 = vst [vmem:[#allocation73_spill] sm:$0xff] %v6990_v45  ;;  %v2037_v13 = vshll.u32 %v2036_v36, 16  ;;  %2453 = vadd.xlane.f32.xlu0 %v2450_v7  ;;  %v1289_v36 = vsel %vm1161_vm1, 1, %v9127_v0  ;;  %v2485_v42 = vcvt.s32.f32 %v2483_v14  ;;  %vm1036_vm1 = vmand %vm892_vm15, %vm9360_vm13 }
 0x2a0   :  { %2463 = vadd.xlane.f32.xlu1 %v2461_v27  ;;  %v2046_v26 = vpop.xlane.xlu0 %2045  ;;  %v2496_v14 = vshrl.u32 %v1289_v36, 16  ;;  %vm7036_vm0 = vmor %vm764_vm7, %vm1036_vm1  ;;  %vm894_vm7 = vcmp.eq.f32.partialorder %v6933_v31, %v5918_v43 }
 0x2a1   :  { %v2048_v59 = vcvt.f32.s32 %v2046_v26  ;;  %v2056_v47 = vpop.xlane.xlu1 %2055  ;;  %v7001_v57 = vadd.s32 %v2037_v13, %v2035_v3  ;;  %v2495_v13 = vand.u32 65535, %v1289_v36  ;;  %vm1037_vm15 = vmand %vm893_vm12, %vm9414_vm6  ;;  %v1292_v38 = vsel %vm7036_vm0, 1, %v9127_v0 }
 0x2a2   :  { %v2059_v26 = vcvt.f32.s32 %v2056_v47  ;;  %vm766_vm12 = vcmp.gt.f32.partialorder %v6933_v31, %v5918_v43  ;;  %vm1038_vm1 = vmand %vm894_vm7, %vm9311_vm8 }
 0x2a3   :  { %9406 = vst [vmem:[#allocation74_spill] sm:$0xff] %v7001_v57  ;;  %v2049_v17 = vshll.u32 %v2048_v59, 16  ;;  %2465 = vadd.xlane.f32.xlu0 %v2462_v49  ;;  %vm7063_vm0 = vmor %vm766_vm12, %vm1038_vm1  ;;  %vm896_vm12 = vcmp.eq.f32.partialorder %v6933_v31, %v5931_v29 }
 0x2a4   :  { %2475 = vadd.xlane.f32.xlu1 %v2473_v19  ;;  %v2058_v62 = vpop.xlane.xlu0 %2057  ;;  %v2486_v19 = vcvt.s32.f32 %v2484_v53  ;;  %v2508_v53 = vshrl.u32 %v1290_v1, 16  ;;  %vm1040_vm1 = vmand %vm896_vm12, %vm9256_vm10  ;;  %vm898_vm12 = vcmp.eq.f32.partialorder %v6933_v31, %v5947_v50 }
 0x2a5   :  { %v2060_v34 = vcvt.f32.s32 %v2058_v62  ;;  %v2068_v27 = vpop.xlane.xlu1 %2067  ;;  %v7017_v3 = vadd.s32 %v2049_v17, %v2047_v16  ;;  %v2497_v16 = vcvt.s32.f32 %v2495_v13  ;;  %v2507_v17 = vand.u32 65535, %v1290_v1 }
 0x2a6   :  { %v2071_v7 = vcvt.f32.s32 %v2068_v27  ;;  %v2498_v13 = vcvt.s32.f32 %v2496_v14 }
 0x2a7   :  { %9410 = vst [vmem:[#allocation75_spill] sm:$0xff] %v7017_v3  ;;  %v2061_v59 = vshll.u32 %v2060_v34, 16  ;;  %2477 = vadd.xlane.f32.xlu0 %v2474_v52  ;;  %v1291_v34 = vsel %vm1163_vm2, 1, %v9127_v0  ;;  %v2509_v37 = vcvt.s32.f32 %v2507_v17  ;;  %vm1165_vm2 = vmor %vm765_vm11, %vm1037_vm15  ;;  %v2531_v52 = vand.u32 65535, %v1292_v38 }
 0x2a8   :  { %2487 = vadd.xlane.f32.xlu1 %v2485_v42  ;;  %v2070_v15 = vpop.xlane.xlu0 %2069  ;;  %v2520_v17 = vshrl.u32 %v1291_v34, 16  ;;  %vm9420_vm15 = vnez %v9147_v9 }
 0x2a9   :  { %v2072_v49 = vcvt.f32.s32 %v2070_v15  ;;  %v2080_v12 = vpop.xlane.xlu1 %2079  ;;  %v7028_v47 = vadd.s32 %v2061_v59, %v2059_v26  ;;  %v2519_v59 = vand.u32 65535, %v1291_v34  ;;  %v2533_v43 = vcvt.s32.f32 %v2531_v52 }
 0x2aa   :  { %v2083_v15 = vcvt.f32.s32 %v2080_v12 }
 0x2ab   :  { %9411 = vst [vmem:[#allocation76_spill] sm:$0xff] %v7028_v47  ;;  %v2073_v62 = vshll.u32 %v2072_v49, 16  ;;  %2489 = vadd.xlane.f32.xlu0 %v2486_v19 }
 0x2ac   :  { %2499 = vadd.xlane.f32.xlu1 %v2497_v16  ;;  %v2082_v36 = vpop.xlane.xlu0 %2081  ;;  %v2510_v16 = vcvt.s32.f32 %v2508_v53  ;;  %v2532_v53 = vshrl.u32 %v1292_v38, 16  ;;  %v1294_v38 = vsel %vm7063_vm0, 1, %v9127_v0 }
 0x2ad   :  { %v2084_v27 = vcvt.f32.s32 %v2082_v36  ;;  %v2092_v42 = vpop.xlane.xlu1 %2091  ;;  %v7044_v26 = vadd.s32 %v2073_v62, %v2071_v7  ;;  %v9417_v7 = vld [vmem:[#allocation56_spill] sm:$0xff]  ;;  %v2521_v62 = vcvt.s32.f32 %v2519_v59 }
 0x2ae   :  { %vm895_vm6 = vcmp.eq.f32.partialorder %v6933_v31, %v9417_v7  ;;  %v2095_v36 = vcvt.f32.s32 %v2092_v42  ;;  %vm767_vm11 = vcmp.gt.f32.partialorder %v6933_v31, %v9417_v7  ;;  %v2534_v52 = vcvt.s32.f32 %v2532_v53 }
 0x2af   :  { %9415 = vst [vmem:[#allocation77_spill] sm:$0xff] %v7044_v26  ;;  %v2085_v49 = vshll.u32 %v2084_v27, 16  ;;  %2501 = vadd.xlane.f32.xlu0 %v2498_v13  ;;  %v1293_v13 = vsel %vm1165_vm2, 1, %v9127_v0  ;;  %vm1039_vm7 = vmand %vm895_vm6, %vm9420_vm15  ;;  %vm768_vm6 = vcmp.gt.f32.partialorder %v6933_v31, %v5931_v29  ;;  %vm897_vm15 = vcmp.eq.f32.partialorder %v6933_v31, %v5934_v30 }
 0x2b0   :  { %2511 = vadd.xlane.f32.xlu1 %v2509_v37  ;;  %v2094_v1 = vpop.xlane.xlu0 %2093  ;;  %vm1167_vm2 = vmor %vm767_vm11, %vm1039_vm7  ;;  %v2555_v37 = vand.u32 65535, %v1294_v38  ;;  %v2556_v53 = vshrl.u32 %v1294_v38, 16  ;;  %vm769_vm11 = vcmp.gt.f32.partialorder %v6933_v31, %v5934_v30 }
 0x2b1   :  { %v2096_v19 = vcvt.f32.s32 %v2094_v1  ;;  %v2104_v14 = vpop.xlane.xlu1 %2103  ;;  %v7055_v12 = vadd.s32 %v2085_v49, %v2083_v15  ;;  %v2522_v15 = vcvt.s32.f32 %v2520_v17  ;;  %v2543_v1 = vand.u32 65535, %v1293_v13  ;;  %vm7090_vm0 = vmor %vm768_vm6, %vm1040_vm1 }
 0x2b2   :  { %vm1041_vm7 = vmand %vm897_vm15, %vm9261_vm4  ;;  %v2557_v29 = vcvt.s32.f32 %v2555_v37  ;;  %v1296_v30 = vsel %vm7090_vm0, 1, %v9127_v0  ;;  %vm770_vm15 = vcmp.gt.f32.partialorder %v6933_v31, %v5947_v50  ;;  %v2558_v37 = vcvt.s32.f32 %v2556_v53 }
 0x2b3   :  { %9416 = vst [vmem:[#allocation78_spill] sm:$0xff] %v7055_v12  ;;  %v2097_v27 = vshll.u32 %v2096_v19, 16  ;;  %2513 = vadd.xlane.f32.xlu0 %v2510_v16  ;;  %v2107_v19 = vcvt.f32.s32 %v2104_v14  ;;  %vm1169_vm6 = vmor %vm769_vm11, %vm1041_vm7  ;;  %v2580_v53 = vshrl.u32 %v1296_v30, 16 }
 0x2b4   :  { %2523 = vadd.xlane.f32.xlu1 %v2521_v62  ;;  %v2106_v34 = vpop.xlane.xlu0 %2105 }
 0x2b5   :  { %v2108_v42 = vcvt.f32.s32 %v2106_v34  ;;  %v2116_v59 = vpop.xlane.xlu1 %2115  ;;  %v7071_v49 = vadd.s32 %v2097_v27, %v2095_v36  ;;  %v2544_v36 = vshrl.u32 %v1293_v13, 16  ;;  %v2545_v27 = vcvt.s32.f32 %v2543_v1 }
 0x2b6   :  { %v2119_v34 = vcvt.f32.s32 %v2116_v59 }
 0x2b7   :  { %9421 = vst [vmem:[#allocation56_spill] sm:$0xff] %v7071_v49  ;;  %v2109_v16 = vshll.u32 %v2108_v42, 16  ;;  %2525 = vadd.xlane.f32.xlu0 %v2522_v15  ;;  %v1295_v15 = vsel %vm1167_vm2, 1, %v9127_v0  ;;  %vm1042_vm2 = vmand %vm898_vm12, %vm9205_vm9  ;;  %vm900_vm12 = vcmp.eq.f32.partialorder %v6933_v31, %v5960_v44 }
 0x2b8   :  { %2535 = vadd.xlane.f32.xlu1 %v2533_v43  ;;  %v2118_v17 = vpop.xlane.xlu0 %2117  ;;  %vm7117_vm0 = vmor %vm770_vm15, %vm1042_vm2  ;;  %vm772_vm15 = vcmp.gt.f32.partialorder %v6933_v31, %v5960_v44 }
 0x2b9   :  { %v2120_v7 = vcvt.f32.s32 %v2118_v17  ;;  %v2128_v62 = vpop.xlane.xlu1 %2127  ;;  %v7082_v14 = vadd.s32 %v2109_v16, %v2107_v19  ;;  %v2546_v19 = vcvt.s32.f32 %v2544_v36  ;;  %v2567_v17 = vand.u32 65535, %v1295_v15  ;;  %vm1044_vm2 = vmand %vm900_vm12, %vm9214_vm5 }
 0x2bb   :  { %9422 = vst [vmem:[#allocation79_spill] sm:$0xff] %v7082_v14  ;;  %v2121_v42 = vshll.u32 %v2120_v7, 16  ;;  %2537 = vadd.xlane.f32.xlu0 %v2534_v52  ;;  %v2131_v7 = vcvt.f32.s32 %v2128_v62  ;;  %v2569_v43 = vcvt.s32.f32 %v2567_v17 }
 0x2bc   :  { %2547 = vadd.xlane.f32.xlu1 %v2545_v27  ;;  %v2130_v13 = vpop.xlane.xlu0 %2129 }
 0x2bd   :  { %v2132_v59 = vcvt.f32.s32 %v2130_v13  ;;  %v2140_v1 = vpop.xlane.xlu1 %2139  ;;  %v7098_v16 = vadd.s32 %v2121_v42, %v2119_v34  ;;  %v2568_v34 = vshrl.u32 %v1295_v15, 16  ;;  %v9427_v42 = vld [vmem:[#allocation57_spill] sm:$0xff]  ;;  %v2579_v13 = vand.u32 65535, %v1296_v30 }
 0x2be   :  { %vm899_vm1 = vcmp.eq.f32.partialorder %v6933_v31, %v9427_v42  ;;  %vm771_vm11 = vcmp.gt.f32.partialorder %v6933_v31, %v9427_v42  ;;  %v1298_v30 = vsel %vm7117_vm0, 1, %v9127_v0  ;;  %vm7152_vm0 = vmor %vm772_vm15, %vm1044_vm2  ;;  %vm902_vm15 = vcmp.eq.f32.partialorder %v6933_v31, %v5976_v51 }
 0x2bf   :  { %9425 = vst [vmem:[#allocation80_spill] sm:$0xff] %v7098_v16  ;;  %v2133_v52 = vshll.u32 %v2132_v59, 16  ;;  %2549 = vadd.xlane.f32.xlu0 %v2546_v19  ;;  %v2143_v59 = vcvt.f32.s32 %v2140_v1  ;;  %vm1043_vm7 = vmand %vm899_vm1, %vm5808_vm3  ;;  %v2581_v50 = vcvt.s32.f32 %v2579_v13  ;;  %vm901_vm1 = vcmp.eq.f32.partialorder %v6933_v31, %v5963_v23 }
 0x2c0   :  { %2559 = vadd.xlane.f32.xlu1 %v2557_v29  ;;  %v2142_v38 = vpop.xlane.xlu0 %2141  ;;  %v1297_v29 = vsel %vm1169_vm6, 1, %v9127_v0  ;;  %vm7134_vm6 = vmor %vm771_vm11, %vm1043_vm7  ;;  %vm773_vm11 = vcmp.gt.f32.partialorder %v6933_v31, %v5963_v23  ;;  %vm9436_vm7 = vnez %v9166_v32 }
 0x2c1   :  { %v2144_v36 = vcvt.f32.s32 %v2142_v38  ;;  %v2152_v27 = vpop.xlane.xlu1 %2151  ;;  %v7109_v62 = vadd.s32 %v2133_v52, %v2131_v7  ;;  %v2570_v7 = vcvt.s32.f32 %v2568_v34  ;;  %v618_v38 = vcombine.high %v6681_v55, %v6681_v55  ;;  %vm1045_vm12 = vmand %vm901_vm1, %vm9436_vm7 }
 0x2c2   :  { %vm1173_vm2 = vmor %vm773_vm11, %vm1045_vm12  ;;  %vm9438_vm1 = vnez %v9168_v35 }
 0x2c3   :  { %9426 = vst [vmem:[#allocation81_spill] sm:$0xff] %v7109_v62  ;;  %v2145_v19 = vshll.u32 %v2144_v36, 16  ;;  %2561 = vadd.xlane.f32.xlu0 %v2558_v37  ;;  %v2591_v36 = vand.u32 65535, %v1297_v29  ;;  %v2155_v37 = vcvt.f32.s32 %v2152_v27  ;;  %v7163_v44 = vrot.slane %v618_v38, %v5409_v8  ;;  %vm1046_vm7 = vmand %vm902_vm15, %vm9438_vm1 }
 0x2c4   :  { %2571 = vadd.xlane.f32.xlu1 %v2569_v43  ;;  %v2154_v15 = vpop.xlane.xlu0 %2153  ;;  %v1301_v23 = vsel %vm1173_vm2, 1, %v9127_v0  ;;  %vm9443_vm15 = vnez %v9118_v21 }
 0x2c5   :  { %v2156_v1 = vcvt.f32.s32 %v2154_v15  ;;  %v2164_v17 = vpop.xlane.xlu1 %2163  ;;  %v7125_v52 = vadd.s32 %v2145_v19, %v2143_v59  ;;  %v2582_v59 = vcvt.s32.f32 %v2580_v53  ;;  %v2592_v19 = vshrl.u32 %v1297_v29, 16  ;;  %v9440_v29 = vld [vmem:[#allocation58_spill] sm:$0xff] }
 0x2c6   :  { %v2167_v62 = vcvt.f32.s32 %v2164_v17  ;;  %v2604_v53 = vshrl.u32 %v1298_v30, 16  ;;  %vm775_vm12 = vcmp.gt.f32.partialorder %v7163_v44, %v9440_v29  ;;  %vm905_vm5 = vcmp.eq.f32.partialorder %v7163_v44, %v5992_v41 }
 0x2c7   :  { %9430 = vst [vmem:[#allocation57_spill] sm:$0xff] %v7125_v52  ;;  %v2157_v43 = vshll.u32 %v2156_v1, 16  ;;  %2573 = vadd.xlane.f32.xlu0 %v2570_v7  ;;  %v2593_v1 = vcvt.s32.f32 %v2591_v36  ;;  %v2603_v7 = vand.u32 65535, %v1298_v30 }
 0x2c8   :  { %2583 = vadd.xlane.f32.xlu1 %v2581_v50  ;;  %v2166_v34 = vpop.xlane.xlu0 %2165  ;;  %v2606_v38 = vcvt.s32.f32 %v2604_v53 }
 0x2c9   :  { %v2168_v13 = vcvt.f32.s32 %v2166_v34  ;;  %v2176_v27 = vpop.xlane.xlu1 %2175  ;;  %v7140_v15 = vadd.s32 %v2157_v43, %v2155_v37  ;;  %v1299_v34 = vsel %vm7134_vm6, 1, %v9127_v0  ;;  %v2594_v37 = vcvt.s32.f32 %v2592_v19 }
 0x2ca   :  { %v2605_v42 = vcvt.s32.f32 %v2603_v7  ;;  %v2179_v30 = vcvt.f32.s32 %v2176_v27  ;;  %vm774_vm6 = vcmp.gt.f32.partialorder %v6933_v31, %v5976_v51  ;;  %v2616_v7 = vshrl.u32 %v1299_v34, 16 }
 0x2cb   :  { %9433 = vst [vmem:[#allocation82_spill] sm:$0xff] %v7140_v15  ;;  %v2169_v50 = vshll.u32 %v2168_v13, 16  ;;  %2585 = vadd.xlane.f32.xlu0 %v2582_v59  ;;  %v2615_v13 = vand.u32 65535, %v1299_v34  ;;  %vm7185_vm11 = vmor %vm774_vm6, %vm1046_vm7  ;;  %vm904_vm7 = vcmp.eq.f32.partialorder %v7163_v44, %v5989_v46  ;;  %v2639_v31 = vand.u32 65535, %v1301_v23 }
 0x2cc   :  { %2595 = vadd.xlane.f32.xlu1 %v2593_v1  ;;  %v2178_v55 = vpop.xlane.xlu0 %2177  ;;  %v1300_v1 = vsel %vm7152_vm0, 1, %v9127_v0  ;;  %vm903_vm0 = vcmp.eq.f32.partialorder %v7163_v44, %v9440_v29  ;;  %vm776_vm6 = vcmp.gt.f32.partialorder %v7163_v44, %v5989_v46  ;;  %v2640_v29 = vshrl.u32 %v1301_v23, 16 }
 0x2cd   :  { %v2180_v17 = vcvt.f32.s32 %v2178_v55  ;;  %v2188_v36 = vpop.xlane.xlu1 %2187  ;;  %v7160_v43 = vadd.s32 %v2169_v50, %v2167_v62  ;;  %v2617_v55 = vcvt.s32.f32 %v2615_v13  ;;  %v2628_v53 = vshrl.u32 %v1300_v1, 16  ;;  %vm1047_vm1 = vmand %vm903_vm0, %vm9443_vm15 }
 0x2ce   :  { %vm1175_vm2 = vmor %vm775_vm12, %vm1047_vm1  ;;  %vm9445_vm0 = vnez %v9122_v6  ;;  %vm9449_vm12 = vnez %v9126_v11 }
 0x2cf   :  { %9437 = vst [vmem:[#allocation83_spill] sm:$0xff] %v7160_v43  ;;  %v2181_v59 = vshll.u32 %v2180_v17, 16  ;;  %2597 = vadd.xlane.f32.xlu0 %v2594_v37  ;;  %v2627_v17 = vand.u32 65535, %v1300_v1  ;;  %v2191_v37 = vcvt.f32.s32 %v2188_v36  ;;  %v1302_v1 = vsel %vm7185_vm11, 1, %v9127_v0  ;;  %vm1048_vm15 = vmand %vm904_vm7, %vm9445_vm0 }
 0x2d0   :  { %2607 = vadd.xlane.f32.xlu1 %v2605_v42  ;;  %v2190_v62 = vpop.xlane.xlu0 %2189  ;;  %vm7212_vm1 = vmor %vm776_vm6, %vm1048_vm15  ;;  %vm777_vm11 = vcmp.gt.f32.partialorder %v7163_v44, %v5992_v41  ;;  %vm906_vm6 = vcmp.eq.f32.partialorder %v7163_v44, %v6005_v56 }
 0x2d1   :  { %v2192_v19 = vcvt.f32.s32 %v2190_v62  ;;  %v2200_v27 = vpop.xlane.xlu1 %2199  ;;  %v7177_v50 = vadd.s32 %v2181_v59, %v2179_v30  ;;  %v2618_v30 = vcvt.s32.f32 %v2616_v7  ;;  %v2629_v51 = vcvt.s32.f32 %v2627_v17  ;;  %vm1049_vm7 = vmand %vm905_vm5, %vm9449_vm12 }
 0x2d2   :  { %v2203_v62 = vcvt.f32.s32 %v2200_v27  ;;  %v2630_v7 = vcvt.s32.f32 %v2628_v53  ;;  %v2651_v17 = vand.u32 65535, %v1302_v1  ;;  %v2652_v53 = vshrl.u32 %v1302_v1, 16  ;;  %vm1050_vm0 = vmand %vm906_vm6, %vm9405_vm14 }
 0x2d3   :  { %9439 = vst [vmem:[#allocation84_spill] sm:$0xff] %v7177_v50  ;;  %v2193_v15 = vshll.u32 %v2192_v19, 16  ;;  %2609 = vadd.xlane.f32.xlu0 %v2606_v38  ;;  %v1304_v41 = vsel %vm7212_vm1, 1, %v9127_v0  ;;  %vm778_vm5 = vcmp.gt.f32.partialorder %v7163_v44, %v6005_v56  ;;  %vm780_vm6 = vcmp.gt.f32.partialorder %v7163_v44, %v6023_v39 }
 0x2d4   :  { %2619 = vadd.xlane.f32.xlu1 %v2617_v55  ;;  %v2202_v34 = vpop.xlane.xlu0 %2201  ;;  %v2641_v55 = vcvt.s32.f32 %v2639_v31  ;;  %v2653_v46 = vcvt.s32.f32 %v2651_v17  ;;  %v2675_v17 = vand.u32 65535, %v1304_v41  ;;  %vm7239_vm14 = vmor %vm778_vm5, %vm1050_vm0 }
 0x2d5   :  { %v2204_v36 = vcvt.f32.s32 %v2202_v34  ;;  %v2212_v13 = vpop.xlane.xlu1 %2211  ;;  %v7193_v59 = vadd.s32 %v2193_v15, %v2191_v37  ;;  %v1303_v34 = vsel %vm1175_vm2, 1, %v9127_v0  ;;  %vm1177_vm2 = vmor %vm777_vm11, %vm1049_vm7  ;;  %vm9455_vm11 = vnez %v9133_v22 }
 0x2d6   :  { %v2215_v37 = vcvt.f32.s32 %v2212_v13  ;;  %v2663_v31 = vand.u32 65535, %v1303_v34  ;;  %v1305_v6 = vsel %vm1177_vm2, 1, %v9127_v0  ;;  %vm908_vm7 = vcmp.eq.f32.partialorder %v7163_v44, %v6023_v39 }
 0x2d7   :  { %9444 = vst [vmem:[#allocation58_spill] sm:$0xff] %v7193_v59  ;;  %v2205_v19 = vshll.u32 %v2204_v36, 16  ;;  %2621 = vadd.xlane.f32.xlu0 %v2618_v30  ;;  %v2642_v30 = vcvt.s32.f32 %v2640_v29  ;;  %v9452_v29 = vld [vmem:[#allocation59_spill] sm:$0xff]  ;;  %v2677_v56 = vcvt.s32.f32 %v2675_v17  ;;  %vm1052_vm2 = vmand %vm908_vm7, %vm9360_vm13 }
 0x2d8   :  { %2631 = vadd.xlane.f32.xlu1 %v2629_v51  ;;  %v2214_v21 = vpop.xlane.xlu0 %2213  ;;  %vm907_vm15 = vcmp.eq.f32.partialorder %v7163_v44, %v9452_v29  ;;  %vm779_vm1 = vcmp.gt.f32.partialorder %v7163_v44, %v9452_v29  ;;  %vm1180_vm13 = vmor %vm780_vm6, %vm1052_vm2 }
 0x2d9   :  { %v2216_v15 = vcvt.f32.s32 %v2214_v21  ;;  %v2224_v38 = vpop.xlane.xlu1 %2223  ;;  %v7204_v27 = vadd.s32 %v2205_v19, %v2203_v62  ;;  %vm1051_vm12 = vmand %vm907_vm15, %vm9455_vm11 }
 0x2da   :  { %v2227_v62 = vcvt.f32.s32 %v2224_v38  ;;  %vm1179_vm5 = vmor %vm779_vm1, %vm1051_vm12 }
 0x2db   :  { %9446 = vst [vmem:[#allocation85_spill] sm:$0xff] %v7204_v27  ;;  %v2217_v42 = vshll.u32 %v2216_v15, 16  ;;  %2633 = vadd.xlane.f32.xlu0 %v2630_v7  ;;  %v2654_v15 = vcvt.s32.f32 %v2652_v53  ;;  %v2664_v7 = vshrl.u32 %v1303_v34, 16 }
 0x2dc   :  { %2643 = vadd.xlane.f32.xlu1 %v2641_v55  ;;  %v2226_v23 = vpop.xlane.xlu0 %2225  ;;  %v2665_v55 = vcvt.s32.f32 %v2663_v31 }
 0x2dd   :  { %v2228_v36 = vcvt.f32.s32 %v2226_v23  ;;  %v2236_v13 = vpop.xlane.xlu1 %2235  ;;  %v7220_v51 = vadd.s32 %v2217_v42, %v2215_v37  ;;  %v2676_v23 = vshrl.u32 %v1304_v41, 16 }
 0x2de   :  { %v2239_v37 = vcvt.f32.s32 %v2236_v13  ;;  %v2666_v13 = vcvt.s32.f32 %v2664_v7  ;;  %v9459_v7 = vld [vmem:[#allocation60_spill] sm:$0xff] }
 0x2df   :  { %9450 = vst [vmem:[#allocation86_spill] sm:$0xff] %v7220_v51  ;;  %v2229_v19 = vshll.u32 %v2228_v36, 16  ;;  %2645 = vadd.xlane.f32.xlu0 %v2642_v30  ;;  %vm909_vm0 = vcmp.eq.f32.partialorder %v7163_v44, %v9459_v7  ;;  %vm781_vm15 = vcmp.gt.f32.partialorder %v7163_v44, %v9459_v7 }
 0x2e0   :  { %2655 = vadd.xlane.f32.xlu1 %v2653_v46  ;;  %v2238_v11 = vpop.xlane.xlu0 %2237  ;;  %v2687_v46 = vand.u32 65535, %v1305_v6 }
 0x2e1   :  { %v2240_v1 = vcvt.f32.s32 %v2238_v11  ;;  %v2248_v21 = vpop.xlane.xlu1 %2247  ;;  %v7231_v38 = vadd.s32 %v2229_v19, %v2227_v62  ;;  %v1306_v19 = vsel %vm7239_vm14, 1, %v9127_v0  ;;  %vm9461_vm14 = vnez %v9140_v48 }
 0x2e2   :  { %v2251_v31 = vcvt.f32.s32 %v2248_v21  ;;  %v2688_v21 = vshrl.u32 %v1305_v6, 16  ;;  %v2689_v29 = vcvt.s32.f32 %v2687_v46  ;;  %vm1053_vm1 = vmand %vm909_vm0, %vm9461_vm14 }
 0x2e3   :  { %9451 = vst [vmem:[#allocation87_spill] sm:$0xff] %v7231_v38  ;;  %v2241_v42 = vshll.u32 %v2240_v1, 16  ;;  %2657 = vadd.xlane.f32.xlu0 %v2654_v15  ;;  %v2678_v1 = vcvt.s32.f32 %v2676_v23  ;;  %vm1181_vm12 = vmor %vm781_vm15, %vm1053_vm1 }
 0x2e4   :  { %2667 = vadd.xlane.f32.xlu1 %v2665_v55  ;;  %v2250_v34 = vpop.xlane.xlu0 %2249  ;;  %v2699_v55 = vand.u32 65535, %v1306_v19  ;;  %v2690_v24 = vcvt.s32.f32 %v2688_v21 }
 0x2e5   :  { %v2252_v53 = vcvt.f32.s32 %v2250_v34  ;;  %v2260_v36 = vpop.xlane.xlu1 %2259  ;;  %v7247_v30 = vadd.s32 %v2241_v42, %v2239_v37  ;;  %v1307_v42 = vsel %vm1179_vm5, 1, %v9127_v0  ;;  %v2700_v34 = vshrl.u32 %v1306_v19, 16 }
 0x2e6   :  { %v2263_v17 = vcvt.f32.s32 %v2260_v36  ;;  %v2701_v39 = vcvt.s32.f32 %v2699_v55  ;;  %v2711_v36 = vand.u32 65535, %v1307_v42 }
 0x2e7   :  { %9456 = vst [vmem:[#allocation59_spill] sm:$0xff] %v7247_v30  ;;  %v2253_v62 = vshll.u32 %v2252_v53, 16  ;;  %2669 = vadd.xlane.f32.xlu0 %v2666_v13  ;;  %v9464_v53 = vld [vmem:[#allocation61_spill] sm:$0xff]  ;;  %v1308_v13 = vsel %vm1180_vm13, 1, %v9127_v0  ;;  %v2702_v46 = vcvt.s32.f32 %v2700_v34 }
 0x2e8   :  { %2679 = vadd.xlane.f32.xlu1 %v2677_v56  ;;  %v2262_v22 = vpop.xlane.xlu0 %2261  ;;  %vm910_vm11 = vcmp.eq.f32.partialorder %v7163_v44, %v9464_v53  ;;  %vm782_vm7 = vcmp.gt.f32.partialorder %v7163_v44, %v9464_v53  ;;  %v2713_v19 = vcvt.s32.f32 %v2711_v36  ;;  %v2724_v7 = vshrl.u32 %v1308_v13, 16  ;;  %v9474_v53 = vld [vmem:[#allocation64_spill] sm:$0xff] }
 0x2e9   :  { %v2264_v41 = vcvt.f32.s32 %v2262_v22  ;;  %v7258_v11 = vpop.xlane.xlu1 %2271  ;;  %v7260_v15 = vadd.s32 %v2253_v62, %v2251_v31  ;;  %vm1054_vm6 = vmand %vm910_vm11, %vm9311_vm8  ;;  %v2712_v31 = vshrl.u32 %v1307_v42, 16  ;;  %v9467_v62 = vld [vmem:[#allocation62_spill] sm:$0xff]  ;;  %v2723_v22 = vand.u32 65535, %v1308_v13 }
 0x2ea   :  { %9457 = vst [vmem:[#allocation88_spill] sm:$0xff] %v7258_v11  ;;  %vm911_vm5 = vcmp.eq.f32.partialorder %v7163_v44, %v9467_v62  ;;  %vm1182_vm2 = vmor %vm782_vm7, %vm1054_vm6  ;;  %vm783_vm0 = vcmp.gt.f32.partialorder %v7163_v44, %v9467_v62  ;;  %vm9469_vm8 = vnez %v9147_v9  ;;  %vm785_vm6 = vcmp.gt.f32.partialorder %v7163_v44, %v9474_v53 }
 0x2eb   :  { %9458 = vst [vmem:[#allocation89_spill] sm:$0xff] %v7260_v15  ;;  %v2265_v37 = vshll.u32 %v2264_v41, 16  ;;  %2681 = vadd.xlane.f32.xlu0 %v2678_v1  ;;  %v1309_v41 = vsel %vm1181_vm12, 1, %v9127_v0  ;;  %vm1055_vm13 = vmand %vm911_vm5, %vm9469_vm8  ;;  %v2714_v21 = vcvt.s32.f32 %v2712_v31  ;;  %v2725_v55 = vcvt.s32.f32 %v2723_v22 }
 0x2ec   :  { %2691 = vadd.xlane.f32.xlu1 %v2689_v29  ;;  %v7268_v4 = vpop.xlane.xlu0 %2273  ;;  %v9471_v29 = vld [vmem:[#allocation63_spill] sm:$0xff]  ;;  %vm1183_vm14 = vmor %vm783_vm0, %vm1055_vm13  ;;  %v2736_v34 = vshrl.u32 %v1309_v41, 16  ;;  %vm913_vm12 = vcmp.eq.f32.partialorder %v7163_v44, %v9474_v53 }
 0x2ed   :  { %9460 = vst [vmem:[#allocation60_spill] sm:$0xff] %v7268_v4  ;;  %v7274_v6 = vpop.xlane.xlu1 %2283  ;;  %v7276_v23 = vadd.s32 %v2265_v37, %v2263_v17  ;;  %vm912_vm15 = vcmp.eq.f32.partialorder %v7163_v44, %v9471_v29  ;;  %v2735_v17 = vand.u32 65535, %v1309_v41  ;;  %v1310_v37 = vsel %vm1182_vm2, 1, %v9127_v0 }
 0x2ee   :  { %9462 = vst [vmem:[#allocation90_spill] sm:$0xff] %v7274_v6  ;;  %vm784_vm1 = vcmp.gt.f32.partialorder %v7163_v44, %v9471_v29  ;;  %vm1056_vm11 = vmand %vm912_vm15, %vm9256_vm10  ;;  %v2747_v36 = vand.u32 65535, %v1310_v37  ;;  %v1311_v13 = vsel %vm1183_vm14, 1, %v9127_v0  ;;  %v2738_v31 = vcvt.s32.f32 %v2736_v34 }
 0x2ef   :  { %9463 = vst [vmem:[#allocation91_spill] sm:$0xff] %v7276_v23  ;;  %2693 = vadd.xlane.f32.xlu0 %v2690_v24  ;;  %v2726_v24 = vcvt.s32.f32 %v2724_v7  ;;  %vm1184_vm7 = vmor %vm784_vm1, %vm1056_vm11  ;;  %v2748_v62 = vshrl.u32 %v1310_v37, 16  ;;  %v2759_v41 = vand.u32 65535, %v1311_v13 }
 0x2f0   :  { %2703 = vadd.xlane.f32.xlu1 %v2701_v39  ;;  %v7281_v56 = vpop.xlane.xlu0 %2285  ;;  %v2737_v39 = vcvt.s32.f32 %v2735_v17  ;;  %vm1057_vm10 = vmand %vm913_vm12, %vm9261_vm4  ;;  %v2749_v22 = vcvt.s32.f32 %v2747_v36  ;;  %v9480_v17 = vld [vmem:[#allocation66_spill] sm:$0xff] }
 0x2f1   :  { %9465 = vst [vmem:[#allocation61_spill] sm:$0xff] %v7281_v56  ;;  %v7287_v48 = vpop.xlane.xlu1 %2295  ;;  %vm1185_vm2 = vmor %vm785_vm6, %vm1057_vm10  ;;  %v2750_v29 = vcvt.s32.f32 %v2748_v62  ;;  %vm915_vm8 = vcmp.eq.f32.partialorder %v7163_v44, %v9480_v17  ;;  %v2761_v37 = vcvt.s32.f32 %v2759_v41  ;;  %vm787_vm15 = vcmp.gt.f32.partialorder %v7163_v44, %v9480_v17 }
 0x2f2   :  { %9466 = vst [vmem:[#allocation92_spill] sm:$0xff] %v7287_v48  ;;  %v1313_v34 = vsel %vm1185_vm2, 1, %v9127_v0 }
 0x2f3   :  { %2705 = vadd.xlane.f32.xlu0 %v2702_v46  ;;  %v2783_v62 = vand.u32 65535, %v1313_v34 }
 0x2f4   :  { %2715 = vadd.xlane.f32.xlu1 %v2713_v19  ;;  %v7292_v1 = vpop.xlane.xlu0 %2297  ;;  %v9477_v19 = vld [vmem:[#allocation65_spill] sm:$0xff] }
 0x2f5   :  { %9468 = vst [vmem:[#allocation62_spill] sm:$0xff] %v7292_v1  ;;  %v7298_v25 = vpop.xlane.xlu1 %2307  ;;  %vm914_vm5 = vcmp.eq.f32.partialorder %v7163_v44, %v9477_v19  ;;  %vm786_vm0 = vcmp.gt.f32.partialorder %v7163_v44, %v9477_v19 }
 0x2f6   :  { %9470 = vst [vmem:[#allocation93_spill] sm:$0xff] %v7298_v25  ;;  %vm1058_vm4 = vmand %vm914_vm5, %vm9205_vm9  ;;  %vm9489_vm5 = vnez %v9166_v32 }
 0x2f7   :  { %2717 = vadd.xlane.f32.xlu0 %v2714_v21  ;;  %v1312_v21 = vsel %vm1184_vm7, 1, %v9127_v0  ;;  %vm1186_vm13 = vmor %vm786_vm0, %vm1058_vm4 }
 0x2f8   :  { %2727 = vadd.xlane.f32.xlu1 %v2725_v55  ;;  %v7303_v42 = vpop.xlane.xlu0 %2309  ;;  %v2760_v55 = vshrl.u32 %v1311_v13, 16  ;;  %vm1059_vm9 = vmand %vm915_vm8, %vm5808_vm3  ;;  %v2772_v36 = vshrl.u32 %v1312_v21, 16  ;;  %v9483_v13 = vld [vmem:[#allocation67_spill] sm:$0xff]  ;;  %v1314_v19 = vsel %vm1186_vm13, 1, %v9127_v0  ;;  %vm9485_vm3 = vnez %v9163_v33 }
 0x2f9   :  { %9472 = vst [vmem:[#allocation63_spill] sm:$0xff] %v7303_v42  ;;  %v7309_v9 = vpop.xlane.xlu1 %2319  ;;  %vm916_vm14 = vcmp.eq.f32.partialorder %v7163_v44, %v9483_v13  ;;  %vm1187_vm1 = vmor %vm787_vm15, %vm1059_vm9  ;;  %vm788_vm11 = vcmp.gt.f32.partialorder %v7163_v44, %v9483_v13  ;;  %v2795_v17 = vand.u32 65535, %v1314_v19  ;;  %vm9493_vm13 = vnez %v9168_v35 }
 0x2fa   :  { %9473 = vst [vmem:[#allocation94_spill] sm:$0xff] %v7309_v9  ;;  %vm1060_vm12 = vmand %vm916_vm14, %vm9485_vm3  ;;  %v2774_v41 = vcvt.s32.f32 %v2772_v36  ;;  %v9491_v36 = vld [vmem:[#allocation69_spill] sm:$0xff] }
 0x2fb   :  { %2729 = vadd.xlane.f32.xlu0 %v2726_v24  ;;  %v2771_v24 = vand.u32 65535, %v1312_v21  ;;  %v2784_v21 = vshrl.u32 %v1313_v34, 16  ;;  %vm1188_vm6 = vmor %vm788_vm11, %vm1060_vm12  ;;  %vm918_vm0 = vcmp.eq.f32.partialorder %v7163_v44, %v9491_v36  ;;  %v2797_v13 = vcvt.s32.f32 %v2795_v17 }
 0x2fc   :  { %2739 = vadd.xlane.f32.xlu1 %v2737_v39  ;;  %v7314_v46 = vpop.xlane.xlu0 %2321  ;;  %v2762_v39 = vcvt.s32.f32 %v2760_v55  ;;  %v2785_v55 = vcvt.s32.f32 %v2783_v62  ;;  %v1316_v62 = vsel %vm1188_vm6, 1, %v9127_v0  ;;  %vm790_vm8 = vcmp.gt.f32.partialorder %v7163_v44, %v9491_v36  ;;  %vm1062_vm15 = vmand %vm918_vm0, %vm9493_vm13 }
 0x2fd   :  { %9475 = vst [vmem:[#allocation64_spill] sm:$0xff] %v7314_v46  ;;  %v7320_v28 = vpop.xlane.xlu1 %2331  ;;  %v2786_v34 = vcvt.s32.f32 %v2784_v21  ;;  %vm1190_vm9 = vmor %vm790_vm8, %vm1062_vm15 }
 0x2fe   :  { %9476 = vst [vmem:[#allocation95_spill] sm:$0xff] %v7320_v28 }
 0x2ff   :  { %2741 = vadd.xlane.f32.xlu0 %v2738_v31  ;;  %v2773_v31 = vcvt.s32.f32 %v2771_v24 }
 0x300   :  { %2751 = vadd.xlane.f32.xlu1 %v2749_v22  ;;  %v7325_v7 = vpop.xlane.xlu0 %2333 }
 0x301   :  { %9478 = vst [vmem:[#allocation65_spill] sm:$0xff] %v7325_v7  ;;  %v7331_v20 = vpop.xlane.xlu1 %2343 }
 0x302   :  { %9479 = vst [vmem:[#allocation96_spill] sm:$0xff] %v7331_v20 }
 0x303   :  { %2753 = vadd.xlane.f32.xlu0 %v2750_v29  ;;  %v9487_v29 = vld [vmem:[#allocation68_spill] sm:$0xff] }
 0x304   :  { %2763 = vadd.xlane.f32.xlu1 %v2761_v37  ;;  %v7336_v53 = vpop.xlane.xlu0 %2345  ;;  %vm917_vm7 = vcmp.eq.f32.partialorder %v7163_v44, %v9487_v29  ;;  %v1315_v37 = vsel %vm1187_vm1, 1, %v9127_v0  ;;  %vm789_vm10 = vcmp.gt.f32.partialorder %v7163_v44, %v9487_v29  ;;  %v2820_v44 = vshrl.u32 %v1316_v62, 16 }
 0x305   :  { %9481 = vst [vmem:[#allocation66_spill] sm:$0xff] %v7336_v53  ;;  %v7342_v63 = vpop.xlane.xlu1 %2355  ;;  %vm1061_vm2 = vmand %vm917_vm7, %vm9489_vm5  ;;  %v2808_v21 = vshrl.u32 %v1315_v37, 16 }
 0x306   :  { %9482 = vst [vmem:[#allocation97_spill] sm:$0xff] %v7342_v63  ;;  %vm1189_vm4 = vmor %vm789_vm10, %vm1061_vm2 }
 0x307   :  { %2765 = vadd.xlane.f32.xlu0 %v2762_v39  ;;  %v2796_v39 = vshrl.u32 %v1314_v19, 16  ;;  %v1317_v17 = vsel %vm1189_vm4, 1, %v9127_v0 }
 0x308   :  { %2775 = vadd.xlane.f32.xlu1 %v2773_v31  ;;  %v7347_v22 = vpop.xlane.xlu0 %2357  ;;  %v2807_v31 = vand.u32 65535, %v1315_v37  ;;  %v2831_v35 = vand.u32 65535, %v1317_v17 }
 0x309   :  { %9484 = vst [vmem:[#allocation67_spill] sm:$0xff] %v7347_v22  ;;  %v7353_v18 = vpop.xlane.xlu1 %2367  ;;  %v2798_v19 = vcvt.s32.f32 %v2796_v39 }
 0x30a   :  { %9486 = vst [vmem:[#allocation98_spill] sm:$0xff] %v7353_v18  ;;  %v2809_v29 = vcvt.s32.f32 %v2807_v31  ;;  %v2822_v31 = vcvt.s32.f32 %v2820_v44  ;;  %v2833_v18 = vcvt.s32.f32 %v2831_v35 }
 0x30b   :  { %2777 = vadd.xlane.f32.xlu0 %v2774_v41 }
 0x30c   :  { %2787 = vadd.xlane.f32.xlu1 %v2785_v55  ;;  %v7358_v24 = vpop.xlane.xlu0 %2369  ;;  %v2819_v55 = vand.u32 65535, %v1316_v62 }
 0x30d   :  { %9488 = vst [vmem:[#allocation68_spill] sm:$0xff] %v7358_v24  ;;  %v7364_v33 = vpop.xlane.xlu1 %2379 }
 0x30e   :  { %9490 = vst [vmem:[#allocation99_spill] sm:$0xff] %v7364_v33  ;;  %v2810_v33 = vcvt.s32.f32 %v2808_v21  ;;  %v2821_v36 = vcvt.s32.f32 %v2819_v55 }
 0x30f   :  { %2789 = vadd.xlane.f32.xlu0 %v2786_v34 }
 0x310   :  { %2799 = vadd.xlane.f32.xlu1 %v2797_v13  ;;  %v7369_v41 = vpop.xlane.xlu0 %2381 }
 0x311   :  { %9492 = vst [vmem:[#allocation69_spill] sm:$0xff] %v7369_v41  ;;  %v7375_v32 = vpop.xlane.xlu1 %2391 }
 0x312   :  { %9494 = vst [vmem:[#allocation100_spill] sm:$0xff] %v7375_v32  ;;  %v1318_v32 = vsel %vm1190_vm9, 1, %v9127_v0 }
 0x313   :  { %2801 = vadd.xlane.f32.xlu0 %v2798_v19  ;;  %v2832_v19 = vshrl.u32 %v1317_v17, 16  ;;  %v2844_v55 = vshrl.u32 %v1318_v32, 16 }
 0x314   :  { %2811 = vadd.xlane.f32.xlu1 %v2809_v29  ;;  %v7378_v34 = vpop.xlane.xlu0 %2393  ;;  %v2843_v29 = vand.u32 65535, %v1318_v32  ;;  %v7406_v32 = vld [vmem:[%s8932_s1] sm:$0xff] }
 0x315   :  { %9495 = vst [vmem:[#allocation101_spill] sm:$0xff] %v7378_v34  ;;  %v7380_v13 = vpop.xlane.xlu1 %2403  ;;  %v2834_v62 = vcvt.s32.f32 %v2832_v19 }
 0x316   :  { %9496 = vst [vmem:[#allocation102_spill] sm:$0xff] %v7380_v13 }
 0x317   :  { %2813 = vadd.xlane.f32.xlu0 %v2810_v33  ;;  %v2845_v33 = vcvt.s32.f32 %v2843_v29 }
 0x318   :  { %2823 = vadd.xlane.f32.xlu1 %v2821_v36  ;;  %v7383_v37 = vpop.xlane.xlu0 %2405 }
 0x319   :  { %9497 = vst [vmem:[#allocation103_spill] sm:$0xff] %v7383_v37  ;;  %v7385_v39 = vpop.xlane.xlu1 %2415 }
 0x31a   :  { %9498 = vst [vmem:[#allocation104_spill] sm:$0xff] %v7385_v39  ;;  %v2846_v39 = vcvt.s32.f32 %v2844_v55 }
 0x31b   :  { %2825 = vadd.xlane.f32.xlu0 %v2822_v31 }
 0x31c   :  { %2835 = vadd.xlane.f32.xlu1 %v2833_v18  ;;  %v7387_v63 = vpop.xlane.xlu0 %2417 }
 0x31d   :  { %9499 = vst [vmem:[#allocation105_spill] sm:$0xff] %v7387_v63  ;;  %v7389_v21 = vpop.xlane.xlu1 %2427 }
 0x31e   :  { %9500 = vst [vmem:[#allocation106_spill] sm:$0xff] %v7389_v21 }
 0x31f   :  { %2837 = vadd.xlane.f32.xlu0 %v2834_v62 }
 0x320   :  { %2847 = vadd.xlane.f32.xlu1 %v2845_v33  ;;  %v7391_v0 = vpop.xlane.xlu0 %2429 }
 0x321   :  { %9501 = vst [vmem:[#allocation107_spill] sm:$0xff] %v7391_v0  ;;  %v7393_v36 = vpop.xlane.xlu1 %2439 }
 0x322   :  { %9502 = vst [vmem:[#allocation108_spill] sm:$0xff] %v7393_v36 }
 0x323   :  { %2849 = vadd.xlane.f32.xlu0 %v2846_v39  ;;  %v3243_v39 = vrot.slane %v7406_v32, %v5409_v8 }
 0x324   :  { %v7395_v17 = vpop.xlane.xlu0 %2441 }
 0x325   :  { %9503 = vst [vmem:[#allocation109_spill] sm:$0xff] %v7395_v17  ;;  %v7397_v44 = vpop.xlane.xlu1 %2451 }
 0x326   :  { %9504 = vst [vmem:[#allocation110_spill] sm:$0xff] %v7397_v44 }
 0x328   :  { %v7399_v18 = vpop.xlane.xlu0 %2453 }
 0x329   :  { %9505 = vst [vmem:[#allocation111_spill] sm:$0xff] %v7399_v18  ;;  %v7401_v35 = vpop.xlane.xlu1 %2463 }
 0x32a   :  { %9506 = vst [vmem:[#allocation112_spill] sm:$0xff] %v7401_v35 }
 0x32c   :  { %v7408_v31 = vpop.xlane.xlu0 %2465 }
 0x32d   :  { %9507 = vst [vmem:[#allocation113_spill] sm:$0xff] %v7408_v31  ;;  %v7410_v19 = vpop.xlane.xlu1 %2475 }
 0x32e   :  { %9508 = vst [vmem:[#allocation114_spill] sm:$0xff] %v7410_v19 }
 0x330   :  { %v7414_v29 = vpop.xlane.xlu0 %2477 }
 0x331   :  { %9509 = vst [vmem:[#allocation115_spill] sm:$0xff] %v7414_v29  ;;  %v7416_v62 = vpop.xlane.xlu1 %2487  ;;  %3245 = vbcast.lane.b32.xlu1 %v3243_v39, 256 }
 0x332   :  { %9510 = vst [vmem:[#allocation116_spill] sm:$0xff] %v7416_v62 }
 0x334   :  { %v7418_v55 = vpop.xlane.xlu0 %2489 }
 0x335   :  { %9511 = vst [vmem:[#allocation117_spill] sm:$0xff] %v7418_v55  ;;  %v7420_v33 = vpop.xlane.xlu1 %2499  ;;  %3253 = vbcast.lane.b32.xlu1 %v3243_v39, 272 }
 0x336   :  { %9512 = vst [vmem:[#allocation118_spill] sm:$0xff] %v7420_v33 }
 0x338   :  { %v7422_v35 = vpop.xlane.xlu0 %2501 }
 0x339   :  { %9513 = vst [vmem:[#allocation119_spill] sm:$0xff] %v7422_v35  ;;  %v7424_v44 = vpop.xlane.xlu1 %2511  ;;  %3257 = vbcast.lane.b32.xlu1 %v3243_v39, 280  ;;  %3249 = vbcast.lane.b32.xlu0 %v3243_v39, 264 }
 0x33a   :  { %9514 = vst [vmem:[#allocation120_spill] sm:$0xff] %v7424_v44 }
 0x33c   :  { %v7426_v31 = vpop.xlane.xlu0 %2513 }
 0x33d   :  { %9515 = vst [vmem:[#allocation121_spill] sm:$0xff] %v7426_v31  ;;  %v7428_v19 = vpop.xlane.xlu1 %2523  ;;  %3265 = vbcast.lane.b32.xlu1 %v3243_v39, 296  ;;  %3261 = vbcast.lane.b32.xlu0 %v3243_v39, 288 }
 0x33e   :  { %9516 = vst [vmem:[#allocation122_spill] sm:$0xff] %v7428_v19 }
 0x340   :  { %v7430_v8 = vpop.xlane.xlu0 %2525 }
 0x341   :  { %9517 = vst [vmem:[#allocation123_spill] sm:$0xff] %v7430_v8  ;;  %v7432_v62 = vpop.xlane.xlu1 %2535  ;;  %3273 = vbcast.lane.b32.xlu1 %v3243_v39, 312  ;;  %3269 = vbcast.lane.b32.xlu0 %v3243_v39, 304 }
 0x342   :  { %9518 = vst [vmem:[#allocation124_spill] sm:$0xff] %v7432_v62 }
 0x344   :  { %v7434_v33 = vpop.xlane.xlu0 %2537 }
 0x345   :  { %9519 = vst [vmem:[#allocation125_spill] sm:$0xff] %v7434_v33  ;;  %v7436_v55 = vpop.xlane.xlu1 %2547  ;;  %3281 = vbcast.lane.b32.xlu1 %v3243_v39, 328  ;;  %3277 = vbcast.lane.b32.xlu0 %v3243_v39, 320 }
 0x346   :  { %9520 = vst [vmem:[#allocation126_spill] sm:$0xff] %v7436_v55  ;;  %v9527_v55 = vld [vmem:[#allocation2_spill] sm:$0xff] }
 0x347   :  { %v9528_v33 = vsub.s32 1, %v9527_v55  ;;  %v9577_v28 = vsub.s32 5, %v9527_v55  ;;  %v9578_v11 = vsub.s32 6, %v9527_v55  ;;  %v9582_v57 = vsub.s32 7, %v9527_v55 }
 0x348   :  { %v7438_v44 = vpop.xlane.xlu0 %2549 }
 0x349   :  { %9521 = vst [vmem:[#allocation127_spill] sm:$0xff] %v7438_v44  ;;  %v7440_v35 = vpop.xlane.xlu1 %2559  ;;  %3289 = vbcast.lane.b32.xlu1 %v3243_v39, 344  ;;  %3285 = vbcast.lane.b32.xlu0 %v3243_v39, 336  ;;  %v3310_v44 = vrot.slane %v7406_v32, %v9528_v33  ;;  %v3578_v24 = vrot.slane %v7406_v32, %v9577_v28 }
 0x34a   :  { %9522 = vst [vmem:[#allocation128_spill] sm:$0xff] %v7440_v35  ;;  %v3645_v50 = vrot.slane %v7406_v32, %v9578_v11  ;;  %v3712_v54 = vrot.slane %v7406_v32, %v9582_v57 }
 0x34c   :  { %v7442_v19 = vpop.xlane.xlu0 %2561 }
 0x34d   :  { %9523 = vst [vmem:[#allocation129_spill] sm:$0xff] %v7442_v19  ;;  %v7444_v31 = vpop.xlane.xlu1 %2571  ;;  %3297 = vbcast.lane.b32.xlu1 %v3243_v39, 360  ;;  %3293 = vbcast.lane.b32.xlu0 %v3243_v39, 352 }
 0x34e   :  { %9524 = vst [vmem:[#allocation130_spill] sm:$0xff] %v7444_v31 }
 0x350   :  { %v7446_v62 = vpop.xlane.xlu0 %2573 }
 0x351   :  { %9525 = vst [vmem:[#allocation131_spill] sm:$0xff] %v7446_v62  ;;  %v7448_v8 = vpop.xlane.xlu1 %2583  ;;  %3305 = vbcast.lane.b32.xlu1 %v3243_v39, 376  ;;  %3301 = vbcast.lane.b32.xlu0 %v3243_v39, 368 }
 0x352   :  { %9526 = vst [vmem:[#allocation132_spill] sm:$0xff] %v7448_v8 }
 0x354   :  { %v7453_v18 = vpop.xlane.xlu0 %2585 }
 0x355   :  { %9529 = vst [vmem:[#allocation133_spill] sm:$0xff] %v7453_v18  ;;  %v7455_v35 = vpop.xlane.xlu1 %2595  ;;  %3316 = vbcast.lane.b32.xlu1 %v3310_v44, 264  ;;  %3312 = vbcast.lane.b32.xlu0 %v3310_v44, 256 }
 0x356   :  { %9530 = vst [vmem:[#allocation134_spill] sm:$0xff] %v7455_v35 }
 0x358   :  { %v7457_v19 = vpop.xlane.xlu0 %2597 }
 0x359   :  { %9531 = vst [vmem:[#allocation135_spill] sm:$0xff] %v7457_v19  ;;  %v7459_v31 = vpop.xlane.xlu1 %2607  ;;  %3324 = vbcast.lane.b32.xlu1 %v3310_v44, 280  ;;  %3320 = vbcast.lane.b32.xlu0 %v3310_v44, 272 }
 0x35a   :  { %9532 = vst [vmem:[#allocation136_spill] sm:$0xff] %v7459_v31 }
 0x35c   :  { %v7461_v62 = vpop.xlane.xlu0 %2609 }
 0x35d   :  { %9533 = vst [vmem:[#allocation137_spill] sm:$0xff] %v7461_v62  ;;  %v7463_v8 = vpop.xlane.xlu1 %2619  ;;  %3332 = vbcast.lane.b32.xlu1 %v3310_v44, 296  ;;  %3328 = vbcast.lane.b32.xlu0 %v3310_v44, 288 }
 0x35e   :  { %9534 = vst [vmem:[#allocation138_spill] sm:$0xff] %v7463_v8 }
 0x360   :  { %v7465_v39 = vpop.xlane.xlu0 %2621 }
 0x361   :  { %9535 = vst [vmem:[#allocation139_spill] sm:$0xff] %v7465_v39  ;;  %v7467_v33 = vpop.xlane.xlu1 %2631  ;;  %3340 = vbcast.lane.b32.xlu1 %v3310_v44, 312  ;;  %3336 = vbcast.lane.b32.xlu0 %v3310_v44, 304 }
 0x362   :  { %9536 = vst [vmem:[#allocation140_spill] sm:$0xff] %v7467_v33 }
 0x364   :  { %v7469_v35 = vpop.xlane.xlu0 %2633 }
 0x365   :  { %9537 = vst [vmem:[#allocation141_spill] sm:$0xff] %v7469_v35  ;;  %v7471_v18 = vpop.xlane.xlu1 %2643  ;;  %3348 = vbcast.lane.b32.xlu1 %v3310_v44, 328  ;;  %3344 = vbcast.lane.b32.xlu0 %v3310_v44, 320 }
 0x366   :  { %9538 = vst [vmem:[#allocation142_spill] sm:$0xff] %v7471_v18  ;;  %v9545_v18 = vsub.s32 2, %v9527_v55 }
 0x368   :  { %v7473_v31 = vpop.xlane.xlu0 %2645 }
 0x369   :  { %9539 = vst [vmem:[#allocation143_spill] sm:$0xff] %v7473_v31  ;;  %v7475_v19 = vpop.xlane.xlu1 %2655  ;;  %3356 = vbcast.lane.b32.xlu1 %v3310_v44, 344  ;;  %3352 = vbcast.lane.b32.xlu0 %v3310_v44, 336  ;;  %v3377_v31 = vrot.slane %v7406_v32, %v9545_v18 }
 0x36a   :  { %9540 = vst [vmem:[#allocation144_spill] sm:$0xff] %v7475_v19 }
 0x36c   :  { %v7477_v8 = vpop.xlane.xlu0 %2657 }
 0x36d   :  { %9541 = vst [vmem:[#allocation145_spill] sm:$0xff] %v7477_v8  ;;  %v7479_v62 = vpop.xlane.xlu1 %2667  ;;  %3364 = vbcast.lane.b32.xlu1 %v3310_v44, 360  ;;  %3360 = vbcast.lane.b32.xlu0 %v3310_v44, 352 }
 0x36e   :  { %9542 = vst [vmem:[#allocation146_spill] sm:$0xff] %v7479_v62 }
 0x370   :  { %v7481_v33 = vpop.xlane.xlu0 %2669 }
 0x371   :  { %9543 = vst [vmem:[#allocation147_spill] sm:$0xff] %v7481_v33  ;;  %v7483_v39 = vpop.xlane.xlu1 %2679  ;;  %3372 = vbcast.lane.b32.xlu1 %v3310_v44, 376  ;;  %3368 = vbcast.lane.b32.xlu0 %v3310_v44, 368 }
 0x372   :  { %9544 = vst [vmem:[#allocation148_spill] sm:$0xff] %v7483_v39 }
 0x374   :  { %v7488_v35 = vpop.xlane.xlu0 %2681 }
 0x375   :  { %9546 = vst [vmem:[#allocation149_spill] sm:$0xff] %v7488_v35  ;;  %v7490_v19 = vpop.xlane.xlu1 %2691  ;;  %3383 = vbcast.lane.b32.xlu1 %v3377_v31, 264  ;;  %3379 = vbcast.lane.b32.xlu0 %v3377_v31, 256 }
 0x376   :  { %9547 = vst [vmem:[#allocation150_spill] sm:$0xff] %v7490_v19 }
 0x378   :  { %v7492_v8 = vpop.xlane.xlu0 %2693 }
 0x379   :  { %9548 = vst [vmem:[#allocation151_spill] sm:$0xff] %v7492_v8  ;;  %v7494_v62 = vpop.xlane.xlu1 %2703  ;;  %3391 = vbcast.lane.b32.xlu1 %v3377_v31, 280  ;;  %3387 = vbcast.lane.b32.xlu0 %v3377_v31, 272 }
 0x37a   :  { %9549 = vst [vmem:[#allocation152_spill] sm:$0xff] %v7494_v62 }
 0x37c   :  { %v7496_v33 = vpop.xlane.xlu0 %2705 }
 0x37d   :  { %9550 = vst [vmem:[#allocation153_spill] sm:$0xff] %v7496_v33  ;;  %v7498_v39 = vpop.xlane.xlu1 %2715  ;;  %3399 = vbcast.lane.b32.xlu1 %v3377_v31, 296  ;;  %3395 = vbcast.lane.b32.xlu0 %v3377_v31, 288 }
 0x37e   :  { %9551 = vst [vmem:[#allocation154_spill] sm:$0xff] %v7498_v39 }
 0x380   :  { %v7500_v44 = vpop.xlane.xlu0 %2717 }
 0x381   :  { %9552 = vst [vmem:[#allocation155_spill] sm:$0xff] %v7500_v44  ;;  %v7502_v18 = vpop.xlane.xlu1 %2727  ;;  %3407 = vbcast.lane.b32.xlu1 %v3377_v31, 312  ;;  %3403 = vbcast.lane.b32.xlu0 %v3377_v31, 304 }
 0x382   :  { %9553 = vst [vmem:[#allocation156_spill] sm:$0xff] %v7502_v18 }
 0x384   :  { %v7504_v19 = vpop.xlane.xlu0 %2729 }
 0x385   :  { %9554 = vst [vmem:[#allocation157_spill] sm:$0xff] %v7504_v19  ;;  %v7506_v35 = vpop.xlane.xlu1 %2739  ;;  %3415 = vbcast.lane.b32.xlu1 %v3377_v31, 328  ;;  %3411 = vbcast.lane.b32.xlu0 %v3377_v31, 320 }
 0x386   :  { %9555 = vst [vmem:[#allocation158_spill] sm:$0xff] %v7506_v35  ;;  %v9562_v35 = vsub.s32 3, %v9527_v55 }
 0x388   :  { %v7508_v62 = vpop.xlane.xlu0 %2741 }
 0x389   :  { %9556 = vst [vmem:[#allocation159_spill] sm:$0xff] %v7508_v62  ;;  %v7510_v8 = vpop.xlane.xlu1 %2751  ;;  %3423 = vbcast.lane.b32.xlu1 %v3377_v31, 344  ;;  %3419 = vbcast.lane.b32.xlu0 %v3377_v31, 336  ;;  %v3444_v62 = vrot.slane %v7406_v32, %v9562_v35 }
 0x38a   :  { %9557 = vst [vmem:[#allocation160_spill] sm:$0xff] %v7510_v8 }
 0x38c   :  { %v7512_v39 = vpop.xlane.xlu0 %2753 }
 0x38d   :  { %9558 = vst [vmem:[#allocation161_spill] sm:$0xff] %v7512_v39  ;;  %v7514_v33 = vpop.xlane.xlu1 %2763  ;;  %3431 = vbcast.lane.b32.xlu1 %v3377_v31, 360  ;;  %3427 = vbcast.lane.b32.xlu0 %v3377_v31, 352 }
 0x38e   :  { %9559 = vst [vmem:[#allocation162_spill] sm:$0xff] %v7514_v33 }
 0x390   :  { %v7516_v18 = vpop.xlane.xlu0 %2765 }
 0x391   :  { %9560 = vst [vmem:[#allocation163_spill] sm:$0xff] %v7516_v18  ;;  %v7518_v44 = vpop.xlane.xlu1 %2775  ;;  %3439 = vbcast.lane.b32.xlu1 %v3377_v31, 376  ;;  %3435 = vbcast.lane.b32.xlu0 %v3377_v31, 368 }
 0x392   :  { %9561 = vst [vmem:[#allocation164_spill] sm:$0xff] %v7518_v44 }
 0x394   :  { %v7523_v19 = vpop.xlane.xlu0 %2777 }
 0x395   :  { %9563 = vst [vmem:[#allocation165_spill] sm:$0xff] %v7523_v19  ;;  %v7525_v8 = vpop.xlane.xlu1 %2787  ;;  %3450 = vbcast.lane.b32.xlu1 %v3444_v62, 264  ;;  %3446 = vbcast.lane.b32.xlu0 %v3444_v62, 256 }
 0x396   :  { %9564 = vst [vmem:[#allocation166_spill] sm:$0xff] %v7525_v8 }
 0x398   :  { %v7527_v39 = vpop.xlane.xlu0 %2789 }
 0x399   :  { %9565 = vst [vmem:[#allocation167_spill] sm:$0xff] %v7527_v39  ;;  %v7529_v33 = vpop.xlane.xlu1 %2799  ;;  %3458 = vbcast.lane.b32.xlu1 %v3444_v62, 280  ;;  %3454 = vbcast.lane.b32.xlu0 %v3444_v62, 272 }
 0x39a   :  { %9566 = vst [vmem:[#allocation168_spill] sm:$0xff] %v7529_v33 }
 0x39c   :  { %v7531_v18 = vpop.xlane.xlu0 %2801 }
 0x39d   :  { %9567 = vst [vmem:[#allocation169_spill] sm:$0xff] %v7531_v18  ;;  %v7533_v44 = vpop.xlane.xlu1 %2811  ;;  %3466 = vbcast.lane.b32.xlu1 %v3444_v62, 296  ;;  %3462 = vbcast.lane.b32.xlu0 %v3444_v62, 288 }
 0x39e   :  { %9568 = vst [vmem:[#allocation170_spill] sm:$0xff] %v7533_v44 }
 0x3a0   :  { %v7535_v31 = vpop.xlane.xlu0 %2813 }
 0x3a1   :  { %9569 = vst [vmem:[#allocation171_spill] sm:$0xff] %v7535_v31  ;;  %v7537_v35 = vpop.xlane.xlu1 %2823  ;;  %3474 = vbcast.lane.b32.xlu1 %v3444_v62, 312  ;;  %3470 = vbcast.lane.b32.xlu0 %v3444_v62, 304 }
 0x3a2   :  { %9570 = vst [vmem:[#allocation172_spill] sm:$0xff] %v7537_v35 }
 0x3a4   :  { %v7539_v8 = vpop.xlane.xlu0 %2825 }
 0x3a5   :  { %9571 = vst [vmem:[#allocation173_spill] sm:$0xff] %v7539_v8  ;;  %3482 = vbcast.lane.b32.xlu1 %v3444_v62, 328  ;;  %v7541_v39 = vpop.xlane.xlu1 %2835  ;;  %3478 = vbcast.lane.b32.xlu0 %v3444_v62, 320 }
 0x3a6   :  { %9572 = vst [vmem:[#allocation174_spill] sm:$0xff] %v7541_v39  ;;  %v9576_v39 = vsub.s32 4, %v9527_v55 }
 0x3a8   :  { %v7543_v33 = vpop.xlane.xlu0 %2837 }
 0x3a9   :  { %9573 = vst [vmem:[#allocation175_spill] sm:$0xff] %v7543_v33  ;;  %3490 = vbcast.lane.b32.xlu1 %v3444_v62, 344  ;;  %v7545_v18 = vpop.xlane.xlu1 %2847  ;;  %3486 = vbcast.lane.b32.xlu0 %v3444_v62, 336  ;;  %v3511_v33 = vrot.slane %v7406_v32, %v9576_v39 }
 0x3aa   :  { %9574 = vst [vmem:[#allocation176_spill] sm:$0xff] %v7545_v18 }
 0x3ac   :  { %v7547_v44 = vpop.xlane.xlu0 %2849 }
 0x3ad   :  { %9575 = vst [vmem:[#allocation177_spill] sm:$0xff] %v7547_v44  ;;  %3498 = vbcast.lane.b32.xlu1 %v3444_v62, 360  ;;  %v7549_v31 = vpop.permute.xlu1 %3245  ;;  %3494 = vbcast.lane.b32.xlu0 %v3444_v62, 352 }
 0x3b0   :  { %v7551_v35 = vpop.permute.xlu0 %3249 }
 0x3b1   :  { %3506 = vbcast.lane.b32.xlu1 %v3444_v62, 376  ;;  %v7553_v8 = vpop.permute.xlu1 %3253  ;;  %3502 = vbcast.lane.b32.xlu0 %v3444_v62, 368 }
 0x3b4   :  { %v7558_v19 = vpop.permute.xlu0 %3261 }
 0x3b5   :  { %3517 = vbcast.lane.b32.xlu1 %v3511_v33, 264  ;;  %v7560_v18 = vpop.permute.xlu1 %3257  ;;  %3513 = vbcast.lane.b32.xlu0 %v3511_v33, 256 }
 0x3b8   :  { %v7562_v44 = vpop.permute.xlu0 %3269 }
 0x3b9   :  { %3525 = vbcast.lane.b32.xlu1 %v3511_v33, 280  ;;  %v7564_v29 = vpop.permute.xlu1 %3265  ;;  %3521 = vbcast.lane.b32.xlu0 %v3511_v33, 272 }
 0x3bc   :  { %v7566_v36 = vpop.permute.xlu0 %3277 }
 0x3bd   :  { %3533 = vbcast.lane.b32.xlu1 %v3511_v33, 296  ;;  %v7568_v62 = vpop.permute.xlu1 %3273  ;;  %3529 = vbcast.lane.b32.xlu0 %v3511_v33, 288 }
 0x3c0   :  { %v7570_v21 = vpop.permute.xlu0 %3285 }
 0x3c1   :  { %3541 = vbcast.lane.b32.xlu1 %v3511_v33, 312  ;;  %v7572_v39 = vpop.permute.xlu1 %3281  ;;  %3537 = vbcast.lane.b32.xlu0 %v3511_v33, 304 }
 0x3c4   :  { %v7574_v13 = vpop.permute.xlu0 %3293 }
 0x3c5   :  { %3549 = vbcast.lane.b32.xlu1 %v3511_v33, 328  ;;  %v7576_v17 = vpop.permute.xlu1 %3289  ;;  %3545 = vbcast.lane.b32.xlu0 %v3511_v33, 320 }
 0x3c8   :  { %v7578_v0 = vpop.permute.xlu0 %3301 }
 0x3c9   :  { %3557 = vbcast.lane.b32.xlu1 %v3511_v33, 344  ;;  %v7580_v63 = vpop.permute.xlu1 %3297  ;;  %3553 = vbcast.lane.b32.xlu0 %v3511_v33, 336 }
 0x3cc   :  { %v7582_v20 = vpop.permute.xlu0 %3312 }
 0x3cd   :  { %3565 = vbcast.lane.b32.xlu1 %v3511_v33, 360  ;;  %v7584_v37 = vpop.permute.xlu1 %3305  ;;  %3561 = vbcast.lane.b32.xlu0 %v3511_v33, 352 }
 0x3d0   :  { %v7586_v34 = vpop.permute.xlu0 %3320 }
 0x3d1   :  { %3573 = vbcast.lane.b32.xlu1 %v3511_v33, 376  ;;  %v7588_v41 = vpop.permute.xlu1 %3316  ;;  %3569 = vbcast.lane.b32.xlu0 %v3511_v33, 368 }
 0x3d4   :  { %v7593_v22 = vpop.permute.xlu0 %3328 }
 0x3d5   :  { %3584 = vbcast.lane.b32.xlu1 %v3578_v24, 264  ;;  %v7595_v9 = vpop.permute.xlu1 %3324  ;;  %3580 = vbcast.lane.b32.xlu0 %v3578_v24, 256 }
 0x3d8   :  { %v7597_v53 = vpop.permute.xlu0 %3336 }
 0x3d9   :  { %3592 = vbcast.lane.b32.xlu1 %v3578_v24, 280  ;;  %v7599_v7 = vpop.permute.xlu1 %3332  ;;  %3588 = vbcast.lane.b32.xlu0 %v3578_v24, 272 }
 0x3dc   :  { %v7601_v23 = vpop.permute.xlu0 %3344 }
 0x3dd   :  { %3600 = vbcast.lane.b32.xlu1 %v3578_v24, 296  ;;  %v7603_v33 = vpop.permute.xlu1 %3340  ;;  %3596 = vbcast.lane.b32.xlu0 %v3578_v24, 288 }
 0x3e0   :  { %v7605_v15 = vpop.permute.xlu0 %3352 }
 0x3e1   :  { %3608 = vbcast.lane.b32.xlu1 %v3578_v24, 312  ;;  %v7607_v28 = vpop.permute.xlu1 %3348  ;;  %3604 = vbcast.lane.b32.xlu0 %v3578_v24, 304 }
 0x3e4   :  { %v7609_v30 = vpop.permute.xlu0 %3360 }
 0x3e5   :  { %3616 = vbcast.lane.b32.xlu1 %v3578_v24, 328  ;;  %v7611_v25 = vpop.permute.xlu1 %3356  ;;  %3612 = vbcast.lane.b32.xlu0 %v3578_v24, 320 }
 0x3e8   :  { %v7613_v38 = vpop.permute.xlu0 %3368 }
 0x3e9   :  { %3624 = vbcast.lane.b32.xlu1 %v3578_v24, 344  ;;  %v7615_v46 = vpop.permute.xlu1 %3364  ;;  %3620 = vbcast.lane.b32.xlu0 %v3578_v24, 336 }
 0x3ec   :  { %v7617_v48 = vpop.permute.xlu0 %3379 }
 0x3ed   :  { %3632 = vbcast.lane.b32.xlu1 %v3578_v24, 360  ;;  %v7619_v27 = vpop.permute.xlu1 %3372  ;;  %3628 = vbcast.lane.b32.xlu0 %v3578_v24, 352 }
 0x3f0   :  { %v7621_v51 = vpop.permute.xlu0 %3387 }
 0x3f1   :  { %3640 = vbcast.lane.b32.xlu1 %v3578_v24, 376  ;;  %v7623_v6 = vpop.permute.xlu1 %3383  ;;  %3636 = vbcast.lane.b32.xlu0 %v3578_v24, 368 }
 0x3f4   :  { %v7628_v59 = vpop.permute.xlu0 %3395 }
 0x3f5   :  { %3651 = vbcast.lane.b32.xlu1 %v3645_v50, 264  ;;  %v7630_v42 = vpop.permute.xlu1 %3391  ;;  %3647 = vbcast.lane.b32.xlu0 %v3645_v50, 256 }
 0x3f8   :  { %v7632_v43 = vpop.permute.xlu0 %3403 }
 0x3f9   :  { %3659 = vbcast.lane.b32.xlu1 %v3645_v50, 280  ;;  %v7634_v1 = vpop.permute.xlu1 %3399  ;;  %3655 = vbcast.lane.b32.xlu0 %v3645_v50, 272 }
 0x3fc   :  { %v7636_v56 = vpop.permute.xlu0 %3411 }
 0x3fd   :  { %3667 = vbcast.lane.b32.xlu1 %v3645_v50, 296  ;;  %v7638_v24 = vpop.permute.xlu1 %3407  ;;  %3663 = vbcast.lane.b32.xlu0 %v3645_v50, 288 }
 0x400   :  { %v7640_v52 = vpop.permute.xlu0 %3419 }
 0x401   :  { %3675 = vbcast.lane.b32.xlu1 %v3645_v50, 312  ;;  %v7642_v11 = vpop.permute.xlu1 %3415  ;;  %3671 = vbcast.lane.b32.xlu0 %v3645_v50, 304 }
 0x404   :  { %v7644_v4 = vpop.permute.xlu0 %3427 }
 0x405   :  { %3683 = vbcast.lane.b32.xlu1 %v3645_v50, 328  ;;  %v7646_v14 = vpop.permute.xlu1 %3423  ;;  %3679 = vbcast.lane.b32.xlu0 %v3645_v50, 320 }
 0x408   :  { %v7648_v16 = vpop.permute.xlu0 %3435 }
 0x409   :  { %3691 = vbcast.lane.b32.xlu1 %v3645_v50, 344  ;;  %v7650_v12 = vpop.permute.xlu1 %3431  ;;  %3687 = vbcast.lane.b32.xlu0 %v3645_v50, 336 }
 0x40c   :  { %v7652_v49 = vpop.permute.xlu0 %3446 }
 0x40d   :  { %9579 = vst [vmem:[#allocation178_spill] sm:$0xff] %v7652_v49  ;;  %3699 = vbcast.lane.b32.xlu1 %v3645_v50, 360  ;;  %v7654_v26 = vpop.permute.xlu1 %3439  ;;  %3695 = vbcast.lane.b32.xlu0 %v3645_v50, 352  ;;  %v9603_v49 = vld [vmem:[#allocation6_spill] sm:$0xff] }
 0x40e   :  { %vm2859_vm12 = vcmp.lt.s32.totalorder %v9603_v49, 6 }
 0x410   :  { %v7656_v47 = vpop.permute.xlu0 %3454 }
 0x411   :  { %9580 = vst [vmem:[#allocation179_spill] sm:$0xff] %v7656_v47  ;;  %3707 = vbcast.lane.b32.xlu1 %v3645_v50, 376  ;;  %v7658_v3 = vpop.permute.xlu1 %3450  ;;  %3703 = vbcast.lane.b32.xlu0 %v3645_v50, 368  ;;  %v9601_v47 = vld [vmem:[#allocation72_spill] sm:$0xff] }
 0x412   :  { %9581 = vst [vmem:[#allocation180_spill] sm:$0xff] %v7658_v3  ;;  %vm2857_vm11 = vcmp.lt.s32.totalorder %v9601_v47, 6 }
 0x414   :  { %v7663_v45 = vpop.permute.xlu0 %3462 }
 0x415   :  { %9583 = vst [vmem:[#allocation181_spill] sm:$0xff] %v7663_v45  ;;  %3718 = vbcast.lane.b32.xlu1 %v3712_v54, 264  ;;  %v7665_v10 = vpop.permute.xlu1 %3458  ;;  %3714 = vbcast.lane.b32.xlu0 %v3712_v54, 256  ;;  %v9598_v45 = vld [vmem:[#allocation71_spill] sm:$0xff] }
 0x416   :  { %9584 = vst [vmem:[#allocation182_spill] sm:$0xff] %v7665_v10  ;;  %vm2856_vm1 = vcmp.lt.s32.totalorder %v9598_v45, 6 }
 0x418   :  { %v7667_v61 = vpop.permute.xlu0 %3470 }
 0x419   :  { %9585 = vst [vmem:[#allocation183_spill] sm:$0xff] %v7667_v61  ;;  %3726 = vbcast.lane.b32.xlu1 %v3712_v54, 280  ;;  %v7669_v5 = vpop.permute.xlu1 %3466  ;;  %3722 = vbcast.lane.b32.xlu0 %v3712_v54, 272 }
 0x41a   :  { %9586 = vst [vmem:[#allocation184_spill] sm:$0xff] %v7669_v5 }
 0x41c   :  { %v7671_v60 = vpop.permute.xlu0 %3478 }
 0x41d   :  { %9587 = vst [vmem:[#allocation185_spill] sm:$0xff] %v7671_v60  ;;  %3734 = vbcast.lane.b32.xlu1 %v3712_v54, 296  ;;  %v7673_v50 = vpop.permute.xlu1 %3474  ;;  %3730 = vbcast.lane.b32.xlu0 %v3712_v54, 288 }
 0x41e   :  { %9588 = vst [vmem:[#allocation186_spill] sm:$0xff] %v7673_v50 }
 0x420   :  { %v7675_v55 = vpop.permute.xlu0 %3486 }
 0x421   :  { %9589 = vst [vmem:[#allocation187_spill] sm:$0xff] %v7675_v55  ;;  %3742 = vbcast.lane.b32.xlu1 %v3712_v54, 312  ;;  %v7677_v57 = vpop.permute.xlu1 %3482  ;;  %3738 = vbcast.lane.b32.xlu0 %v3712_v54, 304 }
 0x422   :  { %9590 = vst [vmem:[#allocation188_spill] sm:$0xff] %v7677_v57  ;;  %v9597_v57 = vld [vmem:[#allocation70_spill] sm:$0xff] }
 0x423   :  { %vm2855_vm14 = vcmp.lt.s32.totalorder %v9597_v57, 6  ;;  %v9602_v57 = vld [vmem:[#allocation4_spill] sm:$0xff] }
 0x424   :  { %v7679_v32 = vpop.permute.xlu0 %3494  ;;  %vm2858_vm3 = vcmp.lt.s32.totalorder %v9602_v57, 6  ;;  %v9605_v57 = vld [vmem:[#allocation8_spill] sm:$0xff] }
 0x425   :  { %9591 = vst [vmem:[#allocation189_spill] sm:$0xff] %v7679_v32  ;;  %3750 = vbcast.lane.b32.xlu1 %v3712_v54, 328  ;;  %v7681_v61 = vpop.permute.xlu1 %3490  ;;  %3746 = vbcast.lane.b32.xlu0 %v3712_v54, 320  ;;  %vm2861_vm6 = vcmp.lt.s32.totalorder %v9605_v57, 6 }
 0x426   :  { %9592 = vst [vmem:[#allocation190_spill] sm:$0xff] %v7681_v61 }
 0x428   :  { %v7683_v5 = vpop.permute.xlu0 %3502 }
 0x429   :  { %9593 = vst [vmem:[#allocation191_spill] sm:$0xff] %v7683_v5  ;;  %3758 = vbcast.lane.b32.xlu1 %v3712_v54, 344  ;;  %v7685_v60 = vpop.permute.xlu1 %3498  ;;  %3754 = vbcast.lane.b32.xlu0 %v3712_v54, 336  ;;  %v9071_v5 = vmov 0.0  }
 0x42a   :  { %9594 = vst [vmem:[#allocation192_spill] sm:$0xff] %v7685_v60  ;;  %v5237_v60 = vsel %vm2855_vm14, 1.0, %v9071_v5  ;;  %v5238_v10 = vsel %vm2856_vm1, 1.0, %v9071_v5 }
 0x42c   :  { %v7687_v50 = vpop.permute.xlu0 %3513 }
 0x42d   :  { %9595 = vst [vmem:[#allocation193_spill] sm:$0xff] %v7687_v50  ;;  %3766 = vbcast.lane.b32.xlu1 %v3712_v54, 360  ;;  %v7689_v55 = vpop.permute.xlu1 %3506  ;;  %3762 = vbcast.lane.b32.xlu0 %v3712_v54, 352  ;;  %v3904_v50 = vmul.f32 %v5237_v60, %v7549_v31 }
 0x42e   :  { %9596 = vst [vmem:[#allocation194_spill] sm:$0xff] %v7689_v55  ;;  %v3905_v55 = vmul.f32 %v5238_v10, %v7551_v35  ;;  %v9604_v10 = vld [vmem:[#allocation5_spill] sm:$0xff] }
 0x42f   :  { %vm2860_vm7 = vcmp.lt.s32.totalorder %v9604_v10, 6  ;;  %v9607_v10 = vld [vmem:[#allocation10_spill] sm:$0xff] }
 0x430   :  { %v7693_v32 = vpop.permute.xlu0 %3521  ;;  %v5242_v35 = vsel %vm2860_vm7, 1.0, %v9071_v5  ;;  %vm2863_vm5 = vcmp.lt.s32.totalorder %v9607_v10, 6 }
 0x431   :  { %9599 = vst [vmem:[#allocation70_spill] sm:$0xff] %v7693_v32  ;;  %3774 = vbcast.lane.b32.xlu1 %v3712_v54, 376  ;;  %v7695_v61 = vpop.permute.xlu1 %3517  ;;  %3770 = vbcast.lane.b32.xlu0 %v3712_v54, 368  ;;  %v5239_v54 = vsel %vm2857_vm11, 1.0, %v9071_v5  ;;  %v3909_v49 = vmul.f32 %v5242_v35, %v7564_v29 }
 0x432   :  { %9600 = vst [vmem:[#allocation71_spill] sm:$0xff] %v7695_v61  ;;  %v5240_v61 = vsel %vm2858_vm3, 1.0, %v9071_v5  ;;  %v3906_v3 = vmul.f32 %v5239_v54, %v7553_v8  ;;  %v9606_v8 = vld [vmem:[#allocation7_spill] sm:$0xff] }
 0x433   :  { %v3907_v60 = vmul.f32 %v5240_v61, %v7560_v18  ;;  %vm2862_vm10 = vcmp.lt.s32.totalorder %v9606_v8, 6  ;;  %v9609_v8 = vld [vmem:[#allocation12_spill] sm:$0xff] }
 0x434   :  { %v7703_v45 = vpop.permute.xlu0 %3529  ;;  %v5244_v54 = vsel %vm2862_vm10, 1.0, %v9071_v5  ;;  %vm2865_vm0 = vcmp.lt.s32.totalorder %v9609_v8, 6  ;;  %vm2878_vm10 = vcmp.lt.s32.totalorder %v6480_v40, 6 }
 0x435   :  { %v7705_v32 = vpop.permute.xlu1 %3525  ;;  %4164 = vperm.xlu1 %5369, %v3905_v55   ;;  %4161 = vperm.xlu0 %5368, %v3904_v50   ;;  %v5241_v55 = vsel %vm2859_vm12, 1.0, %v9071_v5 }
 0x436   :  { %v3908_v50 = vmul.f32 %v5241_v55, %v7558_v19  ;;  %v3911_v19 = vmul.f32 %v5244_v54, %v7568_v62  ;;  %v9608_v55 = vld [vmem:[#allocation9_spill] sm:$0xff] }
 0x437   :  { %vm2864_vm2 = vcmp.lt.s32.totalorder %v9608_v55, 6  ;;  %v9611_v55 = vld [vmem:[#allocation14_spill] sm:$0xff] }
 0x438   :  { %v7713_v47 = vpop.permute.xlu0 %3537  ;;  %v5246_v57 = vsel %vm2864_vm2, 1.0, %v9071_v5  ;;  %vm2867_vm8 = vcmp.lt.s32.totalorder %v9611_v55, 6 }
 0x439   :  { %v7715_v31 = vpop.permute.xlu1 %3533  ;;  %4167 = vperm.xlu1 %5369, %v3906_v3   ;;  %4170 = vperm.xlu0 %5368, %v3907_v60   ;;  %v5243_v3 = vsel %vm2861_vm6, 1.0, %v9071_v5 }
 0x43a   :  { %v3910_v60 = vmul.f32 %v5243_v3, %v7562_v44  ;;  %v3913_v44 = vmul.f32 %v5246_v57, %v7572_v39  ;;  %v9610_v3 = vld [vmem:[#allocation11_spill] sm:$0xff] }
 0x43b   :  { %vm2866_vm4 = vcmp.lt.s32.totalorder %v9610_v3, 6  ;;  %v9613_v3 = vld [vmem:[#allocation16_spill] sm:$0xff] }
 0x43c   :  { %v7723_v61 = vpop.permute.xlu0 %3545  ;;  %v5248_v10 = vsel %vm2866_vm4, 1.0, %v9071_v5  ;;  %vm2869_vm15 = vcmp.lt.s32.totalorder %v9613_v3, 6 }
 0x43d   :  { %v7725_v18 = vpop.permute.xlu1 %3541  ;;  %4173 = vperm.xlu1 %5369, %v3908_v50   ;;  %4176 = vperm.xlu0 %5368, %v3909_v49   ;;  %v5245_v50 = vsel %vm2863_vm5, 1.0, %v9071_v5 }
 0x43e   :  { %v3912_v49 = vmul.f32 %v5245_v50, %v7566_v36  ;;  %v3915_v36 = vmul.f32 %v5248_v10, %v7576_v17  ;;  %v9612_v50 = vld [vmem:[#allocation13_spill] sm:$0xff] }
 0x43f   :  { %vm2868_vm13 = vcmp.lt.s32.totalorder %v9612_v50, 6  ;;  %v9615_v50 = vld [vmem:[#allocation18_spill] sm:$0xff] }
 0x440   :  { %v7733_v29 = vpop.permute.xlu0 %3553  ;;  %v5250_v8 = vsel %vm2868_vm13, 1.0, %v9071_v5  ;;  %vm2871_vm14 = vcmp.lt.s32.totalorder %v9615_v50, 6 }
 0x441   :  { %v7735_v35 = vpop.permute.xlu1 %3549  ;;  %4179 = vperm.xlu1 %5369, %v3910_v60   ;;  %4182 = vperm.xlu0 %5368, %v3911_v19   ;;  %v5247_v60 = vsel %vm2865_vm0, 1.0, %v9071_v5 }
 0x442   :  { %v3914_v19 = vmul.f32 %v5247_v60, %v7570_v21  ;;  %v3917_v21 = vmul.f32 %v5250_v8, %v7580_v63  ;;  %v9614_v60 = vld [vmem:[#allocation15_spill] sm:$0xff] }
 0x443   :  { %vm2870_vm9 = vcmp.lt.s32.totalorder %v9614_v60, 6  ;;  %v9617_v60 = vld [vmem:[#allocation20_spill] sm:$0xff] }
 0x444   :  { %v7743_v62 = vpop.permute.xlu0 %3561  ;;  %v5252_v55 = vsel %vm2870_vm9, 1.0, %v9071_v5  ;;  %vm2873_vm11 = vcmp.lt.s32.totalorder %v9617_v60, 6 }
 0x445   :  { %v7745_v54 = vpop.permute.xlu1 %3557  ;;  %4185 = vperm.xlu1 %5369, %v3912_v49   ;;  %4188 = vperm.xlu0 %5368, %v3913_v44   ;;  %v5249_v49 = vsel %vm2867_vm8, 1.0, %v9071_v5 }
 0x446   :  { %v3916_v44 = vmul.f32 %v5249_v49, %v7574_v13  ;;  %v3919_v13 = vmul.f32 %v5252_v55, %v7584_v37  ;;  %v9616_v49 = vld [vmem:[#allocation17_spill] sm:$0xff] }
 0x447   :  { %vm2872_vm1 = vcmp.lt.s32.totalorder %v9616_v49, 6  ;;  %v9621_v49 = vld [vmem:[#allocation22_spill] sm:$0xff] }
 0x448   :  { %v7753_v39 = vpop.permute.xlu0 %3569  ;;  %v5254_v3 = vsel %vm2872_vm1, 1.0, %v9071_v5  ;;  %vm2875_vm12 = vcmp.lt.s32.totalorder %v9621_v49, 6 }
 0x449   :  { %v7755_v57 = vpop.permute.xlu1 %3565  ;;  %4191 = vperm.xlu1 %5369, %v3914_v19   ;;  %4194 = vperm.xlu0 %5368, %v3915_v36   ;;  %v5251_v19 = vsel %vm2869_vm15, 1.0, %v9071_v5 }
 0x44a   :  { %v3918_v36 = vmul.f32 %v5251_v19, %v7578_v0  ;;  %v3921_v0 = vmul.f32 %v5254_v3, %v7588_v41  ;;  %v9618_v19 = vld [vmem:[#allocation19_spill] sm:$0xff] }
 0x44b   :  { %vm2874_vm3 = vcmp.lt.s32.totalorder %v9618_v19, 6  ;;  %v9625_v19 = vld [vmem:[#allocation21_spill] sm:$0xff] }
 0x44c   :  { %v7763_v17 = vpop.permute.xlu0 %3580  ;;  %v5256_v50 = vsel %vm2874_vm3, 1.0, %v9071_v5  ;;  %vm2877_vm6 = vcmp.lt.s32.totalorder %v9625_v19, 6  ;;  %v9632_v19 = vld [vmem:[#allocation26_spill] sm:$0xff] }
 0x44d   :  { %v7765_v10 = vpop.permute.xlu1 %3573  ;;  %4197 = vperm.xlu1 %5369, %v3916_v44   ;;  %4200 = vperm.xlu0 %5368, %v3917_v21   ;;  %v5253_v44 = vsel %vm2871_vm14, 1.0, %v9071_v5  ;;  %vm2881_vm0 = vcmp.lt.s32.totalorder %v9632_v19, 6 }
 0x44e   :  { %v3920_v21 = vmul.f32 %v5253_v44, %v7582_v20  ;;  %v3923_v20 = vmul.f32 %v5256_v50, %v7595_v9  ;;  %v9622_v44 = vld [vmem:[#allocation3_spill] sm:$0xff]  ;;  %v5259_v50 = vsel %vm2877_vm6, 1.0, %v9071_v5 }
 0x44f   :  { %vm2876_vm7 = vcmp.lt.s32.totalorder %v9622_v44, 6  ;;  %v3926_v49 = vmul.f32 %v5259_v50, %v7597_v53  ;;  %v9629_v44 = vld [vmem:[#allocation23_spill] sm:$0xff] }
 0x450   :  { %v7773_v63 = vpop.permute.xlu0 %3588  ;;  %v5258_v60 = vsel %vm2876_vm7, 1.0, %v9071_v5  ;;  %vm2880_vm2 = vcmp.lt.s32.totalorder %v9629_v44, 6  ;;  %v9637_v44 = vld [vmem:[#allocation27_spill] sm:$0xff] }
 0x451   :  { %v7775_v8 = vpop.permute.xlu1 %3584  ;;  %4203 = vperm.xlu1 %5369, %v3918_v36   ;;  %4206 = vperm.xlu0 %5368, %v3919_v13   ;;  %v5255_v36 = vsel %vm2873_vm11, 1.0, %v9071_v5  ;;  %vm2884_vm13 = vcmp.lt.s32.totalorder %v9637_v44, 6  ;;  %v9645_v44 = vld [vmem:[#allocation31_spill] sm:$0xff] }
 0x452   :  { %v3922_v13 = vmul.f32 %v5255_v36, %v7586_v34  ;;  %v3925_v34 = vmul.f32 %v5258_v60, %v7599_v7  ;;  %v5262_v60 = vsel %vm2880_vm2, 1.0, %v9071_v5  ;;  %vm2888_vm1 = vcmp.lt.s32.totalorder %v9645_v44, 6  ;;  %v9653_v44 = vld [vmem:[#allocation37_spill] sm:$0xff] }
 0x453   :  { %v3929_v53 = vmul.f32 %v5262_v60, %v7607_v28  ;;  %vm2892_vm7 = vcmp.lt.s32.totalorder %v9653_v44, 6 }
 0x454   :  { %v7783_v37 = vpop.permute.xlu0 %3596 }
 0x455   :  { %9619 = vst [vmem:[#allocation72_spill] sm:$0xff] %v7783_v37  ;;  %v7785_v55 = vpop.permute.xlu1 %3592  ;;  %4209 = vperm.xlu1 %5369, %v3920_v21   ;;  %4212 = vperm.xlu0 %5368, %v3921_v0   ;;  %v5257_v21 = vsel %vm2875_vm12, 1.0, %v9071_v5 }
 0x456   :  { %9620 = vst [vmem:[#allocation4_spill] sm:$0xff] %v7785_v55  ;;  %v3924_v0 = vmul.f32 %v5257_v21, %v7593_v22 }
 0x458   :  { %v7793_v41 = vpop.permute.xlu0 %3604 }
 0x459   :  { %9623 = vst [vmem:[#allocation6_spill] sm:$0xff] %v7793_v41  ;;  %v7795_v3 = vpop.permute.xlu1 %3600  ;;  %4215 = vperm.xlu1 %5369, %v3922_v13   ;;  %4218 = vperm.xlu0 %5368, %v3923_v20   ;;  %v5260_v13 = vsel %vm2878_vm10, 1.0, %v9071_v5  ;;  %v9628_v20 = vld [vmem:[#allocation24_spill] sm:$0xff]  ;;  %vm2894_vm10 = vcmp.lt.s32.totalorder %v6717_v2, 6 }
 0x45a   :  { %9624 = vst [vmem:[#allocation5_spill] sm:$0xff] %v7795_v3  ;;  %vm2879_vm5 = vcmp.lt.s32.totalorder %v9628_v20, 6  ;;  %v3927_v22 = vmul.f32 %v5260_v13, %v7603_v33  ;;  %v5263_v13 = vsel %vm2881_vm0, 1.0, %v9071_v5 }
 0x45b   :  { %v5261_v21 = vsel %vm2879_vm5, 1.0, %v9071_v5  ;;  %v3930_v20 = vmul.f32 %v5263_v13, %v7605_v15  ;;  %vm2895_vm5 = vcmp.lt.s32.totalorder %v6733_v58, 6 }
 0x45c   :  { %v7803_v9 = vpop.permute.xlu0 %3612 }
 0x45d   :  { %9626 = vst [vmem:[#allocation8_spill] sm:$0xff] %v7803_v9  ;;  %v7805_v36 = vpop.permute.xlu1 %3608  ;;  %4221 = vperm.xlu1 %5369, %v3924_v0   ;;  %4224 = vperm.xlu0 %5368, %v3925_v34   ;;  %v3928_v0 = vmul.f32 %v5261_v21, %v7601_v23  ;;  %v9633_v34 = vld [vmem:[#allocation25_spill] sm:$0xff]  ;;  %v9761_v9 = vld [vmem:[#allocation71_spill] sm:$0xff] }
 0x45e   :  { %9627 = vst [vmem:[#allocation7_spill] sm:$0xff] %v7805_v36  ;;  %vm2882_vm4 = vcmp.lt.s32.totalorder %v9633_v34, 6  ;;  %v9641_v34 = vld [vmem:[#allocation29_spill] sm:$0xff] }
 0x45f   :  { %vm2886_vm9 = vcmp.lt.s32.totalorder %v9641_v34, 6  ;;  %v9649_v34 = vld [vmem:[#allocation34_spill] sm:$0xff] }
 0x460   :  { %v7813_v7 = vpop.permute.xlu0 %3620  ;;  %vm2890_vm3 = vcmp.lt.s32.totalorder %v9649_v34, 6 }
 0x461   :  { %9630 = vst [vmem:[#allocation10_spill] sm:$0xff] %v7813_v7  ;;  %v7815_v40 = vpop.permute.xlu1 %3616  ;;  %4227 = vperm.xlu1 %5369, %v3926_v49   ;;  %4230 = vperm.xlu0 %5368, %v3927_v22   ;;  %v5264_v49 = vsel %vm2882_vm4, 1.0, %v9071_v5  ;;  %v9636_v22 = vld [vmem:[#allocation28_spill] sm:$0xff]  ;;  %v9756_v7 = vld [vmem:[#allocation103_spill] sm:$0xff] }
 0x462   :  { %9631 = vst [vmem:[#allocation9_spill] sm:$0xff] %v7815_v40  ;;  %vm2883_vm8 = vcmp.lt.s32.totalorder %v9636_v22, 6  ;;  %v3931_v23 = vmul.f32 %v5264_v49, %v7611_v25  ;;  %v2408_v40 = vcvt.f32.s32 %v9756_v7 }
 0x463   :  { %v5265_v60 = vsel %vm2883_vm8, 1.0, %v9071_v5 }
 0x464   :  { %v7823_v33 = vpop.permute.xlu0 %3628  ;;  %v3932_v19 = vmul.f32 %v5265_v60, %v7609_v30 }
 0x465   :  { %9634 = vst [vmem:[#allocation12_spill] sm:$0xff] %v7823_v33  ;;  %v7825_v50 = vpop.permute.xlu1 %3624  ;;  %4233 = vperm.xlu1 %5369, %v3928_v0   ;;  %4236 = vperm.xlu0 %5368, %v3929_v53   ;;  %v5266_v0 = vsel %vm2884_vm13, 1.0, %v9071_v5  ;;  %v9640_v53 = vld [vmem:[#allocation30_spill] sm:$0xff]  ;;  %v9736_v33 = vld [vmem:[#allocation59_spill] sm:$0xff] }
 0x466   :  { %9635 = vst [vmem:[#allocation11_spill] sm:$0xff] %v7825_v50  ;;  %vm2885_vm15 = vcmp.lt.s32.totalorder %v9640_v53, 6  ;;  %v3933_v15 = vmul.f32 %v5266_v0, %v7615_v46 }
 0x467   :  { %v5267_v49 = vsel %vm2885_vm15, 1.0, %v9071_v5 }
 0x468   :  { %v7833_v28 = vpop.permute.xlu0 %3636  ;;  %v3934_v22 = vmul.f32 %v5267_v49, %v7613_v38 }
 0x469   :  { %9638 = vst [vmem:[#allocation14_spill] sm:$0xff] %v7833_v28  ;;  %v7835_v21 = vpop.permute.xlu1 %3632  ;;  %4239 = vperm.xlu1 %5369, %v3930_v20   ;;  %4242 = vperm.xlu0 %5368, %v3931_v23   ;;  %v5268_v20 = vsel %vm2886_vm9, 1.0, %v9071_v5  ;;  %v9644_v23 = vld [vmem:[#allocation32_spill] sm:$0xff]  ;;  %v9705_v28 = vld [vmem:[#allocation183_spill] sm:$0xff] }
 0x46a   :  { %9639 = vst [vmem:[#allocation13_spill] sm:$0xff] %v7835_v21  ;;  %vm2887_vm14 = vcmp.lt.s32.totalorder %v9644_v23, 6  ;;  %v3935_v30 = vmul.f32 %v5268_v20, %v7619_v27 }
 0x46b   :  { %v5269_v0 = vsel %vm2887_vm14, 1.0, %v9071_v5 }
 0x46c   :  { %v7843_v25 = vpop.permute.xlu0 %3647  ;;  %v3936_v53 = vmul.f32 %v5269_v0, %v7617_v48 }
 0x46d   :  { %9642 = vst [vmem:[#allocation16_spill] sm:$0xff] %v7843_v25  ;;  %v7845_v13 = vpop.permute.xlu1 %3640  ;;  %4245 = vperm.xlu1 %5369, %v3932_v19   ;;  %4248 = vperm.xlu0 %5368, %v3933_v15   ;;  %v5270_v19 = vsel %vm2888_vm1, 1.0, %v9071_v5  ;;  %v9648_v15 = vld [vmem:[#allocation33_spill] sm:$0xff] }
 0x46e   :  { %9643 = vst [vmem:[#allocation15_spill] sm:$0xff] %v7845_v13  ;;  %vm2889_vm11 = vcmp.lt.s32.totalorder %v9648_v15, 6  ;;  %v3937_v38 = vmul.f32 %v5270_v19, %v7623_v6  ;;  %v9698_v13 = vld [vmem:[#allocation75_spill] sm:$0xff]  ;;  %v9735_v25 = vld [vmem:[#allocation93_spill] sm:$0xff] }
 0x46f   :  { %v5271_v20 = vsel %vm2889_vm11, 1.0, %v9071_v5  ;;  %v2311_v21 = vcvt.f32.s32 %v9735_v25  ;;  %v9738_v25 = vld [vmem:[#allocation89_spill] sm:$0xff] }
 0x470   :  { %v7853_v46 = vpop.permute.xlu0 %3655  ;;  %v3938_v23 = vmul.f32 %v5271_v20, %v7621_v51 }
 0x471   :  { %9646 = vst [vmem:[#allocation18_spill] sm:$0xff] %v7853_v46  ;;  %v7855_v60 = vpop.permute.xlu1 %3651  ;;  %4251 = vperm.xlu1 %5369, %v3934_v22   ;;  %4254 = vperm.xlu0 %5368, %v3935_v30   ;;  %v5272_v22 = vsel %vm2890_vm3, 1.0, %v9071_v5  ;;  %v9652_v30 = vld [vmem:[#allocation36_spill] sm:$0xff] }
 0x472   :  { %9647 = vst [vmem:[#allocation17_spill] sm:$0xff] %v7855_v60  ;;  %vm2891_vm12 = vcmp.lt.s32.totalorder %v9652_v30, 6  ;;  %v3939_v48 = vmul.f32 %v5272_v22, %v7630_v42  ;;  %v5276_v22 = vsel %vm2894_vm10, 1.0, %v9071_v5  ;;  %v9659_v30 = vld [vmem:[#allocation39_spill] sm:$0xff] }
 0x473   :  { %v5273_v19 = vsel %vm2891_vm12, 1.0, %v9071_v5  ;;  %vm2896_vm2 = vcmp.lt.s32.totalorder %v9659_v30, 6 }
 0x474   :  { %v7863_v27 = vpop.permute.xlu0 %3663  ;;  %v3940_v15 = vmul.f32 %v5273_v19, %v7628_v59  ;;  %v3943_v59 = vmul.f32 %v5276_v22, %v7638_v24  ;;  %v5278_v44 = vsel %vm2896_vm2, 1.0, %v9071_v5  ;;  %v9666_v22 = vld [vmem:[#allocation42_spill] sm:$0xff] }
 0x475   :  { %9650 = vst [vmem:[#allocation20_spill] sm:$0xff] %v7863_v27  ;;  %v7865_v49 = vpop.permute.xlu1 %3659  ;;  %4257 = vperm.xlu1 %5369, %v3936_v53   ;;  %4260 = vperm.xlu0 %5368, %v3937_v38   ;;  %v5274_v53 = vsel %vm2892_vm7, 1.0, %v9071_v5  ;;  %v9656_v38 = vld [vmem:[#allocation38_spill] sm:$0xff]  ;;  %v3945_v58 = vmul.f32 %v5278_v44, %v7642_v11  ;;  %vm2899_vm8 = vcmp.lt.s32.totalorder %v9666_v22, 6  ;;  %v9675_v22 = vld [vmem:[#allocation47_spill] sm:$0xff]  ;;  %v9727_v27 = vld [vmem:[#allocation85_spill] sm:$0xff] }
 0x476   :  { %9651 = vst [vmem:[#allocation19_spill] sm:$0xff] %v7865_v49  ;;  %vm2893_vm6 = vcmp.lt.s32.totalorder %v9656_v38, 6  ;;  %v3941_v51 = vmul.f32 %v5274_v53, %v7634_v1  ;;  %v9662_v53 = vld [vmem:[#allocation40_spill] sm:$0xff]  ;;  %v5281_v30 = vsel %vm2899_vm8, 1.0, %v9071_v5  ;;  %vm2904_vm1 = vcmp.lt.s32.totalorder %v9675_v22, 6  ;;  %v9730_v49 = vld [vmem:[#allocation187_spill] sm:$0xff] }
 0x477   :  { %v5275_v20 = vsel %vm2893_vm6, 1.0, %v9071_v5  ;;  %vm2897_vm0 = vcmp.lt.s32.totalorder %v9662_v53, 6  ;;  %v3948_v44 = vmul.f32 %v5281_v30, %v7644_v4  ;;  %v9671_v53 = vld [vmem:[#allocation45_spill] sm:$0xff]  ;;  %v5286_v30 = vsel %vm2904_vm1, 1.0, %v9071_v5 }
 0x478   :  { %v7873_v6 = vpop.permute.xlu0 %3671  ;;  %v5279_v38 = vsel %vm2897_vm0, 1.0, %v9071_v5  ;;  %vm2902_vm9 = vcmp.lt.s32.totalorder %v9671_v53, 6  ;;  %v9681_v53 = vld [vmem:[#allocation49_spill] sm:$0xff]  ;;  %vm2915_vm8 = vcmp.lt.s32.totalorder %v9698_v13, 6 }
 0x479   :  { %9654 = vst [vmem:[#allocation22_spill] sm:$0xff] %v7873_v6  ;;  %v7875_v0 = vpop.permute.xlu1 %3667  ;;  %4263 = vperm.xlu1 %5369, %v3938_v23   ;;  %4266 = vperm.xlu0 %5368, %v3939_v48   ;;  %v3942_v23 = vmul.f32 %v5275_v20, %v7632_v43  ;;  %v5277_v48 = vsel %vm2895_vm5, 1.0, %v9071_v5  ;;  %v9663_v43 = vld [vmem:[#allocation41_spill] sm:$0xff]  ;;  %v3946_v20 = vmul.f32 %v5279_v38, %v7640_v52  ;;  %v5284_v38 = vsel %vm2902_vm9, 1.0, %v9071_v5 }
 0x47a   :  { %9655 = vst [vmem:[#allocation3_spill] sm:$0xff] %v7875_v0  ;;  %v3944_v19 = vmul.f32 %v5277_v48, %v7636_v56  ;;  %vm2898_vm4 = vcmp.lt.s32.totalorder %v9663_v43, 6  ;;  %v3951_v4 = vmul.f32 %v5284_v38, %v7654_v26  ;;  %vm2906_vm3 = vcmp.lt.s32.totalorder %v9681_v53, 6  ;;  %v9689_v53 = vld [vmem:[#allocation52_spill] sm:$0xff] }
 0x47b   :  { %vm2909_vm6 = vcmp.lt.s32.totalorder %v9689_v53, 6  ;;  %v7981_v13 = vsel %vm2915_vm8, 1.0, %v9071_v5  ;;  %vm2931_vm8 = vcmp.lt.s32.totalorder %v9736_v33, 6 }
 0x47c   :  { %v7883_v42 = vpop.permute.xlu0 %3679 }
 0x47d   :  { %9657 = vst [vmem:[#allocation21_spill] sm:$0xff] %v7883_v42  ;;  %v7885_v34 = vpop.permute.xlu1 %3675  ;;  %4269 = vperm.xlu1 %5369, %v3940_v15   ;;  %4272 = vperm.xlu0 %5368, %v3941_v51   ;;  %v5280_v51 = vsel %vm2898_vm4, 1.0, %v9071_v5 }
 0x47e   :  { %9658 = vst [vmem:[#allocation24_spill] sm:$0xff] %v7885_v34  ;;  %v3947_v56 = vmul.f32 %v5280_v51, %v7646_v14 }
 0x480   :  { %v7893_v1 = vpop.permute.xlu0 %3687 }
 0x481   :  { %9660 = vst [vmem:[#allocation23_spill] sm:$0xff] %v7893_v1  ;;  %v7895_v2 = vpop.permute.xlu1 %3683  ;;  %4275 = vperm.xlu1 %5369, %v3942_v23   ;;  %4278 = vperm.xlu0 %5368, %v3943_v59   ;;  %v9667_v23 = vld [vmem:[#allocation43_spill] sm:$0xff]  ;;  %v9707_v1 = vld [vmem:[#allocation80_spill] sm:$0xff] }
 0x482   :  { %9661 = vst [vmem:[#allocation26_spill] sm:$0xff] %v7895_v2  ;;  %vm2900_vm13 = vcmp.lt.s32.totalorder %v9667_v23, 6  ;;  %vm2921_vm1 = vcmp.lt.s32.totalorder %v9707_v1, 6  ;;  %v9710_v2 = vld [vmem:[#allocation57_spill] sm:$0xff] }
 0x483   :  { %v5282_v48 = vsel %vm2900_vm13, 1.0, %v9071_v5 }
 0x484   :  { %v7903_v24 = vpop.permute.xlu0 %3695  ;;  %v3949_v52 = vmul.f32 %v5282_v48, %v7650_v12  ;;  %v9678_v48 = vld [vmem:[#allocation178_spill] sm:$0xff] }
 0x485   :  { %9664 = vst [vmem:[#allocation25_spill] sm:$0xff] %v7903_v24  ;;  %v7905_v15 = vpop.permute.xlu1 %3691  ;;  %4281 = vperm.xlu1 %5369, %v3944_v19   ;;  %4284 = vperm.xlu0 %5368, %v3945_v58   ;;  %v9670_v19 = vld [vmem:[#allocation44_spill] sm:$0xff] }
 0x486   :  { %9665 = vst [vmem:[#allocation28_spill] sm:$0xff] %v7905_v15  ;;  %vm2901_vm15 = vcmp.lt.s32.totalorder %v9670_v19, 6  ;;  %v9679_v19 = vld [vmem:[#allocation48_spill] sm:$0xff]  ;;  %v9706_v15 = vld [vmem:[#allocation186_spill] sm:$0xff] }
 0x487   :  { %v5283_v43 = vsel %vm2901_vm15, 1.0, %v9071_v5  ;;  %vm2905_vm11 = vcmp.lt.s32.totalorder %v9679_v19, 6  ;;  %v9687_v19 = vld [vmem:[#allocation51_spill] sm:$0xff] }
 0x488   :  { %v7913_v11 = vpop.permute.xlu0 %3703  ;;  %v3950_v51 = vmul.f32 %v5283_v43, %v7648_v16  ;;  %v9680_v16 = vld [vmem:[#allocation180_spill] sm:$0xff]  ;;  %v5287_v38 = vsel %vm2905_vm11, 1.0, %v9071_v5  ;;  %vm2908_vm7 = vcmp.lt.s32.totalorder %v9687_v19, 6 }
 0x489   :  { %9668 = vst [vmem:[#allocation27_spill] sm:$0xff] %v7913_v11  ;;  %v7915_v59 = vpop.permute.xlu1 %3699  ;;  %4287 = vperm.xlu1 %5369, %v3946_v20   ;;  %4290 = vperm.xlu0 %5368, %v3947_v56   ;;  %v9674_v20 = vld [vmem:[#allocation46_spill] sm:$0xff]  ;;  %v9697_v11 = vld [vmem:[#allocation184_spill] sm:$0xff] }
 0x48a   :  { %9669 = vst [vmem:[#allocation30_spill] sm:$0xff] %v7915_v59  ;;  %vm2903_vm14 = vcmp.lt.s32.totalorder %v9674_v20, 6  ;;  %v5288_v20 = vsel %vm2906_vm3, 1.0, %v9071_v5  ;;  %vm2923_vm3 = vcmp.lt.s32.totalorder %v9710_v2, 6 }
 0x48b   :  { %v5285_v23 = vsel %vm2903_vm14, 1.0, %v9071_v5  ;;  %v8037_v1 = vsel %vm2923_vm3, 1.0, %v9071_v5 }
 0x48c   :  { %v7923_v14 = vpop.permute.xlu0 %3714 }
 0x48d   :  { %9672 = vst [vmem:[#allocation29_spill] sm:$0xff] %v7923_v14  ;;  %v7925_v58 = vpop.permute.xlu1 %3707  ;;  %4293 = vperm.xlu1 %5369, %v3948_v44   ;;  %4296 = vperm.xlu0 %5368, %v3949_v52   ;;  %v3952_v44 = vmul.f32 %v5285_v23, %v9678_v48  ;;  %v3953_v52 = vmul.f32 %v5286_v30, %v9680_v16  ;;  %v9686_v23 = vld [vmem:[#allocation182_spill] sm:$0xff] }
 0x48e   :  { %9673 = vst [vmem:[#allocation32_spill] sm:$0xff] %v7925_v58  ;;  %v3955_v48 = vmul.f32 %v5288_v20, %v9686_v23  ;;  %v9694_v20 = vld [vmem:[#allocation55_spill] sm:$0xff]  ;;  %v9696_v23 = vld [vmem:[#allocation181_spill] sm:$0xff] }
 0x48f   :  { %vm2912_vm0 = vcmp.lt.s32.totalorder %v9694_v20, 6 }
 0x490   :  { %v7933_v12 = vpop.permute.xlu0 %3722  ;;  %v5294_v20 = vsel %vm2912_vm0, 1.0, %v9071_v5  ;;  %vm2928_vm0 = vcmp.lt.s32.totalorder %v9727_v27, 6 }
 0x491   :  { %9676 = vst [vmem:[#allocation31_spill] sm:$0xff] %v7933_v12  ;;  %v7935_v56 = vpop.permute.xlu1 %3718  ;;  %4299 = vperm.xlu1 %5369, %v3950_v51   ;;  %4302 = vperm.xlu0 %5368, %v3951_v4   ;;  %v9684_v51 = vld [vmem:[#allocation50_spill] sm:$0xff]  ;;  %v9685_v4 = vld [vmem:[#allocation179_spill] sm:$0xff] }
 0x492   :  { %9677 = vst [vmem:[#allocation33_spill] sm:$0xff] %v7935_v56  ;;  %vm2907_vm12 = vcmp.lt.s32.totalorder %v9684_v51, 6  ;;  %v3954_v22 = vmul.f32 %v5287_v38, %v9685_v4  ;;  %v5290_v38 = vsel %vm2908_vm7, 1.0, %v9071_v5  ;;  %v9693_v51 = vld [vmem:[#allocation73_spill] sm:$0xff]  ;;  %v9695_v4 = vld [vmem:[#allocation74_spill] sm:$0xff] }
 0x493   :  { %v5289_v16 = vsel %vm2907_vm12, 1.0, %v9071_v5  ;;  %vm2913_vm2 = vcmp.lt.s32.totalorder %v9693_v51, 6  ;;  %vm2914_vm4 = vcmp.lt.s32.totalorder %v9695_v4, 6  ;;  %v3957_v53 = vmul.f32 %v5290_v38, %v9697_v11  ;;  %v9701_v4 = vld [vmem:[#allocation77_spill] sm:$0xff]  ;;  %v9726_v12 = vld [vmem:[#allocation86_spill] sm:$0xff] }
 0x494   :  { %v7943_v26 = vpop.permute.xlu0 %3730  ;;  %v3956_v19 = vmul.f32 %v5289_v16, %v9696_v23  ;;  %v5295_v51 = vsel %vm2913_vm2, 1.0, %v9071_v5  ;;  %v5296_v16 = vsel %vm2914_vm4, 1.0, %v9071_v5  ;;  %vm2917_vm15 = vcmp.lt.s32.totalorder %v9701_v4, 6  ;;  %v9703_v23 = vld [vmem:[#allocation56_spill] sm:$0xff]  ;;  %v9708_v4 = vld [vmem:[#allocation79_spill] sm:$0xff] }
 0x495   :  { %9682 = vst [vmem:[#allocation34_spill] sm:$0xff] %v7943_v26  ;;  %v7945_v43 = vpop.permute.xlu1 %3726  ;;  %4305 = vperm.xlu1 %5369, %v3952_v44   ;;  %4308 = vperm.xlu0 %5368, %v3953_v52   ;;  %v9690_v44 = vld [vmem:[#allocation54_spill] sm:$0xff]  ;;  %v9691_v52 = vld [vmem:[#allocation53_spill] sm:$0xff]  ;;  %vm2919_vm9 = vcmp.lt.s32.totalorder %v9703_v23, 6  ;;  %vm2920_vm11 = vcmp.lt.s32.totalorder %v9708_v4, 6  ;;  %vm2929_vm2 = vcmp.lt.s32.totalorder %v9726_v12, 6  ;;  %v3962_v14 = vmul.f32 %v5295_v51, %v9730_v49 }
 0x496   :  { %9683 = vst [vmem:[#allocation36_spill] sm:$0xff] %v7945_v43  ;;  %vm2911_vm10 = vcmp.lt.s32.totalorder %v9690_v44, 6  ;;  %vm2910_vm5 = vcmp.lt.s32.totalorder %v9691_v52, 6  ;;  %v9699_v44 = vld [vmem:[#allocation76_spill] sm:$0xff]  ;;  %v5291_v52 = vsel %vm2909_vm6, 1.0, %v9071_v5  ;;  %v9719_v23 = vld [vmem:[#allocation185_spill] sm:$0xff] }
 0x497   :  { %vm2916_vm13 = vcmp.lt.s32.totalorder %v9699_v44, 6  ;;  %v9704_v44 = vld [vmem:[#allocation78_spill] sm:$0xff]  ;;  %v3958_v24 = vmul.f32 %v5291_v52, %v9705_v28 }
 0x498   :  { %v7953_v30 = vpop.permute.xlu0 %3738  ;;  %v7984_v38 = vsel %vm2916_vm13, 1.0, %v9071_v5  ;;  %vm2918_vm14 = vcmp.lt.s32.totalorder %v9704_v44, 6  ;;  %v9714_v28 = vld [vmem:[#allocation62_spill] sm:$0xff]  ;;  %vm2932_vm13 = vcmp.lt.s32.totalorder %v9738_v25, 6 }
 0x499   :  { %9688 = vst [vmem:[#allocation37_spill] sm:$0xff] %v7953_v30  ;;  %v7959_v58 = vpop.permute.xlu1 %3734  ;;  %4311 = vperm.xlu1 %5369, %v3954_v22   ;;  %4314 = vperm.xlu0 %5368, %v3955_v48   ;;  %v5293_v22 = vsel %vm2911_vm10, 1.0, %v9071_v5  ;;  %v5292_v48 = vsel %vm2910_vm5, 1.0, %v9071_v5  ;;  %v9711_v30 = vld [vmem:[#allocation81_spill] sm:$0xff]  ;;  %v2300_v52 = vcvt.f32.s32 %v9714_v28  ;;  %v9725_v43 = vld [vmem:[#allocation90_spill] sm:$0xff] }
 0x49a   :  { %9692 = vst [vmem:[#allocation38_spill] sm:$0xff] %v7959_v58  ;;  %vm2922_vm12 = vcmp.lt.s32.totalorder %v9711_v30, 6  ;;  %v9713_v58 = vld [vmem:[#allocation61_spill] sm:$0xff]  ;;  %v2287_v0 = vcvt.f32.s32 %v9725_v43 }
 0x49b   :  { %v2288_v34 = vcvt.f32.s32 %v9713_v58  ;;  %v8019_v58 = vsel %vm2921_vm1, 1.0, %v9071_v5  ;;  %v8032_v44 = vsel %vm2922_vm12, 1.0, %v9071_v5 }
 0x49c   :  { %v7972_v59 = vpop.permute.xlu0 %3746 }
 0x49d   :  { %9700 = vst [vmem:[#allocation39_spill] sm:$0xff] %v7972_v59  ;;  %v7978_v11 = vpop.permute.xlu1 %3742  ;;  %4317 = vperm.xlu1 %5369, %v3956_v19   ;;  %4320 = vperm.xlu0 %5368, %v3957_v53   ;;  %v3959_v59 = vmul.f32 %v5292_v48, %v9706_v15  ;;  %v9709_v19 = vld [vmem:[#allocation60_spill] sm:$0xff]  ;;  %v9715_v15 = vld [vmem:[#allocation83_spill] sm:$0xff]  ;;  %v9716_v48 = vld [vmem:[#allocation82_spill] sm:$0xff] }
 0x49e   :  { %9702 = vst [vmem:[#allocation40_spill] sm:$0xff] %v7978_v11  ;;  %v2276_v53 = vcvt.f32.s32 %v9709_v19  ;;  %v7994_v11 = vsel %vm2917_vm15, 1.0, %v9071_v5  ;;  %vm2925_vm7 = vcmp.lt.s32.totalorder %v9715_v15, 6  ;;  %vm2924_vm6 = vcmp.lt.s32.totalorder %v9716_v48, 6  ;;  %v9720_v48 = vld [vmem:[#allocation188_spill] sm:$0xff] }
 0x49f   :  { %v8009_v19 = vsel %vm2919_vm9, 1.0, %v9071_v5  ;;  %v3960_v15 = vmul.f32 %v5293_v22, %v9719_v23  ;;  %v8040_v4 = vsel %vm2925_vm7, 1.0, %v9071_v5  ;;  %v2289_v22 = vshll.u32 %v2288_v34, 16  ;;  %v9729_v34 = vld [vmem:[#allocation92_spill] sm:$0xff] }
 0x4a0   :  { %v7998_v42 = vpop.permute.xlu0 %3754  ;;  %v2277_v6 = vshll.u32 %v2276_v53, 16  ;;  %v2301_v23 = vshll.u32 %v2300_v52, 16  ;;  %v9724_v53 = vld [vmem:[#allocation88_spill] sm:$0xff]  ;;  %v2299_v52 = vcvt.f32.s32 %v9729_v34 }
 0x4a1   :  { %9712 = vst [vmem:[#allocation41_spill] sm:$0xff] %v7998_v42  ;;  %v8004_v26 = vpop.permute.xlu1 %3750  ;;  %4323 = vperm.xlu1 %5369, %v3958_v24   ;;  %4326 = vperm.xlu0 %5368, %v3959_v59   ;;  %v8014_v42 = vsel %vm2918_vm14, 1.0, %v9071_v5  ;;  %v8024_v24 = vsel %vm2920_vm11, 1.0, %v9071_v5  ;;  %v9718_v59 = vld [vmem:[#allocation63_spill] sm:$0xff]  ;;  %v2275_v2 = vcvt.f32.s32 %v9724_v53 }
 0x4a2   :  { %9717 = vst [vmem:[#allocation42_spill] sm:$0xff] %v8004_v26  ;;  %v2312_v28 = vcvt.f32.s32 %v9718_v59  ;;  %v3961_v26 = vmul.f32 %v5294_v20, %v9720_v48  ;;  %v8043_v59 = vsel %vm2924_vm6, 1.0, %v9071_v5  ;;  %v9721_v20 = vld [vmem:[#allocation58_spill] sm:$0xff]  ;;  %v9722_v48 = vld [vmem:[#allocation84_spill] sm:$0xff]  ;;  %v9734_v53 = vld [vmem:[#allocation87_spill] sm:$0xff]  ;;  %v2302_v50 = vadd.s32 %v2301_v23, %v2299_v52 }
 0x4a3   :  { %vm2927_vm10 = vcmp.lt.s32.totalorder %v9721_v20, 6  ;;  %vm2926_vm5 = vcmp.lt.s32.totalorder %v9722_v48, 6  ;;  %v9731_v48 = vld [vmem:[#allocation190_spill] sm:$0xff]  ;;  %vm2930_vm4 = vcmp.lt.s32.totalorder %v9734_v53, 6  ;;  %v2278_v43 = vadd.s32 %v2277_v6, %v2275_v2  ;;  %v9739_v6 = vld [vmem:[#allocation189_spill] sm:$0xff]  ;;  %v9747_v52 = vld [vmem:[#allocation67_spill] sm:$0xff] }
 0x4a4   :  { %v8053_v5 = vpop.permute.xlu0 %3762  ;;  %v2313_v56 = vshll.u32 %v2312_v28, 16  ;;  %v3963_v46 = vmul.f32 %v5296_v16, %v9731_v48  ;;  %v9741_v16 = vld [vmem:[#allocation91_spill] sm:$0xff]  ;;  %v9743_v20 = vld [vmem:[#allocation65_spill] sm:$0xff]  ;;  %vm2936_vm1 = vcmp.lt.s32.totalorder %v2302_v50, 6  ;;  %v2360_v48 = vcvt.f32.s32 %v9747_v52 }
 0x4a5   :  { %v8047_v30 = vpop.permute.xlu1 %3758  ;;  %4329 = vperm.xlu1 %5369, %v3960_v15   ;;  %4332 = vperm.xlu0 %5368, %v3961_v26   ;;  %9728 = vst [vmem:[#allocation44_spill] sm:$0xff] %v8053_v5  ;;  %v9733_v26 = vmov 0.0   ;;  %v2290_v5 = vadd.s32 %v2289_v22, %v2287_v0  ;;  %v9740_v0 = vld [vmem:[#allocation192_spill] sm:$0xff]  ;;  %vm2933_vm15 = vcmp.lt.s32.totalorder %v9741_v16, 6  ;;  %vm2934_vm9 = vcmp.lt.s32.totalorder %v2278_v43, 6  ;;  %v9749_v43 = vld [vmem:[#allocation194_spill] sm:$0xff] }
 0x4a6   :  { %9723 = vst [vmem:[#allocation43_spill] sm:$0xff] %v8047_v30  ;;  %v9732_v30 = vld [vmem:[#allocation64_spill] sm:$0xff]  ;;  %v8060_v60 = vsel %vm2926_vm5, 1.0, %v9733_v26  ;;  %v8070_v49 = vsel %vm2927_vm10, 1.0, %v9733_v26  ;;  %v8075_v51 = vsel %vm2929_vm2, 1.0, %v9733_v26  ;;  %v8080_v33 = vsel %vm2928_vm0, 1.0, %v9733_v26 }
 0x4a7   :  { %v2324_v15 = vcvt.f32.s32 %v9732_v30  ;;  %v2314_v28 = vadd.s32 %v2313_v56, %v2311_v21  ;;  %v8089_v12 = vsel %vm2931_vm8, 1.0, %v9733_v26  ;;  %v8094_v27 = vsel %vm2930_vm4, 1.0, %v9733_v26  ;;  %v9744_v30 = vld [vmem:[#allocation66_spill] sm:$0xff] }
 0x4a8   :  { %v8096_v23 = vpop.permute.xlu0 %3770  ;;  %v2348_v2 = vcvt.f32.s32 %v9744_v30  ;;  %vm2935_vm14 = vcmp.lt.s32.totalorder %v2290_v5, 6  ;;  %v9746_v21 = vld [vmem:[#allocation94_spill] sm:$0xff]  ;;  %v8112_v53 = vsel %vm2932_vm13, 1.0, %v9733_v26  ;;  %v9748_v5 = vld [vmem:[#allocation191_spill] sm:$0xff] }
 0x4a9   :  { %v8065_v34 = vpop.permute.xlu1 %3766  ;;  %4335 = vperm.xlu1 %5369, %v3962_v14   ;;  %4338 = vperm.xlu0 %5368, %v3963_v46   ;;  %v3964_v46 = vmul.f32 %v7981_v13, %v9739_v6  ;;  %v3965_v14 = vmul.f32 %v7984_v38, %v9740_v0  ;;  %v2325_v22 = vshll.u32 %v2324_v15, 16  ;;  %9742 = vst [vmem:[#allocation46_spill] sm:$0xff] %v8096_v23  ;;  %v2336_v13 = vcvt.f32.s32 %v9743_v20  ;;  %v9750_v0 = vld [vmem:[#allocation68_spill] sm:$0xff]  ;;  %v9755_v23 = vld [vmem:[#allocation101_spill] sm:$0xff] }
 0x4aa   :  { %9737 = vst [vmem:[#allocation45_spill] sm:$0xff] %v8065_v34  ;;  %v2323_v56 = vcvt.f32.s32 %v9746_v21  ;;  %v8107_v15 = vsel %vm2933_vm15, 1.0, %v9733_v26  ;;  %v3966_v50 = vmul.f32 %v7994_v11, %v9748_v5  ;;  %v3967_v6 = vmul.f32 %v8014_v42, %v9749_v43  ;;  %v9752_v11 = vld [vmem:[#allocation95_spill] sm:$0xff]  ;;  %v9753_v5 = vld [vmem:[#allocation69_spill] sm:$0xff] }
 0x4ab   :  { %vm2937_vm11 = vcmp.lt.s32.totalorder %v2314_v28, 6  ;;  %v8123_v16 = vsel %vm2935_vm14, 1.0, %v9733_v26  ;;  %v8126_v20 = vsel %vm2936_vm1, 1.0, %v9733_v26  ;;  %v2335_v21 = vcvt.f32.s32 %v9752_v11  ;;  %v9759_v11 = vld [vmem:[#allocation105_spill] sm:$0xff]  ;;  %v9765_v28 = vld [vmem:[#allocation98_spill] sm:$0xff] }
 0x4ac   :  { %v8128_v25 = vadd.s32 %v2325_v22, %v2323_v56  ;;  %v2337_v52 = vshll.u32 %v2336_v13, 16  ;;  %v2349_v42 = vshll.u32 %v2348_v2, 16  ;;  %v2384_v43 = vcvt.f32.s32 %v9753_v5  ;;  %v9758_v56 = vld [vmem:[#allocation96_spill] sm:$0xff]  ;;  %v9760_v2 = vld [vmem:[#allocation193_spill] sm:$0xff] }
 0x4ad   :  { %v8100_v38 = vpop.permute.xlu1 %3774  ;;  %4341 = vperm.xlu1 %5369, %v3964_v46   ;;  %4344 = vperm.xlu0 %5368, %v3965_v14   ;;  %v8119_v46 = vsel %vm2934_vm9, 1.0, %v9733_v26  ;;  %v2372_v14 = vcvt.f32.s32 %v9750_v0  ;;  %v2361_v0 = vshll.u32 %v2360_v48, 16  ;;  %v2396_v34 = vcvt.f32.s32 %v9755_v23  ;;  %v9763_v23 = vld [vmem:[#allocation107_spill] sm:$0xff] }
 0x4ae   :  { %9745 = vst [vmem:[#allocation47_spill] sm:$0xff] %v8100_v38  ;;  %v8140_v22 = vsel %vm2937_vm11, 1.0, %v9733_v26  ;;  %v2420_v13 = vcvt.f32.s32 %v9759_v11  ;;  %v3968_v5 = vmul.f32 %v8009_v19, %v9760_v2  ;;  %v2432_v36 = vcvt.f32.s32 %v9763_v23 }
 0x4af   :  { %9757 = vst [vmem:[#allocation180_spill] sm:$0xff] %v8140_v22  ;;  %vm2938_vm3 = vcmp.lt.s32.totalorder %v8128_v25, 6  ;;  %v2371_v41 = vcvt.f32.s32 %v9765_v28  ;;  %v2338_v3 = vadd.s32 %v2337_v52, %v2335_v21  ;;  %v2397_v19 = vshll.u32 %v2396_v34, 16  ;;  %v9768_v22 = vld [vmem:[#allocation70_spill] sm:$0xff]  ;;  %v9769_v21 = vld [vmem:[#allocation100_spill] sm:$0xff] }
 0x4b0   :  { %v8130_v30 = vpop.permute.xlu0 %4161  ;;  %v2421_v55 = vshll.u32 %v2420_v13, 16  ;;  %v9770_v52 = vld [vmem:[#allocation102_spill] sm:$0xff]  ;;  %v3975_v25 = vmul.f32 %v8060_v60, %v7725_v18 }
 0x4b1   :  { %9751 = vst [vmem:[#allocation178_spill] sm:$0xff] %v8130_v30  ;;  %v8134_v38 = vpop.permute.xlu1 %4164  ;;  %4347 = vperm.xlu1 %5369, %v3966_v50   ;;  %4350 = vperm.xlu0 %5368, %v3967_v6   ;;  %v2347_v30 = vcvt.f32.s32 %v9758_v56  ;;  %v3969_v50 = vmul.f32 %v8024_v24, %v9761_v9  ;;  %v9762_v6 = vld [vmem:[#allocation97_spill] sm:$0xff]  ;;  %v2385_v56 = vshll.u32 %v2384_v43, 16  ;;  %v2409_v9 = vshll.u32 %v2408_v40, 16  ;;  %v9771_v40 = vld [vmem:[#allocation104_spill] sm:$0xff] }
 0x4b2   :  { %9754 = vst [vmem:[#allocation48_spill] sm:$0xff] %v8134_v38  ;;  %v2359_v48 = vcvt.f32.s32 %v9762_v6  ;;  %v2373_v38 = vshll.u32 %v2372_v14, 16  ;;  %v9766_v24 = vld [vmem:[#allocation109_spill] sm:$0xff]  ;;  %v9767_v6 = vld [vmem:[#allocation99_spill] sm:$0xff]  ;;  %v3971_v43 = vmul.f32 %v8032_v44, %v7705_v32  ;;  %v2419_v28 = vcvt.f32.s32 %v9771_v40 }
 0x4b3   :  { %v2350_v11 = vadd.s32 %v2349_v42, %v2347_v30  ;;  %v2444_v2 = vcvt.f32.s32 %v9766_v24  ;;  %v2383_v23 = vcvt.f32.s32 %v9767_v6  ;;  %v2395_v30 = vcvt.f32.s32 %v9769_v21  ;;  %v9773_v24 = vld [vmem:[#allocation108_spill] sm:$0xff] }
 0x4b4   :  { %v8151_v7 = vpop.permute.xlu0 %4170  ;;  %v2362_v14 = vadd.s32 %v2361_v0, %v2359_v48  ;;  %v2407_v42 = vcvt.f32.s32 %v9770_v52  ;;  %vm2939_vm12 = vcmp.lt.s32.totalorder %v2338_v3, 6  ;;  %v2443_v6 = vcvt.f32.s32 %v9773_v24  ;;  %v9777_v52 = vld [vmem:[#allocation117_spill] sm:$0xff]  ;;  %v9797_v24 = vld [vmem:[#allocation124_spill] sm:$0xff] }
 0x4b5   :  { %9764 = vst [vmem:[#allocation49_spill] sm:$0xff] %v8151_v7  ;;  %v8154_v37 = vpop.permute.xlu1 %4167  ;;  %4353 = vperm.xlu1 %5369, %v3968_v5   ;;  %4356 = vperm.xlu0 %5368, %v3969_v50   ;;  %v3970_v7 = vmul.f32 %v8019_v58, %v9768_v22  ;;  %v2433_v5 = vshll.u32 %v2432_v36, 16  ;;  %v2374_v50 = vadd.s32 %v2373_v38, %v2371_v41  ;;  %vm2940_vm7 = vcmp.lt.s32.totalorder %v2350_v11, 6  ;;  %v9772_v58 = vld [vmem:[#allocation106_spill] sm:$0xff] }
 0x4b6   :  { %v2386_v0 = vadd.s32 %v2385_v56, %v2383_v23  ;;  %v2431_v22 = vcvt.f32.s32 %v9772_v58  ;;  %v2445_v32 = vshll.u32 %v2444_v2, 16  ;;  %v2410_v44 = vadd.s32 %v2409_v9, %v2407_v42  ;;  %v9774_v56 = vld [vmem:[#allocation115_spill] sm:$0xff] }
 0x4b7   :  { %v2398_v48 = vadd.s32 %v2397_v19, %v2395_v30  ;;  %v3972_v36 = vmul.f32 %v8037_v1, %v7703_v45  ;;  %v3973_v41 = vmul.f32 %v8043_v59, %v7715_v31  ;;  %vm2941_vm6 = vcmp.lt.s32.totalorder %v2362_v14, 6  ;;  %v9775_v19 = vld [vmem:[#allocation111_spill] sm:$0xff] }
 0x4b8   :  { %v8164_v34 = vpop.permute.xlu0 %4176  ;;  %v2422_v38 = vadd.s32 %v2421_v55, %v2419_v28  ;;  %v2480_v23 = vcvt.f32.s32 %v9774_v56  ;;  %vm2942_vm10 = vcmp.lt.s32.totalorder %v2374_v50, 6  ;;  %v8180_v9 = vsel %vm2939_vm12, 1.0, %v9733_v26  ;;  %v9779_v50 = vld [vmem:[#allocation114_spill] sm:$0xff]  ;;  %v9780_v28 = vld [vmem:[#allocation121_spill] sm:$0xff] }
 0x4b9   :  { %v8167_v13 = vpop.permute.xlu1 %4173  ;;  %4359 = vperm.xlu1 %5369, %v3970_v7   ;;  %4362 = vperm.xlu0 %5368, %v3971_v43   ;;  %v2434_v7 = vadd.s32 %v2433_v5, %v2431_v22  ;;  %v8185_v45 = vsel %vm2938_vm3, 1.0, %v9733_v26  ;;  %v8189_v31 = vsel %vm2940_vm7, 1.0, %v9733_v26  ;;  %vm2943_vm5 = vcmp.lt.s32.totalorder %v2386_v0, 6  ;;  %v9781_v22 = vld [vmem:[#allocation110_spill] sm:$0xff] }
 0x4ba   :  { %v8194_v1 = vsel %vm2941_vm6, 1.0, %v9733_v26  ;;  %vm2945_vm2 = vcmp.lt.s32.totalorder %v2410_v44, 6  ;;  %vm2944_vm0 = vcmp.lt.s32.totalorder %v2398_v48, 6  ;;  %v2446_v3 = vadd.s32 %v2445_v32, %v2443_v6  ;;  %v9783_v6 = vld [vmem:[#allocation123_spill] sm:$0xff] }
 0x4bb   :  { %v3974_v59 = vmul.f32 %v8040_v4, %v7713_v47  ;;  %v8202_v11 = vsel %vm2942_vm10, 1.0, %v9733_v26  ;;  %vm2946_vm4 = vcmp.lt.s32.totalorder %v2422_v38, 6  ;;  %v2456_v2 = vcvt.f32.s32 %v9775_v19  ;;  %v9778_v47 = vld [vmem:[#allocation119_spill] sm:$0xff]  ;;  %v9785_v19 = vld [vmem:[#allocation125_spill] sm:$0xff] }
 0x4bc   :  { %v8176_v43 = vpop.permute.xlu0 %4182  ;;  %v2481_v14 = vshll.u32 %v2480_v23, 16  ;;  %v8206_v21 = vsel %vm2943_vm5, 1.0, %v9733_v26  ;;  %vm2947_vm8 = vcmp.lt.s32.totalorder %v2434_v7, 6  ;;  %v2492_v42 = vcvt.f32.s32 %v9777_v52 }
 0x4bd   :  { %v8191_v55 = vpop.permute.xlu1 %4179  ;;  %4365 = vperm.xlu1 %5369, %v3972_v36   ;;  %4368 = vperm.xlu0 %5368, %v3973_v41   ;;  %v2504_v4 = vcvt.f32.s32 %v9778_v47  ;;  %v8213_v18 = vsel %vm2945_vm2, 1.0, %v9733_v26  ;;  %v8216_v60 = vsel %vm2944_vm0, 1.0, %v9733_v26  ;;  %v2479_v40 = vcvt.f32.s32 %v9779_v50  ;;  %v9788_v50 = vld [vmem:[#allocation129_spill] sm:$0xff] }
 0x4be   :  { %v2516_v0 = vcvt.f32.s32 %v9780_v28  ;;  %v8223_v58 = vsel %vm2946_vm4, 1.0, %v9733_v26  ;;  %vm2948_vm13 = vcmp.lt.s32.totalorder %v2446_v3, 6  ;;  %v3976_v44 = vmul.f32 %v8070_v49, %v7723_v61  ;;  %v9786_v49 = vld [vmem:[#allocation116_spill] sm:$0xff] }
 0x4bf   :  { %v3977_v48 = vmul.f32 %v8080_v33, %v7735_v35  ;;  %v8232_v36 = vsel %vm2947_vm8, 1.0, %v9733_v26  ;;  %v2457_v41 = vshll.u32 %v2456_v2, 16  ;;  %v2528_v56 = vcvt.f32.s32 %v9783_v6  ;;  %v9787_v2 = vld [vmem:[#allocation127_spill] sm:$0xff] }
 0x4c0   :  { %v8208_v30 = vpop.permute.xlu0 %4188  ;;  %v2482_v23 = vadd.s32 %v2481_v14, %v2479_v40  ;;  %v2493_v3 = vshll.u32 %v2492_v42, 16  ;;  %v2540_v52 = vcvt.f32.s32 %v9785_v19  ;;  %v8240_v61 = vsel %vm2948_vm13, 1.0, %v9733_v26  ;;  %v9789_v40 = vld [vmem:[#allocation118_spill] sm:$0xff]  ;;  %v9790_v42 = vld [vmem:[#allocation131_spill] sm:$0xff] }
 0x4c1   :  { %9776 = vst [vmem:[#allocation50_spill] sm:$0xff] %v8208_v30  ;;  %v8218_v5 = vpop.permute.xlu1 %4185  ;;  %4371 = vperm.xlu1 %5369, %v3974_v59   ;;  %4374 = vperm.xlu0 %5368, %v3975_v25   ;;  %v2505_v25 = vshll.u32 %v2504_v4, 16  ;;  %v2491_v33 = vcvt.f32.s32 %v9786_v49  ;;  %v2517_v7 = vshll.u32 %v2516_v0, 16  ;;  %v2552_v47 = vcvt.f32.s32 %v9787_v2 }
 0x4c2   :  { %v2564_v14 = vcvt.f32.s32 %v9788_v50  ;;  %v2503_v28 = vcvt.f32.s32 %v9789_v40  ;;  %v2576_v4 = vcvt.f32.s32 %v9790_v42  ;;  %v3978_v6 = vmul.f32 %v8075_v51, %v7733_v29  ;;  %v9794_v50 = vld [vmem:[#allocation133_spill] sm:$0xff]  ;;  %v9796_v29 = vld [vmem:[#allocation122_spill] sm:$0xff] }
 0x4c3   :  { %v3979_v19 = vmul.f32 %v8094_v27, %v7745_v54  ;;  %v2529_v49 = vshll.u32 %v2528_v56, 16  ;;  %vm2951_vm15 = vcmp.lt.s32.totalorder %v2482_v23, 6  ;;  %v2541_v2 = vshll.u32 %v2540_v52, 16 }
 0x4c4   :  { %v8236_v59 = vpop.permute.xlu0 %4194  ;;  %v2588_v38 = vcvt.f32.s32 %v9794_v50  ;;  %v2506_v40 = vadd.s32 %v2505_v25, %v2503_v28  ;;  %v2527_v51 = vcvt.f32.s32 %v9796_v29  ;;  %v2553_v54 = vshll.u32 %v2552_v47, 16  ;;  %v9798_v25 = vld [vmem:[#allocation126_spill] sm:$0xff] }
 0x4c5   :  { %9784 = vst [vmem:[#allocation179_spill] sm:$0xff] %v8236_v59  ;;  %v8242_v35 = vpop.permute.xlu1 %4191  ;;  %4377 = vperm.xlu1 %5369, %v3976_v44   ;;  %4380 = vperm.xlu0 %5368, %v3977_v48   ;;  %v9792_v48 = vld [vmem:[#allocation120_spill] sm:$0xff]  ;;  %v2494_v59 = vadd.s32 %v2493_v3, %v2491_v33  ;;  %v2565_v27 = vshll.u32 %v2564_v14, 16  ;;  %v2577_v56 = vshll.u32 %v2576_v4, 16  ;;  %v3981_v52 = vmul.f32 %v8112_v53, %v7755_v57  ;;  %v9802_v47 = vld [vmem:[#allocation130_spill] sm:$0xff] }
 0x4c6   :  { %v2515_v32 = vcvt.f32.s32 %v9792_v48  ;;  %v2539_v48 = vcvt.f32.s32 %v9797_v24  ;;  %v2551_v3 = vcvt.f32.s32 %v9798_v25  ;;  %v9799_v33 = vld [vmem:[#allocation128_spill] sm:$0xff]  ;;  %v2530_v50 = vadd.s32 %v2529_v49, %v2527_v51  ;;  %v9809_v25 = vld [vmem:[#allocation147_spill] sm:$0xff] }
 0x4c7   :  { %v2563_v28 = vcvt.f32.s32 %v9799_v33  ;;  %vm2952_vm9 = vcmp.lt.s32.totalorder %v2494_v59, 6  ;;  %vm2953_vm14 = vcmp.lt.s32.totalorder %v2506_v40, 6  ;;  %v3982_v4 = vmul.f32 %v8107_v15, %v7753_v39 }
 0x4c8   :  { %v8255_v0 = vpop.permute.xlu0 %4200  ;;  %v2518_v44 = vadd.s32 %v2517_v7, %v2515_v32  ;;  %v2575_v32 = vcvt.f32.s32 %v9802_v47  ;;  %v2589_v7 = vshll.u32 %v2588_v38, 16  ;;  %v2542_v24 = vadd.s32 %v2541_v2, %v2539_v48  ;;  %v9813_v47 = vld [vmem:[#allocation153_spill] sm:$0xff] }
 0x4c9   :  { %9793 = vst [vmem:[#allocation182_spill] sm:$0xff] %v8255_v0  ;;  %v8258_v42 = vpop.permute.xlu1 %4197  ;;  %4383 = vperm.xlu1 %5369, %v3978_v6   ;;  %4386 = vperm.xlu0 %5368, %v3979_v19   ;;  %v3980_v0 = vmul.f32 %v8089_v12, %v7743_v62  ;;  %v9800_v6 = vld [vmem:[#allocation135_spill] sm:$0xff]  ;;  %v2554_v62 = vadd.s32 %v2553_v54, %v2551_v3  ;;  %v9804_v12 = vld [vmem:[#allocation132_spill] sm:$0xff]  ;;  %v9805_v2 = vcvt.f32.s32 %v9781_v22  ;;  %vm2955_vm11 = vcmp.lt.s32.totalorder %v2530_v50, 6 }
 0x4ca   :  { %9795 = vst [vmem:[#allocation51_spill] sm:$0xff] %v8258_v42  ;;  %v2600_v19 = vcvt.f32.s32 %v9800_v6  ;;  %vm2954_vm1 = vcmp.lt.s32.totalorder %v2518_v44, 6  ;;  %v2566_v57 = vadd.s32 %v2565_v27, %v2563_v28  ;;  %v2587_v53 = vcvt.f32.s32 %v9804_v12  ;;  %v9810_v6 = vld [vmem:[#allocation149_spill] sm:$0xff] }
 0x4cb   :  { %v3983_v49 = vmul.f32 %v8119_v46, %v7765_v10  ;;  %v2578_v51 = vadd.s32 %v2577_v56, %v2575_v32  ;;  %v8281_v48 = vadd.s32 %v2457_v41, %v9805_v2  ;;  %v8290_v54 = vsel %vm2953_vm14, 1.0, %v9733_v26  ;;  %v9807_v46 = vld [vmem:[#allocation134_spill] sm:$0xff]  ;;  %v9808_v56 = vld [vmem:[#allocation137_spill] sm:$0xff]  ;;  %v9819_v2 = vld [vmem:[#allocation4_spill] sm:$0xff] }
 0x4cc   :  { %v8269_v29 = vpop.permute.xlu0 %4206  ;;  %v2601_v38 = vshll.u32 %v2600_v19, 16  ;;  %v8294_v39 = vsel %vm2952_vm9, 1.0, %v9733_v26  ;;  %vm2956_vm3 = vcmp.lt.s32.totalorder %v2542_v24, 6  ;;  %v2590_v10 = vadd.s32 %v2589_v7, %v2587_v53  ;;  %v9814_v7 = vld [vmem:[#allocation155_spill] sm:$0xff]  ;;  %v9817_v53 = vld [vmem:[#allocation157_spill] sm:$0xff] }
 0x4cd   :  { %9801 = vst [vmem:[#allocation52_spill] sm:$0xff] %v8269_v29  ;;  %v8272_v14 = vpop.permute.xlu1 %4203  ;;  %4389 = vperm.xlu1 %5369, %v3980_v0   ;;  %4392 = vperm.xlu0 %5368, %v3981_v52   ;;  %9806 = vst [vmem:[#allocation53_spill] sm:$0xff] %v8281_v48  ;;  %v8285_v0 = vsel %vm2951_vm15, 1.0, %v9733_v26  ;;  %v2599_v22 = vcvt.f32.s32 %v9807_v46  ;;  %v8301_v41 = vsel %vm2954_vm1, 1.0, %v9733_v26  ;;  %vm2957_vm12 = vcmp.lt.s32.totalorder %v2554_v62, 6  ;;  %v9828_v29 = vld [vmem:[#allocation150_spill] sm:$0xff] }
 0x4ce   :  { %9803 = vst [vmem:[#allocation54_spill] sm:$0xff] %v8272_v14  ;;  %vm2958_vm7 = vcmp.lt.s32.totalorder %v2566_v57, 6  ;;  %v3984_v23 = vmul.f32 %v8123_v16, %v7763_v17  ;;  %v3985_v59 = vmul.f32 %v8126_v20, %v7775_v8  ;;  %v8308_v27 = vsel %vm2955_vm11, 1.0, %v9733_v26  ;;  %v9812_v20 = vld [vmem:[#allocation151_spill] sm:$0xff]  ;;  %v9816_v57 = vld [vmem:[#allocation136_spill] sm:$0xff] }
 0x4cf   :  { %vm2959_vm6 = vcmp.lt.s32.totalorder %v2578_v51, 6  ;;  %v2612_v52 = vcvt.f32.s32 %v9808_v56  ;;  %v2672_v3 = vcvt.f32.s32 %v9809_v25  ;;  %v8313_v44 = vsel %vm2956_vm3, 1.0, %v9733_v26  ;;  %v9821_v51 = vld [vmem:[#allocation139_spill] sm:$0xff] }
 0x4d0   :  { %v8287_v40 = vpop.permute.xlu0 %4212  ;;  %v2602_v33 = vadd.s32 %v2601_v38, %v2599_v22  ;;  %v2684_v19 = vcvt.f32.s32 %v9810_v6  ;;  %v8319_v17 = vsel %vm2957_vm12, 1.0, %v9733_v26  ;;  %v8322_v8 = vsel %vm2958_vm7, 1.0, %v9733_v26  ;;  %v9822_v6 = vld [vmem:[#allocation159_spill] sm:$0xff] }
 0x4d1   :  { %v8296_v15 = vpop.permute.xlu1 %4209  ;;  %4395 = vperm.xlu1 %5369, %v3982_v4   ;;  %4398 = vperm.xlu0 %5368, %v3983_v49   ;;  %9811 = vst [vmem:[#allocation73_spill] sm:$0xff] %v8322_v8  ;;  %vm2960_vm10 = vcmp.lt.s32.totalorder %v2590_v10, 6  ;;  %v2696_v50 = vcvt.f32.s32 %v9812_v20  ;;  %v2708_v32 = vcvt.f32.s32 %v9813_v47  ;;  %v2720_v24 = vcvt.f32.s32 %v9814_v7  ;;  %v9818_v49 = vld [vmem:[#allocation180_spill] sm:$0xff]  ;;  %v9823_v47 = vld [vmem:[#allocation161_spill] sm:$0xff] }
 0x4d2   :  { %v8331_v62 = vsel %vm2959_vm6, 1.0, %v9733_v26  ;;  %v2611_v12 = vcvt.f32.s32 %v9816_v57  ;;  %v2732_v4 = vcvt.f32.s32 %v9817_v53  ;;  %v3986_v38 = vmul.f32 %v9818_v49, %v7773_v63  ;;  %v9824_v63 = vld [vmem:[#allocation146_spill] sm:$0xff]  ;;  %v9825_v49 = vld [vmem:[#allocation148_spill] sm:$0xff] }
 0x4d3   :  { %9815 = vst [vmem:[#allocation55_spill] sm:$0xff] %v8331_v62  ;;  %v3987_v10 = vmul.f32 %v8185_v45, %v9819_v2  ;;  %v2613_v46 = vshll.u32 %v2612_v52, 16  ;;  %v2673_v22 = vshll.u32 %v2672_v3, 16  ;;  %vm2961_vm5 = vcmp.lt.s32.totalorder %v2602_v33, 6  ;;  %v9829_v62 = vld [vmem:[#allocation152_spill] sm:$0xff] }
 0x4d4   :  { %v8315_v28 = vpop.permute.xlu0 %4218  ;;  %v2624_v56 = vcvt.f32.s32 %v9821_v51  ;;  %v2685_v25 = vshll.u32 %v2684_v19, 16  ;;  %v2744_v20 = vcvt.f32.s32 %v9822_v6  ;;  %v2756_v7 = vcvt.f32.s32 %v9823_v47  ;;  %v9827_v19 = vld [vmem:[#allocation5_spill] sm:$0xff]  ;;  %v9840_v33 = vld [vmem:[#allocation8_spill] sm:$0xff] }
 0x4d5   :  { %v8324_v16 = vpop.permute.xlu1 %4215  ;;  %4401 = vperm.xlu1 %5369, %v3984_v23   ;;  %4404 = vperm.xlu0 %5368, %v3985_v59   ;;  %v8340_v23 = vsel %vm2960_vm10, 1.0, %v9733_v26  ;;  %v2671_v45 = vcvt.f32.s32 %v9824_v63  ;;  %v2697_v52 = vshll.u32 %v2696_v50, 16  ;;  %v2709_v3 = vshll.u32 %v2708_v32, 16  ;;  %v9831_v50 = vld [vmem:[#allocation156_spill] sm:$0xff] }
 0x4d6   :  { %9820 = vst [vmem:[#allocation74_spill] sm:$0xff] %v8340_v23  ;;  %v2721_v53 = vshll.u32 %v2720_v24, 16  ;;  %v2683_v2 = vcvt.f32.s32 %v9825_v49  ;;  %v2733_v48 = vshll.u32 %v2732_v4, 16  ;;  %v9826_v23 = vld [vmem:[#allocation72_spill] sm:$0xff]  ;;  %v3989_v6 = vmul.f32 %v8189_v31, %v9827_v19 }
 0x4d7   :  { %v3988_v51 = vmul.f32 %v8180_v9, %v9826_v23  ;;  %v2695_v47 = vcvt.f32.s32 %v9828_v29  ;;  %v2707_v14 = vcvt.f32.s32 %v9829_v62  ;;  %v2674_v8 = vadd.s32 %v2673_v22, %v2671_v45  ;;  %v9832_v9 = vld [vmem:[#allocation158_spill] sm:$0xff]  ;;  %v9833_v62 = vld [vmem:[#allocation160_spill] sm:$0xff]  ;;  %v9835_v45 = vld [vmem:[#allocation7_spill] sm:$0xff] }
 0x4d8   :  { %v8342_v59 = vpop.permute.xlu0 %4224  ;;  %v2731_v32 = vcvt.f32.s32 %v9831_v50  ;;  %v2745_v24 = vshll.u32 %v2744_v20, 16  ;;  %v2757_v49 = vshll.u32 %v2756_v7, 16  ;;  %v2686_v4 = vadd.s32 %v2685_v25, %v2683_v2  ;;  %v9836_v7 = vld [vmem:[#allocation138_spill] sm:$0xff] }
 0x4d9   :  { %v8347_v57 = vpop.permute.xlu1 %4221  ;;  %4407 = vperm.xlu1 %5369, %v3986_v38   ;;  %4410 = vperm.xlu0 %5368, %v3987_v10   ;;  %v9830_v38 = vld [vmem:[#allocation154_spill] sm:$0xff]  ;;  %v2743_v31 = vcvt.f32.s32 %v9832_v9  ;;  %v2698_v23 = vadd.s32 %v2697_v52, %v2695_v47  ;;  %v2710_v19 = vadd.s32 %v2709_v3, %v2707_v14  ;;  %v2755_v30 = vcvt.f32.s32 %v9833_v62  ;;  %v9838_v14 = vld [vmem:[#allocation163_spill] sm:$0xff] }
 0x4da   :  { %v2719_v10 = vcvt.f32.s32 %v9830_v38  ;;  %v9834_v38 = vld [vmem:[#allocation6_spill] sm:$0xff]  ;;  %v3991_v50 = vmul.f32 %v8202_v11, %v9835_v45  ;;  %v2734_v20 = vadd.s32 %v2733_v48, %v2731_v32  ;;  %v2623_v25 = vcvt.f32.s32 %v9836_v7  ;;  %v9839_v11 = vld [vmem:[#allocation165_spill] sm:$0xff] }
 0x4db   :  { %v3990_v22 = vmul.f32 %v8194_v1, %v9834_v38  ;;  %v2625_v2 = vshll.u32 %v2624_v56, 16  ;;  %vm2967_vm2 = vcmp.lt.s32.totalorder %v2674_v8, 6  ;;  %v2768_v3 = vcvt.f32.s32 %v9838_v14  ;;  %v9844_v62 = vld [vmem:[#allocation162_spill] sm:$0xff]  ;;  %v9848_v14 = vld [vmem:[#allocation164_spill] sm:$0xff] }
 0x4dc   :  { %v8358_v63 = vpop.permute.xlu0 %4230  ;;  %v2722_v29 = vadd.s32 %v2721_v53, %v2719_v10  ;;  %vm2968_vm0 = vcmp.lt.s32.totalorder %v2686_v4, 6  ;;  %v2746_v53 = vadd.s32 %v2745_v24, %v2743_v31  ;;  %v2780_v48 = vcvt.f32.s32 %v9839_v11  ;;  %v9841_v10 = vld [vmem:[#allocation9_spill] sm:$0xff]  ;;  %v9859_v11 = vld [vmem:[#allocation178_spill] sm:$0xff] }
 0x4dd   :  { %v8361_v42 = vpop.permute.xlu1 %4227  ;;  %4413 = vperm.xlu1 %5369, %v3988_v51   ;;  %4416 = vperm.xlu0 %5368, %v3989_v6   ;;  %v8372_v51 = vsel %vm2961_vm5, 1.0, %v9733_v26  ;;  %v2758_v6 = vadd.s32 %v2757_v49, %v2755_v30  ;;  %v8380_v47 = vadd.s32 %v2613_v46, %v2611_v12  ;;  %vm2969_vm4 = vcmp.lt.s32.totalorder %v2698_v23, 6 }
 0x4de   :  { %9837 = vst [vmem:[#allocation181_spill] sm:$0xff] %v8372_v51  ;;  %vm2970_vm8 = vcmp.lt.s32.totalorder %v2710_v19, 6  ;;  %v3992_v56 = vmul.f32 %v8206_v21, %v9840_v33  ;;  %v3993_v32 = vmul.f32 %v8216_v60, %v9841_v10  ;;  %vm2971_vm13 = vcmp.lt.s32.totalorder %v2722_v29, 6  ;;  %v9858_v51 = vld [vmem:[#allocation17_spill] sm:$0xff] }
 0x4df   :  { %vm2972_vm15 = vcmp.lt.s32.totalorder %v2734_v20, 6  ;;  %v8387_v49 = vadd.s32 %v2625_v2, %v2623_v25  ;;  %v8391_v9 = vsel %vm2967_vm2, 1.0, %v9733_v26  ;;  %v8395_v12 = vsel %vm2968_vm0, 1.0, %v9733_v26  ;;  %v9847_v25 = vld [vmem:[#allocation35_spill] sm:$0xff]  ;;  %v9862_v10 = vld [vmem:[#allocation29_spill] sm:$0xff] }
 0x4e0   :  { %v8374_v52 = vpop.permute.xlu0 %4236  ;;  %v2769_v21 = vshll.u32 %v2768_v3, 16  ;;  %v8400_v31 = vsel %vm2969_vm4, 1.0, %v9733_v26  ;;  %vm2973_vm9 = vcmp.lt.s32.totalorder %v2746_v53, 6  ;;  %vm2974_vm14 = vcmp.lt.s32.totalorder %v2758_v6, 6 }
 0x4e1   :  { %v8377_v1 = vpop.permute.xlu1 %4233  ;;  %4419 = vperm.xlu1 %5369, %v3990_v22   ;;  %4422 = vperm.xlu0 %5368, %v3991_v50   ;;  %9843 = vst [vmem:[#allocation184_spill] sm:$0xff] %v8387_v49  ;;  %v2781_v23 = vshll.u32 %v2780_v48, 16  ;;  %v8405_v8 = vsel %vm2971_vm13, 1.0, %v9733_v26  ;;  %v8409_v4 = vsel %vm2970_vm8, 1.0, %v9733_v26  ;;  %v8413_v29 = vsel %vm2972_vm15, 1.0, %v9733_v26  ;;  %v9845_v22 = vld [vmem:[#allocation10_spill] sm:$0xff] }
 0x4e2   :  { %v2767_v38 = vcvt.f32.s32 %v9844_v62  ;;  %v3994_v45 = vmul.f32 %v8213_v18, %v9845_v22  ;;  %v9846_v50 = vld [vmem:[#allocation11_spill] sm:$0xff]  ;;  %v4548_v2 = vadd.s32 4294967288, %v9847_v25  ;;  %v2779_v3 = vcvt.f32.s32 %v9848_v14  ;;  %v9853_v22 = vld [vmem:[#allocation2_spill] sm:$0xff]  ;;  %v9854_v14 = vld [vmem:[#allocation12_spill] sm:$0xff] }
 0x4e3   :  { %v3995_v7 = vmul.f32 %v8223_v58, %v9846_v50  ;;  %v8423_v19 = vsel %vm2973_vm9, 1.0, %v9733_v26  ;;  %v8426_v53 = vsel %vm2974_vm14, 1.0, %v9733_v26  ;;  %v4562_v20 = vadd.s32 4294967272, %v9847_v25 }
 0x4e4   :  { %v8397_v46 = vpop.permute.xlu0 %4242  ;;  %9849 = vst [vmem:[#allocation75_spill] sm:$0xff] %v8426_v53  ;;  %v8432_v18 = vadd.s32 %v2769_v21, %v2767_v38  ;;  %v4555_v58 = vadd.s32 4294967280, %v9847_v25  ;;  %v4576_v33 = vadd.s32 4294967256, %v9847_v25  ;;  %v8439_v62 = vadd.s32 %v2781_v23, %v2779_v3  ;;  %v9855_v38 = vld [vmem:[#allocation13_spill] sm:$0xff] }
 0x4e5   :  { %v8402_v60 = vpop.permute.xlu1 %4239  ;;  %4425 = vperm.xlu1 %5369, %v3992_v56   ;;  %4428 = vperm.xlu0 %5368, %v3993_v32   ;;  %v8443_v50 = vsub.s32 %v9847_v25, %v9853_v22  ;;  %vm4553_vm1 = vcmask 130112   ;;  %v3996_v21 = vmul.f32 %v8232_v36, %v9854_v14  ;;  %v3997_v30 = vmul.f32 %v8240_v61, %v9855_v38 }
 0x4e6   :  { %9852 = vst [vmem:[#allocation76_spill] sm:$0xff] %v8439_v62  ;;  %v8450_v48 = vsub.s32 %v4548_v2, %v9853_v22  ;;  %vm4560_vm11 = vcmask 195712   ;;  %v4590_v23 = vadd.s32 4294967240, %v9847_v25  ;;  %v4583_v3 = vadd.s32 4294967248, %v9847_v25 }
 0x4e7   :  { %v8461_v36 = vsub.s32 %v4555_v58, %v9853_v22  ;;  %v8464_v61 = vsub.s32 %v4576_v33, %v9853_v22  ;;  %vm4567_vm3 = vcmask 261312   ;;  %v4604_v2 = vadd.s32 4294967224, %v9847_v25  ;;  %v9857_v33 = vld [vmem:[#allocation16_spill] sm:$0xff] }
 0x4e8   :  { %v8429_v6 = vpop.permute.xlu0 %4248  ;;  %vm4574_vm12 = vcmask 326912   ;;  %v4618_v38 = vadd.s32 4294967208, %v9847_v25  ;;  %v4660_v49 = vrot.slane %v8287_v40, %v8450_v48  ;;  %v4656_v58 = vrot.slane %v8296_v15, %v8443_v50  ;;  %v9860_v40 = vld [vmem:[#allocation48_spill] sm:$0xff] }
 0x4e9   :  { %v8436_v56 = vpop.permute.xlu1 %4245  ;;  %4431 = vperm.xlu1 %5369, %v3994_v45   ;;  %4434 = vperm.xlu0 %5368, %v3995_v7   ;;  %v4569_v45 = vadd.s32 4294967264, %v9847_v25  ;;  %v8454_v7 = vsub.s32 %v4562_v20, %v9853_v22  ;;  %v4597_v20 = vadd.s32 4294967232, %v9847_v25  ;;  %v4000_v24 = vmul.f32 %v8285_v0, %v9857_v33 }
 0x4ea   :  { %v4001_v62 = vmul.f32 %v8294_v39, %v9858_v51  ;;  %v4547_v26 = vrot.slane %v9859_v11, %v8443_v50  ;;  %v4552_v53 = vrot.slane %v9860_v40, %v8450_v48  ;;  %v8489_v15 = vsub.s32 %v4590_v23, %v9853_v22 }
 0x4eb   :  { %v8492_v0 = vsub.s32 %v4583_v3, %v9853_v22  ;;  %v4559_v39 = vrot.slane %v8154_v37, %v8461_v36  ;;  %vm4581_vm7 = vcmask 392512   ;;  %v8497_v51 = vsub.s32 %v4604_v2, %v9853_v22  ;;  %v9861_v2 = vld [vmem:[#allocation18_spill] sm:$0xff] }
 0x4ec   :  { %v8458_v32 = vpop.permute.xlu0 %4254  ;;  %vm4588_vm6 = vcmask 458112   ;;  %v8502_v23 = vsub.s32 %v4597_v20, %v9853_v22  ;;  %v8505_v3 = vsub.s32 %v4618_v38, %v9853_v22  ;;  %v4661_v37 = vsel %vm4553_vm1, %v4660_v49, %v4656_v58 }
 0x4ed   :  { %9856 = vst [vmem:[#allocation77_spill] sm:$0xff] %v8458_v32  ;;  %v8467_v14 = vpop.permute.xlu1 %4251  ;;  %4437 = vperm.xlu1 %5369, %v3996_v21   ;;  %4440 = vperm.xlu0 %5368, %v3997_v30   ;;  %v8480_v21 = vsub.s32 %v4569_v45, %v9853_v22  ;;  %v4665_v30 = vrot.slane %v8324_v16, %v8461_v36  ;;  %v4611_v16 = vadd.s32 4294967216, %v9847_v25  ;;  %v4632_v38 = vadd.s32 4294967192, %v9847_v25 }
 0x4ee   :  { %v4002_v32 = vmul.f32 %v8290_v54, %v9861_v2  ;;  %v4554_v20 = vsel %vm4553_vm1, %v4552_v53, %v4547_v26  ;;  %v4670_v49 = vrot.slane %v8315_v28, %v8454_v7  ;;  %vm4595_vm10 = vcmask 523712   ;;  %v9863_v53 = vld [vmem:[#allocation19_spill] sm:$0xff] }
 0x4ef   :  { %v4561_v54 = vsel %vm4560_vm11, %v4559_v39, %v4554_v20  ;;  %v4003_v28 = vmul.f32 %v8301_v41, %v9863_v53  ;;  %vm4602_vm5 = vcmask 589312   ;;  %vm9080_vm2 = vcmask 654912  }
 0x4f0   :  { %v4261_v33 = vpop.permute.xlu0 %4260  ;;  %vm9077_vm0 = vcmask 720512   ;;  %vm9076_vm4 = vcmask 786112   ;;  %vm9078_vm8 = vcmask 851712   ;;  %vm2975_vm13 = vcmp.lt.s32.totalorder %v8432_v18, 6 }
 0x4f1   :  { %v4739_v11 = vrot.slane %v4261_v33, %v8450_v48  ;;  %v4258_v45 = vpop.permute.xlu1 %4257  ;;  %4449 = vperm.xlu1 %5369, %v4000_v24   ;;  %4452 = vperm.xlu0 %5368, %v4001_v62   ;;  %v4016_v33 = vmul.f32 %v8391_v9, %v9862_v10  ;;  %v4666_v24 = vsel %vm4560_vm11, %v4665_v30, %v4661_v37  ;;  %v9864_v30 = vld [vmem:[#allocation49_spill] sm:$0xff]  ;;  %vm9079_vm15 = vcmask 917312  }
 0x4f2   :  { %v4735_v40 = vrot.slane %v4258_v45, %v8443_v50  ;;  %v4675_v62 = vrot.slane %v8347_v57, %v8480_v21  ;;  %v4573_v9 = vrot.slane %v8167_v13, %v8480_v21  ;;  %v8525_v10 = vsub.s32 %v4611_v16, %v9853_v22  ;;  %v9865_v37 = vld [vmem:[#allocation33_spill] sm:$0xff] }
 0x4f3   :  { %v4625_v57 = vadd.s32 4294967200, %v9847_v25  ;;  %v4671_v39 = vsel %vm4567_vm3, %v4670_v49, %v4666_v24  ;;  %v4017_v16 = vmul.f32 %v8395_v12, %v9865_v37  ;;  %v4680_v24 = vrot.slane %v8342_v59, %v8464_v61 }
 0x4f4   :  { %v4740_v58 = vsel %vm4553_vm1, %v4739_v11, %v4735_v40  ;;  %v4267_v45 = vpop.permute.xlu0 %4266  ;;  %v4566_v11 = vrot.slane %v9864_v30, %v8454_v7  ;;  %v4676_v40 = vsel %vm4574_vm12, %v4675_v62, %v4671_v39  ;;  %v4587_v62 = vrot.slane %v8191_v55, %v8492_v0 }
 0x4f5   :  { %v4264_v26 = vpop.permute.xlu1 %4263  ;;  %4455 = vperm.xlu1 %5369, %v4002_v32   ;;  %4497 = vperm.xlu0 %5368, %v4016_v33   ;;  %v4685_v32 = vrot.slane %v8361_v42, %v8492_v0  ;;  %v4749_v2 = vrot.slane %v4267_v45, %v8454_v7  ;;  %v8542_v33 = vsub.s32 %v4632_v38, %v9853_v22  ;;  %vm4644_vm9 = vcmask 982912  }
 0x4f6   :  { %v4744_v13 = vrot.slane %v4264_v26, %v8461_v36  ;;  %v4568_v41 = vsel %vm4567_vm3, %v4566_v11, %v4561_v54  ;;  %v9866_v54 = vld [vmem:[#allocation20_spill] sm:$0xff]  ;;  %v4580_v59 = vrot.slane %v8164_v34, %v8464_v61  ;;  %v9867_v26 = vld [vmem:[#allocation31_spill] sm:$0xff]  ;;  %v4695_v30 = vrot.slane %v8377_v1, %v8502_v23 }
 0x4f7   :  { %v4575_v12 = vsel %vm4574_vm12, %v4573_v9, %v4568_v41  ;;  %v4004_v38 = vmul.f32 %v8308_v27, %v9866_v54  ;;  %v4018_v55 = vmul.f32 %v8400_v31, %v9867_v26  ;;  %v8565_v11 = vsub.s32 %v4625_v57, %v9853_v22  ;;  %v9869_v41 = vld [vmem:[#allocation36_spill] sm:$0xff] }
 0x4f8   :  { %v4745_v20 = vsel %vm4560_vm11, %v4744_v13, %v4740_v58  ;;  %v4273_v49 = vpop.permute.xlu0 %4272  ;;  %v4681_v58 = vsel %vm4581_vm7, %v4680_v24, %v4676_v40  ;;  %v4582_v27 = vsel %vm4581_vm7, %v4580_v59, %v4575_v12  ;;  %v4690_v34 = vrot.slane %v8358_v63, %v8489_v15  ;;  %v9868_v40 = vld [vmem:[#allocation3_spill] sm:$0xff] }
 0x4f9   :  { %v4270_v42 = vpop.permute.xlu1 %4269  ;;  %v4750_v45 = vsel %vm4567_vm3, %v4749_v2, %v4745_v20  ;;  %4500 = vperm.xlu1 %5369, %v4017_v16   ;;  %4458 = vperm.xlu0 %5368, %v4003_v28   ;;  %v4686_v53 = vsel %vm4588_vm6, %v4685_v32, %v4681_v58  ;;  %v4759_v28 = vrot.slane %v4273_v49, %v8464_v61  ;;  %v9871_v58 = vld [vmem:[#allocation50_spill] sm:$0xff]  ;;  %vm2962_vm14 = vcmp.lt.s32.totalorder %v8380_v47, 6 }
 0x4fa   :  { %v4754_v9 = vrot.slane %v4270_v42, %v8480_v21  ;;  %v4589_v31 = vsel %vm4588_vm6, %v4587_v62, %v4582_v27  ;;  %v4601_v37 = vrot.slane %v8218_v5, %v8502_v23  ;;  %v4005_v57 = vmul.f32 %v8313_v44, %v9868_v40  ;;  %v9874_v40 = vld [vmem:[#allocation24_spill] sm:$0xff]  ;;  %v9910_v47 = vld [vmem:[#allocation42_spill] sm:$0xff] }
 0x4fb   :  { %v4594_v63 = vrot.slane %v8176_v43, %v8489_v15  ;;  %v4691_v32 = vsel %vm4595_vm10, %v4690_v34, %v4686_v53  ;;  %v4019_v24 = vmul.f32 %v8409_v4, %v9869_v41  ;;  %v4705_v20 = vrot.slane %v8402_v60, %v8525_v10 }
 0x4fc   :  { %v4755_v39 = vsel %vm4574_vm12, %v4754_v9, %v4750_v45  ;;  %v4279_v13 = vpop.permute.xlu0 %4278  ;;  %v4696_v5 = vsel %vm4602_vm5, %v4695_v30, %v4691_v32  ;;  %v4639_v44 = vadd.s32 4294967184, %v9847_v25  ;;  %v4700_v43 = vrot.slane %v8374_v52, %v8497_v51 }
 0x4fd   :  { %v4276_v1 = vpop.permute.xlu1 %4275  ;;  %v4760_v16 = vsel %vm4581_vm7, %v4759_v28, %v4755_v39  ;;  %4503 = vperm.xlu1 %5369, %v4018_v55   ;;  %4461 = vperm.xlu0 %5368, %v4004_v38   ;;  %v4769_v49 = vrot.slane %v4279_v13, %v8489_v15  ;;  %v4596_v12 = vsel %vm4595_vm10, %v4594_v63, %v4589_v31  ;;  %v9870_v38 = vld [vmem:[#allocation22_spill] sm:$0xff]  ;;  %v9873_v31 = vld [vmem:[#allocation51_spill] sm:$0xff] }
 0x4fe   :  { %v4764_v2 = vrot.slane %v4276_v1, %v8492_v0  ;;  %v4603_v45 = vsel %vm4602_vm5, %v4601_v37, %v4596_v12  ;;  %v4615_v4 = vrot.slane %v8242_v35, %v8525_v10  ;;  %v4006_v59 = vmul.f32 %v8319_v17, %v9870_v38  ;;  %v9872_v55 = vld [vmem:[#allocation34_spill] sm:$0xff]  ;;  %v9876_v63 = vld [vmem:[#allocation179_spill] sm:$0xff] }
 0x4ff   :  { %v4608_v52 = vrot.slane %v9871_v58, %v8497_v51  ;;  %v4701_v9 = vsel %vm9080_vm2, %v4700_v43, %v4696_v5  ;;  %v4020_v53 = vmul.f32 %v8405_v8, %v9872_v55  ;;  %v4715_v30 = vrot.slane %v8436_v56, %v8565_v11  ;;  %v9880_v58 = vld [vmem:[#allocation21_spill] sm:$0xff] }
 0x500   :  { %v4765_v62 = vsel %vm4588_vm6, %v4764_v2, %v4760_v16  ;;  %v4285_v42 = vpop.permute.xlu0 %4284  ;;  %v4706_v35 = vsel %vm9077_vm0, %v4705_v20, %v4701_v9  ;;  %v8609_v17 = vsub.s32 %v4639_v44, %v9853_v22  ;;  %v4710_v34 = vrot.slane %v8397_v46, %v8505_v3 }
 0x501   :  { %v4282_v54 = vpop.permute.xlu1 %4281  ;;  %v4770_v60 = vsel %vm4595_vm10, %v4769_v49, %v4765_v62  ;;  %4506 = vperm.xlu1 %5369, %v4019_v24   ;;  %4464 = vperm.xlu0 %5368, %v4005_v57   ;;  %v4779_v28 = vrot.slane %v4285_v42, %v8497_v51  ;;  %v4610_v27 = vsel %vm9080_vm2, %v4608_v52, %v4603_v45  ;;  %v4646_v37 = vadd.s32 4294967176, %v9847_v25  ;;  %v9875_v57 = vld [vmem:[#allocation73_spill] sm:$0xff]  ;;  %v9877_v24 = vld [vmem:[#allocation38_spill] sm:$0xff]  ;;  %v9881_v52 = vld [vmem:[#allocation55_spill] sm:$0xff] }
 0x502   :  { %v4774_v26 = vrot.slane %v4282_v54, %v8502_v23  ;;  %v4617_v8 = vsel %vm9077_vm0, %v4615_v4, %v4610_v27  ;;  %v4629_v56 = vrot.slane %v9873_v31, %v8565_v11  ;;  %v4007_v46 = vmul.f32 %v9875_v57, %v9874_v40  ;;  %v9879_v54 = vld [vmem:[#allocation182_spill] sm:$0xff]  ;;  %v9886_v31 = vld [vmem:[#allocation169_spill] sm:$0xff] }
 0x503   :  { %v4622_v32 = vrot.slane %v9876_v63, %v8505_v3  ;;  %v4711_v2 = vsel %vm9076_vm4, %v4710_v34, %v4706_v35  ;;  %v4021_v5 = vmul.f32 %v8413_v29, %v9877_v24  ;;  %v4725_v20 = vrot.slane %v8467_v14, %v8609_v17  ;;  %v9878_v29 = vld [vmem:[#allocation54_spill] sm:$0xff]  ;;  %v9885_v34 = vld [vmem:[#allocation77_spill] sm:$0xff]  ;;  %v9891_v24 = vld [vmem:[#allocation75_spill] sm:$0xff] }
 0x504   :  { %v4775_v39 = vsel %vm4602_vm5, %v4774_v26, %v4770_v60  ;;  %v4291_v13 = vpop.permute.xlu0 %4290  ;;  %v4716_v25 = vsel %vm9078_vm8, %v4715_v30, %v4711_v2  ;;  %v4720_v44 = vrot.slane %v8429_v6, %v8542_v33  ;;  %v4643_v45 = vrot.slane %v9878_v29, %v8609_v17  ;;  %v9882_v26 = vld [vmem:[#allocation37_spill] sm:$0xff]  ;;  %v9883_v30 = vld [vmem:[#allocation167_spill] sm:$0xff]  ;;  %v9888_v63 = vld [vmem:[#allocation26_spill] sm:$0xff] }
 0x505   :  { %v4288_v1 = vpop.permute.xlu1 %4287  ;;  %v4780_v16 = vsel %vm9080_vm2, %v4779_v28, %v4775_v39  ;;  %4509 = vperm.xlu1 %5369, %v4020_v53   ;;  %4467 = vperm.xlu0 %5368, %v4006_v59   ;;  %v4789_v49 = vrot.slane %v4291_v13, %v8505_v3  ;;  %v4624_v12 = vsel %vm9076_vm4, %v4622_v32, %v4617_v8  ;;  %v9884_v28 = vcvt.f32.s32 %v9883_v30  ;;  %v9889_v32 = vld [vmem:[#allocation74_spill] sm:$0xff]  ;;  %v9901_v30 = vld [vmem:[#allocation181_spill] sm:$0xff] }
 0x506   :  { %v4784_v41 = vrot.slane %v4288_v1, %v8525_v10  ;;  %v4631_v42 = vsel %vm9078_vm8, %v4629_v56, %v4624_v12  ;;  %v4636_v60 = vrot.slane %v9879_v54, %v8542_v33  ;;  %v8644_v6 = vsub.s32 %v4646_v37, %v9853_v22  ;;  %v9893_v12 = vld [vmem:[#allocation166_spill] sm:$0xff] }
 0x507   :  { %v4721_v38 = vsel %vm9079_vm15, %v4720_v44, %v4716_v25  ;;  %v4008_v9 = vmul.f32 %v9881_v52, %v9880_v58  ;;  %v4022_v55 = vmul.f32 %v8423_v19, %v9882_v26  ;;  %v2793_v27 = vshll.u32 %v9884_v28, 16 }
 0x508   :  { %v4785_v43 = vsel %vm9077_vm0, %v4784_v41, %v4780_v16  ;;  %v4297_v62 = vpop.permute.xlu0 %4296  ;;  %v4726_v53 = vsel %vm4644_vm9, %v4725_v20, %v4721_v38  ;;  %v4638_v22 = vsel %vm9079_vm15, %v4636_v60, %v4631_v42  ;;  %v4730_v39 = vrot.slane %v9885_v34, %v8644_v6  ;;  %v9887_v16 = vld [vmem:[#allocation52_spill] sm:$0xff]  ;;  %v9896_v38 = vld [vmem:[#allocation171_spill] sm:$0xff] }
 0x509   :  { %v4294_v4 = vpop.permute.xlu1 %4293  ;;  %v4790_v14 = vsel %vm9076_vm4, %v4789_v49, %v4785_v43  ;;  %4512 = vperm.xlu1 %5369, %v4021_v5   ;;  %4470 = vperm.xlu0 %5368, %v4007_v46   ;;  %v4799_v35 = vrot.slane %v4297_v62, %v8542_v33  ;;  %v2804_v56 = vcvt.f32.s32 %v9886_v31  ;;  %vm4651_vm4 = vcmask 1048512   ;;  %v9890_v41 = vld [vmem:[#allocation40_spill] sm:$0xff] }
 0x50a   :  { %v4794_v59 = vrot.slane %v4294_v4, %v8565_v11  ;;  %v4645_v19 = vsel %vm4644_vm9, %v4643_v45, %v4638_v22  ;;  %v4650_v40 = vrot.slane %v9887_v16, %v8644_v6  ;;  %vm5206_vm0 = vcmask 1041409   ;;  %v9895_v45 = vld [vmem:[#allocation76_spill] sm:$0xff]  ;;  %v9907_v16 = vld [vmem:[#allocation143_spill] sm:$0xff] }
 0x50b   :  { %v4731_v57 = vsel %vm4651_vm4, %v4730_v39, %v4726_v53  ;;  %v4009_v2 = vmul.f32 %v9889_v32, %v9888_v63  ;;  %v4023_v5 = vmul.f32 %v9891_v24, %v9890_v41  ;;  %v9892_v20 = vmov 0.0   ;;  %v9899_v53 = vld [vmem:[#allocation53_spill] sm:$0xff]  ;;  %v9903_v34 = vld [vmem:[#allocation140_spill] sm:$0xff] }
 0x50c   :  { %v4795_v13 = vsel %vm9078_vm8, %v4794_v59, %v4790_v14  ;;  %v4303_v8 = vpop.permute.xlu0 %4302  ;;  %vm5208_vm8 = vcmask 1042434   ;;  %v5357_v49 = vsel %vm2975_vm13, 1.0, %v9892_v20  ;;  %v9894_v44 = vcvt.f32.s32 %v9893_v12 }
 0x50d   :  { %v4300_v37 = vpop.permute.xlu1 %4299  ;;  %v4800_v1 = vsel %vm9079_vm15, %v4799_v35, %v4795_v13  ;;  %4515 = vperm.xlu1 %5369, %v4022_v55   ;;  %4473 = vperm.xlu0 %5368, %v4008_v9   ;;  %v4809_v25 = vrot.slane %v4303_v8, %v8644_v6  ;;  %v4652_v62 = vsel %vm4651_vm4, %v4650_v40, %v4645_v19  ;;  %vm2976_vm15 = vcmp.lt.s32.totalorder %v9895_v45, 6  ;;  %v9897_v9 = vld [vmem:[#allocation113_spill] sm:$0xff]  ;;  %v9900_v35 = vld [vmem:[#allocation23_spill] sm:$0xff] }
 0x50e   :  { %v4804_v46 = vrot.slane %v4300_v37, %v8609_v17  ;;  %v2794_v43 = vadd.s32 %v2793_v27, %v9894_v44  ;;  %v5207_v4 = vsel %vm5206_vm0, %v4731_v57, %v4652_v62  ;;  %v2805_v18 = vshll.u32 %v2804_v56, 16  ;;  %v9902_v27 = vld [vmem:[#allocation39_spill] sm:$0xff]  ;;  %v9904_v13 = vld [vmem:[#allocation141_spill] sm:$0xff]  ;;  %v9906_v56 = vld [vmem:[#allocation168_spill] sm:$0xff] }
 0x50f   :  { %v2816_v59 = vcvt.f32.s32 %v9896_v38  ;;  %v9898_v26 = vcvt.f32.s32 %v9897_v9  ;;  %vm2949_vm13 = vcmp.lt.s32.totalorder %v9899_v53, 6  ;;  %v4010_v28 = vmul.f32 %v9901_v30, %v9900_v35  ;;  %v9908_v57 = vld [vmem:[#allocation184_spill] sm:$0xff]  ;;  %v9911_v62 = vld [vmem:[#allocation170_spill] sm:$0xff] }
 0x510   :  { %v4805_v42 = vsel %vm4644_vm9, %v4804_v46, %v4800_v1  ;;  %v4309_v29 = vpop.permute.xlu0 %4308  ;;  %v4024_v22 = vmul.f32 %v5357_v49, %v9902_v27  ;;  %v2635_v39 = vcvt.f32.s32 %v9903_v34  ;;  %v9905_v8 = vcvt.f32.s32 %v9904_v13  ;;  %v9914_v35 = vld [vmem:[#allocation142_spill] sm:$0xff]  ;;  %v9917_v13 = vld [vmem:[#allocation144_spill] sm:$0xff] }
 0x511   :  { %v4810_v14 = vsel %vm4651_vm4, %v4809_v25, %v4805_v42  ;;  %v4818_v54 = vrot.slane %v4309_v29, %v8450_v48  ;;  %v4306_v60 = vpop.permute.xlu1 %4305  ;;  %4518 = vperm.xlu1 %5369, %v4023_v5   ;;  %4476 = vperm.xlu0 %5368, %v4009_v2   ;;  %v2469_v55 = vshll.u32 %v9898_v26, 16  ;;  %v2803_v19 = vcvt.f32.s32 %v9906_v56  ;;  %v9909_v25 = vld [vmem:[#allocation28_spill] sm:$0xff] }
 0x512   :  { %v8683_v58 = vsel %vm5208_vm8, %v4810_v14, %v5207_v4  ;;  %v4814_v52 = vrot.slane %v4306_v60, %v8443_v50  ;;  %v2637_v31 = vshll.u32 %v9905_v8, 16  ;;  %v2648_v40 = vcvt.f32.s32 %v9907_v16 }
 0x513   :  { %vm2963_vm0 = vcmp.lt.s32.totalorder %v9908_v57, 6  ;;  %v5344_v46 = vsel %vm2962_vm14, 1.0, %v9892_v20  ;;  %v5358_v63 = vsel %vm2976_vm15, 1.0, %v9892_v20  ;;  %v2817_v2 = vshll.u32 %v2816_v59, 16 }
 0x514   :  { %v4819_v37 = vsel %vm4553_vm1, %v4818_v54, %v4814_v52  ;;  %v4315_v1 = vpop.permute.xlu0 %4314  ;;  %vm2977_vm8 = vcmp.lt.s32.totalorder %v2794_v43, 6  ;;  %v2806_v41 = vadd.s32 %v2805_v18, %v2803_v19  ;;  %v5331_v5 = vsel %vm2949_vm13, 1.0, %v9892_v20  ;;  %v9912_v54 = vld [vmem:[#allocation145_spill] sm:$0xff] }
 0x515   :  { %v4312_v32 = vpop.permute.xlu1 %4311  ;;  %4521 = vperm.xlu1 %5369, %v4024_v22   ;;  %4479 = vperm.xlu0 %5368, %v4010_v28   ;;  %v4011_v49 = vmul.f32 %v5344_v46, %v9909_v25  ;;  %v4025_v12 = vmul.f32 %v5358_v63, %v9910_v47  ;;  %v4828_v44 = vrot.slane %v4315_v1, %v8454_v7  ;;  %v2815_v42 = vcvt.f32.s32 %v9911_v62  ;;  %v9913_v52 = vld [vmem:[#allocation173_spill] sm:$0xff] }
 0x516   :  { %v4823_v24 = vrot.slane %v4312_v32, %v8461_v36  ;;  %v5345_v29 = vsel %vm2963_vm0, 1.0, %v9892_v20  ;;  %v2638_v45 = vadd.s32 %v2637_v31, %v2635_v39  ;;  %v2649_v14 = vshll.u32 %v2648_v40, 16  ;;  %v9915_v28 = vld [vmem:[#allocation25_spill] sm:$0xff]  ;;  %v9918_v31 = vld [vmem:[#allocation112_spill] sm:$0xff] }
 0x517   :  { %v2660_v60 = vcvt.f32.s32 %v9912_v54  ;;  %v5359_v18 = vsel %vm2977_vm8, 1.0, %v9892_v20  ;;  %v2828_v9 = vcvt.f32.s32 %v9913_v52  ;;  %v2818_v26 = vadd.s32 %v2817_v2, %v2815_v42  ;;  %v9916_v22 = vld [vmem:[#allocation41_spill] sm:$0xff]  ;;  %v9920_v2 = vld [vmem:[#allocation175_spill] sm:$0xff]  ;;  %v9924_v42 = vld [vmem:[#allocation172_spill] sm:$0xff] }
 0x518   :  { %v4824_v43 = vsel %vm4560_vm11, %v4823_v24, %v4819_v37  ;;  %v4321_v4 = vpop.permute.xlu0 %4320  ;;  %vm2978_vm15 = vcmp.lt.s32.totalorder %v2806_v41, 6  ;;  %v2647_v30 = vcvt.f32.s32 %v9914_v35  ;;  %v4012_v27 = vmul.f32 %v5345_v29, %v9915_v28 }
 0x519   :  { %v4318_v38 = vpop.permute.xlu1 %4317  ;;  %v4829_v59 = vsel %vm4567_vm3, %v4828_v44, %v4824_v43  ;;  %4524 = vperm.xlu1 %5369, %v4025_v12   ;;  %4482 = vperm.xlu0 %5368, %v4011_v49   ;;  %v4026_v34 = vmul.f32 %v5359_v18, %v9916_v22  ;;  %v4838_v39 = vrot.slane %v4321_v4, %v8464_v61  ;;  %v2659_v8 = vcvt.f32.s32 %v9917_v13  ;;  %v9922_v49 = vld [vmem:[#allocation14_spill] sm:$0xff]  ;;  %v9923_v12 = vld [vmem:[#allocation43_spill] sm:$0xff]  ;;  %v9928_v13 = vld [vmem:[#allocation176_spill] sm:$0xff] }
 0x51a   :  { %v4833_v53 = vrot.slane %v4318_v38, %v8480_v21  ;;  %v9919_v56 = vcvt.f32.s32 %v9918_v31  ;;  %vm2964_vm14 = vcmp.lt.s32.totalorder %v2638_v45, 6  ;;  %v2661_v16 = vshll.u32 %v2660_v60, 16 }
 0x51b   :  { %v2650_v40 = vadd.s32 %v2649_v14, %v2647_v30  ;;  %v5360_v57 = vsel %vm2978_vm15, 1.0, %v9892_v20  ;;  %v2829_v32 = vshll.u32 %v2828_v9, 16  ;;  %v2840_v41 = vcvt.f32.s32 %v9920_v2  ;;  %v9926_v30 = vld [vmem:[#allocation44_spill] sm:$0xff] }
 0x51c   :  { %v2470_v19 = vadd.s32 %v2469_v55, %v9919_v56  ;;  %v4834_v37 = vsel %vm4574_vm12, %v4833_v53, %v4829_v59  ;;  %v4327_v1 = vpop.permute.xlu0 %4326  ;;  %vm2979_vm13 = vcmp.lt.s32.totalorder %v2818_v26, 6  ;;  %v9921_v55 = vld [vmem:[#allocation177_spill] sm:$0xff]  ;;  %v3998_v47 = vmul.f32 %v5331_v5, %v9922_v49  ;;  %v9925_v53 = vld [vmem:[#allocation30_spill] sm:$0xff] }
 0x51d   :  { %v4324_v46 = vpop.permute.xlu1 %4323  ;;  %v4839_v63 = vsel %vm4581_vm7, %v4838_v39, %v4834_v37  ;;  %4527 = vperm.xlu1 %5369, %v4026_v34   ;;  %4485 = vperm.xlu0 %5368, %v4012_v27   ;;  %v2852_v25 = vcvt.f32.s32 %v9921_v55  ;;  %v4027_v44 = vmul.f32 %v5360_v57, %v9923_v12  ;;  %v4848_v62 = vrot.slane %v4327_v1, %v8489_v15  ;;  %v9927_v27 = vld [vmem:[#allocation174_spill] sm:$0xff]  ;;  %v9929_v57 = vld [vmem:[#allocation15_spill] sm:$0xff]  ;;  %v9933_v12 = vld [vmem:[#allocation32_spill] sm:$0xff] }
 0x51e   :  { %v4843_v24 = vrot.slane %v4324_v46, %v8492_v0  ;;  %v2827_v29 = vcvt.f32.s32 %v9924_v42  ;;  %vm2950_vm0 = vcmp.lt.s32.totalorder %v2470_v19, 6  ;;  %vm2965_vm8 = vcmp.lt.s32.totalorder %v2650_v40, 6 }
 0x51f   :  { %v5346_v14 = vsel %vm2964_vm14, 1.0, %v9892_v20  ;;  %v2662_v54 = vadd.s32 %v2661_v16, %v2659_v8  ;;  %v2841_v5 = vshll.u32 %v2840_v41, 16  ;;  %v5361_v38 = vsel %vm2979_vm13, 1.0, %v9892_v20 }
 0x520   :  { %v4844_v43 = vsel %vm4588_vm6, %v4843_v24, %v4839_v63  ;;  %v4333_v4 = vpop.permute.xlu0 %4332  ;;  %v2830_v59 = vadd.s32 %v2829_v32, %v2827_v29  ;;  %v2853_v9 = vshll.u32 %v2852_v25, 16  ;;  %v4013_v35 = vmul.f32 %v5346_v14, %v9925_v53  ;;  %v9930_v63 = vld [vmem:[#allocation27_spill] sm:$0xff] }
 0x521   :  { %v4330_v60 = vpop.permute.xlu1 %4329  ;;  %v4849_v18 = vsel %vm4595_vm10, %v4848_v62, %v4844_v43  ;;  %4530 = vperm.xlu1 %5369, %v4027_v44   ;;  %4443 = vperm.xlu0 %5368, %v3998_v47   ;;  %v4028_v28 = vmul.f32 %v5361_v38, %v9926_v30  ;;  %v4858_v45 = vrot.slane %v4333_v4, %v8497_v51  ;;  %v2839_v22 = vcvt.f32.s32 %v9927_v27  ;;  %v9934_v62 = vld [vmem:[#allocation45_spill] sm:$0xff]  ;;  %v9937_v38 = vld [vmem:[#allocation46_spill] sm:$0xff] }
 0x522   :  { %v4853_v52 = vrot.slane %v4330_v60, %v8502_v23  ;;  %v2851_v8 = vcvt.f32.s32 %v9928_v13  ;;  %v5332_v26 = vsel %vm2950_vm0, 1.0, %v9892_v20  ;;  %v5347_v31 = vsel %vm2965_vm8, 1.0, %v9892_v20 }
 0x523   :  { %vm2966_vm15 = vcmp.lt.s32.totalorder %v2662_v54, 6  ;;  %v2842_v1 = vadd.s32 %v2841_v5, %v2839_v22  ;;  %vm2980_vm14 = vcmp.lt.s32.totalorder %v2830_v59, 6  ;;  %v3999_v46 = vmul.f32 %v5332_v26, %v9929_v57 }
 0x524   :  { %v4854_v34 = vsel %vm4602_vm5, %v4853_v52, %v4849_v18  ;;  %v4339_v39 = vpop.permute.xlu0 %4338  ;;  %v4014_v32 = vmul.f32 %v5347_v31, %v9930_v63  ;;  %v2854_v2 = vadd.s32 %v2853_v9, %v2851_v8  ;;  %vm9931_vm13 = vcmask 720512   ;;  %v9938_v52 = vld [vmem:[#allocation47_spill] sm:$0xff] }
 0x525   :  { %v4336_v56 = vpop.permute.xlu1 %4335  ;;  %v4859_v37 = vsel %vm9080_vm2, %v4858_v45, %v4854_v34  ;;  %4488 = vperm.xlu1 %5369, %v4013_v35   ;;  %4533 = vperm.xlu0 %5368, %v4028_v28   ;;  %v4868_v19 = vrot.slane %v4339_v39, %v8505_v3  ;;  %vm9932_vm0 = vcmask 786112   ;;  %v5348_v25 = vsel %vm2966_vm15, 1.0, %v9892_v20 }
 0x526   :  { %v4863_v16 = vrot.slane %v4336_v56, %v8525_v10  ;;  %vm2981_vm8 = vcmp.lt.s32.totalorder %v2842_v1, 6  ;;  %v5362_v49 = vsel %vm2980_vm14, 1.0, %v9892_v20  ;;  %v4015_v44 = vmul.f32 %v5348_v25, %v9933_v12 }
 0x527   :  { %v4029_v42 = vmul.f32 %v5362_v49, %v9934_v62  ;;  %vm2982_vm2 = vcmp.lt.s32.totalorder %v2854_v2, 6  ;;  %v5363_v60 = vsel %vm2981_vm8, 1.0, %v9892_v20  ;;  %vm5210_vm15 = vcmask 1043459  }
 0x528   :  { %v4864_v40 = vsel %vm9931_vm13, %v4863_v16, %v4859_v37  ;;  %v4345_v41 = vpop.permute.xlu0 %4344  ;;  %vm9935_vm13 = vcmask 851712   ;;  %v5364_v18 = vsel %vm2982_vm2, 1.0, %v9892_v20  ;;  %v4030_v59 = vmul.f32 %v5363_v60, %v9937_v38 }
 0x529   :  { %v4342_v24 = vpop.permute.xlu1 %4341  ;;  %v4869_v55 = vsel %vm9932_vm0, %v4868_v19, %v4864_v40  ;;  %4446 = vperm.xlu1 %5369, %v3999_v46   ;;  %4491 = vperm.xlu0 %5368, %v4014_v32   ;;  %v4878_v29 = vrot.slane %v4345_v41, %v8542_v33  ;;  %vm9936_vm0 = vcmask 917312   ;;  %v4031_v9 = vmul.f32 %v5364_v18, %v9938_v52 }
 0x52a   :  { %v4873_v47 = vrot.slane %v4342_v24, %v8565_v11  ;;  %vm9939_vm2 = vcmask 654912   ;;  %vm9940_vm14 = vcmask 720512   ;;  %vm9941_vm8 = vcmask 786112  }
 0x52c   :  { %v4874_v43 = vsel %vm9935_vm13, %v4873_v47, %v4869_v55  ;;  %v4351_v4 = vpop.permute.xlu0 %4350 }
 0x52d   :  { %v4348_v14 = vpop.permute.xlu1 %4347  ;;  %v4879_v54 = vsel %vm9936_vm0, %v4878_v29, %v4874_v43  ;;  %4536 = vperm.xlu1 %5369, %v4029_v42   ;;  %4494 = vperm.xlu0 %5368, %v4015_v44   ;;  %v4888_v53 = vrot.slane %v4351_v4, %v8644_v6 }
 0x52e   :  { %v4883_v5 = vrot.slane %v4348_v14, %v8609_v17 }
 0x530   :  { %v4884_v35 = vsel %vm4644_vm9, %v4883_v5, %v4879_v54  ;;  %v4357_v30 = vpop.permute.xlu0 %4356 }
 0x531   :  { %v4889_v28 = vsel %vm4651_vm4, %v4888_v53, %v4884_v35  ;;  %v4897_v45 = vrot.slane %v4357_v30, %v8450_v48  ;;  %v4354_v27 = vpop.permute.xlu1 %4353  ;;  %4539 = vperm.xlu1 %5369, %v4030_v59   ;;  %4542 = vperm.xlu0 %5368, %v4031_v9  }
 0x532   :  { %v5211_v20 = vsel %vm5210_vm15, %v4889_v28, %v8683_v58  ;;  %v4893_v22 = vrot.slane %v4354_v27, %v8443_v50  ;;  %vm5212_vm15 = vcmask 1044484  }
 0x534   :  { %v4898_v34 = vsel %vm4553_vm1, %v4897_v45, %v4893_v22  ;;  %v4363_v39 = vpop.permute.xlu0 %4362 }
 0x535   :  { %v4360_v13 = vpop.permute.xlu1 %4359  ;;  %v4907_v26 = vrot.slane %v4363_v39, %v8454_v7 }
 0x536   :  { %v4902_v8 = vrot.slane %v4360_v13, %v8461_v36 }
 0x538   :  { %v4903_v31 = vsel %vm4560_vm11, %v4902_v8, %v4898_v34  ;;  %v4369_v56 = vpop.permute.xlu0 %4368 }
 0x539   :  { %v4366_v37 = vpop.permute.xlu1 %4365  ;;  %v4908_v1 = vsel %vm4567_vm3, %v4907_v26, %v4903_v31  ;;  %v4917_v58 = vrot.slane %v4369_v56, %v8464_v61 }
 0x53a   :  { %v4912_v16 = vrot.slane %v4366_v37, %v8480_v21 }
 0x53c   :  { %v4913_v57 = vsel %vm4574_vm12, %v4912_v16, %v4908_v1  ;;  %v4375_v46 = vpop.permute.xlu0 %4374 }
 0x53d   :  { %v4372_v63 = vpop.permute.xlu1 %4371  ;;  %v4918_v32 = vsel %vm4581_vm7, %v4917_v58, %v4913_v57  ;;  %v4927_v19 = vrot.slane %v4375_v46, %v8489_v15 }
 0x53e   :  { %v4922_v2 = vrot.slane %v4372_v63, %v8492_v0 }
 0x540   :  { %v4923_v40 = vsel %vm4588_vm6, %v4922_v2, %v4918_v32  ;;  %v4381_v41 = vpop.permute.xlu0 %4380 }
 0x541   :  { %v4378_v24 = vpop.permute.xlu1 %4377  ;;  %v4928_v55 = vsel %vm4595_vm10, %v4927_v19, %v4923_v40  ;;  %v4937_v49 = vrot.slane %v4381_v41, %v8497_v51 }
 0x542   :  { %v4932_v25 = vrot.slane %v4378_v24, %v8502_v23 }
 0x544   :  { %v4933_v47 = vsel %vm4602_vm5, %v4932_v25, %v4928_v55  ;;  %v4387_v12 = vpop.permute.xlu0 %4386 }
 0x545   :  { %v4384_v44 = vpop.permute.xlu1 %4383  ;;  %v4938_v62 = vsel %vm9939_vm2, %v4937_v49, %v4933_v47  ;;  %v4947_v29 = vrot.slane %v4387_v12, %v8505_v3 }
 0x546   :  { %v4942_v42 = vrot.slane %v4384_v44, %v8525_v10 }
 0x548   :  { %v4943_v43 = vsel %vm9940_vm14, %v4942_v42, %v4938_v62  ;;  %v4393_v4 = vpop.permute.xlu0 %4392 }
 0x549   :  { %v4390_v14 = vpop.permute.xlu1 %4389  ;;  %v4948_v54 = vsel %vm9941_vm8, %v4947_v29, %v4943_v43  ;;  %v4957_v18 = vrot.slane %v4393_v4, %v8542_v33 }
 0x54a   :  { %v4952_v60 = vrot.slane %v4390_v14, %v8565_v11 }
 0x54c   :  { %v4953_v5 = vsel %vm9935_vm13, %v4952_v60, %v4948_v54  ;;  %v4399_v38 = vpop.permute.xlu0 %4398 }
 0x54d   :  { %v4396_v59 = vpop.permute.xlu1 %4395  ;;  %v4958_v52 = vsel %vm9936_vm0, %v4957_v18, %v4953_v5  ;;  %v4967_v53 = vrot.slane %v4399_v38, %v8644_v6 }
 0x54e   :  { %v4962_v9 = vrot.slane %v4396_v59, %v8609_v17 }
 0x550   :  { %v4963_v35 = vsel %vm4644_vm9, %v4962_v9, %v4958_v52  ;;  %v4405_v30 = vpop.permute.xlu0 %4404 }
 0x551   :  { %v4968_v28 = vsel %vm4651_vm4, %v4967_v53, %v4963_v35  ;;  %v4976_v45 = vrot.slane %v4405_v30, %v8450_v48  ;;  %v4402_v27 = vpop.permute.xlu1 %4401 }
 0x552   :  { %v4972_v22 = vrot.slane %v4402_v27, %v8443_v50  ;;  %v8811_v34 = vsel %vm5212_vm15, %v4968_v28, %v5211_v20  ;;  %vm9948_vm15 = vmmov %vm9936_vm0 }
 0x554   :  { %v4977_v39 = vsel %vm4553_vm1, %v4976_v45, %v4972_v22  ;;  %v4411_v13 = vpop.permute.xlu0 %4410 }
 0x555   :  { %v4408_v8 = vpop.permute.xlu1 %4407  ;;  %v4986_v31 = vrot.slane %v4411_v13, %v8454_v7 }
 0x556   :  { %v4981_v26 = vrot.slane %v4408_v8, %v8461_v36 }
 0x558   :  { %v4982_v56 = vsel %vm4560_vm11, %v4981_v26, %v4977_v39  ;;  %v4417_v37 = vpop.permute.xlu0 %4416 }
 0x559   :  { %v4414_v1 = vpop.permute.xlu1 %4413  ;;  %v4987_v16 = vsel %vm4567_vm3, %v4986_v31, %v4982_v56  ;;  %v4996_v57 = vrot.slane %v4417_v37, %v8464_v61 }
 0x55a   :  { %v4991_v58 = vrot.slane %v4414_v1, %v8480_v21 }
 0x55c   :  { %v4992_v20 = vsel %vm4574_vm12, %v4991_v58, %v4987_v16  ;;  %v4423_v46 = vpop.permute.xlu0 %4422 }
 0x55d   :  { %v4420_v63 = vpop.permute.xlu1 %4419  ;;  %v4997_v32 = vsel %vm4581_vm7, %v4996_v57, %v4992_v20  ;;  %v5006_v19 = vrot.slane %v4423_v46, %v8489_v15 }
 0x55e   :  { %v5001_v2 = vrot.slane %v4420_v63, %v8492_v0 }
 0x560   :  { %v5002_v40 = vsel %vm4588_vm6, %v5001_v2, %v4997_v32  ;;  %v4429_v41 = vpop.permute.xlu0 %4428 }
 0x561   :  { %v4426_v24 = vpop.permute.xlu1 %4425  ;;  %v5007_v55 = vsel %vm4595_vm10, %v5006_v19, %v5002_v40  ;;  %v5016_v49 = vrot.slane %v4429_v41, %v8497_v51 }
 0x562   :  { %v5011_v25 = vrot.slane %v4426_v24, %v8502_v23 }
 0x564   :  { %v5012_v47 = vsel %vm4602_vm5, %v5011_v25, %v5007_v55  ;;  %v4435_v12 = vpop.permute.xlu0 %4434 }
 0x565   :  { %v4432_v44 = vpop.permute.xlu1 %4431  ;;  %v5017_v62 = vsel %vm9939_vm2, %v5016_v49, %v5012_v47  ;;  %v5026_v29 = vrot.slane %v4435_v12, %v8505_v3 }
 0x566   :  { %v5021_v42 = vrot.slane %v4432_v44, %v8525_v10 }
 0x568   :  { %v5022_v43 = vsel %vm9940_vm14, %v5021_v42, %v5017_v62  ;;  %v4441_v4 = vpop.permute.xlu0 %4440 }
 0x569   :  { %v4438_v14 = vpop.permute.xlu1 %4437  ;;  %v5027_v54 = vsel %vm9941_vm8, %v5026_v29, %v5022_v43  ;;  %v5036_v18 = vrot.slane %v4441_v4, %v8542_v33 }
 0x56a   :  { %v5031_v60 = vrot.slane %v4438_v14, %v8565_v11 }
 0x56c   :  { %v5032_v5 = vsel %vm9935_vm13, %v5031_v60, %v5027_v54  ;;  %v4453_v38 = vpop.permute.xlu0 %4452 }
 0x56d   :  { %v4450_v59 = vpop.permute.xlu1 %4449  ;;  %v8838_v52 = vsel %vm9936_vm0, %v5036_v18, %v5032_v5  ;;  %v5055_v32 = vrot.slane %v4453_v38, %v8450_v48 }
 0x56e   :  { %v5051_v2 = vrot.slane %v4450_v59, %v8443_v50 }
 0x570   :  { %v4498_v9 = vpop.permute.xlu0 %4497  ;;  %v5056_v49 = vsel %vm4553_vm1, %v5055_v32, %v5051_v2 }
 0x571   :  { %v4456_v53 = vpop.permute.xlu1 %4455  ;;  %v5130_v44 = vrot.slane %v4498_v9, %v8443_v50 }
 0x572   :  { %v5060_v19 = vrot.slane %v4456_v53, %v8461_v36 }
 0x574   :  { %v4459_v35 = vpop.permute.xlu0 %4458  ;;  %v5061_v62 = vsel %vm4560_vm11, %v5060_v19, %v5056_v49 }
 0x575   :  { %v4501_v30 = vpop.permute.xlu1 %4500  ;;  %v5065_v40 = vrot.slane %v4459_v35, %v8454_v7 }
 0x576   :  { %v5134_v24 = vrot.slane %v4501_v30, %v8450_v48 }
 0x577   :  { %v5066_v48 = vsel %vm4567_vm3, %v5065_v40, %v5061_v62 }
 0x578   :  { %v4462_v28 = vpop.permute.xlu0 %4461  ;;  %v5135_v54 = vsel %vm4553_vm1, %v5134_v24, %v5130_v44  ;;  %vm5214_vm1 = vcmask 1045509  }
 0x579   :  { %v4504_v45 = vpop.permute.xlu1 %4503  ;;  %v5070_v55 = vrot.slane %v4462_v28, %v8480_v21 }
 0x57a   :  { %v5139_v47 = vrot.slane %v4504_v45, %v8461_v36 }
 0x57b   :  { %v5071_v36 = vsel %vm4574_vm12, %v5070_v55, %v5066_v48 }
 0x57c   :  { %v4465_v27 = vpop.permute.xlu0 %4464 }
 0x57d   :  { %v4507_v22 = vpop.permute.xlu1 %4506  ;;  %v5075_v12 = vrot.slane %v4465_v27, %v8464_v61 }
 0x57e   :  { %v5144_v42 = vrot.slane %v4507_v22, %v8454_v7  ;;  %v5140_v7 = vsel %vm4560_vm11, %v5139_v47, %v5135_v54  ;;  %vm9942_vm11 = vmmov %vm9939_vm2 }
 0x57f   :  { %v5076_v5 = vsel %vm4581_vm7, %v5075_v12, %v5071_v36 }
 0x580   :  { %v4468_v39 = vpop.permute.xlu0 %4467 }
 0x581   :  { %v4510_v13 = vpop.permute.xlu1 %4509  ;;  %v5080_v29 = vrot.slane %v4468_v39, %v8492_v0 }
 0x582   :  { %v5149_v43 = vrot.slane %v4510_v13, %v8480_v21  ;;  %v5145_v21 = vsel %vm4567_vm3, %v5144_v42, %v5140_v7  ;;  %vm9943_vm3 = vmmov %vm9940_vm14  ;;  %vm5216_vm14 = vcmask 1046534  }
 0x583   :  { %v5081_v59 = vsel %vm4588_vm6, %v5080_v29, %v5076_v5 }
 0x584   :  { %v4471_v8 = vpop.permute.xlu0 %4470  ;;  %v5150_v35 = vsel %vm4574_vm12, %v5149_v43, %v5145_v21  ;;  %vm9944_vm12 = vmmov %vm9941_vm8 }
 0x585   :  { %v4513_v26 = vpop.permute.xlu1 %4512  ;;  %v5085_v4 = vrot.slane %v4471_v8, %v8489_v15 }
 0x586   :  { %v5154_v60 = vrot.slane %v4513_v26, %v8464_v61 }
 0x587   :  { %v5086_v61 = vsel %vm4595_vm10, %v5085_v4, %v5081_v59 }
 0x588   :  { %v4474_v31 = vpop.permute.xlu0 %4473  ;;  %v5155_v45 = vsel %vm4581_vm7, %v5154_v60, %v5150_v35  ;;  %vm9945_vm7 = vmmov %vm9939_vm2 }
 0x589   :  { %v4516_v56 = vpop.permute.xlu1 %4515  ;;  %v5090_v50 = vrot.slane %v4474_v31, %v8502_v23  ;;  %vm9949_vm2 = vmmov %vm9941_vm8 }
 0x58a   :  { %v5159_v38 = vrot.slane %v4516_v56, %v8492_v0  ;;  %vm9951_vm8 = vmmov %vm9936_vm0 }
 0x58b   :  { %v5091_v27 = vsel %vm4602_vm5, %v5090_v50, %v5086_v61 }
 0x58c   :  { %v4477_v37 = vpop.permute.xlu0 %4476  ;;  %v5160_v39 = vsel %vm4588_vm6, %v5159_v38, %v5155_v45  ;;  %vm9946_vm6 = vmmov %vm9935_vm13  ;;  %vm5218_vm13 = vcmask 1047559  }
 0x58d   :  { %v4519_v1 = vpop.permute.xlu1 %4518  ;;  %v5095_v9 = vrot.slane %v4477_v37, %v8497_v51 }
 0x58e   :  { %v5164_v30 = vrot.slane %v4519_v1, %v8489_v15 }
 0x58f   :  { %v5096_v15 = vsel %vm9942_vm11, %v5095_v9, %v5091_v27 }
 0x590   :  { %v4480_v16 = vpop.permute.xlu0 %4479  ;;  %v5165_v1 = vsel %vm4595_vm10, %v5164_v30, %v5160_v39  ;;  %vm9947_vm10 = vmmov %vm9943_vm3 }
 0x591   :  { %v8840_v58 = vpop.permute.xlu1 %4521  ;;  %v5100_v0 = vrot.slane %v4480_v16, %v8525_v10 }
 0x592   :  { %v5169_v13 = vrot.slane %v8840_v58, %v8502_v23 }
 0x593   :  { %v5101_v32 = vsel %vm9943_vm3, %v5100_v0, %v5096_v15 }
 0x594   :  { %v8842_v57 = vpop.permute.xlu0 %4482  ;;  %v5170_v2 = vsel %vm4602_vm5, %v5169_v13, %v5165_v1  ;;  %vm9950_vm5 = vmmov %vm9946_vm6 }
 0x595   :  { %v8844_v20 = vpop.permute.xlu1 %4524  ;;  %v5105_v8 = vrot.slane %v8842_v57, %v8505_v3 }
 0x596   :  { %v5174_v31 = vrot.slane %v8844_v20, %v8497_v51 }
 0x598   :  { %v8846_v46 = vpop.permute.xlu0 %4485  ;;  %v5175_v40 = vsel %vm9945_vm7, %v5174_v31, %v5170_v2 }
 0x599   :  { %v8848_v63 = vpop.permute.xlu1 %4527  ;;  %v5110_v56 = vrot.slane %v8846_v46, %v8565_v11 }
 0x59a   :  { %v5179_v23 = vrot.slane %v8848_v63, %v8525_v10  ;;  %v5106_v10 = vsel %vm9944_vm12, %v5105_v8, %v5101_v32 }
 0x59c   :  { %v4444_v41 = vpop.permute.xlu0 %4443  ;;  %v5180_v24 = vsel %vm9947_vm10, %v5179_v23, %v5175_v40 }
 0x59d   :  { %v8856_v25 = vpop.permute.xlu1 %4530  ;;  %v5041_v53 = vrot.slane %v4444_v41, %v8609_v17  ;;  %v5111_v41 = vsel %vm9946_vm6, %v5110_v56, %v5106_v10 }
 0x59e   :  { %v5184_v51 = vrot.slane %v8856_v25, %v8505_v3 }
 0x59f   :  { %v5042_v37 = vsel %vm4644_vm9, %v5041_v53, %v8838_v52 }
 0x5a0   :  { %v4534_v14 = vpop.permute.xlu0 %4533 }
 0x5a1   :  { %v4489_v18 = vpop.permute.xlu1 %4488  ;;  %v5189_v63 = vrot.slane %v4534_v14, %v8565_v11 }
 0x5a2   :  { %v5115_v16 = vrot.slane %v4489_v18, %v8542_v33 }
 0x5a4   :  { %v4492_v28 = vpop.permute.xlu0 %4491  ;;  %v5116_v55 = vsel %vm9948_vm15, %v5115_v16, %v5111_v41 }
 0x5a5   :  { %v4447_v22 = vpop.permute.xlu1 %4446  ;;  %v5120_v20 = vrot.slane %v4492_v28, %v8609_v17 }
 0x5a6   :  { %v5046_v26 = vrot.slane %v4447_v22, %v8644_v6 }
 0x5a7   :  { %v5121_v49 = vsel %vm4644_vm9, %v5120_v20, %v5116_v55 }
 0x5a8   :  { %v5047_v58 = vsel %vm4651_vm4, %v5046_v26, %v5042_v37  ;;  %v4495_v57 = vpop.permute.xlu0 %4494 }
 0x5a9   :  { %v4537_v46 = vpop.permute.xlu1 %4536  ;;  %v5215_v52 = vsel %vm5214_vm1, %v5047_v58, %v8811_v34  ;;  %v5125_v19 = vrot.slane %v4495_v57, %v8644_v6  ;;  %v5185_v34 = vsel %vm9949_vm2, %v5184_v51, %v5180_v24 }
 0x5aa   :  { %v5194_v3 = vrot.slane %v4537_v46, %v8542_v33  ;;  %v5190_v11 = vsel %vm9950_vm5, %v5189_v63, %v5185_v34 }
 0x5ab   :  { %v5126_v12 = vsel %vm4651_vm4, %v5125_v19, %v5121_v49 }
 0x5ac   :  { %v4543_v25 = vpop.permute.xlu0 %4542  ;;  %v5195_v62 = vsel %vm9951_vm8, %v5194_v3, %v5190_v11  ;;  %v5217_v48 = vsel %vm5216_vm14, %v5126_v12, %v5215_v52 }
 0x5ad   :  { %v4540_v47 = vpop.permute.xlu1 %4539  ;;  %v5204_v33 = vrot.slane %v4543_v25, %v8644_v6 }
 0x5ae   :  { %v5199_v44 = vrot.slane %v4540_v47, %v8609_v17 }
 0x5b0   :  { %v5200_v42 = vsel %vm4644_vm9, %v5199_v44, %v5195_v62 }
 0x5b1   :  { %v5205_v29 = vsel %vm4651_vm4, %v5204_v33, %v5200_v42 }
 0x5b2   :  { %v5219_v43 = vsel %vm5218_vm13, %v5205_v29, %v5217_v48 }
 0x5b3   :  { %5221 = vadd.xlane.f32.xlu1 %v5219_v43 }
 0x63c   :  { %v5222_v4 = vpop.xlane.xlu1 %5221 }
 0x63d   :  { %5223 = vst [vmem:[%s8933_s3] sm:$0xff] %v5222_v4 }

</bundles_post_ra>
